<compile_context>
chip_gen: v6e
topology: v6e:2x2x1
jax: 0.10.0
libtpu: 0.0.40
codegen_flags: <defaults>
</compile_context>

<pallas_src>
import numpy as np
import jax
import jax.numpy as jnp
from jax.experimental import pallas as pl
from jax.experimental.pallas import tpu as pltpu

UNTIL_TIME = 35
WAVELET = 16          # number of wavelet filters
WAVELET_KS = 32       # wavelet kernel length
OUT_CHANNEL = 10
LOGIC2_OUT = 12       # And(6) | Or(6)
NEG = -1.0e30         # finite "-inf" for sliding-max padding


# ----------------------------------------------------------------------------
# Static shape chain (derived once from the input length)
# ----------------------------------------------------------------------------
def _derive_dims(L0):
    d = {"L0": L0}
    d["L1"] = L0 - WAVELET_KS + 1                 # wavelet conv (ks=32, no pad)
    d["L2"] = (d["L1"] - 3) // 2 + 1              # maxpool(3,2)
    d["L3"] = (d["L2"] - 3) // 2 + 1              # maxpool(3,2)  -> x_miu length
    d["L4"] = (d["L3"] - 3) // 2 + 1              # AE pool(3,2)
    d["L5"] = (d["L4"] - 3) // 2 + 1              # AE pool(3,2)
    d["L6"] = 2 * d["L5"]                         # upsample x2
    d["L7"] = d["L6"] + 4 - 3 + 1                 # conv ks=3 pad=2
    d["L8"] = 2 * d["L7"]                         # upsample x2
    d["L9"] = d["L8"] + 4 - 3 + 1                 # conv ks=3 pad=2
    d["L10"] = d["L9"] - 4 + 1                    # maxpool(4,1)  (must equal L3)
    d["LF"] = d["L3"] - 2 + 1                     # logic2 conv ks=2 (fc1 needs 170)
    return d


# ----------------------------------------------------------------------------
# Constant resampling matrices (applied on the MXU inside the kernel)
# ----------------------------------------------------------------------------
def _pool_select(l_in):
    """Selection matrix for the stride-2 part of MaxPool1d(3, 2)."""
    lm = l_in - 2
    l_out = (l_in - 3) // 2 + 1
    s = np.zeros((lm, l_out), np.float32)
    s[2 * np.arange(l_out), np.arange(l_out)] = 1.0
    return jnp.asarray(s, jnp.bfloat16)


def _upsample_mat(l_in):
    """nn.Upsample(scale_factor=2, mode='linear', align_corners=False) as a matmul."""
    l_out = 2 * l_in
    u = np.zeros((l_in, l_out), np.float32)
    for i in range(l_in):
        u[i, 2 * i] += 0.75
        u[max(i - 1, 0), 2 * i] += 0.25
        u[i, 2 * i + 1] += 0.75
        u[min(i + 1, l_in - 1), 2 * i + 1] += 0.25
    return jnp.asarray(u, jnp.bfloat16)


# ----------------------------------------------------------------------------
# Fused TLN kernel (one grid step = one batch element, fully VMEM resident)
# ----------------------------------------------------------------------------
def _build_kernel(d):
    L1, L2, L3, L4 = d["L1"], d["L2"], d["L3"], d["L4"]
    L5, L6, L7, L8, L9, LF = d["L5"], d["L6"], d["L7"], d["L8"], d["L9"], d["LF"]
    f32, bf = jnp.float32, jnp.bfloat16

    def sigmoid(v):
        # exact sigmoid via f32 tanh (EUP path, v5e-safe, no inf intermediates)
        return 0.5 * (jnp.tanh(0.5 * v) + 1.0)

    def slide_max(src_ref, width, window):
        m = src_ref[:, pl.ds(0, width)]
        for j in range(1, window):
            m = jnp.maximum(m, src_ref[:, pl.ds(j, width)])
        return m

    def sel(m, s_ref):
        # stride-2 column selection / linear upsample via constant matmul
        return jnp.dot(m.astype(bf), s_ref[...], preferred_element_type=f32)

    def conv(w_ref, b_ref, buf_ref, cin, ks, lout):
        # y = sum_j W[:, j*cin:(j+1)*cin] @ buf[:, j:j+lout]   (in-kernel im2col)
        acc = jnp.dot(w_ref[:, pl.ds(0, cin)],
                      buf_ref[:, pl.ds(0, lout)].astype(bf),
                      preferred_element_type=f32)
        for j in range(1, ks):
            acc = acc + jnp.dot(w_ref[:, pl.ds(j * cin, cin)],
                                buf_ref[:, pl.ds(j, lout)].astype(bf),
                                preferred_element_type=f32)
        return acc + b_ref[...]

    def kernel(x_ref,
               wav_w, wav_b, s1, s2,
               ae1_w, ae1_b, s3, ae2_w, ae2_b, s4, u1, ae3_w, ae3_b, u2, ae4_w, ae4_b,
               mask0, mask1, l1_w, l1_b, l2_w, l2_b,
               fc1_w, fc1_b, fc2_w, fc2_b, fc3_w, fc3_b,
               o_ref,
               wav_p, ys, smiu, xm_s, buf1, t1_s, buf2, t2_s, buf3, buf4, t4_s,
               u_s, l1p_s, x1_s):
        # ---- Basic_Predicate_Network: wavelet conv (BN folded) + ReLU --------
        # TODO(synk): Modules.Wavelet_Convolution(16, 32) source unavailable;
        # stand-in is Conv1d(1 -> 16, kernel_size=32) with synthetic filters.
        for j in range(WAVELET_KS):
            wav_p[pl.ds(j, 1), :] = x_ref[0, :, pl.ds(j, L1)]          # (1, L1)
        y = jnp.dot(wav_w[...], wav_p[...].astype(bf),
                    preferred_element_type=f32) + wav_b[...]
        ys[...] = jnp.maximum(y, 0.0)                                   # (16, L1)
        pooled = sel(slide_max(ys, L1 - 2, 3), s1)                      # (16, L2)

        # ---- Miu_Pos / Miu_Neg (shared sigmoid) + MaxPool(3,2) ---------------
        # TODO(synk): Modules.Miu source unavailable; stand-in mu_+-(x)=sigmoid(+-x).
        s = sigmoid(pooled)
        smiu[pl.ds(0, WAVELET), :] = s
        smiu[pl.ds(WAVELET, WAVELET), :] = 1.0 - s
        xm_s[...] = sel(slide_max(smiu, L2 - 2, 3), s2)                 # (32, L3)

        # ---- AutoEncoder ------------------------------------------------------
        buf1[:, pl.ds(0, 1)] = jnp.zeros((32, 1), f32)
        buf1[:, pl.ds(L3 + 1, 1)] = jnp.zeros((32, 1), f32)
        buf1[:, pl.ds(1, L3)] = xm_s[...]
        t1_s[...] = jnp.tanh(conv(ae1_w, ae1_b, buf1, 32, 3, L3))       # (64, L3)
        h = sel(slide_max(t1_s, L3 - 2, 3), s3)                         # (64, L4)

        buf2[:, pl.ds(0, 1)] = jnp.zeros((64, 1), f32)
        buf2[:, pl.ds(L4 + 1, 1)] = jnp.zeros((64, 1), f32)
        buf2[:, pl.ds(1, L4)] = h
        t2_s[...] = jnp.maximum(conv(ae2_w, ae2_b, buf2, 64, 3, L4), 0.0)  # (32, L4)
        h = sel(slide_max(t2_s, L4 - 2, 3), s4)                         # (32, L5)
        h = jnp.dot(h.astype(bf), u1[...], preferred_element_type=f32)  # (32, L6)

        buf3[:, pl.ds(0, 2)] = jnp.zeros((32, 2), f32)
        buf3[:, pl.ds(L6 + 2, 2)] = jnp.zeros((32, 2), f32)
        buf3[:, pl.ds(2, L6)] = h
        h = jnp.tanh(conv(ae3_w, ae3_b, buf3, 32, 3, L7))               # (64, L7)
        h = jnp.dot(h.astype(bf), u2[...], preferred_element_type=f32)  # (64, L8)

        buf4[:, pl.ds(0, 2)] = jnp.zeros((64, 2), f32)
        buf4[:, pl.ds(L8 + 2, 2)] = jnp.zeros((64, 2), f32)
        buf4[:, pl.ds(2, L8)] = h
        t4_s[...] = sigmoid(conv(ae4_w, ae4_b, buf4, 64, 3, L9))        # (32, L9)
        w_ae = slide_max(t4_s, L9 - 3, 4)                               # (32, L3)

        # ---- Temporal grouping + gated concat --------------------------------
        # TODO(synk): Temporal_Grouping_Algorithm.Segment source unavailable;
        # stand-in is K=2 temporal groups (first / second half of the time axis).
        wm = w_ae * xm_s[...]
        g0 = wm * mask0[...]
        g1 = wm * mask1[...]

        # ---- Until(input, 35): forward sliding max (log-doubling) ------------
        # TODO(synk): Modules.Until source unavailable; stand-in is a
        # forward-looking sliding max over `UNTIL_TIME` steps, length preserving.
        u_s[:, pl.ds(L3, UNTIL_TIME - 1)] = jnp.full((64, UNTIL_TIME - 1), NEG, f32)
        u_s[pl.ds(0, 32), pl.ds(0, L3)] = g0
        u_s[pl.ds(32, 32), pl.ds(0, L3)] = g1
        cov = 1
        while cov * 2 <= UNTIL_TIME:
            u_s[:, pl.ds(0, L3)] = jnp.maximum(u_s[:, pl.ds(0, L3)],
                                               u_s[:, pl.ds(cov, L3)])
            cov *= 2
        x_until = jnp.maximum(u_s[:, pl.ds(0, L3)],
                              u_s[:, pl.ds(UNTIL_TIME - cov, L3)])      # (64, L3)

        # ---- Logic layer 1 (And_2d | Or_2d fused): ks=2, pad_left=1, ReLU -----
        # TODO(synk): And/Or_Convolution{_2d} sources unavailable; stand-in is a
        # Conv1d soft-logic layer (kernel_size=2) followed by ReLU.
        l1p_s[:, pl.ds(0, 1)] = jnp.zeros((64, 1), f32)
        l1p_s[pl.ds(0, 32), pl.ds(1, L3)] = g0
        l1p_s[pl.ds(32, 32), pl.ds(1, L3)] = g1
        andor = jnp.maximum(conv(l1_w, l1_b, l1p_s, 64, 2, L3), 0.0)    # (40, L3)

        # ---- x_1 = [and | or | until];  logic layer 2 (And | Or fused) --------
        x1_s[pl.ds(0, 40), :] = andor
        x1_s[pl.ds(40, 64), :] = x_until
        x2 = jnp.maximum(conv(l2_w, l2_b, x1_s, 104, 2, LF), 0.0)       # (12, LF)

        # ---- Classifier (Dropout = identity in eval mode) ---------------------
        h1 = jnp.maximum(
            jnp.dot(x2.astype(bf), fc1_w[...], preferred_element_type=f32)
            + fc1_b[...], 0.0)
        h2 = jnp.maximum(
            jnp.dot(h1.astype(bf), fc2_w[...], preferred_element_type=f32)
            + fc2_b[...], 0.0)
        out = (jnp.dot(h2.astype(bf), fc3_w[...], preferred_element_type=f32)
               + fc3_b[...])
        o_ref[0, :, :] = out

    return kernel


# ----------------------------------------------------------------------------
# Forward wrapper: weight prep + one pallas_call
# ----------------------------------------------------------------------------
def tln_forward(p, x):
    B, cin, L0 = x.shape
    assert cin == 1
    d = _derive_dims(L0)
    assert d["L10"] == d["L3"], "AutoEncoder output length must match x_miu length"
    assert d["LF"] == 170, "classifier expects 170 temporal features"
    x = x.astype(jnp.float32)
    bf, f32 = jnp.bfloat16, jnp.float32

    # Fold eval-mode BatchNorm1d into the wavelet conv.
    bn_scale = p["bn_gamma"] / jnp.sqrt(p["bn_var"] + 1e-5)
    bn_shift = p["bn_beta"] - p["bn_mean"] * bn_scale
    wav_w = (p["wav_w"] * bn_scale[:, None, None]).reshape(WAVELET, WAVELET_KS).astype(bf)
    wav_b = (p["wav_b"] * bn_scale + bn_shift).reshape(WAVELET, 1).astype(f32)

    def cmat(w):  # (Cout, Cin, ks) -> (Cout, ks*Cin), tap-major (matches in-kernel conv)
        co, ci, ks = w.shape
        return jnp.transpose(w, (0, 2, 1)).reshape(co, ks * ci).astype(bf)

    def cbias(b):
        return b.reshape(-1, 1).astype(f32)

    # Structural constants (trace-time numpy -> baked jit constants).
    S1, S2 = _pool_select(d["L1"]), _pool_select(d["L2"])
    S3, S4 = _pool_select(d["L3"]), _pool_select(d["L4"])
    U1, U2 = _upsample_mat(d["L5"]), _upsample_mat(d["L7"])
    half = d["L3"] // 2
    m0 = (np.arange(d["L3"]) < half).astype(np.float32).reshape(1, -1)
    mask0 = jnp.asarray(m0, f32)
    mask1 = jnp.asarray(1.0 - m0, f32)

    const_inputs = (
        wav_w, wav_b, S1, S2,
        cmat(p["ae1_w"]), cbias(p["ae1_b"]), S3,
        cmat(p["ae2_w"]), cbias(p["ae2_b"]), S4, U1,
        cmat(p["ae3_w"]), cbias(p["ae3_b"]), U2,
        cmat(p["ae4_w"]), cbias(p["ae4_b"]),
        mask0, mask1,
        cmat(p["logic1_w"]), cbias(p["logic1_b"]),
        cmat(p["logic2_w"]), cbias(p["logic2_b"]),
        p["fc1_w"].astype(bf), p["fc1_b"].reshape(1, -1).astype(f32),
        p["fc2_w"].astype(bf), p["fc2_b"].reshape(1, -1).astype(f32),
        p["fc3_w"].astype(bf), p["fc3_b"].reshape(1, -1).astype(f32),
    )

    in_specs = [pl.BlockSpec((1, 1, L0), lambda b: (b, 0, 0))]
    in_specs += [pl.BlockSpec(a.shape, lambda b, _n=a.ndim: (0,) * _n)
                 for a in const_inputs]

    scratch_shapes = [
        pltpu.VMEM((WAVELET_KS, d["L1"]), f32),                 # wav_p (im2col rows)
        pltpu.VMEM((WAVELET, d["L1"]), f32),                    # ys
        pltpu.VMEM((2 * WAVELET, d["L2"]), f32),                # smiu [pos|neg]
        pltpu.VMEM((2 * WAVELET, d["L3"]), f32),                # x_miu
        pltpu.VMEM((32, d["L3"] + 2), f32),                     # buf1 (pad=1)
        pltpu.VMEM((64, d["L3"]), f32),                         # t1
        pltpu.VMEM((64, d["L4"] + 2), f32),                     # buf2 (pad=1)
        pltpu.VMEM((32, d["L4"]), f32),                         # t2
        pltpu.VMEM((32, d["L6"] + 4), f32),                     # buf3 (pad=2)
        pltpu.VMEM((64, d["L8"] + 4), f32),                     # buf4 (pad=2)
        pltpu.VMEM((32, d["L9"]), f32),                         # t4
        pltpu.VMEM((64, d["L3"] + UNTIL_TIME - 1), f32),        # until scratch
        pltpu.VMEM((64, d["L3"] + 1), f32),                     # logic1 padded input
        pltpu.VMEM((104, d["L3"]), f32),                        # x_1 = [and|or|until]
    ]

    return pl.pallas_call(
        _build_kernel(d),
        out_shape=jax.ShapeDtypeStruct((B, LOGIC2_OUT, OUT_CHANNEL), f32),
        grid=(B,),
        in_specs=in_specs,
        out_specs=pl.BlockSpec((1, LOGIC2_OUT, OUT_CHANNEL), lambda b: (b, 0, 0)),
        scratch_shapes=scratch_shapes,
        compiler_params=pltpu.CompilerParams(dimension_semantics=("parallel",)),
    )(x, *const_inputs)


# ----------------------------------------------------------------------------
# Parameters (deterministic synthetic init; stand-in modules marked TODO)
# ----------------------------------------------------------------------------
def init_params(key):
    keys = jax.random.split(key, 32)
    kit = iter(keys)

    def conv_p(cout, cin, ksz):
        scale = 1.0 / jnp.sqrt(cin * ksz)
        w = jax.random.normal(next(kit), (cout, cin, ksz), jnp.float32) * scale
        b = jax.random.normal(next(kit), (cout,), jnp.float32) * 0.01
        return w, b

    def lin_p(fin, fout):
        scale = 1.0 / jnp.sqrt(fin)
        w = jax.random.normal(next(kit), (fin, fout), jnp.float32) * scale
        b = jax.random.normal(next(kit), (fout,), jnp.float32) * 0.01
        return w, b

    p = {}
    # TODO(synk): Modules.Wavelet_Convolution(16, 32) stand-in: Conv1d(1->16, ks=32).
    p["wav_w"], p["wav_b"] = conv_p(WAVELET, 1, WAVELET_KS)
    p["bn_gamma"] = 1.0 + 0.01 * jax.random.normal(next(kit), (WAVELET,), jnp.float32)
    p["bn_beta"] = 0.01 * jax.random.normal(next(kit), (WAVELET,), jnp.float32)
    p["bn_mean"] = jnp.zeros((WAVELET,), jnp.float32)
    p["bn_var"] = jnp.ones((WAVELET,), jnp.float32)
    # AutoEncoder convs
    p["ae1_w"], p["ae1_b"] = conv_p(64, 2 * WAVELET, 3)
    p["ae2_w"], p["ae2_b"] = conv_p(32, 64, 3)
    p["ae3_w"], p["ae3_b"] = conv_p(64, 32, 3)
    p["ae4_w"], p["ae4_b"] = conv_p(2 * WAVELET, 64, 3)
    # TODO(synk): And/Or_Convolution{_2d} stand-ins: Conv1d(ks=2) + ReLU; each
    # And/Or pair shares its input, so fuse along Cout -> one matmul per pair.
    and2d_w, and2d_b = conv_p(20, 4 * WAVELET, 2)
    or2d_w, or2d_b = conv_p(20, 4 * WAVELET, 2)
    and_w, and_b = conv_p(6, 40 + 4 * WAVELET, 2)
    or_w, or_b = conv_p(6, 40 + 4 * WAVELET, 2)
    p["logic1_w"] = jnp.concatenate([and2d_w, or2d_w], axis=0)   # (40, 64, 2)
    p["logic1_b"] = jnp.concatenate([and2d_b, or2d_b], axis=0)
    p["logic2_w"] = jnp.concatenate([and_w, or_w], axis=0)       # (12, 104, 2)
    p["logic2_b"] = jnp.concatenate([and_b, or_b], axis=0)
    # Classifier
    p["fc1_w"], p["fc1_b"] = lin_p(170, 1024)
    p["fc2_w"], p["fc2_b"] = lin_p(1024, 256)
    p["fc3_w"], p["fc3_b"] = lin_p(256, OUT_CHANNEL)
    return p


if __name__ == "__main__":
    # Input length 718 is the smallest that keeps every stage consistent and
    # lands the classifier input at the module-specified 170 features.
    B, L0 = 2, 718
    x = jax.random.normal(jax.random.PRNGKey(0), (B, 1, L0), jnp.float32)
    params = init_params(jax.random.PRNGKey(1234))

    fwd = jax.jit(tln_forward)
    out = fwd(params, x)
    jax.block_until_ready(out)
    assert out.shape == (B, LOGIC2_OUT, OUT_CHANNEL), out.shape
    assert bool(jnp.isfinite(out).all()), "non-finite values in output"
    print("KERNEL_OK")
</pallas_src>

<mosaic_0001>
module attributes {stable_mosaic.version = 11 : i64} {
  func.func @kernel(%arg0: i32, %arg1: memref<1x1x718xf32, #tpu.memory_space<vmem>>, %arg2: memref<16x32xbf16, #tpu.memory_space<vmem>>, %arg3: memref<16x1xf32, #tpu.memory_space<vmem>>, %arg4: memref<685x343xbf16, #tpu.memory_space<vmem>>, %arg5: memref<341x171xbf16, #tpu.memory_space<vmem>>, %arg6: memref<64x96xbf16, #tpu.memory_space<vmem>>, %arg7: memref<64x1xf32, #tpu.memory_space<vmem>>, %arg8: memref<169x85xbf16, #tpu.memory_space<vmem>>, %arg9: memref<32x192xbf16, #tpu.memory_space<vmem>>, %arg10: memref<32x1xf32, #tpu.memory_space<vmem>>, %arg11: memref<83x42xbf16, #tpu.memory_space<vmem>>, %arg12: memref<42x84xbf16, #tpu.memory_space<vmem>>, %arg13: memref<64x96xbf16, #tpu.memory_space<vmem>>, %arg14: memref<64x1xf32, #tpu.memory_space<vmem>>, %arg15: memref<86x172xbf16, #tpu.memory_space<vmem>>, %arg16: memref<32x192xbf16, #tpu.memory_space<vmem>>, %arg17: memref<32x1xf32, #tpu.memory_space<vmem>>, %arg18: memref<1x171xf32, #tpu.memory_space<vmem>>, %arg19: memref<1x171xf32, #tpu.memory_space<vmem>>, %arg20: memref<40x128xbf16, #tpu.memory_space<vmem>>, %arg21: memref<40x1xf32, #tpu.memory_space<vmem>>, %arg22: memref<12x208xbf16, #tpu.memory_space<vmem>>, %arg23: memref<12x1xf32, #tpu.memory_space<vmem>>, %arg24: memref<170x1024xbf16, #tpu.memory_space<vmem>>, %arg25: memref<1x1024xf32, #tpu.memory_space<vmem>>, %arg26: memref<1024x256xbf16, #tpu.memory_space<vmem>>, %arg27: memref<1x256xf32, #tpu.memory_space<vmem>>, %arg28: memref<256x10xbf16, #tpu.memory_space<vmem>>, %arg29: memref<1x10xf32, #tpu.memory_space<vmem>>, %arg30: memref<1x12x10xf32, #tpu.memory_space<vmem>>, %arg31: memref<32x687xf32, #tpu.memory_space<vmem>>, %arg32: memref<16x687xf32, #tpu.memory_space<vmem>>, %arg33: memref<32x343xf32, #tpu.memory_space<vmem>>, %arg34: memref<32x171xf32, #tpu.memory_space<vmem>>, %arg35: memref<32x173xf32, #tpu.memory_space<vmem>>, %arg36: memref<64x171xf32, #tpu.memory_space<vmem>>, %arg37: memref<64x87xf32, #tpu.memory_space<vmem>>, %arg38: memref<32x85xf32, #tpu.memory_space<vmem>>, %arg39: memref<32x88xf32, #tpu.memory_space<vmem>>, %arg40: memref<64x176xf32, #tpu.memory_space<vmem>>, %arg41: memref<32x174xf32, #tpu.memory_space<vmem>>, %arg42: memref<64x205xf32, #tpu.memory_space<vmem>>, %arg43: memref<64x172xf32, #tpu.memory_space<vmem>>, %arg44: memref<104x171xf32, #tpu.memory_space<vmem>>) attributes {dimension_semantics = [#tpu.dimension_semantics<parallel>], iteration_bounds = array<i64: 2>, scalar_prefetch = 0 : i64, scratch_operands = 14 : i64, tpu.core_type = #tpu.core_type<tc>, window_params = [{transform_indices = @transform_0, window_bounds = array<i64: 1, 1, 718>}, {pipeline_mode = #tpu.pipeline_mode<synchronous>, transform_indices = @transform_1, window_bounds = array<i64: 16, 32>}, {pipeline_mode = #tpu.pipeline_mode<synchronous>, transform_indices = @transform_2, window_bounds = array<i64: 16, 1>}, {pipeline_mode = #tpu.pipeline_mode<synchronous>, transform_indices = @transform_3, window_bounds = array<i64: 685, 343>}, {pipeline_mode = #tpu.pipeline_mode<synchronous>, transform_indices = @transform_4, window_bounds = array<i64: 341, 171>}, {pipeline_mode = #tpu.pipeline_mode<synchronous>, transform_indices = @transform_5, window_bounds = array<i64: 64, 96>}, {pipeline_mode = #tpu.pipeline_mode<synchronous>, transform_indices = @transform_6, window_bounds = array<i64: 64, 1>}, {pipeline_mode = #tpu.pipeline_mode<synchronous>, transform_indices = @transform_7, window_bounds = array<i64: 169, 85>}, {pipeline_mode = #tpu.pipeline_mode<synchronous>, transform_indices = @transform_8, window_bounds = array<i64: 32, 192>}, {pipeline_mode = #tpu.pipeline_mode<synchronous>, transform_indices = @transform_9, window_bounds = array<i64: 32, 1>}, {pipeline_mode = #tpu.pipeline_mode<synchronous>, transform_indices = @transform_10, window_bounds = array<i64: 83, 42>}, {pipeline_mode = #tpu.pipeline_mode<synchronous>, transform_indices = @transform_11, window_bounds = array<i64: 42, 84>}, {pipeline_mode = #tpu.pipeline_mode<synchronous>, transform_indices = @transform_12, window_bounds = array<i64: 64, 96>}, {pipeline_mode = #tpu.pipeline_mode<synchronous>, transform_indices = @transform_13, window_bounds = array<i64: 64, 1>}, {pipeline_mode = #tpu.pipeline_mode<synchronous>, transform_indices = @transform_14, window_bounds = array<i64: 86, 172>}, {pipeline_mode = #tpu.pipeline_mode<synchronous>, transform_indices = @transform_15, window_bounds = array<i64: 32, 192>}, {pipeline_mode = #tpu.pipeline_mode<synchronous>, transform_indices = @transform_16, window_bounds = array<i64: 32, 1>}, {pipeline_mode = #tpu.pipeline_mode<synchronous>, transform_indices = @transform_17, window_bounds = array<i64: 1, 171>}, {pipeline_mode = #tpu.pipeline_mode<synchronous>, transform_indices = @transform_18, window_bounds = array<i64: 1, 171>}, {pipeline_mode = #tpu.pipeline_mode<synchronous>, transform_indices = @transform_19, window_bounds = array<i64: 40, 128>}, {pipeline_mode = #tpu.pipeline_mode<synchronous>, transform_indices = @transform_20, window_bounds = array<i64: 40, 1>}, {pipeline_mode = #tpu.pipeline_mode<synchronous>, transform_indices = @transform_21, window_bounds = array<i64: 12, 208>}, {pipeline_mode = #tpu.pipeline_mode<synchronous>, transform_indices = @transform_22, window_bounds = array<i64: 12, 1>}, {pipeline_mode = #tpu.pipeline_mode<synchronous>, transform_indices = @transform_23, window_bounds = array<i64: 170, 1024>}, {pipeline_mode = #tpu.pipeline_mode<synchronous>, transform_indices = @transform_24, window_bounds = array<i64: 1, 1024>}, {pipeline_mode = #tpu.pipeline_mode<synchronous>, transform_indices = @transform_25, window_bounds = array<i64: 1024, 256>}, {pipeline_mode = #tpu.pipeline_mode<synchronous>, transform_indices = @transform_26, window_bounds = array<i64: 1, 256>}, {pipeline_mode = #tpu.pipeline_mode<synchronous>, transform_indices = @transform_27, window_bounds = array<i64: 256, 10>}, {pipeline_mode = #tpu.pipeline_mode<synchronous>, transform_indices = @transform_28, window_bounds = array<i64: 1, 10>}, {transform_indices = @transform_29, window_bounds = array<i64: 1, 12, 10>}]} {
    %c0 = arith.constant 0 : index
    %c0_0 = arith.constant 0 : index
    %c0_1 = arith.constant 0 : index
    %0 = vector.load %arg1[%c0, %c0_0, %c0_1] : memref<1x1x718xf32, #tpu.memory_space<vmem>>, vector<1x1x687xf32>
    %1 = vector.shape_cast %0 : vector<1x1x687xf32> to vector<1x687xf32>
    %c0_2 = arith.constant 0 : index
    %c0_3 = arith.constant 0 : index
    %2 = vector.load %arg31[%c0_2, %c0_3] : memref<32x687xf32, #tpu.memory_space<vmem>>, vector<1x687xf32>
    tpu.vector_store %arg31[%c0_2, %c0_3], %1 {strides = array<i32>} : memref<32x687xf32, #tpu.memory_space<vmem>>, vector<1x687xf32>,
    %c0_4 = arith.constant 0 : index
    %c0_5 = arith.constant 0 : index
    %c1 = arith.constant 1 : index
    %3 = vector.load %arg1[%c0_4, %c0_5, %c1] : memref<1x1x718xf32, #tpu.memory_space<vmem>>, vector<1x1x687xf32>
    %4 = vector.shape_cast %3 : vector<1x1x687xf32> to vector<1x687xf32>
    %c1_6 = arith.constant 1 : index
    %c0_7 = arith.constant 0 : index
    %5 = vector.load %arg31[%c1_6, %c0_7] : memref<32x687xf32, #tpu.memory_space<vmem>>, vector<1x687xf32>
    tpu.vector_store %arg31[%c1_6, %c0_7], %4 {strides = array<i32>} : memref<32x687xf32, #tpu.memory_space<vmem>>, vector<1x687xf32>,
    %c0_8 = arith.constant 0 : index
    %c0_9 = arith.constant 0 : index
    %c2 = arith.constant 2 : index
    %6 = vector.load %arg1[%c0_8, %c0_9, %c2] : memref<1x1x718xf32, #tpu.memory_space<vmem>>, vector<1x1x687xf32>
    %7 = vector.shape_cast %6 : vector<1x1x687xf32> to vector<1x687xf32>
    %c2_10 = arith.constant 2 : index
    %c0_11 = arith.constant 0 : index
    %8 = vector.load %arg31[%c2_10, %c0_11] : memref<32x687xf32, #tpu.memory_space<vmem>>, vector<1x687xf32>
    tpu.vector_store %arg31[%c2_10, %c0_11], %7 {strides = array<i32>} : memref<32x687xf32, #tpu.memory_space<vmem>>, vector<1x687xf32>,
    %c0_12 = arith.constant 0 : index
    %c0_13 = arith.constant 0 : index
    %c3 = arith.constant 3 : index
    %9 = vector.load %arg1[%c0_12, %c0_13, %c3] : memref<1x1x718xf32, #tpu.memory_space<vmem>>, vector<1x1x687xf32>
    %10 = vector.shape_cast %9 : vector<1x1x687xf32> to vector<1x687xf32>
    %c3_14 = arith.constant 3 : index
    %c0_15 = arith.constant 0 : index
    %11 = vector.load %arg31[%c3_14, %c0_15] : memref<32x687xf32, #tpu.memory_space<vmem>>, vector<1x687xf32>
    tpu.vector_store %arg31[%c3_14, %c0_15], %10 {strides = array<i32>} : memref<32x687xf32, #tpu.memory_space<vmem>>, vector<1x687xf32>,
    %c0_16 = arith.constant 0 : index
    %c0_17 = arith.constant 0 : index
    %c4 = arith.constant 4 : index
    %12 = vector.load %arg1[%c0_16, %c0_17, %c4] : memref<1x1x718xf32, #tpu.memory_space<vmem>>, vector<1x1x687xf32>
    %13 = vector.shape_cast %12 : vector<1x1x687xf32> to vector<1x687xf32>
    %c4_18 = arith.constant 4 : index
    %c0_19 = arith.constant 0 : index
    %14 = vector.load %arg31[%c4_18, %c0_19] : memref<32x687xf32, #tpu.memory_space<vmem>>, vector<1x687xf32>
    tpu.vector_store %arg31[%c4_18, %c0_19], %13 {strides = array<i32>} : memref<32x687xf32, #tpu.memory_space<vmem>>, vector<1x687xf32>,
    %c0_20 = arith.constant 0 : index
    %c0_21 = arith.constant 0 : index
    %c5 = arith.constant 5 : index
    %15 = vector.load %arg1[%c0_20, %c0_21, %c5] : memref<1x1x718xf32, #tpu.memory_space<vmem>>, vector<1x1x687xf32>
    %16 = vector.shape_cast %15 : vector<1x1x687xf32> to vector<1x687xf32>
    %c5_22 = arith.constant 5 : index
    %c0_23 = arith.constant 0 : index
    %17 = vector.load %arg31[%c5_22, %c0_23] : memref<32x687xf32, #tpu.memory_space<vmem>>, vector<1x687xf32>
    tpu.vector_store %arg31[%c5_22, %c0_23], %16 {strides = array<i32>} : memref<32x687xf32, #tpu.memory_space<vmem>>, vector<1x687xf32>,
    %c0_24 = arith.constant 0 : index
    %c0_25 = arith.constant 0 : index
    %c6 = arith.constant 6 : index
    %18 = vector.load %arg1[%c0_24, %c0_25, %c6] : memref<1x1x718xf32, #tpu.memory_space<vmem>>, vector<1x1x687xf32>
    %19 = vector.shape_cast %18 : vector<1x1x687xf32> to vector<1x687xf32>
    %c6_26 = arith.constant 6 : index
    %c0_27 = arith.constant 0 : index
    %20 = vector.load %arg31[%c6_26, %c0_27] : memref<32x687xf32, #tpu.memory_space<vmem>>, vector<1x687xf32>
    tpu.vector_store %arg31[%c6_26, %c0_27], %19 {strides = array<i32>} : memref<32x687xf32, #tpu.memory_space<vmem>>, vector<1x687xf32>,
    %c0_28 = arith.constant 0 : index
    %c0_29 = arith.constant 0 : index
    %c7 = arith.constant 7 : index
    %21 = vector.load %arg1[%c0_28, %c0_29, %c7] : memref<1x1x718xf32, #tpu.memory_space<vmem>>, vector<1x1x687xf32>
    %22 = vector.shape_cast %21 : vector<1x1x687xf32> to vector<1x687xf32>
    %c7_30 = arith.constant 7 : index
    %c0_31 = arith.constant 0 : index
    %23 = vector.load %arg31[%c7_30, %c0_31] : memref<32x687xf32, #tpu.memory_space<vmem>>, vector<1x687xf32>
    tpu.vector_store %arg31[%c7_30, %c0_31], %22 {strides = array<i32>} : memref<32x687xf32, #tpu.memory_space<vmem>>, vector<1x687xf32>,
    %c0_32 = arith.constant 0 : index
    %c0_33 = arith.constant 0 : index
    %c8 = arith.constant 8 : index
    %24 = vector.load %arg1[%c0_32, %c0_33, %c8] : memref<1x1x718xf32, #tpu.memory_space<vmem>>, vector<1x1x687xf32>
    %25 = vector.shape_cast %24 : vector<1x1x687xf32> to vector<1x687xf32>
    %c8_34 = arith.constant 8 : index
    %c0_35 = arith.constant 0 : index
    %26 = vector.load %arg31[%c8_34, %c0_35] : memref<32x687xf32, #tpu.memory_space<vmem>>, vector<1x687xf32>
    tpu.vector_store %arg31[%c8_34, %c0_35], %25 {strides = array<i32>} : memref<32x687xf32, #tpu.memory_space<vmem>>, vector<1x687xf32>,
    %c0_36 = arith.constant 0 : index
    %c0_37 = arith.constant 0 : index
    %c9 = arith.constant 9 : index
    %27 = vector.load %arg1[%c0_36, %c0_37, %c9] : memref<1x1x718xf32, #tpu.memory_space<vmem>>, vector<1x1x687xf32>
    %28 = vector.shape_cast %27 : vector<1x1x687xf32> to vector<1x687xf32>
    %c9_38 = arith.constant 9 : index
    %c0_39 = arith.constant 0 : index
    %29 = vector.load %arg31[%c9_38, %c0_39] : memref<32x687xf32, #tpu.memory_space<vmem>>, vector<1x687xf32>
    tpu.vector_store %arg31[%c9_38, %c0_39], %28 {strides = array<i32>} : memref<32x687xf32, #tpu.memory_space<vmem>>, vector<1x687xf32>,
    %c0_40 = arith.constant 0 : index
    %c0_41 = arith.constant 0 : index
    %c10 = arith.constant 10 : index
    %30 = vector.load %arg1[%c0_40, %c0_41, %c10] : memref<1x1x718xf32, #tpu.memory_space<vmem>>, vector<1x1x687xf32>
    %31 = vector.shape_cast %30 : vector<1x1x687xf32> to vector<1x687xf32>
    %c10_42 = arith.constant 10 : index
    %c0_43 = arith.constant 0 : index
    %32 = vector.load %arg31[%c10_42, %c0_43] : memref<32x687xf32, #tpu.memory_space<vmem>>, vector<1x687xf32>
    tpu.vector_store %arg31[%c10_42, %c0_43], %31 {strides = array<i32>} : memref<32x687xf32, #tpu.memory_space<vmem>>, vector<1x687xf32>,
    %c0_44 = arith.constant 0 : index
    %c0_45 = arith.constant 0 : index
    %c11 = arith.constant 11 : index
    %33 = vector.load %arg1[%c0_44, %c0_45, %c11] : memref<1x1x718xf32, #tpu.memory_space<vmem>>, vector<1x1x687xf32>
    %34 = vector.shape_cast %33 : vector<1x1x687xf32> to vector<1x687xf32>
    %c11_46 = arith.constant 11 : index
    %c0_47 = arith.constant 0 : index
    %35 = vector.load %arg31[%c11_46, %c0_47] : memref<32x687xf32, #tpu.memory_space<vmem>>, vector<1x687xf32>
    tpu.vector_store %arg31[%c11_46, %c0_47], %34 {strides = array<i32>} : memref<32x687xf32, #tpu.memory_space<vmem>>, vector<1x687xf32>,
    %c0_48 = arith.constant 0 : index
    %c0_49 = arith.constant 0 : index
    %c12 = arith.constant 12 : index
    %36 = vector.load %arg1[%c0_48, %c0_49, %c12] : memref<1x1x718xf32, #tpu.memory_space<vmem>>, vector<1x1x687xf32>
    %37 = vector.shape_cast %36 : vector<1x1x687xf32> to vector<1x687xf32>
    %c12_50 = arith.constant 12 : index
    %c0_51 = arith.constant 0 : index
    %38 = vector.load %arg31[%c12_50, %c0_51] : memref<32x687xf32, #tpu.memory_space<vmem>>, vector<1x687xf32>
    tpu.vector_store %arg31[%c12_50, %c0_51], %37 {strides = array<i32>} : memref<32x687xf32, #tpu.memory_space<vmem>>, vector<1x687xf32>,
    %c0_52 = arith.constant 0 : index
    %c0_53 = arith.constant 0 : index
    %c13 = arith.constant 13 : index
    %39 = vector.load %arg1[%c0_52, %c0_53, %c13] : memref<1x1x718xf32, #tpu.memory_space<vmem>>, vector<1x1x687xf32>
    %40 = vector.shape_cast %39 : vector<1x1x687xf32> to vector<1x687xf32>
    %c13_54 = arith.constant 13 : index
    %c0_55 = arith.constant 0 : index
    %41 = vector.load %arg31[%c13_54, %c0_55] : memref<32x687xf32, #tpu.memory_space<vmem>>, vector<1x687xf32>
    tpu.vector_store %arg31[%c13_54, %c0_55], %40 {strides = array<i32>} : memref<32x687xf32, #tpu.memory_space<vmem>>, vector<1x687xf32>,
    %c0_56 = arith.constant 0 : index
    %c0_57 = arith.constant 0 : index
    %c14 = arith.constant 14 : index
    %42 = vector.load %arg1[%c0_56, %c0_57, %c14] : memref<1x1x718xf32, #tpu.memory_space<vmem>>, vector<1x1x687xf32>
    %43 = vector.shape_cast %42 : vector<1x1x687xf32> to vector<1x687xf32>
    %c14_58 = arith.constant 14 : index
    %c0_59 = arith.constant 0 : index
    %44 = vector.load %arg31[%c14_58, %c0_59] : memref<32x687xf32, #tpu.memory_space<vmem>>, vector<1x687xf32>
    tpu.vector_store %arg31[%c14_58, %c0_59], %43 {strides = array<i32>} : memref<32x687xf32, #tpu.memory_space<vmem>>, vector<1x687xf32>,
    %c0_60 = arith.constant 0 : index
    %c0_61 = arith.constant 0 : index
    %c15 = arith.constant 15 : index
    %45 = vector.load %arg1[%c0_60, %c0_61, %c15] : memref<1x1x718xf32, #tpu.memory_space<vmem>>, vector<1x1x687xf32>
    %46 = vector.shape_cast %45 : vector<1x1x687xf32> to vector<1x687xf32>
    %c15_62 = arith.constant 15 : index
    %c0_63 = arith.constant 0 : index
    %47 = vector.load %arg31[%c15_62, %c0_63] : memref<32x687xf32, #tpu.memory_space<vmem>>, vector<1x687xf32>
    tpu.vector_store %arg31[%c15_62, %c0_63], %46 {strides = array<i32>} : memref<32x687xf32, #tpu.memory_space<vmem>>, vector<1x687xf32>,
    %c0_64 = arith.constant 0 : index
    %c0_65 = arith.constant 0 : index
    %c16 = arith.constant 16 : index
    %48 = vector.load %arg1[%c0_64, %c0_65, %c16] : memref<1x1x718xf32, #tpu.memory_space<vmem>>, vector<1x1x687xf32>
    %49 = vector.shape_cast %48 : vector<1x1x687xf32> to vector<1x687xf32>
    %c16_66 = arith.constant 16 : index
    %c0_67 = arith.constant 0 : index
    %50 = vector.load %arg31[%c16_66, %c0_67] : memref<32x687xf32, #tpu.memory_space<vmem>>, vector<1x687xf32>
    tpu.vector_store %arg31[%c16_66, %c0_67], %49 {strides = array<i32>} : memref<32x687xf32, #tpu.memory_space<vmem>>, vector<1x687xf32>,
    %c0_68 = arith.constant 0 : index
    %c0_69 = arith.constant 0 : index
    %c17 = arith.constant 17 : index
    %51 = vector.load %arg1[%c0_68, %c0_69, %c17] : memref<1x1x718xf32, #tpu.memory_space<vmem>>, vector<1x1x687xf32>
    %52 = vector.shape_cast %51 : vector<1x1x687xf32> to vector<1x687xf32>
    %c17_70 = arith.constant 17 : index
    %c0_71 = arith.constant 0 : index
    %53 = vector.load %arg31[%c17_70, %c0_71] : memref<32x687xf32, #tpu.memory_space<vmem>>, vector<1x687xf32>
    tpu.vector_store %arg31[%c17_70, %c0_71], %52 {strides = array<i32>} : memref<32x687xf32, #tpu.memory_space<vmem>>, vector<1x687xf32>,
    %c0_72 = arith.constant 0 : index
    %c0_73 = arith.constant 0 : index
    %c18 = arith.constant 18 : index
    %54 = vector.load %arg1[%c0_72, %c0_73, %c18] : memref<1x1x718xf32, #tpu.memory_space<vmem>>, vector<1x1x687xf32>
    %55 = vector.shape_cast %54 : vector<1x1x687xf32> to vector<1x687xf32>
    %c18_74 = arith.constant 18 : index
    %c0_75 = arith.constant 0 : index
    %56 = vector.load %arg31[%c18_74, %c0_75] : memref<32x687xf32, #tpu.memory_space<vmem>>, vector<1x687xf32>
    tpu.vector_store %arg31[%c18_74, %c0_75], %55 {strides = array<i32>} : memref<32x687xf32, #tpu.memory_space<vmem>>, vector<1x687xf32>,
    %c0_76 = arith.constant 0 : index
    %c0_77 = arith.constant 0 : index
    %c19 = arith.constant 19 : index
    %57 = vector.load %arg1[%c0_76, %c0_77, %c19] : memref<1x1x718xf32, #tpu.memory_space<vmem>>, vector<1x1x687xf32>
    %58 = vector.shape_cast %57 : vector<1x1x687xf32> to vector<1x687xf32>
    %c19_78 = arith.constant 19 : index
    %c0_79 = arith.constant 0 : index
    %59 = vector.load %arg31[%c19_78, %c0_79] : memref<32x687xf32, #tpu.memory_space<vmem>>, vector<1x687xf32>
    tpu.vector_store %arg31[%c19_78, %c0_79], %58 {strides = array<i32>} : memref<32x687xf32, #tpu.memory_space<vmem>>, vector<1x687xf32>,
    %c0_80 = arith.constant 0 : index
    %c0_81 = arith.constant 0 : index
    %c20 = arith.constant 20 : index
    %60 = vector.load %arg1[%c0_80, %c0_81, %c20] : memref<1x1x718xf32, #tpu.memory_space<vmem>>, vector<1x1x687xf32>
    %61 = vector.shape_cast %60 : vector<1x1x687xf32> to vector<1x687xf32>
    %c20_82 = arith.constant 20 : index
    %c0_83 = arith.constant 0 : index
    %62 = vector.load %arg31[%c20_82, %c0_83] : memref<32x687xf32, #tpu.memory_space<vmem>>, vector<1x687xf32>
    tpu.vector_store %arg31[%c20_82, %c0_83], %61 {strides = array<i32>} : memref<32x687xf32, #tpu.memory_space<vmem>>, vector<1x687xf32>,
    %c0_84 = arith.constant 0 : index
    %c0_85 = arith.constant 0 : index
    %c21 = arith.constant 21 : index
    %63 = vector.load %arg1[%c0_84, %c0_85, %c21] : memref<1x1x718xf32, #tpu.memory_space<vmem>>, vector<1x1x687xf32>
    %64 = vector.shape_cast %63 : vector<1x1x687xf32> to vector<1x687xf32>
    %c21_86 = arith.constant 21 : index
    %c0_87 = arith.constant 0 : index
    %65 = vector.load %arg31[%c21_86, %c0_87] : memref<32x687xf32, #tpu.memory_space<vmem>>, vector<1x687xf32>
    tpu.vector_store %arg31[%c21_86, %c0_87], %64 {strides = array<i32>} : memref<32x687xf32, #tpu.memory_space<vmem>>, vector<1x687xf32>,
    %c0_88 = arith.constant 0 : index
    %c0_89 = arith.constant 0 : index
    %c22 = arith.constant 22 : index
    %66 = vector.load %arg1[%c0_88, %c0_89, %c22] : memref<1x1x718xf32, #tpu.memory_space<vmem>>, vector<1x1x687xf32>
    %67 = vector.shape_cast %66 : vector<1x1x687xf32> to vector<1x687xf32>
    %c22_90 = arith.constant 22 : index
    %c0_91 = arith.constant 0 : index
    %68 = vector.load %arg31[%c22_90, %c0_91] : memref<32x687xf32, #tpu.memory_space<vmem>>, vector<1x687xf32>
    tpu.vector_store %arg31[%c22_90, %c0_91], %67 {strides = array<i32>} : memref<32x687xf32, #tpu.memory_space<vmem>>, vector<1x687xf32>,
    %c0_92 = arith.constant 0 : index
    %c0_93 = arith.constant 0 : index
    %c23 = arith.constant 23 : index
    %69 = vector.load %arg1[%c0_92, %c0_93, %c23] : memref<1x1x718xf32, #tpu.memory_space<vmem>>, vector<1x1x687xf32>
    %70 = vector.shape_cast %69 : vector<1x1x687xf32> to vector<1x687xf32>
    %c23_94 = arith.constant 23 : index
    %c0_95 = arith.constant 0 : index
    %71 = vector.load %arg31[%c23_94, %c0_95] : memref<32x687xf32, #tpu.memory_space<vmem>>, vector<1x687xf32>
    tpu.vector_store %arg31[%c23_94, %c0_95], %70 {strides = array<i32>} : memref<32x687xf32, #tpu.memory_space<vmem>>, vector<1x687xf32>,
    %c0_96 = arith.constant 0 : index
    %c0_97 = arith.constant 0 : index
    %c24 = arith.constant 24 : index
    %72 = vector.load %arg1[%c0_96, %c0_97, %c24] : memref<1x1x718xf32, #tpu.memory_space<vmem>>, vector<1x1x687xf32>
    %73 = vector.shape_cast %72 : vector<1x1x687xf32> to vector<1x687xf32>
    %c24_98 = arith.constant 24 : index
    %c0_99 = arith.constant 0 : index
    %74 = vector.load %arg31[%c24_98, %c0_99] : memref<32x687xf32, #tpu.memory_space<vmem>>, vector<1x687xf32>
    tpu.vector_store %arg31[%c24_98, %c0_99], %73 {strides = array<i32>} : memref<32x687xf32, #tpu.memory_space<vmem>>, vector<1x687xf32>,
    %c0_100 = arith.constant 0 : index
    %c0_101 = arith.constant 0 : index
    %c25 = arith.constant 25 : index
    %75 = vector.load %arg1[%c0_100, %c0_101, %c25] : memref<1x1x718xf32, #tpu.memory_space<vmem>>, vector<1x1x687xf32>
    %76 = vector.shape_cast %75 : vector<1x1x687xf32> to vector<1x687xf32>
    %c25_102 = arith.constant 25 : index
    %c0_103 = arith.constant 0 : index
    %77 = vector.load %arg31[%c25_102, %c0_103] : memref<32x687xf32, #tpu.memory_space<vmem>>, vector<1x687xf32>
    tpu.vector_store %arg31[%c25_102, %c0_103], %76 {strides = array<i32>} : memref<32x687xf32, #tpu.memory_space<vmem>>, vector<1x687xf32>,
    %c0_104 = arith.constant 0 : index
    %c0_105 = arith.constant 0 : index
    %c26 = arith.constant 26 : index
    %78 = vector.load %arg1[%c0_104, %c0_105, %c26] : memref<1x1x718xf32, #tpu.memory_space<vmem>>, vector<1x1x687xf32>
    %79 = vector.shape_cast %78 : vector<1x1x687xf32> to vector<1x687xf32>
    %c26_106 = arith.constant 26 : index
    %c0_107 = arith.constant 0 : index
    %80 = vector.load %arg31[%c26_106, %c0_107] : memref<32x687xf32, #tpu.memory_space<vmem>>, vector<1x687xf32>
    tpu.vector_store %arg31[%c26_106, %c0_107], %79 {strides = array<i32>} : memref<32x687xf32, #tpu.memory_space<vmem>>, vector<1x687xf32>,
    %c0_108 = arith.constant 0 : index
    %c0_109 = arith.constant 0 : index
    %c27 = arith.constant 27 : index
    %81 = vector.load %arg1[%c0_108, %c0_109, %c27] : memref<1x1x718xf32, #tpu.memory_space<vmem>>, vector<1x1x687xf32>
    %82 = vector.shape_cast %81 : vector<1x1x687xf32> to vector<1x687xf32>
    %c27_110 = arith.constant 27 : index
    %c0_111 = arith.constant 0 : index
    %83 = vector.load %arg31[%c27_110, %c0_111] : memref<32x687xf32, #tpu.memory_space<vmem>>, vector<1x687xf32>
    tpu.vector_store %arg31[%c27_110, %c0_111], %82 {strides = array<i32>} : memref<32x687xf32, #tpu.memory_space<vmem>>, vector<1x687xf32>,
    %c0_112 = arith.constant 0 : index
    %c0_113 = arith.constant 0 : index
    %c28 = arith.constant 28 : index
    %84 = vector.load %arg1[%c0_112, %c0_113, %c28] : memref<1x1x718xf32, #tpu.memory_space<vmem>>, vector<1x1x687xf32>
    %85 = vector.shape_cast %84 : vector<1x1x687xf32> to vector<1x687xf32>
    %c28_114 = arith.constant 28 : index
    %c0_115 = arith.constant 0 : index
    %86 = vector.load %arg31[%c28_114, %c0_115] : memref<32x687xf32, #tpu.memory_space<vmem>>, vector<1x687xf32>
    tpu.vector_store %arg31[%c28_114, %c0_115], %85 {strides = array<i32>} : memref<32x687xf32, #tpu.memory_space<vmem>>, vector<1x687xf32>,
    %c0_116 = arith.constant 0 : index
    %c0_117 = arith.constant 0 : index
    %c29 = arith.constant 29 : index
    %87 = vector.load %arg1[%c0_116, %c0_117, %c29] : memref<1x1x718xf32, #tpu.memory_space<vmem>>, vector<1x1x687xf32>
    %88 = vector.shape_cast %87 : vector<1x1x687xf32> to vector<1x687xf32>
    %c29_118 = arith.constant 29 : index
    %c0_119 = arith.constant 0 : index
    %89 = vector.load %arg31[%c29_118, %c0_119] : memref<32x687xf32, #tpu.memory_space<vmem>>, vector<1x687xf32>
    tpu.vector_store %arg31[%c29_118, %c0_119], %88 {strides = array<i32>} : memref<32x687xf32, #tpu.memory_space<vmem>>, vector<1x687xf32>,
    %c0_120 = arith.constant 0 : index
    %c0_121 = arith.constant 0 : index
    %c30 = arith.constant 30 : index
    %90 = vector.load %arg1[%c0_120, %c0_121, %c30] : memref<1x1x718xf32, #tpu.memory_space<vmem>>, vector<1x1x687xf32>
    %91 = vector.shape_cast %90 : vector<1x1x687xf32> to vector<1x687xf32>
    %c30_122 = arith.constant 30 : index
    %c0_123 = arith.constant 0 : index
    %92 = vector.load %arg31[%c30_122, %c0_123] : memref<32x687xf32, #tpu.memory_space<vmem>>, vector<1x687xf32>
    tpu.vector_store %arg31[%c30_122, %c0_123], %91 {strides = array<i32>} : memref<32x687xf32, #tpu.memory_space<vmem>>, vector<1x687xf32>,
    %c0_124 = arith.constant 0 : index
    %c0_125 = arith.constant 0 : index
    %c31 = arith.constant 31 : index
    %93 = vector.load %arg1[%c0_124, %c0_125, %c31] : memref<1x1x718xf32, #tpu.memory_space<vmem>>, vector<1x1x687xf32>
    %94 = vector.shape_cast %93 : vector<1x1x687xf32> to vector<1x687xf32>
    %c31_126 = arith.constant 31 : index
    %c0_127 = arith.constant 0 : index
    %95 = vector.load %arg31[%c31_126, %c0_127] : memref<32x687xf32, #tpu.memory_space<vmem>>, vector<1x687xf32>
    tpu.vector_store %arg31[%c31_126, %c0_127], %94 {strides = array<i32>} : memref<32x687xf32, #tpu.memory_space<vmem>>, vector<1x687xf32>,
    %c0_128 = arith.constant 0 : index
    %c0_129 = arith.constant 0 : index
    %96 = vector.load %arg2[%c0_128, %c0_129] : memref<16x32xbf16, #tpu.memory_space<vmem>>, vector<16x32xbf16>
    %c0_130 = arith.constant 0 : index
    %c0_131 = arith.constant 0 : index
    %97 = vector.load %arg31[%c0_130, %c0_131] : memref<32x687xf32, #tpu.memory_space<vmem>>, vector<32x687xf32>
    %98 = arith.truncf %97 : vector<32x687xf32> to vector<32x687xbf16>
    %cst = arith.constant dense<0.000000e+00> : vector<16x687xf32>
    %99 = tpu.matmul %96, %98, %cst {dimension_numbers = #tpu.dot_dimension_numbers<[1], [0], [0], [1], [0, 0, 1, 1], [], []>} : vector<16x32xbf16>, vector<32x687xbf16>, vector<16x687xf32> -> vector<16x687xf32>
    %c0_132 = arith.constant 0 : index
    %c0_133 = arith.constant 0 : index
    %100 = vector.load %arg3[%c0_132, %c0_133] : memref<16x1xf32, #tpu.memory_space<vmem>>, vector<16x1xf32>
    %101 = vector.broadcast %100 : vector<16x1xf32> to vector<16x687xf32>
    %102 = arith.addf %99, %101 : vector<16x687xf32>
    %cst_134 = arith.constant 0.000000e+00 : f32
    %103 = vector.broadcast %cst_134 : f32 to vector<16x687xf32>
    %104 = arith.maximumf %102, %103 : vector<16x687xf32>
    %c0_135 = arith.constant 0 : index
    %c0_136 = arith.constant 0 : index
    %105 = vector.load %arg32[%c0_135, %c0_136] : memref<16x687xf32, #tpu.memory_space<vmem>>, vector<16x687xf32>
    tpu.vector_store %arg32[%c0_135, %c0_136], %104 {strides = array<i32>} : memref<16x687xf32, #tpu.memory_space<vmem>>, vector<16x687xf32>,
    %c0_137 = arith.constant 0 : index
    %c0_138 = arith.constant 0 : index
    %106 = vector.load %arg32[%c0_137, %c0_138] : memref<16x687xf32, #tpu.memory_space<vmem>>, vector<16x685xf32>
    %c0_139 = arith.constant 0 : index
    %c1_140 = arith.constant 1 : index
    %107 = vector.load %arg32[%c0_139, %c1_140] : memref<16x687xf32, #tpu.memory_space<vmem>>, vector<16x685xf32>
    %108 = arith.maximumf %106, %107 : vector<16x685xf32>
    %c0_141 = arith.constant 0 : index
    %c2_142 = arith.constant 2 : index
    %109 = vector.load %arg32[%c0_141, %c2_142] : memref<16x687xf32, #tpu.memory_space<vmem>>, vector<16x685xf32>
    %110 = arith.maximumf %108, %109 : vector<16x685xf32>
    %111 = arith.truncf %110 : vector<16x685xf32> to vector<16x685xbf16>
    %c0_143 = arith.constant 0 : index
    %c0_144 = arith.constant 0 : index
    %112 = vector.load %arg4[%c0_143, %c0_144] : memref<685x343xbf16, #tpu.memory_space<vmem>>, vector<685x343xbf16>
    %cst_145 = arith.constant dense<0.000000e+00> : vector<16x343xf32>
    %113 = tpu.matmul %111, %112, %cst_145 {dimension_numbers = #tpu.dot_dimension_numbers<[1], [0], [0], [1], [0, 0, 1, 1], [], []>} : vector<16x685xbf16>, vector<685x343xbf16>, vector<16x343xf32> -> vector<16x343xf32>
    %cst_146 = arith.constant 5.000000e-01 : f32
    %114 = vector.broadcast %cst_146 : f32 to vector<16x343xf32>
    %115 = arith.mulf %114, %113 : vector<16x343xf32>
    %116 = math.tanh %115 : vector<16x343xf32>
    %cst_147 = arith.constant 1.000000e+00 : f32
    %117 = vector.broadcast %cst_147 : f32 to vector<16x343xf32>
    %118 = arith.addf %116, %117 : vector<16x343xf32>
    %cst_148 = arith.constant 5.000000e-01 : f32
    %119 = vector.broadcast %cst_148 : f32 to vector<16x343xf32>
    %120 = arith.mulf %119, %118 : vector<16x343xf32>
    %c0_149 = arith.constant 0 : index
    %c0_150 = arith.constant 0 : index
    %121 = vector.load %arg33[%c0_149, %c0_150] : memref<32x343xf32, #tpu.memory_space<vmem>>, vector<16x343xf32>
    tpu.vector_store %arg33[%c0_149, %c0_150], %120 {strides = array<i32>} : memref<32x343xf32, #tpu.memory_space<vmem>>, vector<16x343xf32>,
    %cst_151 = arith.constant 1.000000e+00 : f32
    %122 = vector.broadcast %cst_151 : f32 to vector<16x343xf32>
    %123 = arith.subf %122, %120 : vector<16x343xf32>
    %c16_152 = arith.constant 16 : index
    %c0_153 = arith.constant 0 : index
    %124 = vector.load %arg33[%c16_152, %c0_153] : memref<32x343xf32, #tpu.memory_space<vmem>>, vector<16x343xf32>
    tpu.vector_store %arg33[%c16_152, %c0_153], %123 {strides = array<i32>} : memref<32x343xf32, #tpu.memory_space<vmem>>, vector<16x343xf32>,
    %c0_154 = arith.constant 0 : index
    %c0_155 = arith.constant 0 : index
    %125 = vector.load %arg33[%c0_154, %c0_155] : memref<32x343xf32, #tpu.memory_space<vmem>>, vector<32x341xf32>
    %c0_156 = arith.constant 0 : index
    %c1_157 = arith.constant 1 : index
    %126 = vector.load %arg33[%c0_156, %c1_157] : memref<32x343xf32, #tpu.memory_space<vmem>>, vector<32x341xf32>
    %127 = arith.maximumf %125, %126 : vector<32x341xf32>
    %c0_158 = arith.constant 0 : index
    %c2_159 = arith.constant 2 : index
    %128 = vector.load %arg33[%c0_158, %c2_159] : memref<32x343xf32, #tpu.memory_space<vmem>>, vector<32x341xf32>
    %129 = arith.maximumf %127, %128 : vector<32x341xf32>
    %130 = arith.truncf %129 : vector<32x341xf32> to vector<32x341xbf16>
    %c0_160 = arith.constant 0 : index
    %c0_161 = arith.constant 0 : index
    %131 = vector.load %arg5[%c0_160, %c0_161] : memref<341x171xbf16, #tpu.memory_space<vmem>>, vector<341x171xbf16>
    %cst_162 = arith.constant dense<0.000000e+00> : vector<32x171xf32>
    %132 = tpu.matmul %130, %131, %cst_162 {dimension_numbers = #tpu.dot_dimension_numbers<[1], [0], [0], [1], [0, 0, 1, 1], [], []>} : vector<32x341xbf16>, vector<341x171xbf16>, vector<32x171xf32> -> vector<32x171xf32>
    %c0_163 = arith.constant 0 : index
    %c0_164 = arith.constant 0 : index
    %133 = vector.load %arg34[%c0_163, %c0_164] : memref<32x171xf32, #tpu.memory_space<vmem>>, vector<32x171xf32>
    tpu.vector_store %arg34[%c0_163, %c0_164], %132 {strides = array<i32>} : memref<32x171xf32, #tpu.memory_space<vmem>>, vector<32x171xf32>,
    %cst_165 = arith.constant 0.000000e+00 : f32
    %134 = vector.broadcast %cst_165 : f32 to vector<32x1xf32>
    %c0_166 = arith.constant 0 : index
    %c0_167 = arith.constant 0 : index
    %135 = vector.load %arg35[%c0_166, %c0_167] : memref<32x173xf32, #tpu.memory_space<vmem>>, vector<32x1xf32>
    tpu.vector_store %arg35[%c0_166, %c0_167], %134 {strides = array<i32>} : memref<32x173xf32, #tpu.memory_space<vmem>>, vector<32x1xf32>,
    %cst_168 = arith.constant 0.000000e+00 : f32
    %136 = vector.broadcast %cst_168 : f32 to vector<32x1xf32>
    %c0_169 = arith.constant 0 : index
    %c172 = arith.constant 172 : index
    %137 = vector.load %arg35[%c0_169, %c172] : memref<32x173xf32, #tpu.memory_space<vmem>>, vector<32x1xf32>
    tpu.vector_store %arg35[%c0_169, %c172], %136 {strides = array<i32>} : memref<32x173xf32, #tpu.memory_space<vmem>>, vector<32x1xf32>,
    %c0_170 = arith.constant 0 : index
    %c0_171 = arith.constant 0 : index
    %138 = vector.load %arg34[%c0_170, %c0_171] : memref<32x171xf32, #tpu.memory_space<vmem>>, vector<32x171xf32>
    %c0_172 = arith.constant 0 : index
    %c1_173 = arith.constant 1 : index
    %139 = vector.load %arg35[%c0_172, %c1_173] : memref<32x173xf32, #tpu.memory_space<vmem>>, vector<32x171xf32>
    tpu.vector_store %arg35[%c0_172, %c1_173], %138 {strides = array<i32>} : memref<32x173xf32, #tpu.memory_space<vmem>>, vector<32x171xf32>,
    %c0_174 = arith.constant 0 : index
    %c0_175 = arith.constant 0 : index
    %140 = vector.load %arg6[%c0_174, %c0_175] : memref<64x96xbf16, #tpu.memory_space<vmem>>, vector<64x32xbf16>
    %c0_176 = arith.constant 0 : index
    %c0_177 = arith.constant 0 : index
    %141 = vector.load %arg35[%c0_176, %c0_177] : memref<32x173xf32, #tpu.memory_space<vmem>>, vector<32x171xf32>
    %142 = arith.truncf %141 : vector<32x171xf32> to vector<32x171xbf16>
    %cst_178 = arith.constant dense<0.000000e+00> : vector<64x171xf32>
    %143 = tpu.matmul %140, %142, %cst_178 {dimension_numbers = #tpu.dot_dimension_numbers<[1], [0], [0], [1], [0, 0, 1, 1], [], []>} : vector<64x32xbf16>, vector<32x171xbf16>, vector<64x171xf32> -> vector<64x171xf32>
    %c0_179 = arith.constant 0 : index
    %c32 = arith.constant 32 : index
    %144 = vector.load %arg6[%c0_179, %c32] : memref<64x96xbf16, #tpu.memory_space<vmem>>, vector<64x32xbf16>
    %c0_180 = arith.constant 0 : index
    %c1_181 = arith.constant 1 : index
    %145 = vector.load %arg35[%c0_180, %c1_181] : memref<32x173xf32, #tpu.memory_space<vmem>>, vector<32x171xf32>
    %146 = arith.truncf %145 : vector<32x171xf32> to vector<32x171xbf16>
    %cst_182 = arith.constant dense<0.000000e+00> : vector<64x171xf32>
    %147 = tpu.matmul %144, %146, %cst_182 {dimension_numbers = #tpu.dot_dimension_numbers<[1], [0], [0], [1], [0, 0, 1, 1], [], []>} : vector<64x32xbf16>, vector<32x171xbf16>, vector<64x171xf32> -> vector<64x171xf32>
    %148 = arith.addf %143, %147 : vector<64x171xf32>
    %c0_183 = arith.constant 0 : index
    %c64 = arith.constant 64 : index
    %149 = vector.load %arg6[%c0_183, %c64] : memref<64x96xbf16, #tpu.memory_space<vmem>>, vector<64x32xbf16>
    %c0_184 = arith.constant 0 : index
    %c2_185 = arith.constant 2 : index
    %150 = vector.load %arg35[%c0_184, %c2_185] : memref<32x173xf32, #tpu.memory_space<vmem>>, vector<32x171xf32>
    %151 = arith.truncf %150 : vector<32x171xf32> to vector<32x171xbf16>
    %cst_186 = arith.constant dense<0.000000e+00> : vector<64x171xf32>
    %152 = tpu.matmul %149, %151, %cst_186 {dimension_numbers = #tpu.dot_dimension_numbers<[1], [0], [0], [1], [0, 0, 1, 1], [], []>} : vector<64x32xbf16>, vector<32x171xbf16>, vector<64x171xf32> -> vector<64x171xf32>
    %153 = arith.addf %148, %152 : vector<64x171xf32>
    %c0_187 = arith.constant 0 : index
    %c0_188 = arith.constant 0 : index
    %154 = vector.load %arg7[%c0_187, %c0_188] : memref<64x1xf32, #tpu.memory_space<vmem>>, vector<64x1xf32>
    %155 = vector.broadcast %154 : vector<64x1xf32> to vector<64x171xf32>
    %156 = arith.addf %153, %155 : vector<64x171xf32>
    %157 = math.tanh %156 : vector<64x171xf32>
    %c0_189 = arith.constant 0 : index
    %c0_190 = arith.constant 0 : index
    %158 = vector.load %arg36[%c0_189, %c0_190] : memref<64x171xf32, #tpu.memory_space<vmem>>, vector<64x171xf32>
    tpu.vector_store %arg36[%c0_189, %c0_190], %157 {strides = array<i32>} : memref<64x171xf32, #tpu.memory_space<vmem>>, vector<64x171xf32>,
    %c0_191 = arith.constant 0 : index
    %c0_192 = arith.constant 0 : index
    %159 = vector.load %arg36[%c0_191, %c0_192] : memref<64x171xf32, #tpu.memory_space<vmem>>, vector<64x169xf32>
    %c0_193 = arith.constant 0 : index
    %c1_194 = arith.constant 1 : index
    %160 = vector.load %arg36[%c0_193, %c1_194] : memref<64x171xf32, #tpu.memory_space<vmem>>, vector<64x169xf32>
    %161 = arith.maximumf %159, %160 : vector<64x169xf32>
    %c0_195 = arith.constant 0 : index
    %c2_196 = arith.constant 2 : index
    %162 = vector.load %arg36[%c0_195, %c2_196] : memref<64x171xf32, #tpu.memory_space<vmem>>, vector<64x169xf32>
    %163 = arith.maximumf %161, %162 : vector<64x169xf32>
    %164 = arith.truncf %163 : vector<64x169xf32> to vector<64x169xbf16>
    %c0_197 = arith.constant 0 : index
    %c0_198 = arith.constant 0 : index
    %165 = vector.load %arg8[%c0_197, %c0_198] : memref<169x85xbf16, #tpu.memory_space<vmem>>, vector<169x85xbf16>
    %cst_199 = arith.constant dense<0.000000e+00> : vector<64x85xf32>
    %166 = tpu.matmul %164, %165, %cst_199 {dimension_numbers = #tpu.dot_dimension_numbers<[1], [0], [0], [1], [0, 0, 1, 1], [], []>} : vector<64x169xbf16>, vector<169x85xbf16>, vector<64x85xf32> -> vector<64x85xf32>
    %cst_200 = arith.constant 0.000000e+00 : f32
    %167 = vector.broadcast %cst_200 : f32 to vector<64x1xf32>
    %c0_201 = arith.constant 0 : index
    %c0_202 = arith.constant 0 : index
    %168 = vector.load %arg37[%c0_201, %c0_202] : memref<64x87xf32, #tpu.memory_space<vmem>>, vector<64x1xf32>
    tpu.vector_store %arg37[%c0_201, %c0_202], %167 {strides = array<i32>} : memref<64x87xf32, #tpu.memory_space<vmem>>, vector<64x1xf32>,
    %cst_203 = arith.constant 0.000000e+00 : f32
    %169 = vector.broadcast %cst_203 : f32 to vector<64x1xf32>
    %c0_204 = arith.constant 0 : index
    %c86 = arith.constant 86 : index
    %170 = vector.load %arg37[%c0_204, %c86] : memref<64x87xf32, #tpu.memory_space<vmem>>, vector<64x1xf32>
    tpu.vector_store %arg37[%c0_204, %c86], %169 {strides = array<i32>} : memref<64x87xf32, #tpu.memory_space<vmem>>, vector<64x1xf32>,
    %c0_205 = arith.constant 0 : index
    %c1_206 = arith.constant 1 : index
    %171 = vector.load %arg37[%c0_205, %c1_206] : memref<64x87xf32, #tpu.memory_space<vmem>>, vector<64x85xf32>
    tpu.vector_store %arg37[%c0_205, %c1_206], %166 {strides = array<i32>} : memref<64x87xf32, #tpu.memory_space<vmem>>, vector<64x85xf32>,
    %c0_207 = arith.constant 0 : index
    %c0_208 = arith.constant 0 : index
    %172 = vector.load %arg9[%c0_207, %c0_208] : memref<32x192xbf16, #tpu.memory_space<vmem>>, vector<32x64xbf16>
    %c0_209 = arith.constant 0 : index
    %c0_210 = arith.constant 0 : index
    %173 = vector.load %arg37[%c0_209, %c0_210] : memref<64x87xf32, #tpu.memory_space<vmem>>, vector<64x85xf32>
    %174 = arith.truncf %173 : vector<64x85xf32> to vector<64x85xbf16>
    %cst_211 = arith.constant dense<0.000000e+00> : vector<32x85xf32>
    %175 = tpu.matmul %172, %174, %cst_211 {dimension_numbers = #tpu.dot_dimension_numbers<[1], [0], [0], [1], [0, 0, 1, 1], [], []>} : vector<32x64xbf16>, vector<64x85xbf16>, vector<32x85xf32> -> vector<32x85xf32>
    %c0_212 = arith.constant 0 : index
    %c64_213 = arith.constant 64 : index
    %176 = vector.load %arg9[%c0_212, %c64_213] : memref<32x192xbf16, #tpu.memory_space<vmem>>, vector<32x64xbf16>
    %c0_214 = arith.constant 0 : index
    %c1_215 = arith.constant 1 : index
    %177 = vector.load %arg37[%c0_214, %c1_215] : memref<64x87xf32, #tpu.memory_space<vmem>>, vector<64x85xf32>
    %178 = arith.truncf %177 : vector<64x85xf32> to vector<64x85xbf16>
    %cst_216 = arith.constant dense<0.000000e+00> : vector<32x85xf32>
    %179 = tpu.matmul %176, %178, %cst_216 {dimension_numbers = #tpu.dot_dimension_numbers<[1], [0], [0], [1], [0, 0, 1, 1], [], []>} : vector<32x64xbf16>, vector<64x85xbf16>, vector<32x85xf32> -> vector<32x85xf32>
    %180 = arith.addf %175, %179 : vector<32x85xf32>
    %c0_217 = arith.constant 0 : index
    %c128 = arith.constant 128 : index
    %181 = vector.load %arg9[%c0_217, %c128] : memref<32x192xbf16, #tpu.memory_space<vmem>>, vector<32x64xbf16>
    %c0_218 = arith.constant 0 : index
    %c2_219 = arith.constant 2 : index
    %182 = vector.load %arg37[%c0_218, %c2_219] : memref<64x87xf32, #tpu.memory_space<vmem>>, vector<64x85xf32>
    %183 = arith.truncf %182 : vector<64x85xf32> to vector<64x85xbf16>
    %cst_220 = arith.constant dense<0.000000e+00> : vector<32x85xf32>
    %184 = tpu.matmul %181, %183, %cst_220 {dimension_numbers = #tpu.dot_dimension_numbers<[1], [0], [0], [1], [0, 0, 1, 1], [], []>} : vector<32x64xbf16>, vector<64x85xbf16>, vector<32x85xf32> -> vector<32x85xf32>
    %185 = arith.addf %180, %184 : vector<32x85xf32>
    %c0_221 = arith.constant 0 : index
    %c0_222 = arith.constant 0 : index
    %186 = vector.load %arg10[%c0_221, %c0_222] : memref<32x1xf32, #tpu.memory_space<vmem>>, vector<32x1xf32>
    %187 = vector.broadcast %186 : vector<32x1xf32> to vector<32x85xf32>
    %188 = arith.addf %185, %187 : vector<32x85xf32>
    %cst_223 = arith.constant 0.000000e+00 : f32
    %189 = vector.broadcast %cst_223 : f32 to vector<32x85xf32>
    %190 = arith.maximumf %188, %189 : vector<32x85xf32>
    %c0_224 = arith.constant 0 : index
    %c0_225 = arith.constant 0 : index
    %191 = vector.load %arg38[%c0_224, %c0_225] : memref<32x85xf32, #tpu.memory_space<vmem>>, vector<32x85xf32>
    tpu.vector_store %arg38[%c0_224, %c0_225], %190 {strides = array<i32>} : memref<32x85xf32, #tpu.memory_space<vmem>>, vector<32x85xf32>,
    %c0_226 = arith.constant 0 : index
    %c0_227 = arith.constant 0 : index
    %192 = vector.load %arg38[%c0_226, %c0_227] : memref<32x85xf32, #tpu.memory_space<vmem>>, vector<32x83xf32>
    %c0_228 = arith.constant 0 : index
    %c1_229 = arith.constant 1 : index
    %193 = vector.load %arg38[%c0_228, %c1_229] : memref<32x85xf32, #tpu.memory_space<vmem>>, vector<32x83xf32>
    %194 = arith.maximumf %192, %193 : vector<32x83xf32>
    %c0_230 = arith.constant 0 : index
    %c2_231 = arith.constant 2 : index
    %195 = vector.load %arg38[%c0_230, %c2_231] : memref<32x85xf32, #tpu.memory_space<vmem>>, vector<32x83xf32>
    %196 = arith.maximumf %194, %195 : vector<32x83xf32>
    %197 = arith.truncf %196 : vector<32x83xf32> to vector<32x83xbf16>
    %c0_232 = arith.constant 0 : index
    %c0_233 = arith.constant 0 : index
    %198 = vector.load %arg11[%c0_232, %c0_233] : memref<83x42xbf16, #tpu.memory_space<vmem>>, vector<83x42xbf16>
    %cst_234 = arith.constant dense<0.000000e+00> : vector<32x42xf32>
    %199 = tpu.matmul %197, %198, %cst_234 {dimension_numbers = #tpu.dot_dimension_numbers<[1], [0], [0], [1], [0, 0, 1, 1], [], []>} : vector<32x83xbf16>, vector<83x42xbf16>, vector<32x42xf32> -> vector<32x42xf32>
    %200 = arith.truncf %199 : vector<32x42xf32> to vector<32x42xbf16>
    %c0_235 = arith.constant 0 : index
    %c0_236 = arith.constant 0 : index
    %201 = vector.load %arg12[%c0_235, %c0_236] : memref<42x84xbf16, #tpu.memory_space<vmem>>, vector<42x84xbf16>
    %cst_237 = arith.constant dense<0.000000e+00> : vector<32x84xf32>
    %202 = tpu.matmul %200, %201, %cst_237 {dimension_numbers = #tpu.dot_dimension_numbers<[1], [0], [0], [1], [0, 0, 1, 1], [], []>} : vector<32x42xbf16>, vector<42x84xbf16>, vector<32x84xf32> -> vector<32x84xf32>
    %cst_238 = arith.constant 0.000000e+00 : f32
    %203 = vector.broadcast %cst_238 : f32 to vector<32x2xf32>
    %c0_239 = arith.constant 0 : index
    %c0_240 = arith.constant 0 : index
    %204 = vector.load %arg39[%c0_239, %c0_240] : memref<32x88xf32, #tpu.memory_space<vmem>>, vector<32x2xf32>
    tpu.vector_store %arg39[%c0_239, %c0_240], %203 {strides = array<i32>} : memref<32x88xf32, #tpu.memory_space<vmem>>, vector<32x2xf32>,
    %cst_241 = arith.constant 0.000000e+00 : f32
    %205 = vector.broadcast %cst_241 : f32 to vector<32x2xf32>
    %c0_242 = arith.constant 0 : index
    %c86_243 = arith.constant 86 : index
    %206 = vector.load %arg39[%c0_242, %c86_243] : memref<32x88xf32, #tpu.memory_space<vmem>>, vector<32x2xf32>
    tpu.vector_store %arg39[%c0_242, %c86_243], %205 {strides = array<i32>} : memref<32x88xf32, #tpu.memory_space<vmem>>, vector<32x2xf32>,
    %c0_244 = arith.constant 0 : index
    %c2_245 = arith.constant 2 : index
    %207 = vector.load %arg39[%c0_244, %c2_245] : memref<32x88xf32, #tpu.memory_space<vmem>>, vector<32x84xf32>
    tpu.vector_store %arg39[%c0_244, %c2_245], %202 {strides = array<i32>} : memref<32x88xf32, #tpu.memory_space<vmem>>, vector<32x84xf32>,
    %c0_246 = arith.constant 0 : index
    %c0_247 = arith.constant 0 : index
    %208 = vector.load %arg13[%c0_246, %c0_247] : memref<64x96xbf16, #tpu.memory_space<vmem>>, vector<64x32xbf16>
    %c0_248 = arith.constant 0 : index
    %c0_249 = arith.constant 0 : index
    %209 = vector.load %arg39[%c0_248, %c0_249] : memref<32x88xf32, #tpu.memory_space<vmem>>, vector<32x86xf32>
    %210 = arith.truncf %209 : vector<32x86xf32> to vector<32x86xbf16>
    %cst_250 = arith.constant dense<0.000000e+00> : vector<64x86xf32>
    %211 = tpu.matmul %208, %210, %cst_250 {dimension_numbers = #tpu.dot_dimension_numbers<[1], [0], [0], [1], [0, 0, 1, 1], [], []>} : vector<64x32xbf16>, vector<32x86xbf16>, vector<64x86xf32> -> vector<64x86xf32>
    %c0_251 = arith.constant 0 : index
    %c32_252 = arith.constant 32 : index
    %212 = vector.load %arg13[%c0_251, %c32_252] : memref<64x96xbf16, #tpu.memory_space<vmem>>, vector<64x32xbf16>
    %c0_253 = arith.constant 0 : index
    %c1_254 = arith.constant 1 : index
    %213 = vector.load %arg39[%c0_253, %c1_254] : memref<32x88xf32, #tpu.memory_space<vmem>>, vector<32x86xf32>
    %214 = arith.truncf %213 : vector<32x86xf32> to vector<32x86xbf16>
    %cst_255 = arith.constant dense<0.000000e+00> : vector<64x86xf32>
    %215 = tpu.matmul %212, %214, %cst_255 {dimension_numbers = #tpu.dot_dimension_numbers<[1], [0], [0], [1], [0, 0, 1, 1], [], []>} : vector<64x32xbf16>, vector<32x86xbf16>, vector<64x86xf32> -> vector<64x86xf32>
    %216 = arith.addf %211, %215 : vector<64x86xf32>
    %c0_256 = arith.constant 0 : index
    %c64_257 = arith.constant 64 : index
    %217 = vector.load %arg13[%c0_256, %c64_257] : memref<64x96xbf16, #tpu.memory_space<vmem>>, vector<64x32xbf16>
    %c0_258 = arith.constant 0 : index
    %c2_259 = arith.constant 2 : index
    %218 = vector.load %arg39[%c0_258, %c2_259] : memref<32x88xf32, #tpu.memory_space<vmem>>, vector<32x86xf32>
    %219 = arith.truncf %218 : vector<32x86xf32> to vector<32x86xbf16>
    %cst_260 = arith.constant dense<0.000000e+00> : vector<64x86xf32>
    %220 = tpu.matmul %217, %219, %cst_260 {dimension_numbers = #tpu.dot_dimension_numbers<[1], [0], [0], [1], [0, 0, 1, 1], [], []>} : vector<64x32xbf16>, vector<32x86xbf16>, vector<64x86xf32> -> vector<64x86xf32>
    %221 = arith.addf %216, %220 : vector<64x86xf32>
    %c0_261 = arith.constant 0 : index
    %c0_262 = arith.constant 0 : index
    %222 = vector.load %arg14[%c0_261, %c0_262] : memref<64x1xf32, #tpu.memory_space<vmem>>, vector<64x1xf32>
    %223 = vector.broadcast %222 : vector<64x1xf32> to vector<64x86xf32>
    %224 = arith.addf %221, %223 : vector<64x86xf32>
    %225 = math.tanh %224 : vector<64x86xf32>
    %226 = arith.truncf %225 : vector<64x86xf32> to vector<64x86xbf16>
    %c0_263 = arith.constant 0 : index
    %c0_264 = arith.constant 0 : index
    %227 = vector.load %arg15[%c0_263, %c0_264] : memref<86x172xbf16, #tpu.memory_space<vmem>>, vector<86x172xbf16>
    %cst_265 = arith.constant dense<0.000000e+00> : vector<64x172xf32>
    %228 = tpu.matmul %226, %227, %cst_265 {dimension_numbers = #tpu.dot_dimension_numbers<[1], [0], [0], [1], [0, 0, 1, 1], [], []>} : vector<64x86xbf16>, vector<86x172xbf16>, vector<64x172xf32> -> vector<64x172xf32>
    %cst_266 = arith.constant 0.000000e+00 : f32
    %229 = vector.broadcast %cst_266 : f32 to vector<64x2xf32>
    %c0_267 = arith.constant 0 : index
    %c0_268 = arith.constant 0 : index
    %230 = vector.load %arg40[%c0_267, %c0_268] : memref<64x176xf32, #tpu.memory_space<vmem>>, vector<64x2xf32>
    tpu.vector_store %arg40[%c0_267, %c0_268], %229 {strides = array<i32>} : memref<64x176xf32, #tpu.memory_space<vmem>>, vector<64x2xf32>,
    %cst_269 = arith.constant 0.000000e+00 : f32
    %231 = vector.broadcast %cst_269 : f32 to vector<64x2xf32>
    %c0_270 = arith.constant 0 : index
    %c174 = arith.constant 174 : index
    %232 = vector.load %arg40[%c0_270, %c174] : memref<64x176xf32, #tpu.memory_space<vmem>>, vector<64x2xf32>
    tpu.vector_store %arg40[%c0_270, %c174], %231 {strides = array<i32>} : memref<64x176xf32, #tpu.memory_space<vmem>>, vector<64x2xf32>,
    %c0_271 = arith.constant 0 : index
    %c2_272 = arith.constant 2 : index
    %233 = vector.load %arg40[%c0_271, %c2_272] : memref<64x176xf32, #tpu.memory_space<vmem>>, vector<64x172xf32>
    tpu.vector_store %arg40[%c0_271, %c2_272], %228 {strides = array<i32>} : memref<64x176xf32, #tpu.memory_space<vmem>>, vector<64x172xf32>,
    %c0_273 = arith.constant 0 : index
    %c0_274 = arith.constant 0 : index
    %234 = vector.load %arg16[%c0_273, %c0_274] : memref<32x192xbf16, #tpu.memory_space<vmem>>, vector<32x64xbf16>
    %c0_275 = arith.constant 0 : index
    %c0_276 = arith.constant 0 : index
    %235 = vector.load %arg40[%c0_275, %c0_276] : memref<64x176xf32, #tpu.memory_space<vmem>>, vector<64x174xf32>
    %236 = arith.truncf %235 : vector<64x174xf32> to vector<64x174xbf16>
    %cst_277 = arith.constant dense<0.000000e+00> : vector<32x174xf32>
    %237 = tpu.matmul %234, %236, %cst_277 {dimension_numbers = #tpu.dot_dimension_numbers<[1], [0], [0], [1], [0, 0, 1, 1], [], []>} : vector<32x64xbf16>, vector<64x174xbf16>, vector<32x174xf32> -> vector<32x174xf32>
    %c0_278 = arith.constant 0 : index
    %c64_279 = arith.constant 64 : index
    %238 = vector.load %arg16[%c0_278, %c64_279] : memref<32x192xbf16, #tpu.memory_space<vmem>>, vector<32x64xbf16>
    %c0_280 = arith.constant 0 : index
    %c1_281 = arith.constant 1 : index
    %239 = vector.load %arg40[%c0_280, %c1_281] : memref<64x176xf32, #tpu.memory_space<vmem>>, vector<64x174xf32>
    %240 = arith.truncf %239 : vector<64x174xf32> to vector<64x174xbf16>
    %cst_282 = arith.constant dense<0.000000e+00> : vector<32x174xf32>
    %241 = tpu.matmul %238, %240, %cst_282 {dimension_numbers = #tpu.dot_dimension_numbers<[1], [0], [0], [1], [0, 0, 1, 1], [], []>} : vector<32x64xbf16>, vector<64x174xbf16>, vector<32x174xf32> -> vector<32x174xf32>
    %242 = arith.addf %237, %241 : vector<32x174xf32>
    %c0_283 = arith.constant 0 : index
    %c128_284 = arith.constant 128 : index
    %243 = vector.load %arg16[%c0_283, %c128_284] : memref<32x192xbf16, #tpu.memory_space<vmem>>, vector<32x64xbf16>
    %c0_285 = arith.constant 0 : index
    %c2_286 = arith.constant 2 : index
    %244 = vector.load %arg40[%c0_285, %c2_286] : memref<64x176xf32, #tpu.memory_space<vmem>>, vector<64x174xf32>
    %245 = arith.truncf %244 : vector<64x174xf32> to vector<64x174xbf16>
    %cst_287 = arith.constant dense<0.000000e+00> : vector<32x174xf32>
    %246 = tpu.matmul %243, %245, %cst_287 {dimension_numbers = #tpu.dot_dimension_numbers<[1], [0], [0], [1], [0, 0, 1, 1], [], []>} : vector<32x64xbf16>, vector<64x174xbf16>, vector<32x174xf32> -> vector<32x174xf32>
    %247 = arith.addf %242, %246 : vector<32x174xf32>
    %c0_288 = arith.constant 0 : index
    %c0_289 = arith.constant 0 : index
    %248 = vector.load %arg17[%c0_288, %c0_289] : memref<32x1xf32, #tpu.memory_space<vmem>>, vector<32x1xf32>
    %249 = vector.broadcast %248 : vector<32x1xf32> to vector<32x174xf32>
    %250 = arith.addf %247, %249 : vector<32x174xf32>
    %cst_290 = arith.constant 5.000000e-01 : f32
    %251 = vector.broadcast %cst_290 : f32 to vector<32x174xf32>
    %252 = arith.mulf %251, %250 : vector<32x174xf32>
    %253 = math.tanh %252 : vector<32x174xf32>
    %cst_291 = arith.constant 1.000000e+00 : f32
    %254 = vector.broadcast %cst_291 : f32 to vector<32x174xf32>
    %255 = arith.addf %253, %254 : vector<32x174xf32>
    %cst_292 = arith.constant 5.000000e-01 : f32
    %256 = vector.broadcast %cst_292 : f32 to vector<32x174xf32>
    %257 = arith.mulf %256, %255 : vector<32x174xf32>
    %c0_293 = arith.constant 0 : index
    %c0_294 = arith.constant 0 : index
    %258 = vector.load %arg41[%c0_293, %c0_294] : memref<32x174xf32, #tpu.memory_space<vmem>>, vector<32x174xf32>
    tpu.vector_store %arg41[%c0_293, %c0_294], %257 {strides = array<i32>} : memref<32x174xf32, #tpu.memory_space<vmem>>, vector<32x174xf32>,
    %c0_295 = arith.constant 0 : index
    %c0_296 = arith.constant 0 : index
    %259 = vector.load %arg41[%c0_295, %c0_296] : memref<32x174xf32, #tpu.memory_space<vmem>>, vector<32x171xf32>
    %c0_297 = arith.constant 0 : index
    %c1_298 = arith.constant 1 : index
    %260 = vector.load %arg41[%c0_297, %c1_298] : memref<32x174xf32, #tpu.memory_space<vmem>>, vector<32x171xf32>
    %261 = arith.maximumf %259, %260 : vector<32x171xf32>
    %c0_299 = arith.constant 0 : index
    %c2_300 = arith.constant 2 : index
    %262 = vector.load %arg41[%c0_299, %c2_300] : memref<32x174xf32, #tpu.memory_space<vmem>>, vector<32x171xf32>
    %263 = arith.maximumf %261, %262 : vector<32x171xf32>
    %c0_301 = arith.constant 0 : index
    %c3_302 = arith.constant 3 : index
    %264 = vector.load %arg41[%c0_301, %c3_302] : memref<32x174xf32, #tpu.memory_space<vmem>>, vector<32x171xf32>
    %265 = arith.maximumf %263, %264 : vector<32x171xf32>
    %c0_303 = arith.constant 0 : index
    %c0_304 = arith.constant 0 : index
    %266 = vector.load %arg34[%c0_303, %c0_304] : memref<32x171xf32, #tpu.memory_space<vmem>>, vector<32x171xf32>
    %267 = arith.mulf %265, %266 : vector<32x171xf32>
    %c0_305 = arith.constant 0 : index
    %c0_306 = arith.constant 0 : index
    %268 = vector.load %arg18[%c0_305, %c0_306] : memref<1x171xf32, #tpu.memory_space<vmem>>, vector<1x171xf32>
    %269 = vector.broadcast %268 : vector<1x171xf32> to vector<32x171xf32>
    %270 = arith.mulf %267, %269 : vector<32x171xf32>
    %c0_307 = arith.constant 0 : index
    %c0_308 = arith.constant 0 : index
    %271 = vector.load %arg19[%c0_307, %c0_308] : memref<1x171xf32, #tpu.memory_space<vmem>>, vector<1x171xf32>
    %272 = vector.broadcast %271 : vector<1x171xf32> to vector<32x171xf32>
    %273 = arith.mulf %267, %272 : vector<32x171xf32>
    %cst_309 = arith.constant -1.000000e+30 : f32
    %274 = vector.broadcast %cst_309 : f32 to vector<64x34xf32>
    %c0_310 = arith.constant 0 : index
    %c171 = arith.constant 171 : index
    %275 = vector.load %arg42[%c0_310, %c171] : memref<64x205xf32, #tpu.memory_space<vmem>>, vector<64x34xf32>
    tpu.vector_store %arg42[%c0_310, %c171], %274 {strides = array<i32>} : memref<64x205xf32, #tpu.memory_space<vmem>>, vector<64x34xf32>,
    %c0_311 = arith.constant 0 : index
    %c0_312 = arith.constant 0 : index
    %276 = vector.load %arg42[%c0_311, %c0_312] : memref<64x205xf32, #tpu.memory_space<vmem>>, vector<32x171xf32>
    tpu.vector_store %arg42[%c0_311, %c0_312], %270 {strides = array<i32>} : memref<64x205xf32, #tpu.memory_space<vmem>>, vector<32x171xf32>,
    %c32_313 = arith.constant 32 : index
    %c0_314 = arith.constant 0 : index
    %277 = vector.load %arg42[%c32_313, %c0_314] : memref<64x205xf32, #tpu.memory_space<vmem>>, vector<32x171xf32>
    tpu.vector_store %arg42[%c32_313, %c0_314], %273 {strides = array<i32>} : memref<64x205xf32, #tpu.memory_space<vmem>>, vector<32x171xf32>,
    %c0_315 = arith.constant 0 : index
    %c0_316 = arith.constant 0 : index
    %278 = vector.load %arg42[%c0_315, %c0_316] : memref<64x205xf32, #tpu.memory_space<vmem>>, vector<64x171xf32>
    %c0_317 = arith.constant 0 : index
    %c1_318 = arith.constant 1 : index
    %279 = vector.load %arg42[%c0_317, %c1_318] : memref<64x205xf32, #tpu.memory_space<vmem>>, vector<64x171xf32>
    %280 = arith.maximumf %278, %279 : vector<64x171xf32>
    %c0_319 = arith.constant 0 : index
    %c0_320 = arith.constant 0 : index
    %281 = vector.load %arg42[%c0_319, %c0_320] : memref<64x205xf32, #tpu.memory_space<vmem>>, vector<64x171xf32>
    tpu.vector_store %arg42[%c0_319, %c0_320], %280 {strides = array<i32>} : memref<64x205xf32, #tpu.memory_space<vmem>>, vector<64x171xf32>,
    %c0_321 = arith.constant 0 : index
    %c0_322 = arith.constant 0 : index
    %282 = vector.load %arg42[%c0_321, %c0_322] : memref<64x205xf32, #tpu.memory_space<vmem>>, vector<64x171xf32>
    %c0_323 = arith.constant 0 : index
    %c2_324 = arith.constant 2 : index
    %283 = vector.load %arg42[%c0_323, %c2_324] : memref<64x205xf32, #tpu.memory_space<vmem>>, vector<64x171xf32>
    %284 = arith.maximumf %282, %283 : vector<64x171xf32>
    %c0_325 = arith.constant 0 : index
    %c0_326 = arith.constant 0 : index
    %285 = vector.load %arg42[%c0_325, %c0_326] : memref<64x205xf32, #tpu.memory_space<vmem>>, vector<64x171xf32>
    tpu.vector_store %arg42[%c0_325, %c0_326], %284 {strides = array<i32>} : memref<64x205xf32, #tpu.memory_space<vmem>>, vector<64x171xf32>,
    %c0_327 = arith.constant 0 : index
    %c0_328 = arith.constant 0 : index
    %286 = vector.load %arg42[%c0_327, %c0_328] : memref<64x205xf32, #tpu.memory_space<vmem>>, vector<64x171xf32>
    %c0_329 = arith.constant 0 : index
    %c4_330 = arith.constant 4 : index
    %287 = vector.load %arg42[%c0_329, %c4_330] : memref<64x205xf32, #tpu.memory_space<vmem>>, vector<64x171xf32>
    %288 = arith.maximumf %286, %287 : vector<64x171xf32>
    %c0_331 = arith.constant 0 : index
    %c0_332 = arith.constant 0 : index
    %289 = vector.load %arg42[%c0_331, %c0_332] : memref<64x205xf32, #tpu.memory_space<vmem>>, vector<64x171xf32>
    tpu.vector_store %arg42[%c0_331, %c0_332], %288 {strides = array<i32>} : memref<64x205xf32, #tpu.memory_space<vmem>>, vector<64x171xf32>,
    %c0_333 = arith.constant 0 : index
    %c0_334 = arith.constant 0 : index
    %290 = vector.load %arg42[%c0_333, %c0_334] : memref<64x205xf32, #tpu.memory_space<vmem>>, vector<64x171xf32>
    %c0_335 = arith.constant 0 : index
    %c8_336 = arith.constant 8 : index
    %291 = vector.load %arg42[%c0_335, %c8_336] : memref<64x205xf32, #tpu.memory_space<vmem>>, vector<64x171xf32>
    %292 = arith.maximumf %290, %291 : vector<64x171xf32>
    %c0_337 = arith.constant 0 : index
    %c0_338 = arith.constant 0 : index
    %293 = vector.load %arg42[%c0_337, %c0_338] : memref<64x205xf32, #tpu.memory_space<vmem>>, vector<64x171xf32>
    tpu.vector_store %arg42[%c0_337, %c0_338], %292 {strides = array<i32>} : memref<64x205xf32, #tpu.memory_space<vmem>>, vector<64x171xf32>,
    %c0_339 = arith.constant 0 : index
    %c0_340 = arith.constant 0 : index
    %294 = vector.load %arg42[%c0_339, %c0_340] : memref<64x205xf32, #tpu.memory_space<vmem>>, vector<64x171xf32>
    %c0_341 = arith.constant 0 : index
    %c16_342 = arith.constant 16 : index
    %295 = vector.load %arg42[%c0_341, %c16_342] : memref<64x205xf32, #tpu.memory_space<vmem>>, vector<64x171xf32>
    %296 = arith.maximumf %294, %295 : vector<64x171xf32>
    %c0_343 = arith.constant 0 : index
    %c0_344 = arith.constant 0 : index
    %297 = vector.load %arg42[%c0_343, %c0_344] : memref<64x205xf32, #tpu.memory_space<vmem>>, vector<64x171xf32>
    tpu.vector_store %arg42[%c0_343, %c0_344], %296 {strides = array<i32>} : memref<64x205xf32, #tpu.memory_space<vmem>>, vector<64x171xf32>,
    %c0_345 = arith.constant 0 : index
    %c0_346 = arith.constant 0 : index
    %298 = vector.load %arg42[%c0_345, %c0_346] : memref<64x205xf32, #tpu.memory_space<vmem>>, vector<64x171xf32>
    %c0_347 = arith.constant 0 : index
    %c3_348 = arith.constant 3 : index
    %299 = vector.load %arg42[%c0_347, %c3_348] : memref<64x205xf32, #tpu.memory_space<vmem>>, vector<64x171xf32>
    %300 = arith.maximumf %298, %299 : vector<64x171xf32>
    %cst_349 = arith.constant 0.000000e+00 : f32
    %301 = vector.broadcast %cst_349 : f32 to vector<64x1xf32>
    %c0_350 = arith.constant 0 : index
    %c0_351 = arith.constant 0 : index
    %302 = vector.load %arg43[%c0_350, %c0_351] : memref<64x172xf32, #tpu.memory_space<vmem>>, vector<64x1xf32>
    tpu.vector_store %arg43[%c0_350, %c0_351], %301 {strides = array<i32>} : memref<64x172xf32, #tpu.memory_space<vmem>>, vector<64x1xf32>,
    %c0_352 = arith.constant 0 : index
    %c1_353 = arith.constant 1 : index
    %303 = vector.load %arg43[%c0_352, %c1_353] : memref<64x172xf32, #tpu.memory_space<vmem>>, vector<32x171xf32>
    tpu.vector_store %arg43[%c0_352, %c1_353], %270 {strides = array<i32>} : memref<64x172xf32, #tpu.memory_space<vmem>>, vector<32x171xf32>,
    %c32_354 = arith.constant 32 : index
    %c1_355 = arith.constant 1 : index
    %304 = vector.load %arg43[%c32_354, %c1_355] : memref<64x172xf32, #tpu.memory_space<vmem>>, vector<32x171xf32>
    tpu.vector_store %arg43[%c32_354, %c1_355], %273 {strides = array<i32>} : memref<64x172xf32, #tpu.memory_space<vmem>>, vector<32x171xf32>,
    %c0_356 = arith.constant 0 : index
    %c0_357 = arith.constant 0 : index
    %305 = vector.load %arg20[%c0_356, %c0_357] : memref<40x128xbf16, #tpu.memory_space<vmem>>, vector<40x64xbf16>
    %c0_358 = arith.constant 0 : index
    %c0_359 = arith.constant 0 : index
    %306 = vector.load %arg43[%c0_358, %c0_359] : memref<64x172xf32, #tpu.memory_space<vmem>>, vector<64x171xf32>
    %307 = arith.truncf %306 : vector<64x171xf32> to vector<64x171xbf16>
    %cst_360 = arith.constant dense<0.000000e+00> : vector<40x171xf32>
    %308 = tpu.matmul %305, %307, %cst_360 {dimension_numbers = #tpu.dot_dimension_numbers<[1], [0], [0], [1], [0, 0, 1, 1], [], []>} : vector<40x64xbf16>, vector<64x171xbf16>, vector<40x171xf32> -> vector<40x171xf32>
    %c0_361 = arith.constant 0 : index
    %c64_362 = arith.constant 64 : index
    %309 = vector.load %arg20[%c0_361, %c64_362] : memref<40x128xbf16, #tpu.memory_space<vmem>>, vector<40x64xbf16>
    %c0_363 = arith.constant 0 : index
    %c1_364 = arith.constant 1 : index
    %310 = vector.load %arg43[%c0_363, %c1_364] : memref<64x172xf32, #tpu.memory_space<vmem>>, vector<64x171xf32>
    %311 = arith.truncf %310 : vector<64x171xf32> to vector<64x171xbf16>
    %cst_365 = arith.constant dense<0.000000e+00> : vector<40x171xf32>
    %312 = tpu.matmul %309, %311, %cst_365 {dimension_numbers = #tpu.dot_dimension_numbers<[1], [0], [0], [1], [0, 0, 1, 1], [], []>} : vector<40x64xbf16>, vector<64x171xbf16>, vector<40x171xf32> -> vector<40x171xf32>
    %313 = arith.addf %308, %312 : vector<40x171xf32>
    %c0_366 = arith.constant 0 : index
    %c0_367 = arith.constant 0 : index
    %314 = vector.load %arg21[%c0_366, %c0_367] : memref<40x1xf32, #tpu.memory_space<vmem>>, vector<40x1xf32>
    %315 = vector.broadcast %314 : vector<40x1xf32> to vector<40x171xf32>
    %316 = arith.addf %313, %315 : vector<40x171xf32>
    %cst_368 = arith.constant 0.000000e+00 : f32
    %317 = vector.broadcast %cst_368 : f32 to vector<40x171xf32>
    %318 = arith.maximumf %316, %317 : vector<40x171xf32>
    %c0_369 = arith.constant 0 : index
    %c0_370 = arith.constant 0 : index
    %319 = vector.load %arg44[%c0_369, %c0_370] : memref<104x171xf32, #tpu.memory_space<vmem>>, vector<40x171xf32>
    tpu.vector_store %arg44[%c0_369, %c0_370], %318 {strides = array<i32>} : memref<104x171xf32, #tpu.memory_space<vmem>>, vector<40x171xf32>,
    %c40 = arith.constant 40 : index
    %c0_371 = arith.constant 0 : index
    %320 = vector.load %arg44[%c40, %c0_371] : memref<104x171xf32, #tpu.memory_space<vmem>>, vector<64x171xf32>
    tpu.vector_store %arg44[%c40, %c0_371], %300 {strides = array<i32>} : memref<104x171xf32, #tpu.memory_space<vmem>>, vector<64x171xf32>,
    %c0_372 = arith.constant 0 : index
    %c0_373 = arith.constant 0 : index
    %321 = vector.load %arg22[%c0_372, %c0_373] : memref<12x208xbf16, #tpu.memory_space<vmem>>, vector<12x104xbf16>
    %c0_374 = arith.constant 0 : index
    %c0_375 = arith.constant 0 : index
    %322 = vector.load %arg44[%c0_374, %c0_375] : memref<104x171xf32, #tpu.memory_space<vmem>>, vector<104x170xf32>
    %323 = arith.truncf %322 : vector<104x170xf32> to vector<104x170xbf16>
    %cst_376 = arith.constant dense<0.000000e+00> : vector<12x170xf32>
    %324 = tpu.matmul %321, %323, %cst_376 {dimension_numbers = #tpu.dot_dimension_numbers<[1], [0], [0], [1], [0, 0, 1, 1], [], []>} : vector<12x104xbf16>, vector<104x170xbf16>, vector<12x170xf32> -> vector<12x170xf32>
    %c0_377 = arith.constant 0 : index
    %c104 = arith.constant 104 : index
    %325 = vector.load %arg22[%c0_377, %c104] : memref<12x208xbf16, #tpu.memory_space<vmem>>, vector<12x104xbf16>
    %c0_378 = arith.constant 0 : index
    %c1_379 = arith.constant 1 : index
    %326 = vector.load %arg44[%c0_378, %c1_379] : memref<104x171xf32, #tpu.memory_space<vmem>>, vector<104x170xf32>
    %327 = arith.truncf %326 : vector<104x170xf32> to vector<104x170xbf16>
    %cst_380 = arith.constant dense<0.000000e+00> : vector<12x170xf32>
    %328 = tpu.matmul %325, %327, %cst_380 {dimension_numbers = #tpu.dot_dimension_numbers<[1], [0], [0], [1], [0, 0, 1, 1], [], []>} : vector<12x104xbf16>, vector<104x170xbf16>, vector<12x170xf32> -> vector<12x170xf32>
    %329 = arith.addf %324, %328 : vector<12x170xf32>
    %c0_381 = arith.constant 0 : index
    %c0_382 = arith.constant 0 : index
    %330 = vector.load %arg23[%c0_381, %c0_382] : memref<12x1xf32, #tpu.memory_space<vmem>>, vector<12x1xf32>
    %331 = vector.broadcast %330 : vector<12x1xf32> to vector<12x170xf32>
    %332 = arith.addf %329, %331 : vector<12x170xf32>
    %cst_383 = arith.constant 0.000000e+00 : f32
    %333 = vector.broadcast %cst_383 : f32 to vector<12x170xf32>
    %334 = arith.maximumf %332, %333 : vector<12x170xf32>
    %335 = arith.truncf %334 : vector<12x170xf32> to vector<12x170xbf16>
    %c0_384 = arith.constant 0 : index
    %c0_385 = arith.constant 0 : index
    %336 = vector.load %arg24[%c0_384, %c0_385] : memref<170x1024xbf16, #tpu.memory_space<vmem>>, vector<170x1024xbf16>
    %cst_386 = arith.constant dense<0.000000e+00> : vector<12x1024xf32>
    %337 = tpu.matmul %335, %336, %cst_386 {dimension_numbers = #tpu.dot_dimension_numbers<[1], [0], [0], [1], [0, 0, 1, 1], [], []>} : vector<12x170xbf16>, vector<170x1024xbf16>, vector<12x1024xf32> -> vector<12x1024xf32>
    %c0_387 = arith.constant 0 : index
    %c0_388 = arith.constant 0 : index
    %338 = vector.load %arg25[%c0_387, %c0_388] : memref<1x1024xf32, #tpu.memory_space<vmem>>, vector<1x1024xf32>
    %339 = vector.broadcast %338 : vector<1x1024xf32> to vector<12x1024xf32>
    %340 = arith.addf %337, %339 : vector<12x1024xf32>
    %cst_389 = arith.constant 0.000000e+00 : f32
    %341 = vector.broadcast %cst_389 : f32 to vector<12x1024xf32>
    %342 = arith.maximumf %340, %341 : vector<12x1024xf32>
    %343 = arith.truncf %342 : vector<12x1024xf32> to vector<12x1024xbf16>
    %c0_390 = arith.constant 0 : index
    %c0_391 = arith.constant 0 : index
    %344 = vector.load %arg26[%c0_390, %c0_391] : memref<1024x256xbf16, #tpu.memory_space<vmem>>, vector<1024x256xbf16>
    %cst_392 = arith.constant dense<0.000000e+00> : vector<12x256xf32>
    %345 = tpu.matmul %343, %344, %cst_392 {dimension_numbers = #tpu.dot_dimension_numbers<[1], [0], [0], [1], [0, 0, 1, 1], [], []>} : vector<12x1024xbf16>, vector<1024x256xbf16>, vector<12x256xf32> -> vector<12x256xf32>
    %c0_393 = arith.constant 0 : index
    %c0_394 = arith.constant 0 : index
    %346 = vector.load %arg27[%c0_393, %c0_394] : memref<1x256xf32, #tpu.memory_space<vmem>>, vector<1x256xf32>
    %347 = vector.broadcast %346 : vector<1x256xf32> to vector<12x256xf32>
    %348 = arith.addf %345, %347 : vector<12x256xf32>
    %cst_395 = arith.constant 0.000000e+00 : f32
    %349 = vector.broadcast %cst_395 : f32 to vector<12x256xf32>
    %350 = arith.maximumf %348, %349 : vector<12x256xf32>
    %351 = arith.truncf %350 : vector<12x256xf32> to vector<12x256xbf16>
    %c0_396 = arith.constant 0 : index
    %c0_397 = arith.constant 0 : index
    %352 = vector.load %arg28[%c0_396, %c0_397] : memref<256x10xbf16, #tpu.memory_space<vmem>>, vector<256x10xbf16>
    %cst_398 = arith.constant dense<0.000000e+00> : vector<12x10xf32>
    %353 = tpu.matmul %351, %352, %cst_398 {dimension_numbers = #tpu.dot_dimension_numbers<[1], [0], [0], [1], [0, 0, 1, 1], [], []>} : vector<12x256xbf16>, vector<256x10xbf16>, vector<12x10xf32> -> vector<12x10xf32>
    %c0_399 = arith.constant 0 : index
    %c0_400 = arith.constant 0 : index
    %354 = vector.load %arg29[%c0_399, %c0_400] : memref<1x10xf32, #tpu.memory_space<vmem>>, vector<1x10xf32>
    %355 = vector.broadcast %354 : vector<1x10xf32> to vector<12x10xf32>
    %356 = arith.addf %353, %355 : vector<12x10xf32>
    %c0_401 = arith.constant 0 : index
    %c0_402 = arith.constant 0 : index
    %c0_403 = arith.constant 0 : index
    %357 = vector.load %arg30[%c0_401, %c0_402, %c0_403] : memref<1x12x10xf32, #tpu.memory_space<vmem>>, vector<1x12x10xf32>
    %358 = vector.shape_cast %357 : vector<1x12x10xf32> to vector<12x10xf32>
    %359 = vector.shape_cast %356 : vector<12x10xf32> to vector<1x12x10xf32>
    tpu.vector_store %arg30[%c0_401, %c0_402, %c0_403], %359 {strides = array<i32>} : memref<1x12x10xf32, #tpu.memory_space<vmem>>, vector<1x12x10xf32>,
    return
  }
  func.func @transform_0(%arg0: i32) -> (i32, i32, i32) {
    %c0_i32 = arith.constant 0 : i32
    %c0_i32_0 = arith.constant 0 : i32
    %c0_i32_1 = arith.constant 0 : i32
    return %arg0, %c0_i32, %c0_i32_0 : i32, i32, i32
  }
  func.func @transform_1(%arg0: i32) -> (i32, i32) {
    %c0_i32 = arith.constant 0 : i32
    %c0_i32_0 = arith.constant 0 : i32
    %c0_i32_1 = arith.constant 0 : i32
    return %c0_i32, %c0_i32_0 : i32, i32
  }
  func.func @transform_2(%arg0: i32) -> (i32, i32) {
    %c0_i32 = arith.constant 0 : i32
    %c0_i32_0 = arith.constant 0 : i32
    %c0_i32_1 = arith.constant 0 : i32
    return %c0_i32, %c0_i32_0 : i32, i32
  }
  func.func @transform_3(%arg0: i32) -> (i32, i32) {
    %c0_i32 = arith.constant 0 : i32
    %c0_i32_0 = arith.constant 0 : i32
    %c0_i32_1 = arith.constant 0 : i32
    return %c0_i32, %c0_i32_0 : i32, i32
  }
  func.func @transform_4(%arg0: i32) -> (i32, i32) {
    %c0_i32 = arith.constant 0 : i32
    %c0_i32_0 = arith.constant 0 : i32
    %c0_i32_1 = arith.constant 0 : i32
    return %c0_i32, %c0_i32_0 : i32, i32
  }
  func.func @transform_5(%arg0: i32) -> (i32, i32) {
    %c0_i32 = arith.constant 0 : i32
    %c0_i32_0 = arith.constant 0 : i32
    %c0_i32_1 = arith.constant 0 : i32
    return %c0_i32, %c0_i32_0 : i32, i32
  }
  func.func @transform_6(%arg0: i32) -> (i32, i32) {
    %c0_i32 = arith.constant 0 : i32
    %c0_i32_0 = arith.constant 0 : i32
    %c0_i32_1 = arith.constant 0 : i32
    return %c0_i32, %c0_i32_0 : i32, i32
  }
  func.func @transform_7(%arg0: i32) -> (i32, i32) {
    %c0_i32 = arith.constant 0 : i32
    %c0_i32_0 = arith.constant 0 : i32
    %c0_i32_1 = arith.constant 0 : i32
    return %c0_i32, %c0_i32_0 : i32, i32
  }
  func.func @transform_8(%arg0: i32) -> (i32, i32) {
    %c0_i32 = arith.constant 0 : i32
    %c0_i32_0 = arith.constant 0 : i32
    %c0_i32_1 = arith.constant 0 : i32
    return %c0_i32, %c0_i32_0 : i32, i32
  }
  func.func @transform_9(%arg0: i32) -> (i32, i32) {
    %c0_i32 = arith.constant 0 : i32
    %c0_i32_0 = arith.constant 0 : i32
    %c0_i32_1 = arith.constant 0 : i32
    return %c0_i32, %c0_i32_0 : i32, i32
  }
  func.func @transform_10(%arg0: i32) -> (i32, i32) {
    %c0_i32 = arith.constant 0 : i32
    %c0_i32_0 = arith.constant 0 : i32
    %c0_i32_1 = arith.constant 0 : i32
    return %c0_i32, %c0_i32_0 : i32, i32
  }
  func.func @transform_11(%arg0: i32) -> (i32, i32) {
    %c0_i32 = arith.constant 0 : i32
    %c0_i32_0 = arith.constant 0 : i32
    %c0_i32_1 = arith.constant 0 : i32
    return %c0_i32, %c0_i32_0 : i32, i32
  }
  func.func @transform_12(%arg0: i32) -> (i32, i32) {
    %c0_i32 = arith.constant 0 : i32
    %c0_i32_0 = arith.constant 0 : i32
    %c0_i32_1 = arith.constant 0 : i32
    return %c0_i32, %c0_i32_0 : i32, i32
  }
  func.func @transform_13(%arg0: i32) -> (i32, i32) {
    %c0_i32 = arith.constant 0 : i32
    %c0_i32_0 = arith.constant 0 : i32
    %c0_i32_1 = arith.constant 0 : i32
    return %c0_i32, %c0_i32_0 : i32, i32
  }
  func.func @transform_14(%arg0: i32) -> (i32, i32) {
    %c0_i32 = arith.constant 0 : i32
    %c0_i32_0 = arith.constant 0 : i32
    %c0_i32_1 = arith.constant 0 : i32
    return %c0_i32, %c0_i32_0 : i32, i32
  }
  func.func @transform_15(%arg0: i32) -> (i32, i32) {
    %c0_i32 = arith.constant 0 : i32
    %c0_i32_0 = arith.constant 0 : i32
    %c0_i32_1 = arith.constant 0 : i32
    return %c0_i32, %c0_i32_0 : i32, i32
  }
  func.func @transform_16(%arg0: i32) -> (i32, i32) {
    %c0_i32 = arith.constant 0 : i32
    %c0_i32_0 = arith.constant 0 : i32
    %c0_i32_1 = arith.constant 0 : i32
    return %c0_i32, %c0_i32_0 : i32, i32
  }
  func.func @transform_17(%arg0: i32) -> (i32, i32) {
    %c0_i32 = arith.constant 0 : i32
    %c0_i32_0 = arith.constant 0 : i32
    %c0_i32_1 = arith.constant 0 : i32
    return %c0_i32, %c0_i32_0 : i32, i32
  }
  func.func @transform_18(%arg0: i32) -> (i32, i32) {
    %c0_i32 = arith.constant 0 : i32
    %c0_i32_0 = arith.constant 0 : i32
    %c0_i32_1 = arith.constant 0 : i32
    return %c0_i32, %c0_i32_0 : i32, i32
  }
  func.func @transform_19(%arg0: i32) -> (i32, i32) {
    %c0_i32 = arith.constant 0 : i32
    %c0_i32_0 = arith.constant 0 : i32
    %c0_i32_1 = arith.constant 0 : i32
    return %c0_i32, %c0_i32_0 : i32, i32
  }
  func.func @transform_20(%arg0: i32) -> (i32, i32) {
    %c0_i32 = arith.constant 0 : i32
    %c0_i32_0 = arith.constant 0 : i32
    %c0_i32_1 = arith.constant 0 : i32
    return %c0_i32, %c0_i32_0 : i32, i32
  }
  func.func @transform_21(%arg0: i32) -> (i32, i32) {
    %c0_i32 = arith.constant 0 : i32
    %c0_i32_0 = arith.constant 0 : i32
    %c0_i32_1 = arith.constant 0 : i32
    return %c0_i32, %c0_i32_0 : i32, i32
  }
  func.func @transform_22(%arg0: i32) -> (i32, i32) {
    %c0_i32 = arith.constant 0 : i32
    %c0_i32_0 = arith.constant 0 : i32
    %c0_i32_1 = arith.constant 0 : i32
    return %c0_i32, %c0_i32_0 : i32, i32
  }
  func.func @transform_23(%arg0: i32) -> (i32, i32) {
    %c0_i32 = arith.constant 0 : i32
    %c0_i32_0 = arith.constant 0 : i32
    %c0_i32_1 = arith.constant 0 : i32
    return %c0_i32, %c0_i32_0 : i32, i32
  }
  func.func @transform_24(%arg0: i32) -> (i32, i32) {
    %c0_i32 = arith.constant 0 : i32
    %c0_i32_0 = arith.constant 0 : i32
    %c0_i32_1 = arith.constant 0 : i32
    return %c0_i32, %c0_i32_0 : i32, i32
  }
  func.func @transform_25(%arg0: i32) -> (i32, i32) {
    %c0_i32 = arith.constant 0 : i32
    %c0_i32_0 = arith.constant 0 : i32
    %c0_i32_1 = arith.constant 0 : i32
    return %c0_i32, %c0_i32_0 : i32, i32
  }
  func.func @transform_26(%arg0: i32) -> (i32, i32) {
    %c0_i32 = arith.constant 0 : i32
    %c0_i32_0 = arith.constant 0 : i32
    %c0_i32_1 = arith.constant 0 : i32
    return %c0_i32, %c0_i32_0 : i32, i32
  }
  func.func @transform_27(%arg0: i32) -> (i32, i32) {
    %c0_i32 = arith.constant 0 : i32
    %c0_i32_0 = arith.constant 0 : i32
    %c0_i32_1 = arith.constant 0 : i32
    return %c0_i32, %c0_i32_0 : i32, i32
  }
  func.func @transform_28(%arg0: i32) -> (i32, i32) {
    %c0_i32 = arith.constant 0 : i32
    %c0_i32_0 = arith.constant 0 : i32
    %c0_i32_1 = arith.constant 0 : i32
    return %c0_i32, %c0_i32_0 : i32, i32
  }
  func.func @transform_29(%arg0: i32) -> (i32, i32, i32) {
    %c0_i32 = arith.constant 0 : i32
    %c0_i32_0 = arith.constant 0 : i32
    %c0_i32_1 = arith.constant 0 : i32
    return %arg0, %c0_i32, %c0_i32_0 : i32, i32, i32
  }
}

</mosaic_0001>

<bundles_post_ra>
// kernel: tln_forward.1
= control target key start
LH: loop header
LB: loop body
LE: loop exit
PB: predicated region body
PF: predicated region fallthrough
CT: control target
= control target key end

     0   :  { %s11009_s6 = smov 1   ;;  %s11010_s10 = smov 2   ;;  %s13607_s0 = inlined_call_operand.smem [shape: u32[30], index: -1, kind: input, shape index: {}] }
   0x1   :  { %s11086_s5 = sld [smem:[%s13607_s0]]   ;;  %s11011_s14 = smov 3  }
   0x2   :  { %s11091_s9 = sld [smem:[%s13607_s0 + %s11009_s6]]   ;;  %s11012_s18 = smov 4  }
   0x3   :  { %s11096_s13 = sld [smem:[%s13607_s0 + %s11010_s10]]   ;;  %s11013_s22 = smov 5  }
   0x4   :  { %s11101_s17 = sld [smem:[%s13607_s0 + %s11011_s14]]   ;;  %s11014_s26 = smov 6  }
   0x5   :  { %s11106_s21 = sld [smem:[%s13607_s0 + %s11012_s18]]   ;;  %s11015_s30 = smov 7  }
   0x6   :  { %s11111_s25 = sld [smem:[%s13607_s0 + %s11013_s22]]   ;;  %s11016_s4 = smov 8  }
   0x7   :  { %s11116_s29 = sld [smem:[%s13607_s0 + %s11014_s26]]   ;;  %s11017_s10 = smov 9  }
   0x8   :  { %s11121_s3 = sld [smem:[%s13607_s0 + %s11015_s30]]   ;;  %s11018_s15 = smov 10  }
   0x9   :  { %s11126_s8 = sld [smem:[%s13607_s0 + %s11016_s4]]   ;;  %s11019_s20 = smov 11  }
   0xa   :  { %s11131_s14 = sld [smem:[%s13607_s0 + %s11017_s10]]   ;;  %s11020_s26 = smov 12  }
   0xb   :  { %s11136_s19 = sld [smem:[%s13607_s0 + %s11018_s15]]   ;;  %s11021_s1 = smov 13  }
   0xc   :  { %s11141_s24 = sld [smem:[%s13607_s0 + %s11019_s20]]   ;;  %s11022_s7 = smov 14  }
   0xd   :  { %s11146_s30 = sld [smem:[%s13607_s0 + %s11020_s26]]   ;;  %s11023_s15 = smov 15  }
   0xe   :  { %s11151_s6 = sld [smem:[%s13607_s0 + %s11021_s1]]   ;;  %s11024_s22 = smov 16  }
   0xf   :  { %s11156_s12 = sld [smem:[%s13607_s0 + %s11022_s7]]   ;;  %s11025_s28 = smov 17  }
  0x10   :  { %s11161_s20 = sld [smem:[%s13607_s0 + %s11023_s15]]   ;;  %s11026_s7 = smov 18  }
  0x11   :  { %s11166_s27 = sld [smem:[%s13607_s0 + %s11024_s22]]   ;;  %s11027_s15 = smov 19  }
  0x12   :  { %s11171_s4 = sld [smem:[%s13607_s0 + %s11025_s28]]   ;;  %s11028_s22 = smov 20  }
  0x13   :  { %s11029_s28 = smov 21  }
  0x15   :  { %13627 = sst [smem:[#allocation16_spill]] %s11156_s12 }
  0x16   :  { %13628 = sst [smem:[#allocation17_spill]] %s11161_s20 }
  0x17   :  { %13629 = sst [smem:[#allocation18_spill]] %s11166_s27 }
  0x18   :  { %13630 = sst [smem:[#allocation19_spill]] %s11171_s4 }
  0x19   :  { %s11176_s12 = sld [smem:[%s13607_s0 + %s11026_s7]]   ;;  %s11030_s7 = smov 22  }
  0x1a   :  { %s11181_s20 = sld [smem:[%s13607_s0 + %s11027_s15]]   ;;  %s11031_s15 = smov 23  }
  0x1b   :  { %s11186_s27 = sld [smem:[%s13607_s0 + %s11028_s22]]   ;;  %s11032_s22 = smov 24  }
  0x1c   :  { %s11191_s4 = sld [smem:[%s13607_s0 + %s11029_s28]]   ;;  %s11033_s28 = smov 25  }
  0x1f   :  { %13631 = sst [smem:[#allocation20_spill]] %s11176_s12 }
  0x20   :  { %13632 = sst [smem:[#allocation21_spill]] %s11181_s20 }
  0x21   :  { %13633 = sst [smem:[#allocation22_spill]] %s11186_s27 }
  0x22   :  { %13634 = sst [smem:[#allocation23_spill]] %s11191_s4 }
  0x23   :  { %s11196_s12 = sld [smem:[%s13607_s0 + %s11030_s7]]   ;;  %s11034_s7 = smov 26  }
  0x24   :  { %s11201_s20 = sld [smem:[%s13607_s0 + %s11031_s15]]   ;;  %s11035_s15 = smov 27  }
  0x25   :  { %s11206_s27 = sld [smem:[%s13607_s0 + %s11032_s22]]   ;;  %s11036_s22 = smov 28  }
  0x26   :  { %s11211_s4 = sld [smem:[%s13607_s0 + %s11033_s28]]   ;;  %s11037_s28 = smov 29  }
  0x29   :  { %13635 = sst [smem:[#allocation24_spill]] %s11196_s12 }
  0x2a   :  { %13636 = sst [smem:[#allocation25_spill]] %s11201_s20 }
  0x2b   :  { %13637 = sst [smem:[#allocation26_spill]] %s11206_s27 }
  0x2c   :  { %13638 = sst [smem:[#allocation27_spill]] %s11211_s4 }
  0x2d   :  { %s11216_s12 = sld [smem:[%s13607_s0 + %s11034_s7]]   ;;  %s11233_s7 = smov 0  }
  0x2e   :  { %s11221_s20 = sld [smem:[%s13607_s0 + %s11035_s15]]  }
  0x2f   :  { %s11226_s27 = sld [smem:[%s13607_s0 + %s11036_s22]]  }
  0x30   :  { %s11231_s4 = sld [smem:[%s13607_s0 + %s11037_s28]]  }
  0x31 LB: > { %s9360_s10 = sadd.s32 4294967295, %s11007_s7   ;;  %p9364_p0 = scmp.ge.s32.totalorder %s11007_s7, 1  ;;  %s11007_s7 = sphi %s11233_s7, %s69_s7  }
  0x32   : > { %p816_p1 = scmp.lt.s32.totalorder %s11007_s7, 3 }
  0x34   : > { %p817_p2 = pnand %p9364_p0, %p816_p1 }
  0x35   : > { %p891_p3 = scmp.lt.s32.totalorder (!%p817_p2), %s9360_s10, 1  ;;  %s11038_s15 = smov (!%p817_p2), 110  }
  0x36   : > { %820 = sbr.rel (%p817_p2) target bundleno = 6378 (0x18ea), region = 136  ;;  %s13617_s16 = smov (!%p817_p2), 112  }
  0x37   : > { %s11040_s18 = smov (!%p817_p2), 109   ;;  %s11041_s22 = smov (!%p817_p2), 111  }
  0x38   : > { %s11042_s23 = smov (!%p817_p2), 107   ;;  %s11043_s26 = smov (!%p817_p2), 108  }
  0x39   : > { %s11044_s28 = smov (!%p817_p2), 105   ;;  %s11045_s1 = smov (!%p817_p2), 106  }
  0x3a   : > { %s11046_s2 = smov (!%p817_p2), 103  }
  0x3b   : > { %s13679_s10 = smov (!%p891_p3, %s9360_s10), 1  ;;  %v902_v18 = vlaneseq  ;;  %v11069_v34 = vmov 0   ;;  %v1287_v35 = vld [vmem:[%s11096_s13] sm:$0xff]  ;;  %v1288_v36 = vld [vmem:[%s11096_s13 + $0x8] sm:$0xff]  ;;  %vm1100_vm1 = vcmask 900096   ;;  %vm13625_vm2 = vcmask 916480  }
  0x3c   : > { %s10119_s0 = smul.u32 6, %s13679_s10  ;;  %1340 = vmatprep.mubr.bf16.mxu0 %v11069_v34  ;;  %10197 = vset.pattern.permute.xlu1 %v11069_v34  ;;  %vm1111_vm3 = vcmask 891904   ;;  %vm1089_vm4 = vcmask 908288   ;;  %vm1133_vm5 = vcmask 875520   ;;  %vm1122_vm6 = vcmask 883712  }
  0x3d   : > { %vm11271_vm0 = vcmp.lt.s32.totalorder %v902_v18, 687  ;;  %10198 = vset.pattern.permute.xlu0 %v11069_v34  ;;  %vm1155_vm7 = vcmask 859136   ;;  %vm1144_vm8 = vcmask 867328   ;;  %vm1177_vm9 = vcmask 842752  }
  0x3e   : > { %s11245_s11 = scalar_lea.vmem %s11086_s5, %s10119_s0  ;;  %s11047_s0 = smov 104   ;;  %vm13623_vm10 = vcmask 850944   ;;  %vm1199_vm11 = vcmask 826368   ;;  %vm1188_vm12 = vcmask 834560   ;;  %vm1221_vm13 = vcmask 809984  }
  0x3f   : > { %v1095_v0 = vld [vmem:[%s11245_s11] sm:$0x3f]  ;;  %vm1210_vm14 = vcmask 818176   ;;  %vm1243_vm15 = vcmask 793600  }
  0x40   : > { %v1073_v1 = vld [vmem:[%s11245_s11] sm:$0x3f]  ;;  %1097 = vrot.lane.b32.xlu1 %v1095_v0, %s11038_s15  ;;  %s11048_s15 = smov 101  }
  0x41   : > { %1075 = vrot.lane.b32.xlu0 %v1073_v1, %s13617_s16  ;;  %v1106_v2 = vld [vmem:[%s11245_s11] sm:$0x3f]  ;;  %s11063_s16 = smov 118  }
  0x42   : > { %v1084_v3 = vld [vmem:[%s11245_s11] sm:$0x3f] }
  0x43   : > { %v1128_v4 = vld [vmem:[%s11245_s11] sm:$0x3f] }
  0x44   : > { %1108 = vrot.lane.b32.xlu1 %v1106_v2, %s11040_s18  ;;  %v1117_v5 = vld [vmem:[%s11245_s11] sm:$0x3f]  ;;  %s11049_s18 = smov 102  }
  0x45   : > { %1086 = vrot.lane.b32.xlu0 %v1084_v3, %s11041_s22  ;;  %v1150_v6 = vld [vmem:[%s11245_s11] sm:$0x3f]  ;;  %s11050_s22 = smov 99  }
  0x46   : > { %v1139_v7 = vld [vmem:[%s11245_s11] sm:$0x3f] }
  0x47   : > { %v1172_v8 = vld [vmem:[%s11245_s11] sm:$0x3f] }
  0x48   : > { %1130 = vrot.lane.b32.xlu1 %v1128_v4, %s11042_s23  ;;  %v1161_v9 = vld [vmem:[%s11245_s11] sm:$0x3f]  ;;  %s11051_s23 = smov 100  }
  0x49   : > { %1119 = vrot.lane.b32.xlu0 %v1117_v5, %s11043_s26  ;;  %v1194_v10 = vld [vmem:[%s11245_s11] sm:$0x3f]  ;;  %s11052_s26 = smov 97  }
  0x4a   : > { %v1183_v11 = vld [vmem:[%s11245_s11] sm:$0x3f] }
  0x4b   : > { %v1216_v12 = vld [vmem:[%s11245_s11] sm:$0x3f] }
  0x4c   : > { %1152 = vrot.lane.b32.xlu1 %v1150_v6, %s11044_s28  ;;  %v1205_v13 = vld [vmem:[%s11245_s11] sm:$0x3f]  ;;  %s11053_s28 = smov 98  }
  0x4d   : > { %1141 = vrot.lane.b32.xlu0 %v1139_v7, %s11045_s1  ;;  %v1238_v14 = vld [vmem:[%s11245_s11] sm:$0x3f]  ;;  %s11054_s1 = smov 127  }
  0x4e   : > { %v1227_v15 = vld [vmem:[%s11245_s11] sm:$0x3f] }
  0x4f   : > { %v908_v16 = vld [vmem:[%s11245_s11] sm:$0x3f] }
  0x50   : > { %1174 = vrot.lane.b32.xlu1 %v1172_v8, %s11046_s2  ;;  %v919_v17 = vld [vmem:[%s11245_s11] sm:$0x3f]  ;;  %s11055_s2 = smov 126  }
  0x51   : > { %1163 = vrot.lane.b32.xlu0 %v1161_v9, %s11047_s0  ;;  %v930_v19 = vld [vmem:[%s11245_s11] sm:$0x3f]  ;;  %s11056_s0 = smov 125  }
  0x52   : > { %v941_v20 = vld [vmem:[%s11245_s11] sm:$0x3f] }
  0x53   : > { %v901_v22 = vld [vmem:[%s11245_s11] sm:$0x3f] }
  0x54   : > { %1196 = vrot.lane.b32.xlu1 %v1194_v10, %s11048_s15  ;;  %906 = vst.msk [vmem:[#allocation2] ss:$8 sm:$0xf] %vm11271_vm0, %v901_v22  ;;  %907 = vst.msk [vmem:[#allocation2] ss:$8 sm:$0x30] %vm11271_vm0, %v901_v22 }
  0x55   : > { %1185 = vrot.lane.b32.xlu0 %v1183_v11, %s11049_s18  ;;  %v952_v23 = vld [vmem:[%s11245_s11] sm:$0x3f]  ;;  %s13619_s15 = smov 124   ;;  %s11058_s18 = smov 123  }
  0x56   : > { %v963_v24 = vld [vmem:[%s11245_s11] sm:$0x3f] }
  0x57   : > { %v974_v25 = vld [vmem:[%s11245_s11] sm:$0x3f] }
  0x58   : > { %1218 = vrot.lane.b32.xlu1 %v1216_v12, %s11050_s22  ;;  %v985_v26 = vld [vmem:[%s11245_s11] sm:$0x3f]  ;;  %s11059_s22 = smov 122  }
  0x59   : > { %1207 = vrot.lane.b32.xlu0 %v1205_v13, %s11051_s23  ;;  %v996_v27 = vld [vmem:[%s11245_s11] sm:$0x3f]  ;;  %s11060_s23 = smov 121  }
  0x5a   : > { %v1007_v28 = vld [vmem:[%s11245_s11] sm:$0x3f] }
  0x5b   : > { %v1018_v29 = vld [vmem:[%s11245_s11] sm:$0x3f] }
  0x5c   : > { %1240 = vrot.lane.b32.xlu1 %v1238_v14, %s11052_s26  ;;  %s13621_s26 = smov 120   ;;  %v1029_v30 = vld [vmem:[%s11245_s11] sm:$0x3f] }
  0x5d   : > { %1229 = vrot.lane.b32.xlu0 %v1227_v15, %s11053_s28  ;;  %s11062_s28 = smov 119   ;;  %v1040_v31 = vld [vmem:[%s11245_s11] sm:$0x3f] }
  0x5e   : > { %v1051_v32 = vld [vmem:[%s11245_s11] sm:$0x3f] }
  0x5f   : > { %v1062_v33 = vld [vmem:[%s11245_s11] sm:$0x3f]  ;;  %s11072_s11 = smov 1  }
  0x60   : > { %921 = vrot.lane.b32.xlu1 %v919_v17, %s11055_s2 }
  0x61   : > { %910 = vrot.lane.b32.xlu0 %v908_v16, %s11054_s1 }
  0x64   : > { %943 = vrot.lane.b32.xlu1 %v941_v20, %s13619_s15  ;;  %s11066_s15 = smov 115  }
  0x65   : > { %932 = vrot.lane.b32.xlu0 %v930_v19, %s11056_s0 }
  0x68   : > { %965 = vrot.lane.b32.xlu1 %v963_v24, %s11059_s22  ;;  %s11065_s22 = smov 116  }
  0x69   : > { %954 = vrot.lane.b32.xlu0 %v952_v23, %s11058_s18  ;;  %s11064_s18 = smov 117  }
  0x6c   : > { %987 = vrot.lane.b32.xlu1 %v985_v26, %s13621_s26  ;;  %s11068_s26 = smov 113  }
  0x6d   : > { %976 = vrot.lane.b32.xlu0 %v974_v25, %s11060_s23  ;;  %s11067_s23 = smov 114  }
  0x70   : > { %1009 = vrot.lane.b32.xlu1 %v1007_v28, %s11063_s16  ;;  %s11073_s16 = smov 96  }
  0x71   : > { %998 = vrot.lane.b32.xlu0 %v996_v27, %s11062_s28  ;;  %s13641_s28 = sld [smem:[#allocation16_spill]] }
  0x74   : > { %1031 = vrot.lane.b32.xlu1 %v1029_v30, %s11065_s22  ;;  %s13643_s22 = sld [smem:[#allocation18_spill]] }
  0x75   : > { %1020 = vrot.lane.b32.xlu0 %v1018_v29, %s11064_s18  ;;  %s13642_s18 = sld [smem:[#allocation17_spill]] }
  0x78   : > { %1053 = vrot.lane.b32.xlu1 %v1051_v32, %s11067_s23  ;;  %s13644_s23 = sld [smem:[#allocation19_spill]] }
  0x79   : > { %1042 = vrot.lane.b32.xlu0 %v1040_v31, %s11066_s15  ;;  %s11074_s15 = smov 64  }
  0x7c   : > { %1291 = vperm.xlu1 %10197, %v1287_v35  }
  0x7d   : > { %1064 = vrot.lane.b32.xlu0 %v1062_v33, %s11068_s26  ;;  %s11075_s26 = smov 2  }
  0x81   : > { %1296 = vperm.xlu0 %10198, %v1288_v36  }
  0xb2   : > { %v1098_v37 = vpop.permute.xlu1 %1097 }
  0xb3   : > { %v1076_v38 = vpop.permute.xlu0 %1075  ;;  %v1099_v39 = vrot.slane %v1098_v37, 1 }
  0xb4   : > { %v1077_v40 = vrot.slane %v1076_v38, 1 }
  0xb5   : > { %v1101_v41 = vsel %vm1100_vm1, %v1098_v37, %v1099_v39  ;;  %vm1232_vm1 = vcmask 801792  }
  0xb6   : > { %v1079_v42 = vsel %vm13625_vm2, %v1076_v38, %v1077_v40  ;;  %1104 = vst.msk [vmem:[#allocation2 + $0x62] ss:$8 sm:$0xf] %vm11271_vm0, %v1101_v41  ;;  %1105 = vst.msk [vmem:[#allocation2 + $0x62] ss:$8 sm:$0x30] %vm11271_vm0, %v1101_v41  ;;  %v1109_v43 = vpop.permute.xlu1 %1108 }
  0xb7   : > { %1082 = vst.msk [vmem:[#allocation2 + $0x60] ss:$8 sm:$0xf] %vm11271_vm0, %v1079_v42  ;;  %1083 = vst.msk [vmem:[#allocation2 + $0x60] ss:$8 sm:$0x30] %vm11271_vm0, %v1079_v42  ;;  %v1087_v44 = vpop.permute.xlu0 %1086 }
  0xb8   : > { %v1110_v45 = vrot.slane %v1109_v43, 1  ;;  %v1088_v46 = vrot.slane %v1087_v44, 1  ;;  %vm4194_vm2 = vcmask 712368  }
  0xba   : > { %v1112_v47 = vsel %vm1111_vm3, %v1109_v43, %v1110_v45  ;;  %v1090_v48 = vsel %vm1089_vm4, %v1087_v44, %v1088_v46  ;;  %v1131_v49 = vpop.permute.xlu1 %1130  ;;  %vm913_vm3 = vcmask 1039360   ;;  %vm924_vm4 = vcmask 1031168  }
  0xbb   : > { %1115 = vst.msk [vmem:[#allocation2 + $0x63] ss:$8 sm:$0xf] %vm11271_vm0, %v1112_v47  ;;  %1116 = vst.msk [vmem:[#allocation2 + $0x63] ss:$8 sm:$0x30] %vm11271_vm0, %v1112_v47  ;;  %v1120_v50 = vpop.permute.xlu0 %1119 }
  0xbc   : > { %1093 = vst.msk [vmem:[#allocation2 + $0x61] ss:$8 sm:$0xf] %vm11271_vm0, %v1090_v48  ;;  %1094 = vst.msk [vmem:[#allocation2 + $0x61] ss:$8 sm:$0x30] %vm11271_vm0, %v1090_v48 }
  0xbd   : > { %v1132_v51 = vrot.slane %v1131_v49, 1  ;;  %v1121_v52 = vrot.slane %v1120_v50, 1 }
  0xbe   : > { %v1153_v55 = vpop.permute.xlu1 %1152 }
  0xbf   : > { %v1134_v53 = vsel %vm1133_vm5, %v1131_v49, %v1132_v51  ;;  %v1123_v54 = vsel %vm1122_vm6, %v1120_v50, %v1121_v52  ;;  %v1142_v56 = vpop.permute.xlu0 %1141  ;;  %v1154_v57 = vrot.slane %v1153_v55, 1  ;;  %vm935_vm5 = vcmask 1022976  }
  0xc0   : > { %1137 = vst.msk [vmem:[#allocation2 + $0x65] ss:$8 sm:$0xf] %vm11271_vm0, %v1134_v53  ;;  %1138 = vst.msk [vmem:[#allocation2 + $0x65] ss:$8 sm:$0x30] %vm11271_vm0, %v1134_v53 }
  0xc1   : > { %1126 = vst.msk [vmem:[#allocation2 + $0x64] ss:$8 sm:$0xf] %vm11271_vm0, %v1123_v54  ;;  %1127 = vst.msk [vmem:[#allocation2 + $0x64] ss:$8 sm:$0x30] %vm11271_vm0, %v1123_v54  ;;  %v1156_v59 = vsel %vm1155_vm7, %v1153_v55, %v1154_v57 }
  0xc2   : > { %v1143_v58 = vrot.slane %v1142_v56, 1  ;;  %1159 = vst.msk [vmem:[#allocation2 + $0x67] ss:$8 sm:$0xf] %vm11271_vm0, %v1156_v59  ;;  %v1175_v61 = vpop.permute.xlu1 %1174  ;;  %vm946_vm6 = vcmask 1014784   ;;  %vm957_vm7 = vcmask 1006592  }
  0xc3   : > { %1160 = vst.msk [vmem:[#allocation2 + $0x67] ss:$8 sm:$0x30] %vm11271_vm0, %v1156_v59  ;;  %v1164_v62 = vpop.permute.xlu0 %1163  ;;  %v1176_v63 = vrot.slane %v1175_v61, 1 }
  0xc4   : > { %v1145_v60 = vsel %vm1144_vm8, %v1142_v56, %v1143_v58  ;;  %v1165_v0 = vrot.slane %v1164_v62, 1  ;;  %vm968_vm8 = vcmask 998400  }
  0xc5   : > { %1148 = vst.msk [vmem:[#allocation2 + $0x66] ss:$8 sm:$0xf] %vm11271_vm0, %v1145_v60  ;;  %1149 = vst.msk [vmem:[#allocation2 + $0x66] ss:$8 sm:$0x30] %vm11271_vm0, %v1145_v60  ;;  %v1178_v1 = vsel %vm1177_vm9, %v1175_v61, %v1176_v63 }
  0xc6   : > { %v1167_v2 = vsel %vm13623_vm10, %v1164_v62, %v1165_v0  ;;  %1181 = vst.msk [vmem:[#allocation2 + $0x91] ss:$8 sm:$0xf] %vm11271_vm0, %v1178_v1  ;;  %1182 = vst.msk [vmem:[#allocation2 + $0x91] ss:$8 sm:$0x30] %vm11271_vm0, %v1178_v1  ;;  %v1197_v3 = vpop.permute.xlu1 %1196 }
  0xc7   : > { %1170 = vst.msk [vmem:[#allocation2 + $0x90] ss:$8 sm:$0xf] %vm11271_vm0, %v1167_v2  ;;  %1171 = vst.msk [vmem:[#allocation2 + $0x90] ss:$8 sm:$0x30] %vm11271_vm0, %v1167_v2  ;;  %v1186_v4 = vpop.permute.xlu0 %1185 }
  0xc8   : > { %v1198_v5 = vrot.slane %v1197_v3, 1  ;;  %v1187_v6 = vrot.slane %v1186_v4, 1  ;;  %vm979_vm9 = vcmask 990208   ;;  %vm13626_vm10 = vcmask 1044480  }
  0xca   : > { %v1200_v7 = vsel %vm1199_vm11, %v1197_v3, %v1198_v5  ;;  %v1189_v8 = vsel %vm1188_vm12, %v1186_v4, %v1187_v6  ;;  %v1219_v9 = vpop.permute.xlu1 %1218  ;;  %vm990_vm11 = vcmask 982016   ;;  %vm1001_vm12 = vcmask 973824  }
  0xcb   : > { %1203 = vst.msk [vmem:[#allocation2 + $0x93] ss:$8 sm:$0xf] %vm11271_vm0, %v1200_v7  ;;  %1204 = vst.msk [vmem:[#allocation2 + $0x93] ss:$8 sm:$0x30] %vm11271_vm0, %v1200_v7  ;;  %v1208_v10 = vpop.permute.xlu0 %1207 }
  0xcc   : > { %1192 = vst.msk [vmem:[#allocation2 + $0x92] ss:$8 sm:$0xf] %vm11271_vm0, %v1189_v8  ;;  %1193 = vst.msk [vmem:[#allocation2 + $0x92] ss:$8 sm:$0x30] %vm11271_vm0, %v1189_v8 }
  0xcd   : > { %v1220_v11 = vrot.slane %v1219_v9, 1  ;;  %v1209_v12 = vrot.slane %v1208_v10, 1  ;;  %v1264_v33 = vld [vmem:[#allocation2 + $0x68] sm:$0xff]  ;;  %v1263_v38 = vld [vmem:[#allocation2 + $0x60] sm:$0xff] }
  0xce   : > { %v1241_v15 = vpop.permute.xlu1 %1240 }
  0xcf   : > { %v1222_v13 = vsel %vm1221_vm13, %v1219_v9, %v1220_v11  ;;  %v1211_v14 = vsel %vm1210_vm14, %v1208_v10, %v1209_v12  ;;  %v1230_v16 = vpop.permute.xlu0 %1229  ;;  %v1242_v17 = vrot.slane %v1241_v15, 1  ;;  %vm1012_vm13 = vcmask 965632  }
  0xd0   : > { %1225 = vst.msk [vmem:[#allocation2 + $0x95] ss:$8 sm:$0xf] %vm11271_vm0, %v1222_v13  ;;  %1226 = vst.msk [vmem:[#allocation2 + $0x95] ss:$8 sm:$0x30] %vm11271_vm0, %v1222_v13 }
  0xd1   : > { %1214 = vst.msk [vmem:[#allocation2 + $0x94] ss:$8 sm:$0xf] %vm11271_vm0, %v1211_v14  ;;  %1215 = vst.msk [vmem:[#allocation2 + $0x94] ss:$8 sm:$0x30] %vm11271_vm0, %v1211_v14  ;;  %v1244_v20 = vsel %vm1243_vm15, %v1241_v15, %v1242_v17 }
  0xd2   : > { %v1231_v19 = vrot.slane %v1230_v16, 1  ;;  %1247 = vst.msk [vmem:[#allocation2 + $0x97] ss:$8 sm:$0xf] %vm11271_vm0, %v1244_v20  ;;  %v922_v24 = vpop.permute.xlu1 %921  ;;  %vm1023_vm14 = vcmask 957440   ;;  %vm1034_vm15 = vcmask 949248  }
  0xd3   : > { %1248 = vst.msk [vmem:[#allocation2 + $0x97] ss:$8 sm:$0x30] %vm11271_vm0, %v1244_v20  ;;  %v911_v23 = vpop.permute.xlu0 %910  ;;  %v923_v26 = vrot.slane %v922_v24, 1 }
  0xd4   : > { %v1233_v22 = vsel %vm1232_vm1, %v1230_v16, %v1231_v19  ;;  %v912_v25 = vrot.slane %v911_v23, 1  ;;  %vm1045_vm1 = vcmask 941056   ;;  %v1266_v19 = vld [vmem:[#allocation2 + $0x78] sm:$0xff] }
  0xd5   : > { %1236 = vst.msk [vmem:[#allocation2 + $0x96] ss:$8 sm:$0xf] %vm11271_vm0, %v1233_v22  ;;  %1237 = vst.msk [vmem:[#allocation2 + $0x96] ss:$8 sm:$0x30] %vm11271_vm0, %v1233_v22  ;;  %v925_v28 = vsel %vm924_vm4, %v922_v24, %v923_v26 }
  0xd6   : > { %v914_v27 = vsel %vm913_vm3, %v911_v23, %v912_v25  ;;  %928 = vst.msk [vmem:[#allocation2 + $0x2] ss:$8 sm:$0xf] %vm11271_vm0, %v925_v28  ;;  %929 = vst.msk [vmem:[#allocation2 + $0x2] ss:$8 sm:$0x30] %vm11271_vm0, %v925_v28  ;;  %v944_v30 = vpop.permute.xlu1 %943 }
  0xd7   : > { %917 = vst.msk [vmem:[#allocation2 + $0x1] ss:$8 sm:$0xf] %vm11271_vm0, %v914_v27  ;;  %918 = vst.msk [vmem:[#allocation2 + $0x1] ss:$8 sm:$0x30] %vm11271_vm0, %v914_v27  ;;  %v933_v29 = vpop.permute.xlu0 %932 }
  0xd8   : > { %v934_v31 = vrot.slane %v933_v29, 1  ;;  %v945_v32 = vrot.slane %v944_v30, 1  ;;  %v10419_v22 = vld [vmem:[%s11091_s9] sm:$0xff]   ;;  %v1265_v25 = vld [vmem:[#allocation2 + $0x70] sm:$0xff] }
  0xda   : > { %v936_v35 = vsel %vm935_vm5, %v933_v29, %v934_v31  ;;  %v947_v36 = vsel %vm946_vm6, %v944_v30, %v945_v32  ;;  %v966_v42 = vpop.permute.xlu1 %965  ;;  %v1268_v32 = vld [vmem:[#allocation2 + $0x88] sm:$0xff] }
  0xdb   : > { %939 = vst.msk [vmem:[#allocation2 + $0x3] ss:$8 sm:$0xf] %vm11271_vm0, %v936_v35  ;;  %940 = vst.msk [vmem:[#allocation2 + $0x3] ss:$8 sm:$0x30] %vm11271_vm0, %v936_v35  ;;  %v955_v40 = vpop.permute.xlu0 %954 }
  0xdc   : > { %v1270_v37 = vld [vmem:[#allocation2 + $0x98] sm:$0xff]  ;;  %v1269_v39 = vld [vmem:[#allocation2 + $0x90] sm:$0xff]  ;;  %950 = vst.msk [vmem:[#allocation2 + $0x4] ss:$8 sm:$0xf] %vm11271_vm0, %v947_v36  ;;  %v956_v44 = vrot.slane %v955_v40, 1 }
  0xdd   : > { %951 = vst.msk [vmem:[#allocation2 + $0x4] ss:$8 sm:$0x30] %vm11271_vm0, %v947_v36  ;;  %v1282_v41 = vpack.c.bf16 %v1270_v37, %v1264_v33  ;;  %v1281_v43 = vpack.c.bf16 %v1269_v39, %v1263_v38  ;;  %v967_v45 = vrot.slane %v966_v42, 1  ;;  %v1272_v12 = vld [vmem:[#allocation2 + $0xa8] sm:$0xff]  ;;  %v1271_v23 = vld [vmem:[#allocation2 + $0xa0] sm:$0xff] }
  0xde   : > { %v958_v46 = vsel %vm957_vm7, %v955_v40, %v956_v44  ;;  %v988_v49 = vpop.permute.xlu1 %987  ;;  %vm1056_vm7 = vcmask 932864   ;;  %v1284_v20 = vpack.c.bf16 %v1272_v12, %v1266_v19  ;;  %v1283_v26 = vpack.c.bf16 %v1271_v23, %v1265_v25  ;;  %v1274_v29 = vld [vmem:[#allocation2 + $0xb8] sm:$0xff]  ;;  %v1273_v35 = vld [vmem:[#allocation2 + $0xb0] sm:$0xff]  ;;  %v1267_v37 = vld [vmem:[#allocation2 + $0x80] sm:$0xff] }
  0xdf   : > { %1320 = vmatprep.subr.bf16.mxu0 %v1282_v41  ;;  %v969_v47 = vsel %vm968_vm8, %v966_v42, %v967_v45  ;;  %961 = vst.msk [vmem:[#allocation2 + $0x5] ss:$8 sm:$0xf] %vm11271_vm0, %v958_v46  ;;  %962 = vst.msk [vmem:[#allocation2 + $0x5] ss:$8 sm:$0x30] %vm11271_vm0, %v958_v46  ;;  %v977_v48 = vpop.permute.xlu0 %976  ;;  %v1286_v33 = vpack.c.bf16 %v1274_v29, %v1268_v32  ;;  %v1285_v38 = vpack.c.bf16 %v1273_v35, %v1267_v37 }
  0xe0   : > { %1321 = vmatpush1.bf16.msra.mxu0 %v1281_v43  ;;  %972 = vst.msk [vmem:[#allocation2 + $0x6] ss:$8 sm:$0xf] %vm11271_vm0, %v969_v47  ;;  %973 = vst.msk [vmem:[#allocation2 + $0x6] ss:$8 sm:$0x30] %vm11271_vm0, %v969_v47 }
  0xe1   : > { %v978_v50 = vrot.slane %v977_v48, 1  ;;  %v989_v51 = vrot.slane %v988_v49, 1  ;;  %vm1067_vm8 = vcmask 924672   ;;  %v10420_v44 = vld [vmem:[%s11101_s17 + $0xac] ss:$12 sps:$4 sm:$0xff]  }
  0xe2   : > { %v1010_v55 = vpop.permute.xlu1 %1009  ;;  %v10422_v45 = vld [vmem:[%s11101_s17 + $0xa8] ss:$12 sps:$4 sm:$0xff]   ;;  %2482 = vmatprep.subr.bf16.mxu1 %v10420_v44  ;;  %v10471_v12 = vld [vmem:[%s11101_s17 + $0x180] ss:$12 sps:$4 sm:$0xff]   ;;  %v10480_v23 = vld [vmem:[%s11101_s17 + $0x124] ss:$12 sps:$4 sm:$0xff]  }
  0xe3   : > { %v980_v52 = vsel %vm979_vm9, %v977_v48, %v978_v50  ;;  %v991_v53 = vsel %vm990_vm11, %v988_v49, %v989_v51  ;;  %v999_v54 = vpop.permute.xlu0 %998  ;;  %v1011_v57 = vrot.slane %v1010_v55, 1  ;;  %vm1304_vm9 = vcmask 261120   ;;  %v10423_v46 = vld [vmem:[%s11101_s17 + $0x94] ss:$12 sps:$4 sm:$0xff]   ;;  %v10431_v48 = vld [vmem:[%s11101_s17 + $0x22c] ss:$12 sps:$4 sm:$0xff]   ;;  %2483 = vmatpush1.bf16.msra.mxu1 %v10422_v45 }
  0xe4   : > { %983 = vst.msk [vmem:[#allocation2 + $0x7] ss:$8 sm:$0xf] %vm11271_vm0, %v980_v52  ;;  %984 = vst.msk [vmem:[#allocation2 + $0x7] ss:$8 sm:$0x30] %vm11271_vm0, %v980_v52  ;;  %2484 = vmatprep.subr.bf16.mxu1 %v10423_v46 }
  0xe5   : > { %994 = vst.msk [vmem:[#allocation2 + $0x30] ss:$8 sm:$0xf] %vm11271_vm0, %v991_v53  ;;  %995 = vst.msk [vmem:[#allocation2 + $0x30] ss:$8 sm:$0x30] %vm11271_vm0, %v991_v53  ;;  %v1013_v59 = vsel %vm1012_vm13, %v1010_v55, %v1011_v57 }
  0xe6   : > { %v1000_v56 = vrot.slane %v999_v54, 1  ;;  %1016 = vst.msk [vmem:[#allocation2 + $0x32] ss:$8 sm:$0xf] %vm11271_vm0, %v1013_v59  ;;  %v1032_v61 = vpop.permute.xlu1 %1031  ;;  %v10429_v47 = vld [vmem:[%s11101_s17 + $0x228] ss:$12 sps:$4 sm:$0xff]  }
  0xe7   : > { %1017 = vst.msk [vmem:[#allocation2 + $0x32] ss:$8 sm:$0x30] %vm11271_vm0, %v1013_v59  ;;  %v1021_v60 = vpop.permute.xlu0 %1020  ;;  %v1033_v63 = vrot.slane %v1032_v61, 1  ;;  %v10425_v49 = vld [vmem:[%s11101_s17 + $0x90] ss:$12 sps:$4 sm:$0xff]  }
  0xe8   : > { %v1002_v58 = vsel %vm1001_vm12, %v999_v54, %v1000_v56  ;;  %v1022_v62 = vrot.slane %v1021_v60, 1  ;;  %v10437_v50 = vld [vmem:[%s11101_s17 + $0x214] ss:$12 sps:$4 sm:$0xff]   ;;  %v10426_v51 = vld [vmem:[%s11101_s17 + $0x7c] ss:$12 sps:$4 sm:$0xff]   ;;  %2485 = vmatpush1.bf16.msra.mxu1 %v10425_v49  ;;  %vm2465_vm12 = vcmask 367616  }
  0xe9   : > { %1005 = vst.msk [vmem:[#allocation2 + $0x31] ss:$8 sm:$0xf] %vm11271_vm0, %v1002_v58  ;;  %1006 = vst.msk [vmem:[#allocation2 + $0x31] ss:$8 sm:$0x30] %vm11271_vm0, %v1002_v58  ;;  %v1035_v1 = vsel %vm1034_vm15, %v1032_v61, %v1033_v63  ;;  %2486 = vmatprep.subr.bf16.mxu1 %v10426_v51 }
  0xea   : > { %v1024_v0 = vsel %vm1023_vm14, %v1021_v60, %v1022_v62  ;;  %1038 = vst.msk [vmem:[#allocation2 + $0x34] ss:$8 sm:$0xf] %vm11271_vm0, %v1035_v1  ;;  %1039 = vst.msk [vmem:[#allocation2 + $0x34] ss:$8 sm:$0x30] %vm11271_vm0, %v1035_v1  ;;  %v1054_v3 = vpop.permute.xlu1 %1053 }
  0xeb   : > { %1027 = vst.msk [vmem:[#allocation2 + $0x33] ss:$8 sm:$0xf] %vm11271_vm0, %v1024_v0  ;;  %1028 = vst.msk [vmem:[#allocation2 + $0x33] ss:$8 sm:$0x30] %vm11271_vm0, %v1024_v0  ;;  %v1043_v2 = vpop.permute.xlu0 %1042 }
  0xec   : > { %v1044_v4 = vrot.slane %v1043_v2, 1  ;;  %v1055_v5 = vrot.slane %v1054_v3, 1  ;;  %v1252_v11 = vld [vmem:[#allocation2 + $0x8] sm:$0xff]  ;;  %v1251_v14 = vld [vmem:[#allocation2] sm:$0xff]  ;;  %v1254_v21 = vld [vmem:[#allocation2 + $0x18] sm:$0xff]  ;;  %vm2469_vm13 = vcmask 1045504  }
  0xed   : > { %v1253_v30 = vld [vmem:[#allocation2 + $0x10] sm:$0xff]  ;;  %v1256_v39 = vld [vmem:[#allocation2 + $0x28] sm:$0xff]  ;;  %v1255_v42 = vld [vmem:[#allocation2 + $0x20] sm:$0xff]  ;;  %vm2470_vm14 = vcmask 1046528   ;;  %vm3184_vm15 = vcmask 1041408  }
  0xee   : > { %v1046_v6 = vsel %vm1045_vm1, %v1043_v2, %v1044_v4  ;;  %v1057_v7 = vsel %vm1056_vm7, %v1054_v3, %v1055_v5  ;;  %v10435_v52 = vld [vmem:[%s11101_s17 + $0x210] ss:$12 sps:$4 sm:$0xff]   ;;  %v10428_v54 = vld [vmem:[%s11101_s17 + $0x78] ss:$12 sps:$4 sm:$0xff]   ;;  %v10434_v58 = vld [vmem:[%s11101_s17 + $0x60] ss:$12 sps:$4 sm:$0xff]  }
  0xef   : > { %1049 = vst.msk [vmem:[#allocation2 + $0x35] ss:$8 sm:$0xf] %vm11271_vm0, %v1046_v6  ;;  %1050 = vst.msk [vmem:[#allocation2 + $0x35] ss:$8 sm:$0x30] %vm11271_vm0, %v1046_v6  ;;  %v1065_v8 = vpop.permute.xlu0 %1064  ;;  %2487 = vmatpush1.bf16.msra.mxu1 %v10428_v54 }
  0xf0   : > { %1060 = vst.msk [vmem:[#allocation2 + $0x36] ss:$8 sm:$0xf] %vm11271_vm0, %v1057_v7  ;;  %1061 = vst.msk [vmem:[#allocation2 + $0x36] ss:$8 sm:$0x30] %vm11271_vm0, %v1057_v7 }
  0xf1   : > { %v1066_v9 = vrot.slane %v1065_v8, 1  ;;  %v10443_v53 = vld [vmem:[%s11101_s17 + $0x1fc] ss:$12 sps:$4 sm:$0xff]   ;;  %v10432_v55 = vld [vmem:[%s11101_s17 + $0x64] ss:$12 sps:$4 sm:$0xff]   ;;  %vm3185_vm1 = vcmask 1042432  }
  0xf2   : > { %v10441_v56 = vld [vmem:[%s11101_s17 + $0x1f8] ss:$12 sps:$4 sm:$0xff]   ;;  %2488 = vmatprep.subr.bf16.mxu1 %v10432_v55  ;;  %v10447_v60 = vld [vmem:[%s11101_s17 + $0x1e0] ss:$12 sps:$4 sm:$0xff]   ;;  %v10440_v62 = vld [vmem:[%s11101_s17 + $0x48] ss:$12 sps:$4 sm:$0xff]  }
  0xf3   : > { %v1068_v10 = vsel %vm1067_vm8, %v1065_v8, %v1066_v9  ;;  %v10449_v57 = vld [vmem:[%s11101_s17 + $0x1e4] ss:$12 sps:$4 sm:$0xff]   ;;  %v10438_v59 = vld [vmem:[%s11101_s17 + $0x4c] ss:$12 sps:$4 sm:$0xff]   ;;  %2489 = vmatpush1.bf16.msra.mxu1 %v10434_v58  ;;  %v10444_v63 = vld [vmem:[%s11101_s17 + $0x34] ss:$12 sps:$4 sm:$0xff]  }
  0xf4   : > { %1071 = vst.msk [vmem:[#allocation2 + $0x37] ss:$8 sm:$0xf] %vm11271_vm0, %v1068_v10  ;;  %1072 = vst.msk [vmem:[#allocation2 + $0x37] ss:$8 sm:$0x30] %vm11271_vm0, %v1068_v10  ;;  %2490 = vmatprep.subr.bf16.mxu1 %v10438_v59 }
  0xf5   : > { %v10455_v61 = vld [vmem:[%s11101_s17 + $0x1cc] ss:$12 sps:$4 sm:$0xff]   ;;  %v10453_v0 = vld [vmem:[%s11101_s17 + $0x1c8] ss:$12 sps:$4 sm:$0xff]   ;;  %v10446_v2 = vld [vmem:[%s11101_s17 + $0x30] ss:$12 sps:$4 sm:$0xff]  }
  0xf6   : > { %v10461_v1 = vld [vmem:[%s11101_s17 + $0x1b4] ss:$12 sps:$4 sm:$0xff]   ;;  %v10450_v3 = vld [vmem:[%s11101_s17 + $0x1c] ss:$12 sps:$4 sm:$0xff]   ;;  %v10452_v6 = vld [vmem:[%s11101_s17 + $0x18] ss:$12 sps:$4 sm:$0xff]  }
  0xf7   : > { %2491 = vmatpush1.bf16.msra.mxu1 %v10440_v62  ;;  %v10459_v4 = vld [vmem:[%s11101_s17 + $0x1b0] ss:$12 sps:$4 sm:$0xff]   ;;  %v10465_v8 = vld [vmem:[%s11101_s17 + $0x198] ss:$12 sps:$4 sm:$0xff]   ;;  %v10458_v10 = vld [vmem:[%s11101_s17] ss:$12 sps:$4 sm:$0xff]  }
  0xf8   : > { %2492 = vmatprep.subr.bf16.mxu1 %v10444_v63  ;;  %v10467_v5 = vld [vmem:[%s11101_s17 + $0x19c] ss:$12 sps:$4 sm:$0xff]   ;;  %v10456_v7 = vld [vmem:[%s11101_s17 + $0x4] ss:$12 sps:$4 sm:$0xff]   ;;  %v10503_v62 = vld [vmem:[%s11101_s17 + $0x28c] ss:$12 sps:$4 sm:$0xff]  }
  0xf9   : > { %v10473_v9 = vld [vmem:[%s11101_s17 + $0x184] ss:$12 sps:$4 sm:$0xff]   ;;  %v10474_v19 = vld [vmem:[%s11101_s17 + $0x13c] ss:$12 sps:$4 sm:$0xff]   ;;  %vm1454_vm0 = vcmask 384000   ;;  %vm2760_vm7 = vcmask 711680  }
  0xfa   : > { %v10483_v25 = vld [vmem:[%s11101_s17 + $0x2d0] ss:$12 sps:$4 sm:$0xff]   ;;  %v10488_v35 = vld [vmem:[%s11101_s17 + $0x108] ss:$12 sps:$4 sm:$0xff]   ;;  %v10500_v59 = vld [vmem:[%s11101_s17 + $0xd8] ss:$12 sps:$4 sm:$0xff]  }
  0xfb   : > { %v1258_v13 = vld [vmem:[#allocation2 + $0x38] sm:$0xff]  ;;  %v1257_v15 = vld [vmem:[#allocation2 + $0x30] sm:$0xff]  ;;  %v1260_v24 = vld [vmem:[#allocation2 + $0x48] sm:$0xff]  ;;  %2493 = vmatpush1.bf16.msra.mxu1 %v10446_v2  ;;  %vm3177_vm8 = vcmask 695296  }
  0xfc   : > { %v1276_v16 = vpack.c.bf16 %v1258_v13, %v1252_v11  ;;  %v1275_v17 = vpack.c.bf16 %v1257_v15, %v1251_v14  ;;  %v1278_v27 = vpack.c.bf16 %v1260_v24, %v1254_v21  ;;  %v1259_v28 = vld [vmem:[#allocation2 + $0x40] sm:$0xff]  ;;  %v1262_v36 = vld [vmem:[#allocation2 + $0x58] sm:$0xff]  ;;  %v1261_v41 = vld [vmem:[#allocation2 + $0x50] sm:$0xff]  ;;  %2494 = vmatprep.subr.bf16.mxu1 %v10450_v3  ;;  %v11485_v29 = vpop.permute.xlu0 %1296 }
  0xfd   : > { %v1277_v31 = vpack.c.bf16 %v1259_v28, %v1253_v30  ;;  %v1280_v40 = vpack.c.bf16 %v1262_v36, %v1256_v39  ;;  %v1279_v43 = vpack.c.bf16 %v1261_v41, %v1255_v42  ;;  %v10462_v11 = vld [vmem:[%s11101_s17 + $0x16c] ss:$12 sps:$4 sm:$0xff]   ;;  %v10464_v14 = vld [vmem:[%s11101_s17 + $0x168] ss:$12 sps:$4 sm:$0xff]   ;;  %v10494_v44 = vld [vmem:[%s11101_s17 + $0xf0] ss:$12 sps:$4 sm:$0xff]  }
  0xfe   : > { %1322 = vmatprep.subr.bf16.mxu0 %v1276_v16  ;;  %v10479_v13 = vld [vmem:[%s11101_s17 + $0x2ec] ss:$12 sps:$4 sm:$0xff]   ;;  %v10468_v15 = vld [vmem:[%s11101_s17 + $0x154] ss:$12 sps:$4 sm:$0xff]   ;;  %v10491_v39 = vld [vmem:[%s11101_s17 + $0x2bc] ss:$12 sps:$4 sm:$0xff]  }
  0xff   : > { %1323 = vmatpush1.bf16.msra.mxu0 %v1275_v17  ;;  %2495 = vmatpush1.bf16.msra.mxu1 %v10452_v6  ;;  %v10477_v16 = vld [vmem:[%s11101_s17 + $0x2e8] ss:$12 sps:$4 sm:$0xff]   ;;  %v10470_v17 = vld [vmem:[%s11101_s17 + $0x150] ss:$12 sps:$4 sm:$0xff]   ;;  %v10482_v24 = vld [vmem:[%s11101_s17 + $0x120] ss:$12 sps:$4 sm:$0xff]  }
 0x100   : > { %1363 = vmatprep.subr.bf16.mxu0 %v1284_v20  ;;  %2496 = vmatprep.subr.bf16.mxu1 %v10456_v7  ;;  %v10476_v20 = vld [vmem:[%s11101_s17 + $0x138] ss:$12 sps:$4 sm:$0xff]   ;;  %v10492_v41 = vld [vmem:[%s11101_s17 + $0xf4] ss:$12 sps:$4 sm:$0xff]   ;;  %v10498_v55 = vld [vmem:[%s11101_s17 + $0xdc] ss:$12 sps:$4 sm:$0xff]  }
 0x101   : > { %v10489_v36 = vld [vmem:[%s11101_s17 + $0x2b8] ss:$12 sps:$4 sm:$0xff]   ;;  %v10506_v6 = vld [vmem:[%s11101_s17 + $0xc0] ss:$12 sps:$4 sm:$0xff]   ;;  %v10507_v7 = vld [vmem:[%s11101_s17 + $0x270] ss:$12 sps:$4 sm:$0xff]  }
 0x102   : > { %9368 = vmatmul.mubr.msk.bf16.vlgmr.msra.gmra.mxu0 %vm1304_vm9, %v10419_v22  ;;  %v10497_v45 = vld [vmem:[%s11101_s17 + $0x2a4] ss:$12 sps:$4 sm:$0xff]  }
 0x103   : > { %1364 = vmatpush1.bf16.msra.mxu0 %v1283_v26  ;;  %1383 = vmatprep.mubr.bf16.mxu0 %v11069_v34  ;;  %v10485_v26 = vld [vmem:[%s11101_s17 + $0x2d4] ss:$12 sps:$4 sm:$0xff]   ;;  %v10504_v2 = vld [vmem:[%s11101_s17 + $0xc4] ss:$12 sps:$4 sm:$0xff]  }
 0x104   : > { %1365 = vmatprep.subr.bf16.mxu0 %v1278_v27  ;;  %2497 = vmatpush1.bf16.msra.mxu1 %v10458_v10 }
 0x105   : > { %2498 = vmatprep.subr.bf16.mxu1 %v10462_v11 }
 0x107   : > { %1366 = vmatpush1.bf16.msra.mxu0 %v1277_v31 }
 0x108   : > { %1406 = vmatprep.subr.bf16.mxu0 %v1286_v33  ;;  %2499 = vmatpush2.bf16.msra.mxu1 %v10464_v14  ;;  %v10486_v33 = vld [vmem:[%s11101_s17 + $0x10c] ss:$12 sps:$4 sm:$0xff]  }
 0x109   : > { %2500 = vmatprep.subr.bf16.mxu1 %v10468_v15 }
 0x10a   : > { %9369 = vmatmul.mubr.msk.bf16.vlgmr.msra.gmra.mxu0 %vm1304_vm9, %v10419_v22 }
 0x10b   : > { %1407 = vmatpush1.bf16.msra.mxu0 %v1285_v38  ;;  %1426 = vmatprep.mubr.bf16.mxu0 %v11069_v34 }
 0x10c   : > { %1408 = vmatprep.subr.bf16.mxu0 %v1280_v40  ;;  %2501 = vmatpush2.bf16.msra.mxu1 %v10470_v17  ;;  %v10515_v17 = vld [vmem:[%s11101_s17 + $0x25c] ss:$12 sps:$4 sm:$0xff]  }
 0x10d   : > { %2502 = vmatprep.subr.bf16.mxu1 %v10474_v19 }
 0x10f   : > { %1409 = vmatpush1.bf16.msra.mxu0 %v1279_v43 }
 0x110   : > { %2525 = vmatprep.subr.bf16.mxu0 %v10431_v48  ;;  %2503 = vmatpush2.bf16.msra.mxu1 %v10476_v20  ;;  %v10513_v20 = vld [vmem:[%s11101_s17 + $0x258] ss:$12 sps:$4 sm:$0xff]  }
 0x111   : > { %2504 = vmatprep.subr.bf16.mxu1 %v10480_v23 }
 0x112   : > { %9370 = vmatmul.mubr.msk.bf16.vlgmr.msra.gmra.mxu0 %vm1304_vm9, %v10419_v22  ;;  %v11476_v22 = vpop.permute.xlu1 %1291 }
 0x113   : > { %2526 = vmatpush1.bf16.msra.mxu0 %v10429_v47  ;;  %v10495_v47 = vld [vmem:[%s11101_s17 + $0x2a0] ss:$12 sps:$4 sm:$0xff]  }
 0x114   : > { %2527 = vmatprep.subr.bf16.mxu0 %v10437_v50  ;;  %2505 = vmatpush2.bf16.msra.mxu1 %v10482_v24 }
 0x115   : > { %2506 = vmatprep.subr.bf16.mxu1 %v10486_v33 }
 0x117   : > { %2528 = vmatpush1.bf16.msra.mxu0 %v10435_v52 }
 0x118   : > { %2529 = vmatprep.subr.bf16.mxu0 %v10443_v53  ;;  %2507 = vmatpush2.bf16.msra.mxu1 %v10488_v35 }
 0x119   : > { %2508 = vmatprep.subr.bf16.mxu1 %v10492_v41 }
 0x11b   : > { %2530 = vmatpush1.bf16.msra.mxu0 %v10441_v56 }
 0x11c   : > { %2531 = vmatprep.subr.bf16.mxu0 %v10449_v57  ;;  %2509 = vmatpush2.bf16.msra.mxu1 %v10494_v44 }
 0x11d   : > { %2510 = vmatprep.subr.bf16.mxu1 %v10498_v55 }
 0x11f   : > { %2532 = vmatpush1.bf16.msra.mxu0 %v10447_v60  ;;  %v10501_v60 = vld [vmem:[%s11101_s17 + $0x288] ss:$12 sps:$4 sm:$0xff]  }
 0x120   : > { %2533 = vmatprep.subr.bf16.mxu0 %v10455_v61  ;;  %2511 = vmatpush2.bf16.msra.mxu1 %v10500_v59 }
 0x121   : > { %2512 = vmatprep.subr.bf16.mxu1 %v10504_v2 }
 0x123   : > { %2534 = vmatpush1.bf16.msra.mxu0 %v10453_v0 }
 0x124   : > { %2535 = vmatprep.subr.bf16.mxu0 %v10461_v1  ;;  %2513 = vmatpush2.bf16.msra.mxu1 %v10506_v6 }
 0x127   : > { %2536 = vmatpush1.bf16.msra.mxu0 %v10459_v4 }
 0x128   : > { %2537 = vmatprep.subr.bf16.mxu0 %v10467_v5 }
 0x12b   : > { %2538 = vmatpush1.bf16.msra.mxu0 %v10465_v8 }
 0x12c   : > { %2539 = vmatprep.subr.bf16.mxu0 %v10473_v9  ;;  %v10509_v9 = vld [vmem:[%s11101_s17 + $0x274] ss:$12 sps:$4 sm:$0xff]  }
 0x12f   : > { %2540 = vmatpush1.bf16.msra.mxu0 %v10471_v12 }
 0x130   : > { %2541 = vmatprep.subr.bf16.mxu0 %v10479_v13  ;;  %v10512_v13 = vld [vmem:[%s11101_s17 + $0x3ac] ss:$12 sps:$4 sm:$0xff]  }
 0x131   : > { %2568 = vmatprep.subr.bf16.mxu1 %v10512_v13 }
 0x133   : > { %2542 = vmatpush2.bf16.msra.mxu0 %v10477_v16 }
 0x134   : > { %2543 = vmatprep.subr.bf16.mxu0 %v10485_v26  ;;  %v10519_v26 = vld [vmem:[%s11101_s17 + $0x240] ss:$12 sps:$4 sm:$0xff]  }
 0x137   : > { %2544 = vmatpush2.bf16.msra.mxu0 %v10483_v25  ;;  %v10521_v25 = vld [vmem:[%s11101_s17 + $0x244] ss:$12 sps:$4 sm:$0xff]  }
 0x138   : > { %2545 = vmatprep.subr.bf16.mxu0 %v10491_v39 }
 0x13b   : > { %2546 = vmatpush2.bf16.msra.mxu0 %v10489_v36 }
 0x13c   : > { %2547 = vmatprep.subr.bf16.mxu0 %v10497_v45 }
 0x13f   : > { %2548 = vmatpush2.bf16.msra.mxu0 %v10495_v47 }
 0x140   : > { %2549 = vmatprep.subr.bf16.mxu0 %v10503_v62 }
 0x143   : > { %2550 = vmatpush2.bf16.msra.mxu0 %v10501_v60 }
 0x144   : > { %2551 = vmatprep.subr.bf16.mxu0 %v10509_v9 }
 0x147   : > { %2552 = vmatpush2.bf16.msra.mxu0 %v10507_v7 }
 0x148   : > { %2553 = vmatprep.subr.bf16.mxu0 %v10515_v17 }
 0x14b   : > { %2554 = vmatpush2.bf16.msra.mxu0 %v10513_v20 }
 0x14c   : > { %2555 = vmatprep.subr.bf16.mxu0 %v10521_v25 }
 0x14f   : > { %2556 = vmatpush2.bf16.msra.mxu0 %v10519_v26 }
 0x1c2   : > { %v1342_v21 = vpop.f32.mrf.mxu0 }
 0x1c3   : > { %v11483_v27 = vadd.f32 %v1342_v21, %v11476_v22 }
 0x1c4   : > { %v1344_v28 = vpop.f32.mrf.mxu0 }
 0x1c5   : > { %v1437_v30 = vmax.f32 %v11483_v27, 0.0  ;;  %v11489_v31 = vadd.f32 %v1344_v28, %v11476_v22  ;;  %v10525_v28 = vld [vmem:[%s11101_s17 + $0x170] ss:$12 sps:$4 sm:$0xff]  }
 0x1c6   : > { %v1346_v32 = vpop.f32.mrf.mxu0  ;;  %9905 = vmatprep.subr.bf16.mxu0 %v10525_v28 }
 0x1c7   : > { %v1438_v37 = vmax.f32 %v11489_v31, 0.0  ;;  %v11496_v38 = vadd.f32 %v1346_v32, %v11485_v29 }
 0x1c8   : > { %v1348_v40 = vpop.f32.mrf.mxu0 }
 0x1c9   : > { %v1443_v42 = vmax.f32 %v11496_v38, 0.0  ;;  %v11502_v43 = vadd.f32 %v1348_v40, %v11485_v29  ;;  %v10510_v38 = vld [vmem:[%s11101_s17 + $0x3a8] ss:$12 sps:$4 sm:$0xff]  }
 0x1ca   : > { %v1385_v46 = vpop.f32.mrf.mxu0 }
 0x1cb   : > { %v1444_v48 = vmax.f32 %v11502_v43, 0.0  ;;  %v11509_v49 = vadd.f32 %v1385_v46, %v11476_v22  ;;  %v10199_v50 = vpack.i.bf16 %v1443_v42, %v1437_v30 }
 0x1cc   : > { %v1387_v51 = vpop.f32.mrf.mxu0 }
 0x1cd   : > { %v1439_v52 = vmax.f32 %v11509_v49, 0.0  ;;  %v11517_v53 = vadd.f32 %v1387_v51, %v11476_v22  ;;  %10200 = vrot.lane.b32.xlu0 %v10199_v50, %s11054_s1  ;;  %v10524_v49 = vld [vmem:[%s11101_s17 + $0x37c] ss:$12 sps:$4 sm:$0xff]  }
 0x1ce   : > { %v1389_v54 = vpop.f32.mrf.mxu0 }
 0x1cf   : > { %v1440_v56 = vmax.f32 %v11517_v53, 0.0  ;;  %v11523_v57 = vadd.f32 %v1389_v54, %v11485_v29  ;;  %v10204_v58 = vpack.i.bf16 %v1439_v52, %v1438_v37 }
 0x1d0   : > { %v1391_v61 = vpop.f32.mrf.mxu0 }
 0x1d1   : > { %v1445_v63 = vmax.f32 %v11523_v57, 0.0  ;;  %v11534_v0 = vadd.f32 %v1391_v61, %v11485_v29  ;;  %10205 = vrot.lane.b32.xlu1 %v10204_v58, %s11054_s1 }
 0x1d2   : > { %v1428_v1 = vpop.f32.mrf.mxu0 }
 0x1d3   : > { %v1446_v3 = vmax.f32 %v11534_v0, 0.0  ;;  %v11540_v4 = vadd.f32 %v1428_v1, %v11476_v22  ;;  %v10219_v5 = vpack.i.bf16 %v1445_v63, %v1444_v48 }
 0x1d4   : > { %v1430_v8 = vpop.f32.mrf.mxu0 }
 0x1d5   : > { %v1441_v10 = vmax.f32 %v11540_v4, 0.0  ;;  %v1431_v11 = vadd.f32 %v1430_v8, %v11476_v22  ;;  %10210 = vrot.lane.b32.xlu1 %v10204_v58, %s11055_s2  ;;  %10220 = vrot.lane.b32.xlu0 %v10219_v5, %s11055_s2  ;;  %v10561_v4 = vld [vmem:[%s11101_s17 + $0x8] ss:$12 sps:$4 sm:$0xff]  }
 0x1d6   : > { %v1432_v12 = vpop.f32.mrf.mxu0 }
 0x1d7   : > { %v1442_v14 = vmax.f32 %v1431_v11, 0.0  ;;  %v11555_v15 = vadd.f32 %v1432_v12, %v11485_v29  ;;  %v10229_v16 = vpack.i.bf16 %v1441_v10, %v1440_v56 }
 0x1d8   : > { %v1434_v19 = vpop.f32.mrf.mxu0 }
 0x1d9   : > { %1455 = vst.msk [vmem:[#allocation3 + $0x28] sm:$0xff] %vm1454_vm0, %v1442_v14  ;;  %v1447_v22 = vmax.f32 %v11555_v15, 0.0  ;;  %v1435_v23 = vadd.f32 %v1434_v19, %v11485_v29  ;;  %10215 = vrot.lane.b32.xlu1 %v10219_v5, %s11054_s1  ;;  %10230 = vrot.lane.b32.xlu0 %v10229_v16, %s11054_s1 }
 0x1db   : > { %v1448_v24 = vmax.f32 %v1435_v23, 0.0  ;;  %v10239_v21 = vpack.i.bf16 %v1447_v22, %v1446_v3 }
 0x1dd   : > { %1461 = vst.msk [vmem:[#allocation3 + $0x58] sm:$0xff] %vm1454_vm0, %v1448_v24  ;;  %10225 = vrot.lane.b32.xlu1 %v10199_v50, %s11055_s2  ;;  %10235 = vrot.lane.b32.xlu0 %v10229_v16, %s11055_s2  ;;  %vm3309_vm0 = vcmask 7168  }
 0x1e0   : > { %v11579_v29 = vld [vmem:[#allocation3 + $0x28] sm:$0xff] }
 0x1e1   : > { %10240 = vrot.lane.b32.xlu1 %v10239_v21, %s11054_s1 }
 0x1e4   : > { %v11581_v32 = vld [vmem:[#allocation3 + $0x58] sm:$0xff] }
 0x1e5   : > { %v10249_v33 = vpack.i.bf16 %v11581_v32, %v11579_v29  ;;  %10245 = vrot.lane.b32.xlu1 %v10239_v21, %s11055_s2 }
 0x1e7   : > { %10250 = vrot.lane.b32.xlu0 %v10249_v33, %s11054_s1 }
 0x1e9   : > { %10255 = vrot.lane.b32.xlu1 %v10249_v33, %s11055_s2 }
 0x23f   : > { %v10201_v35 = vpop.permute.xlu0 %10200 }
 0x240   : > { %v10202_v45 = vunpack.i.l.bf16 %v10201_v35  ;;  %v10203_v50 = vunpack.i.h.bf16 %v10201_v35  ;;  %v10518_v35 = vld [vmem:[%s11101_s17 + $0x394] ss:$12 sps:$4 sm:$0xff]  }
 0x243   : > { %v10206_v36 = vpop.permute.xlu1 %10205 }
 0x244   : > { %v10208_v39 = vunpack.i.h.bf16 %v10206_v36  ;;  %v10207_v40 = vunpack.i.l.bf16 %v10206_v36 }
 0x246   : > { %v1510_v51 = vsel %vm913_vm3, %v10202_v45, %v10207_v40  ;;  %v1511_v55 = vsel %vm913_vm3, %v10207_v40, %v10208_v39 }
 0x247   : > { %v10211_v41 = vpop.permute.xlu1 %10210  ;;  %v11588_v44 = vpop.permute.xlu0 %10220  ;;  %v1533_v7 = vmax.f32 %v1438_v37, %v1511_v55  ;;  %v1532_v9 = vmax.f32 %v1437_v30, %v1510_v51 }
 0x248   : > { %v10213_v46 = vunpack.i.h.bf16 %v10211_v41  ;;  %v10212_v47 = vunpack.i.l.bf16 %v10211_v41  ;;  %v10223_v58 = vunpack.i.h.bf16 %v11588_v44  ;;  %v10222_v59 = vunpack.i.l.bf16 %v11588_v44 }
 0x24a   : > { %v1569_v5 = vsel %vm924_vm4, %v10212_v47, %v10213_v46  ;;  %v1574_v14 = vsel %vm924_vm4, %v10222_v59, %v10223_v58 }
 0x24b   : > { %v10216_v54 = vpop.permute.xlu1 %10215  ;;  %v11594_v62 = vpop.permute.xlu0 %10230  ;;  %v1591_v17 = vmax.f32 %v1533_v7, %v1569_v5  ;;  %v10529_v7 = vld [vmem:[%s11101_s17 + $0x364] ss:$12 sps:$4 sm:$0xff]  }
 0x24c   : > { %v10218_v60 = vunpack.i.h.bf16 %v10216_v54  ;;  %v10217_v61 = vunpack.i.l.bf16 %v10216_v54  ;;  %v10232_v11 = vunpack.i.l.bf16 %v11594_v62  ;;  %v10233_v16 = vunpack.i.h.bf16 %v11594_v62  ;;  %v10564_v62 = vld [vmem:[%s11101_s17 + $0x3c4] ss:$12 sps:$4 sm:$0xff]  }
 0x24e   : > { %v1515_v1 = vsel %vm913_vm3, %v10203_v50, %v10217_v61  ;;  %v1516_v2 = vsel %vm913_vm3, %v10217_v61, %v10218_v60  ;;  %v1512_v24 = vsel %vm913_vm3, %v10208_v39, %v10232_v11 }
 0x24f   : > { %v10226_v6 = vpop.permute.xlu1 %10225  ;;  %v1539_v8 = vmax.f32 %v1444_v48, %v1516_v2  ;;  %v1538_v31 = vmax.f32 %v1443_v42, %v1515_v1  ;;  %v11610_v37 = vpop.permute.xlu0 %10235  ;;  %v1513_v42 = vsel %vm913_vm3, %v10232_v11, %v10233_v16  ;;  %v1534_v41 = vmax.f32 %v1439_v52, %v1512_v24  ;;  %v10544_v24 = vld [vmem:[%s11101_s17 + $0x31c] ss:$12 sps:$4 sm:$0xff]  }
 0x250   : > { %v10228_v12 = vunpack.i.h.bf16 %v10226_v6  ;;  %v10227_v13 = vunpack.i.l.bf16 %v10226_v6  ;;  %v10238_v21 = vunpack.i.h.bf16 %v11610_v37  ;;  %v10237_v28 = vunpack.i.l.bf16 %v11610_v37  ;;  %v10566_v37 = vld [vmem:[%s11101_s17 + $0x230] ss:$12 sps:$4 sm:$0xff]  }
 0x251   : > { %v1597_v19 = vmax.f32 %v1539_v8, %v1574_v14  ;;  %v1535_v50 = vmax.f32 %v1440_v56, %v1513_v42  ;;  %v11070_v42 = vmov 65535  }
 0x252   : > { %v1568_v27 = vsel %vm924_vm4, %v10227_v13, %v10212_v47  ;;  %v1573_v30 = vsel %vm924_vm4, %v10228_v12, %v10222_v59  ;;  %v10516_v47 = vld [vmem:[%s11101_s17 + $0x390] ss:$12 sps:$4 sm:$0xff]   ;;  %v1570_v51 = vsel %vm924_vm4, %v10213_v46, %v10237_v28  ;;  %v1571_v59 = vsel %vm924_vm4, %v10237_v28, %v10238_v21  ;;  %v10530_v12 = vld [vmem:[%s11101_s17 + $0x158] ss:$12 sps:$4 sm:$0xff]   ;;  %v10527_v13 = vld [vmem:[%s11101_s17 + $0x360] ss:$12 sps:$4 sm:$0xff]  }
 0x253   : > { %v11614_v43 = vpop.permute.xlu1 %10240  ;;  %v1603_v48 = vpack.c.bf16 %v1597_v19, %v1591_v17  ;;  %v1590_v20 = vmax.f32 %v1532_v9, %v1568_v27  ;;  %v1596_v23 = vmax.f32 %v1538_v31, %v1573_v30  ;;  %v1593_v2 = vmax.f32 %v1535_v50, %v1571_v59  ;;  %v10534_v17 = vld [vmem:[%s11101_s17 + $0x34c] ss:$12 sps:$4 sm:$0xff]   ;;  %v10532_v27 = vld [vmem:[%s11101_s17 + $0x348] ss:$12 sps:$4 sm:$0xff]  }
 0x254   : > { %v10243_v25 = vunpack.i.h.bf16 %v11614_v43  ;;  %v10242_v26 = vunpack.i.l.bf16 %v11614_v43  ;;  %v10531_v19 = vld [vmem:[%s11101_s17 + $0x98] ss:$12 sps:$4 sm:$0xff]   ;;  %v10535_v31 = vld [vmem:[%s11101_s17 + $0x140] ss:$12 sps:$4 sm:$0xff]   ;;  %v2471_v28 = vsel %vm2469_vm13, 4294967295, %v11070_v42  ;;  %vm3301_vm13 = vcmask 351232  }
 0x255   : > { %2514 = vmatprep.mubr.bf16.mxu1 %v1603_v48  ;;  %v11625_v33 = vpack.c.bf16 %v1596_v23, %v1590_v20  ;;  %v10539_v30 = vld [vmem:[%s11101_s17 + $0x334] ss:$12 sps:$4 sm:$0xff]  }
 0x256   : > { %v1517_v36 = vsel %vm913_vm3, %v10218_v60, %v10242_v26  ;;  %v1518_v39 = vsel %vm913_vm3, %v10242_v26, %v10243_v25  ;;  %v10536_v20 = vld [vmem:[%s11101_s17 + $0x80] ss:$12 sps:$4 sm:$0xff]   ;;  %v10540_v23 = vld [vmem:[%s11101_s17 + $0x128] ss:$12 sps:$4 sm:$0xff]  }
 0x257   : > { %v11632_v40 = vpop.permute.xlu1 %10245  ;;  %2515 = vmatmul.mubr.bf16.vlgmr.msra.gmra.mxu1 %v11625_v33  ;;  %v1540_v54 = vmax.f32 %v1445_v63, %v1517_v36  ;;  %v1541_v52 = vmax.f32 %v1446_v3, %v1518_v39  ;;  %v1592_v3 = vmax.f32 %v1534_v41, %v1570_v51  ;;  %v10541_v26 = vld [vmem:[%s11101_s17 + $0x68] ss:$12 sps:$4 sm:$0xff]   ;;  %v10549_v36 = vld [vmem:[%s11101_s17 + $0x304] ss:$12 sps:$4 sm:$0xff]   ;;  %v10547_v50 = vld [vmem:[%s11101_s17 + $0x300] ss:$12 sps:$4 sm:$0xff]  }
 0x258   : > { %v10248_v44 = vunpack.i.h.bf16 %v11632_v40  ;;  %v10247_v45 = vunpack.i.l.bf16 %v11632_v40  ;;  %2569 = vmatpush1.bf16.msra.mxu1 %v10510_v38  ;;  %v10545_v38 = vld [vmem:[%s11101_s17 + $0x110] ss:$12 sps:$4 sm:$0xff]   ;;  %v10554_v39 = vld [vmem:[%s11101_s17 + $0x3f4] ss:$12 sps:$4 sm:$0x7f]  }
 0x259   : > { %v11645_v55 = vpop.permute.xlu0 %10250  ;;  %2570 = vmatprep.subr.bf16.mxu1 %v10518_v35  ;;  %v10542_v35 = vld [vmem:[%s11101_s17 + $0x318] ss:$12 sps:$4 sm:$0xff]   ;;  %v10546_v41 = vld [vmem:[%s11101_s17 + $0x50] ss:$12 sps:$4 sm:$0xff]  }
 0x25a   : > { %v10253_v53 = vunpack.i.h.bf16 %v11645_v55  ;;  %v10252_v56 = vunpack.i.l.bf16 %v11645_v55  ;;  %v1575_v57 = vsel %vm924_vm4, %v10223_v58, %v10247_v45  ;;  %v1576_v63 = vsel %vm924_vm4, %v10247_v45, %v10248_v44  ;;  %v10522_v58 = vld [vmem:[%s11101_s17 + $0x378] ss:$12 sps:$4 sm:$0xff]   ;;  %v10552_v51 = vld [vmem:[%s11101_s17 + $0x3f0] ss:$12 sps:$4 sm:$0x7f]  }
 0x25b   : > { %v1598_v46 = vmax.f32 %v1540_v54, %v1575_v57  ;;  %v11659_v60 = vpop.permute.xlu1 %10255  ;;  %v1599_v0 = vmax.f32 %v1541_v52, %v1576_v63  ;;  %v11704_v45 = vsel %vm2470_vm14, %v2471_v28, 0  ;;  %v10555_v52 = vld [vmem:[%s11101_s17 + $0xe0] ss:$12 sps:$4 sm:$0xff]   ;;  %v10559_v57 = vld [vmem:[%s11101_s17 + $0x3dc] ss:$12 sps:$4 sm:$0xff]   ;;  %vm3363_vm14 = vcmask 1047560  }
 0x25c   : > { %v1543_v61 = vmax.f32 %v11581_v32, %v10253_v53  ;;  %v1537_v1 = vmax.f32 %v11579_v29, %v10252_v56  ;;  %2571 = vmatpush1.bf16.msra.mxu1 %v10516_v47  ;;  %v10258_v5 = vunpack.i.h.bf16 %v11659_v60  ;;  %v10257_v6 = vunpack.i.l.bf16 %v11659_v60  ;;  %v10526_v32 = vld [vmem:[%s11101_s17 + $0xb0] ss:$12 sps:$4 sm:$0xff]   ;;  %v10550_v47 = vld [vmem:[%s11101_s17 + $0xf8] ss:$12 sps:$4 sm:$0xff]   ;;  %v10570_v60 = vld [vmem:[%s11101_s17 + $0x2c0] ss:$12 sps:$4 sm:$0xff]  }
 0x25d   : > { %2572 = vmatprep.subr.bf16.mxu1 %v10524_v49  ;;  %v11671_v8 = vpack.c.bf16 %v1599_v0, %v1593_v2  ;;  %v11673_v9 = vpack.c.bf16 %v1598_v46, %v1592_v3  ;;  %v2477_v54 = vand.u32 %v10554_v39, %v11704_v45  ;;  %v10551_v49 = vld [vmem:[%s11101_s17 + $0x38] ss:$12 sps:$4 sm:$0xff]   ;;  %v2474_v59 = vand.u32 %v10552_v51, %v11704_v45  ;;  %v10556_v0 = vld [vmem:[%s11101_s17 + $0x20] ss:$12 sps:$4 sm:$0xff]   ;;  %v10560_v3 = vld [vmem:[%s11101_s17 + $0xc8] ss:$12 sps:$4 sm:$0xff]  }
 0x25e   : > { %v1595_v29 = vmax.f32 %v1537_v1, %v10257_v6  ;;  %v1601_v11 = vmax.f32 %v1543_v61, %v10258_v5  ;;  %v1519_v63 = vsel %vm913_vm3, %v10243_v25, %v10253_v53  ;;  %v1514_v46 = vsel %vm913_vm3, %v10233_v16, %v10252_v56  ;;  %v10557_v61 = vld [vmem:[%s11101_s17 + $0x3d8] ss:$12 sps:$4 sm:$0xff]   ;;  %v10568_v40 = vld [vmem:[%s11101_s17 + $0x3b0] ss:$12 sps:$4 sm:$0xff]   ;;  %v10572_v1 = vld [vmem:[%s11101_s17 + $0x200] ss:$12 sps:$4 sm:$0xff]  }
 0x25f   : > { %2557 = vmatprep.mubr.bf16.mxu0 %v11671_v8  ;;  %v1542_v43 = vmax.f32 %v1447_v22, %v1519_v63  ;;  %v1536_v25 = vmax.f32 %v1441_v10, %v1514_v46  ;;  %v1572_v16 = vsel %vm924_vm4, %v10238_v21, %v10257_v6  ;;  %v1577_v15 = vsel %vm924_vm4, %v10248_v44, %v10258_v5  ;;  %v10565_v10 = vld [vmem:[%s11101_s17 + $0x2f0] ss:$12 sps:$4 sm:$0xff]   ;;  %v10562_v22 = vld [vmem:[%s11101_s17 + $0x3c0] ss:$12 sps:$4 sm:$0xff]   ;;  %v10567_v21 = vld [vmem:[%s11101_s17 + $0x2d8] ss:$12 sps:$4 sm:$0xff]  }
 0x260   : > { %2573 = vmatpush1.bf16.msra.mxu1 %v10522_v58  ;;  %2558 = vmatmul.mubr.bf16.vlgmr.msra.gmra.mxu0 %v11673_v9  ;;  %v11684_v14 = vpack.c.bf16 %v1601_v11, %v1595_v29  ;;  %v10569_v56 = vld [vmem:[%s11101_s17 + $0x218] ss:$12 sps:$4 sm:$0xff]   ;;  %v10573_v58 = vld [vmem:[%s11101_s17 + $0x2a8] ss:$12 sps:$4 sm:$0xff]   ;;  %v10574_v2 = vld [vmem:[%s11101_s17 + $0x380] ss:$12 sps:$4 sm:$0xff]  }
 0x261   : > { %2574 = vmatprep.subr.bf16.mxu1 %v10529_v7  ;;  %9906 = vmatpush3.bf16.msra.mxu0 %v10526_v32  ;;  %v1594_v55 = vmax.f32 %v1536_v25, %v1572_v16  ;;  %v1600_v53 = vmax.f32 %v1542_v43, %v1577_v15  ;;  %v10575_v5 = vld [vmem:[%s11101_s17 + $0x1e8] ss:$12 sps:$4 sm:$0xff]   ;;  %v10576_v6 = vld [vmem:[%s11101_s17 + $0x290] ss:$12 sps:$4 sm:$0xff]   ;;  %v10579_v32 = vld [vmem:[%s11101_s17 + $0x278] ss:$12 sps:$4 sm:$0xff]  }
 0x262   : > { %2643 = vmatprep.mubr.bf16.mxu0 %v1603_v48  ;;  %9500 = vmatprep.mubr.msk.bf16.mxu1 %vm2465_vm12, %v11684_v14  ;;  %v10537_v48 = vld [vmem:[%s11101_s17 + $0x330] ss:$12 sps:$4 sm:$0xff]   ;;  %v10577_v7 = vld [vmem:[%s11101_s17 + $0x368] ss:$12 sps:$4 sm:$0xff]   ;;  %v10581_v11 = vld [vmem:[%s11101_s17 + $0x1b8] ss:$12 sps:$4 sm:$0xff]  }
 0x263   : > { %9907 = vmatprep.subr.bf16.mxu0 %v10530_v12  ;;  %v11749_v44 = vpack.c.bf16 %v1600_v53, %v1594_v55  ;;  %v10580_v29 = vld [vmem:[%s11101_s17 + $0x350] ss:$12 sps:$4 sm:$0xff]   ;;  %v10582_v12 = vld [vmem:[%s11101_s17 + $0x260] ss:$12 sps:$4 sm:$0xff]  }
 0x264   : > { %2575 = vmatpush1.bf16.msra.mxu1 %v10527_v13  ;;  %v10583_v13 = vld [vmem:[%s11101_s17 + $0x338] ss:$12 sps:$4 sm:$0xff]  }
 0x265   : > { %2576 = vmatprep.subr.bf16.mxu1 %v10534_v17  ;;  %9908 = vmatpush3.bf16.msra.mxu0 %v10531_v19  ;;  %v10585_v17 = vld [vmem:[%s11101_s17 + $0x248] ss:$12 sps:$4 sm:$0xff]   ;;  %v10586_v19 = vld [vmem:[%s11101_s17 + $0x320] ss:$12 sps:$4 sm:$0xff]  }
 0x266   : > { %9909 = vmatprep.subr.bf16.mxu0 %v10535_v31  ;;  %v10587_v31 = vld [vmem:[%s11101_s17 + $0x188] ss:$12 sps:$4 sm:$0xff]   ;;  %v10603_v55 = vld [vmem:[%s11106_s21 + $0x44] ss:$8 sps:$4 sm:$0xff]  }
 0x268   : > { %2577 = vmatpush1.bf16.msra.mxu1 %v10532_v27  ;;  %v10588_v27 = vld [vmem:[%s11101_s17 + $0x308] ss:$12 sps:$4 sm:$0xff]  }
 0x269   : > { %2578 = vmatprep.subr.bf16.mxu1 %v10539_v30  ;;  %9910 = vmatpush3.bf16.msra.mxu0 %v10536_v20  ;;  %v10589_v30 = vld [vmem:[%s11101_s17 + $0x3f8] ss:$12 sps:$4 sm:$0x7f]  }
 0x26a   : > { %9911 = vmatprep.subr.bf16.mxu0 %v10540_v23  ;;  %v2480_v20 = vand.u32 %v10589_v30, %v11704_v45  ;;  %v10590_v23 = vld [vmem:[%s11101_s17 + $0x3e0] ss:$12 sps:$4 sm:$0xff]  }
 0x26c   : > { %2579 = vmatpush1.bf16.msra.mxu1 %v10537_v48  ;;  %v10591_v48 = vld [vmem:[%s11101_s17 + $0x3c8] ss:$12 sps:$4 sm:$0xff]  }
 0x26d   : > { %2580 = vmatprep.subr.bf16.mxu1 %v10544_v24  ;;  %9912 = vmatpush3.bf16.msra.mxu0 %v10541_v26  ;;  %v10592_v24 = vld [vmem:[%s11106_s21 + $0x70] ss:$8 sps:$4 sm:$0xff]   ;;  %v10594_v26 = vld [vmem:[%s11106_s21 + $0x74] ss:$8 sps:$4 sm:$0xff]  }
 0x26e   : > { %9913 = vmatprep.subr.bf16.mxu0 %v10545_v38  ;;  %v10597_v38 = vld [vmem:[%s11106_s21 + $0x64] ss:$8 sps:$4 sm:$0xff]  }
 0x270   : > { %2581 = vmatpush1.bf16.msra.mxu1 %v10542_v35 }
 0x271   : > { %2582 = vmatprep.subr.bf16.mxu1 %v10549_v36  ;;  %9914 = vmatpush3.bf16.msra.mxu0 %v10546_v41 }
 0x272   : > { %9915 = vmatprep.subr.bf16.mxu0 %v10550_v47 }
 0x274   : > { %2583 = vmatpush1.bf16.msra.mxu1 %v10547_v50 }
 0x275   : > { %2594 = vmatprep.subr.bf16.mxu1 %v2477_v54  ;;  %9916 = vmatpush3.bf16.msra.mxu0 %v10551_v49 }
 0x276   : > { %9917 = vmatprep.subr.bf16.mxu0 %v10555_v52 }
 0x278   : > { %2595 = vmatpush2.bf16.msra.mxu1 %v2474_v59 }
 0x279   : > { %2596 = vmatprep.subr.bf16.mxu1 %v10559_v57  ;;  %9918 = vmatpush3.bf16.msra.mxu0 %v10556_v0 }
 0x27a   : > { %9919 = vmatprep.subr.bf16.mxu0 %v10560_v3 }
 0x27c   : > { %2597 = vmatpush2.bf16.msra.mxu1 %v10557_v61 }
 0x27d   : > { %2598 = vmatprep.subr.bf16.mxu1 %v10564_v62  ;;  %9920 = vmatpush3.bf16.msra.mxu0 %v10561_v4 }
 0x27e   : > { %9927 = vmatprep.subr.bf16.mxu0 %v10565_v10  ;;  %v10598_v10 = vld [vmem:[%s11106_s21 + $0x50] ss:$8 sps:$4 sm:$0xff]  }
 0x280   : > { %2599 = vmatpush2.bf16.msra.mxu1 %v10562_v22  ;;  %2644 = vmatmul.mubr.bf16.vlgmr.msra.gmra.mxu0 %v11625_v33  ;;  %v10571_v33 = vld [vmem:[%s11101_s17 + $0x398] ss:$12 sps:$4 sm:$0xff]   ;;  %v10600_v22 = vld [vmem:[%s11106_s21 + $0x54] ss:$8 sps:$4 sm:$0xff]  }
 0x281   : > { %2693 = vmatprep.subr.bf16.mxu1 %v11069_v34  ;;  %9928 = vmatpush3.bf16.msra.mxu0 %v10566_v37 }
 0x282   : > { %2684 = vmatprep.mubr.bf16.mxu0 %v11671_v8  ;;  %9929 = vmatprep.subr.bf16.mxu0 %v10567_v21  ;;  %v10578_v8 = vld [vmem:[%s11101_s17 + $0x1d0] ss:$12 sps:$4 sm:$0xff]   ;;  %v10601_v21 = vld [vmem:[%s11106_s21 + $0x40] ss:$8 sps:$4 sm:$0xff]  }
 0x283   : > { %2601 = vmatmul.mubr.bf16.vlgmr.msra.gmra.mxu1 %v11749_v44 }
 0x284   : > { %2694 = vmatpush1.bf16.msra.mxu1 %v10568_v40  ;;  %9501 = vmatprep.mubr.msk.bf16.mxu1 %vm2465_vm12, %v11684_v14  ;;  %v10584_v14 = vld [vmem:[%s11101_s17 + $0x1a0] ss:$12 sps:$4 sm:$0xff]   ;;  %vm3314_vm12 = vcmask 367968  }
 0x285   : > { %2695 = vmatprep.subr.bf16.mxu1 %v11069_v34  ;;  %9930 = vmatpush3.bf16.msra.mxu0 %v10569_v56  ;;  %v10606_v56 = vld [vmem:[%s11106_s21 + $0x34] ss:$8 sps:$4 sm:$0xff]  }
 0x286   : > { %9931 = vmatprep.subr.bf16.mxu0 %v10570_v60 }
 0x288   : > { %2696 = vmatpush1.bf16.msra.mxu1 %v10571_v33 }
 0x289   : > { %2697 = vmatprep.subr.bf16.mxu1 %v11069_v34  ;;  %9932 = vmatpush3.bf16.msra.mxu0 %v10572_v1 }
 0x28a   : > { %9933 = vmatprep.subr.bf16.mxu0 %v10573_v58  ;;  %v2961_v58 = vld [vmem:[%s11106_s21 + $0x150] sm:$0x77] }
 0x28c   : > { %2698 = vmatpush1.bf16.msra.mxu1 %v10574_v2  ;;  %v3186_v2 = vsel %vm3184_vm15, 4294967295, %v11070_v42 }
 0x28d   : > { %2699 = vmatprep.subr.bf16.mxu1 %v11069_v34  ;;  %9934 = vmatpush3.bf16.msra.mxu0 %v10575_v5 }
 0x28e   : > { %9935 = vmatprep.subr.bf16.mxu0 %v10576_v6 }
 0x290   : > { %2700 = vmatpush1.bf16.msra.mxu1 %v10577_v7 }
 0x291   : > { %2701 = vmatprep.subr.bf16.mxu1 %v11069_v34  ;;  %9936 = vmatpush3.bf16.msra.mxu0 %v10578_v8  ;;  %v10604_v8 = vld [vmem:[%s11106_s21 + $0x30] ss:$8 sps:$4 sm:$0xff]  }
 0x292   : > { %9937 = vmatprep.subr.bf16.mxu0 %v10579_v32  ;;  %v9544_v32 = vcombine.low %v2961_v58, %v2961_v58 }
 0x294   : > { %2702 = vmatpush1.bf16.msra.mxu1 %v10580_v29 }
 0x295   : > { %2703 = vmatprep.subr.bf16.mxu1 %v11069_v34  ;;  %9938 = vmatpush3.bf16.msra.mxu0 %v10581_v11 }
 0x296   : > { %9939 = vmatprep.subr.bf16.mxu0 %v10582_v12  ;;  %v10609_v12 = vld [vmem:[%s11106_s21 + $0x24] ss:$8 sps:$4 sm:$0xff]  }
 0x298   : > { %2704 = vmatpush1.bf16.msra.mxu1 %v10583_v13  ;;  %v9545_v13 = vcombine.high %v2961_v58, %v2961_v58  ;;  %v10636_v58 = vld [vmem:[%s11106_s21 + $0xb0] ss:$8 sps:$4 sm:$0xff]  }
 0x299   : > { %2705 = vmatprep.subr.bf16.mxu1 %v11069_v34  ;;  %9940 = vmatpush3.bf16.msra.mxu0 %v10584_v14  ;;  %v3187_v14 = vsel %vm3185_vm1, %v3186_v2, 0 }
 0x29a   : > { %9941 = vmatprep.subr.bf16.mxu0 %v10585_v17  ;;  %v3192_v30 = vand.u32 %v9545_v13, %v3187_v14  ;;  %v10642_v13 = vld [vmem:[%s11106_s21 + $0xa0] ss:$8 sps:$4 sm:$0xff]  }
 0x29c   : > { %2706 = vmatpush1.bf16.msra.mxu1 %v10586_v19 }
 0x29d   : > { %2707 = vmatprep.subr.bf16.mxu1 %v11069_v34  ;;  %9942 = vmatpush3.bf16.msra.mxu0 %v10587_v31 }
 0x29e   : > { %3194 = vmatprep.subr.bf16.mxu0 %v10594_v26  ;;  %v10629_v26 = vld [vmem:[%s11106_s21 + $0x144] ss:$8 sps:$4 sm:$0xff]  }
 0x2a0   : > { %2708 = vmatpush1.bf16.msra.mxu1 %v10588_v27  ;;  %2685 = vmatmul.mubr.bf16.vlgmr.msra.gmra.mxu0 %v11673_v9  ;;  %v10595_v9 = vld [vmem:[%s11106_s21 + $0x60] ss:$8 sps:$4 sm:$0xff]   ;;  %v3189_v27 = vand.u32 %v9544_v32, %v3187_v14 }
 0x2a1   : > { %2719 = vmatprep.subr.bf16.mxu1 %v11069_v34  ;;  %3195 = vmatpush1.bf16.msra.mxu0 %v10592_v24  ;;  %v10607_v24 = vld [vmem:[%s11106_s21 + $0x20] ss:$8 sps:$4 sm:$0xff]  }
 0x2a2   : > { %3196 = vmatprep.subr.bf16.mxu0 %v10597_v38  ;;  %v10639_v32 = vld [vmem:[%s11106_s21 + $0x120] ss:$8 sps:$4 sm:$0xff]  }
 0x2a4   : > { %2720 = vmatpush2.bf16.msra.mxu1 %v2480_v20 }
 0x2a5   : > { %2721 = vmatprep.subr.bf16.mxu1 %v11069_v34  ;;  %3197 = vmatpush1.bf16.msra.mxu0 %v10595_v9  ;;  %v10612_v9 = vld [vmem:[%s11106_s21 + $0x14] ss:$8 sps:$4 sm:$0xff]  }
 0x2a6   : > { %3198 = vmatprep.subr.bf16.mxu0 %v10600_v22 }
 0x2a8   : > { %2722 = vmatpush2.bf16.msra.mxu1 %v10590_v23 }
 0x2a9   : > { %2723 = vmatprep.subr.bf16.mxu1 %v11069_v34  ;;  %3199 = vmatpush1.bf16.msra.mxu0 %v10598_v10 }
 0x2aa   : > { %3200 = vmatprep.subr.bf16.mxu0 %v10603_v55  ;;  %v10624_v55 = vld [vmem:[%s11106_s21 + $0xd0] ss:$8 sps:$4 sm:$0xff]  }
 0x2ac   : > { %2724 = vmatpush2.bf16.msra.mxu1 %v10591_v48 }
 0x2ad   : > { %3201 = vmatpush1.bf16.msra.mxu0 %v10601_v21  ;;  %3251 = vmatprep.subr.bf16.mxu1 %v3192_v30 }
 0x2ae   : > { %3202 = vmatprep.subr.bf16.mxu0 %v10606_v56 }
 0x2af   : > { %2726 = vmatmul.mubr.bf16.vlgmr.msra.gmra.mxu1 %v11749_v44 }
 0x2b0   : > { %3279 = vmatprep.mubr.bf16.mxu1 %v11069_v34  ;;  %3252 = vmatpush1.bf16.msra.mxu1 %v3189_v27  ;;  %v10645_v27 = vld [vmem:[%s11106_s21 + $0x110] ss:$8 sps:$4 sm:$0xff]  }
 0x2b1   : > { %3203 = vmatpush1.bf16.msra.mxu0 %v10604_v8  ;;  %3253 = vmatprep.subr.bf16.mxu1 %v10629_v26  ;;  %v10653_v26 = vld [vmem:[%s11106_s21 + $0x104] ss:$8 sps:$4 sm:$0xff]  }
 0x2b2   : > { %3204 = vmatprep.subr.bf16.mxu0 %v10609_v12  ;;  %v10644_v12 = vld [vmem:[%s11106_s21 + $0xa4] ss:$8 sps:$4 sm:$0xff]  }
 0x2b5   : > { %3205 = vmatpush1.bf16.msra.mxu0 %v10607_v24  ;;  %v10648_v24 = vld [vmem:[%s11106_s21 + $0x90] ss:$8 sps:$4 sm:$0xff]  }
 0x2b6   : > { %3206 = vmatprep.subr.bf16.mxu0 %v10612_v9  ;;  %v10651_v9 = vld [vmem:[%s11106_s21 + $0x100] ss:$8 sps:$4 sm:$0xff]  }
 0x317   : > { %v2516_v28 = vpop.f32.mrf.mxu1 }
 0x319   : > { %v2518_v35 = vpop.f32.mrf.mxu1 }
 0x31b   : > { %v2520_v39 = vpop.f32.mrf.mxu1 }
 0x31d   : > { %v2522_v45 = vpop.f32.mrf.mxu1 }
 0x320   : > { %v2559_v36 = vpop.f32.mrf.mxu0 }
 0x321   : > { %v2560_v50 = vadd.f32 %v2559_v36, %v2516_v28  ;;  %v10627_v36 = vld [vmem:[%s11106_s21 + $0x140] ss:$8 sps:$4 sm:$0xff]  }
 0x322   : > { %v2561_v41 = vpop.f32.mrf.mxu0  ;;  %3254 = vmatpush1.bf16.msra.mxu1 %v10627_v36  ;;  %v10656_v36 = vld [vmem:[%s11106_s21 + $0x84] ss:$8 sps:$4 sm:$0xff]  }
 0x323   : > { %v2562_v54 = vadd.f32 %v2561_v41, %v2518_v35  ;;  %v10635_v41 = vld [vmem:[%s11106_s21 + $0x134] ss:$8 sps:$4 sm:$0xff]  }
 0x324   : > { %v2563_v47 = vpop.f32.mrf.mxu0  ;;  %3255 = vmatprep.subr.bf16.mxu1 %v10635_v41  ;;  %v10654_v41 = vld [vmem:[%s11106_s21 + $0x80] ss:$8 sps:$4 sm:$0xff]  }
 0x325   : > { %v2564_v57 = vadd.f32 %v2563_v47, %v2520_v39  ;;  %v10610_v39 = vld [vmem:[%s11106_s21 + $0x10] ss:$8 sps:$4 sm:$0xff]   ;;  %v10615_v47 = vld [vmem:[%s11106_s21 + $0x4] ss:$8 sps:$4 sm:$0xff]  }
 0x326   : > { %v2565_v52 = vpop.f32.mrf.mxu0  ;;  %3207 = vmatpush1.bf16.msra.mxu0 %v10610_v39 }
 0x327   : > { %v2566_v3 = vadd.f32 %v2565_v52, %v2522_v45  ;;  %3208 = vmatprep.subr.bf16.mxu0 %v10615_v47 }
 0x340   : > { %v11797_v4 = vpop.f32.mrf.mxu0 }
 0x342   : > { %v11803_v44 = vpop.f32.mrf.mxu0 }
 0x343   : > { %v2602_v51 = vpop.f32.mrf.mxu1 }
 0x344   : > { %v2603_v49 = vadd.f32 %v2602_v51, %v2560_v50  ;;  %v9924_v11 = vpop.f32.mrf.mxu0  ;;  %v10633_v50 = vld [vmem:[%s11106_s21 + $0x130] ss:$8 sps:$4 sm:$0xff]   ;;  %v10613_v51 = vld [vmem:[%s11106_s21] ss:$8 sps:$4 sm:$0xff]  }
 0x345   : > { %v2604_v59 = vpop.f32.mrf.mxu1  ;;  %3256 = vmatpush1.bf16.msra.mxu1 %v10633_v50  ;;  %3209 = vmatpush1.bf16.msra.mxu0 %v10613_v51 }
 0x346   : > { %v2734_v63 = vmul.f32 0.5, %v2603_v49  ;;  %v2605_v46 = vadd.f32 %v2604_v59, %v2562_v54  ;;  %v9925_v38 = vpop.f32.mrf.mxu0  ;;  %v10618_v49 = vld [vmem:[%s11106_s21 + $0xf4] ss:$8 sps:$4 sm:$0xff]   ;;  %v10616_v59 = vld [vmem:[%s11106_s21 + $0xf0] ss:$8 sps:$4 sm:$0xff]  }
 0x347   : > { %v2606_v0 = vpop.f32.mrf.mxu1  ;;  %3210 = vmatprep.subr.bf16.mxu0 %v10618_v49 }
 0x348   : > { %10925 = vtanh.f32 %v2734_v63  ;;  %v2735_v61 = vmul.f32 0.5, %v2605_v46  ;;  %v2607_v43 = vadd.f32 %v2606_v0, %v2564_v57  ;;  %v10621_v63 = vld [vmem:[%s11106_s21 + $0xe4] ss:$8 sps:$4 sm:$0xff]   ;;  %v9923_v46 = vadd.f32 %v11803_v44, %v11797_v4  ;;  %v10630_v44 = vld [vmem:[%s11106_s21 + $0xc0] ss:$8 sps:$4 sm:$0xff]  }
 0x349   : > { %v2608_v25 = vpop.f32.mrf.mxu1  ;;  %3211 = vmatpush2.bf16.msra.mxu0 %v10616_v59  ;;  %v10632_v4 = vld [vmem:[%s11106_s21 + $0xc4] ss:$8 sps:$4 sm:$0xff]  }
 0x34a   : > { %10927 = vtanh.f32 %v2735_v61  ;;  %v2737_v62 = vmul.f32 0.5, %v2607_v43  ;;  %v2609_v16 = vadd.f32 %v2608_v25, %v2566_v3  ;;  %v10619_v61 = vld [vmem:[%s11106_s21 + $0xe0] ss:$8 sps:$4 sm:$0xff]   ;;  %3212 = vmatprep.subr.bf16.mxu0 %v10621_v63  ;;  %v10626_v25 = vld [vmem:[%s11106_s21 + $0xd4] ss:$8 sps:$4 sm:$0xff]  }
 0x34c   : > { %10929 = vtanh.f32 %v2737_v62  ;;  %v2738_v15 = vmul.f32 0.5, %v2609_v16  ;;  %v9926_v62 = vadd.f32 %v9925_v38, %v9924_v11 }
 0x34d   : > { %3213 = vmatpush2.bf16.msra.mxu0 %v10619_v61 }
 0x34e   : > { %10931 = vtanh.f32 %v2738_v15  ;;  %3214 = vmatprep.subr.bf16.mxu0 %v10626_v25 }
 0x351   : > { %3215 = vmatpush2.bf16.msra.mxu0 %v10624_v55 }
 0x352   : > { %3216 = vmatprep.subr.bf16.mxu0 %v10632_v4 }
 0x355   : > { %v10926_v53 = vpop.eup %10925  ;;  %3217 = vmatpush2.bf16.msra.mxu0 %v10630_v44 }
 0x356   : > { %v2746_v37 = vadd.f32 1.0, %v10926_v53 }
 0x357   : > { %v10928_v40 = vpop.eup %10927 }
 0x358   : > { %v11806_v60 = vmul.f32 0.5, %v2746_v37  ;;  %v2747_v33 = vadd.f32 1.0, %v10928_v40 }
 0x359   : > { %v10930_v1 = vpop.eup %10929 }
 0x35a   : > { %v2765_v5 = vsub.f32 1.0, %v11806_v60  ;;  %v11812_v6 = vmul.f32 0.5, %v2747_v33  ;;  %v2749_v7 = vadd.f32 1.0, %v10930_v1  ;;  %v10638_v1 = vld [vmem:[%s11106_s21 + $0xb4] ss:$8 sps:$4 sm:$0xff]  }
 0x35b   : > { %v10932_v29 = vpop.eup %10931  ;;  %3218 = vmatprep.subr.bf16.mxu0 %v10638_v1 }
 0x35c   : > { %v2766_v17 = vsub.f32 1.0, %v11812_v6  ;;  %v11818_v19 = vmul.f32 0.5, %v2749_v7  ;;  %v2750_v31 = vadd.f32 1.0, %v10932_v29  ;;  %v10641_v7 = vld [vmem:[%s11106_s21 + $0x124] ss:$8 sps:$4 sm:$0xff]   ;;  %3219 = vmatpush2.bf16.msra.mxu0 %v10636_v58 }
 0x35d   : > { %3257 = vmatprep.subr.bf16.mxu1 %v10641_v7  ;;  %3220 = vmatprep.subr.bf16.mxu0 %v10644_v12 }
 0x35e   : > { %v2768_v20 = vsub.f32 1.0, %v11818_v19  ;;  %v11821_v23 = vmul.f32 0.5, %v2750_v31  ;;  %v10264_v48 = vpack.i.bf16 %v11818_v19, %v11806_v60  ;;  %3258 = vmatpush1.bf16.msra.mxu1 %v10639_v32  ;;  %v10647_v31 = vld [vmem:[%s11106_s21 + $0x114] ss:$8 sps:$4 sm:$0xff]  }
 0x35f   : > { %3259 = vmatprep.subr.bf16.mxu1 %v10647_v31 }
 0x360   : > { %v2769_v28 = vsub.f32 1.0, %v11821_v23  ;;  %10265 = vrot.lane.b32.xlu1 %v10264_v48, %s11055_s2  ;;  %10260 = vrot.lane.b32.xlu0 %v10264_v48, %s11054_s1  ;;  %v9943_v35 = vpop.f32.mrf.mxu0  ;;  %v10650_v48 = vld [vmem:[%s11106_s21 + $0x94] ss:$8 sps:$4 sm:$0xff]  }
 0x361   : > { %3221 = vmatpush2.bf16.msra.mxu0 %v10642_v13 }
 0x362   : > { %v9944_v45 = vpop.f32.mrf.mxu0  ;;  %3260 = vmatpush1.bf16.msra.mxu1 %v10645_v27  ;;  %3222 = vmatprep.subr.bf16.mxu0 %v10650_v48 }
 0x363   : > { %v9945_v52 = vadd.f32 %v9944_v45, %v9943_v35  ;;  %3261 = vmatprep.subr.bf16.mxu1 %v10653_v26 }
 0x364   : > { %v9946_v54 = vpop.f32.mrf.mxu0 }
 0x365   : > { %v2687_v3 = vadd.f32 %v9945_v52, %v9923_v46  ;;  %3223 = vmatpush2.bf16.msra.mxu0 %v10648_v24 }
 0x366   : > { %v9947_v57 = vpop.f32.mrf.mxu0  ;;  %3262 = vmatpush1.bf16.msra.mxu1 %v10651_v9  ;;  %3224 = vmatprep.subr.bf16.mxu0 %v10656_v36 }
 0x367   : > { %v9948_v0 = vadd.f32 %v9947_v57, %v9946_v54  ;;  %v10294_v54 = vpack.i.bf16 %v2768_v20, %v2765_v5 }
 0x369   : > { %v2690_v22 = vadd.f32 %v9948_v0, %v9926_v62  ;;  %3225 = vmatpush2.bf16.msra.mxu0 %v10654_v41 }
 0x36f   : > { %v2727_v43 = vpop.f32.mrf.mxu1 }
 0x370   : > { %v2728_v16 = vadd.f32 %v2727_v43, %v2687_v3 }
 0x371   : > { %v2729_v15 = vpop.f32.mrf.mxu1 }
 0x372   : > { %v2736_v10 = vmul.f32 0.5, %v2728_v16 }
 0x373   : > { %v2730_v53 = vpop.f32.mrf.mxu1 }
 0x374   : > { %10933 = vtanh.f32 %v2736_v10  ;;  %v2731_v37 = vadd.f32 %v2730_v53, %v2690_v22 }
 0x375   : > { %v2732_v21 = vpop.f32.mrf.mxu1 }
 0x376   : > { %v2739_v40 = vmul.f32 0.5, %v2731_v37 }
 0x378   : > { %10935 = vtanh.f32 %v2739_v40 }
 0x381   : > { %v10934_v56 = vpop.eup %10933 }
 0x382   : > { %v2748_v33 = vadd.f32 1.0, %v10934_v56 }
 0x384   : > { %v2754_v2 = vmul.f32 0.5, %v2748_v33 }
 0x385   : > { %v10936_v8 = vpop.eup %10935 }
 0x386   : > { %2761 = vst.msk [vmem:[#allocation4 + $0x10] sm:$0xff] %vm2760_vm7, %v2754_v2  ;;  %v2767_v29 = vsub.f32 1.0, %v2754_v2  ;;  %v2751_v11 = vadd.f32 1.0, %v10936_v8 }
 0x388   : > { %2773 = vst.msk [vmem:[#allocation4 + $0x40] sm:$0xff] %vm2760_vm7, %v2767_v29  ;;  %v2757_v14 = vmul.f32 0.5, %v2751_v11 }
 0x38a   : > { %2764 = vst.msk [vmem:[#allocation4 + $0x28] sm:$0xff] %vm2760_vm7, %v2757_v14  ;;  %v2770_v30 = vsub.f32 1.0, %v2757_v14 }
 0x38c   : > { %2776 = vst.msk [vmem:[#allocation4 + $0x58] sm:$0xff] %vm2760_vm7, %v2770_v30  ;;  %vm3365_vm7 = vcmask 359424  }
 0x38d   : > { %v2779_v38 = vld [vmem:[#allocation4 + $0x10] sm:$0xff] }
 0x38e   : > { %v10274_v35 = vpack.i.bf16 %v2779_v38, %v11812_v6 }
 0x38f   : > { %v11865_v39 = vld [vmem:[#allocation4 + $0x40] sm:$0xff] }
 0x390   : > { %10275 = vrot.lane.b32.xlu1 %v10274_v35, %s11055_s2  ;;  %10270 = vrot.lane.b32.xlu0 %v10274_v35, %s11054_s1  ;;  %v10279_v47 = vpack.i.bf16 %v11865_v39, %v2766_v17 }
 0x391   : > { %v2782_v45 = vld [vmem:[#allocation4 + $0x28] sm:$0xff] }
 0x392   : > { %v10284_v50 = vpack.i.bf16 %v2782_v45, %v11821_v23 }
 0x393   : > { %v11876_v51 = vld [vmem:[#allocation4 + $0x58] sm:$0xff] }
 0x394   : > { %10280 = vrot.lane.b32.xlu0 %v10279_v47, %s11054_s1  ;;  %10285 = vrot.lane.b32.xlu1 %v10284_v50, %s11054_s1  ;;  %v10304_v49 = vpack.i.bf16 %v11876_v51, %v2769_v28 }
 0x398   : > { %10290 = vrot.lane.b32.xlu0 %v10284_v50, %s11055_s2  ;;  %10300 = vrot.lane.b32.xlu1 %v10279_v47, %s11055_s2 }
 0x39c   : > { %10295 = vrot.lane.b32.xlu0 %v10294_v54, %s11054_s1  ;;  %10305 = vrot.lane.b32.xlu1 %v10304_v49, %s11054_s1 }
 0x3a0   : > { %10310 = vrot.lane.b32.xlu0 %v10304_v49, %s11055_s2  ;;  %10315 = vrot.lane.b32.xlu1 %v10294_v54, %s11055_s2 }
 0x3d2   : > { %v10266_v52 = vpop.permute.xlu1 %10265  ;;  %v10261_v59 = vpop.permute.xlu0 %10260 }
 0x3d3   : > { %v10262_v3 = vunpack.i.l.bf16 %v10261_v59  ;;  %v10267_v10 = vunpack.i.l.bf16 %v10266_v52  ;;  %v10263_v53 = vunpack.i.h.bf16 %v10261_v59  ;;  %v10268_v21 = vunpack.i.h.bf16 %v10266_v52 }
 0x402   : > { %v10276_v57 = vpop.permute.xlu1 %10275  ;;  %v10271_v63 = vpop.permute.xlu0 %10270 }
 0x403   : > { %v10273_v46 = vunpack.i.h.bf16 %v10271_v63  ;;  %v10272_v0 = vunpack.i.l.bf16 %v10271_v63  ;;  %v10278_v61 = vunpack.i.h.bf16 %v10276_v57  ;;  %v10277_v43 = vunpack.i.l.bf16 %v10276_v57 }
 0x405   : > { %v2826_v25 = vsel %vm913_vm3, %v10272_v0, %v10273_v46  ;;  %v2825_v62 = vsel %vm913_vm3, %v10262_v3, %v10272_v0  ;;  %v2847_v22 = vmax.f32 %v2779_v38, %v10273_v46  ;;  %v2881_v40 = vsel %vm924_vm4, %v10267_v10, %v10277_v43 }
 0x406   : > { %v10281_v16 = vpop.permute.xlu0 %10280  ;;  %v10286_v15 = vpop.permute.xlu1 %10285  ;;  %v2846_v37 = vmax.f32 %v11812_v6, %v2826_v25  ;;  %v2845_v44 = vmax.f32 %v11806_v60, %v2825_v62  ;;  %v2882_v56 = vsel %vm924_vm4, %v10277_v43, %v10278_v61  ;;  %v11071_v60 = vmov 0.0  }
 0x407   : > { %v10288_v55 = vunpack.i.h.bf16 %v10286_v15  ;;  %v10287_v4 = vunpack.i.l.bf16 %v10286_v15  ;;  %v10283_v33 = vunpack.i.h.bf16 %v10281_v16  ;;  %v10282_v1 = vunpack.i.l.bf16 %v10281_v16  ;;  %3310 = vst.msk [vmem:[#allocation6] sm:$0xff] %vm3309_vm0, %v11071_v60  ;;  %3311 = vst.msk [vmem:[#allocation6 + $0x10] sm:$0xff] %vm3309_vm0, %v11071_v60 }
 0x408   : > { %v2903_v32 = vmax.f32 %v2847_v22, %v10278_v61  ;;  %v2902_v27 = vmax.f32 %v2846_v37, %v2882_v56  ;;  %3312 = vst.msk [vmem:[#allocation6 + $0x20] sm:$0xff] %vm3309_vm0, %v11071_v60  ;;  %3313 = vst.msk [vmem:[#allocation6 + $0x30] sm:$0xff] %vm3309_vm0, %v11071_v60 }
 0x409   : > { %v2827_v58 = vsel %vm913_vm3, %v10263_v53, %v10287_v4  ;;  %v2828_v2 = vsel %vm913_vm3, %v10287_v4, %v10288_v55  ;;  %v2850_v29 = vmax.f32 %v2782_v45, %v10288_v55  ;;  %v2830_v38 = vsel %vm913_vm3, %v10282_v1, %v10283_v33  ;;  %4186 = vst.msk [vmem:[#allocation8] sm:$0xff] %vm3309_vm0, %v11071_v60 }
 0x40a   : > { %v10291_v7 = vpop.permute.xlu0 %10290  ;;  %v10301_v8 = vpop.permute.xlu1 %10300  ;;  %v2848_v13 = vmax.f32 %v11818_v19, %v2827_v58  ;;  %v2849_v31 = vmax.f32 %v11821_v23, %v2828_v2  ;;  %v2901_v45 = vmax.f32 %v2845_v44, %v2881_v40  ;;  %v2853_v63 = vmax.f32 %v11865_v39, %v10283_v33  ;;  %4187 = vst.msk [vmem:[#allocation8 + $0x8] sm:$0xff] %vm3309_vm0, %v11071_v60 }
 0x40b   : > { %v10293_v11 = vunpack.i.h.bf16 %v10291_v7  ;;  %v10292_v12 = vunpack.i.l.bf16 %v10291_v7  ;;  %v10303_v14 = vunpack.i.h.bf16 %v10301_v8  ;;  %v10302_v24 = vunpack.i.l.bf16 %v10301_v8  ;;  %4188 = vst.msk [vmem:[#allocation8 + $0x10] sm:$0xff] %vm3309_vm0, %v11071_v60  ;;  %4189 = vst.msk [vmem:[#allocation8 + $0x18] sm:$0xff] %vm3309_vm0, %v11071_v60 }
 0x40c   : > { %v2852_v0 = vmax.f32 %v2766_v17, %v2830_v38  ;;  %4190 = vst.msk [vmem:[#allocation8 + $0x20] sm:$0xff] %vm3309_vm0, %v11071_v60  ;;  %4191 = vst.msk [vmem:[#allocation8 + $0x28] sm:$0xff] %vm3309_vm0, %v11071_v60 }
 0x40d   : > { %v2883_v30 = vsel %vm924_vm4, %v10268_v21, %v10292_v12  ;;  %v2906_v48 = vmax.f32 %v2850_v29, %v10293_v11  ;;  %v2884_v26 = vsel %vm924_vm4, %v10292_v12, %v10293_v11  ;;  %v2886_v3 = vsel %vm924_vm4, %v10302_v24, %v10303_v14  ;;  %4192 = vst.msk [vmem:[#allocation8 + $0x30] sm:$0xff] %vm3309_vm0, %v11071_v60 }
 0x40e   : > { %v2904_v9 = vmax.f32 %v2848_v13, %v2883_v30  ;;  %v10296_v35 = vpop.permute.xlu0 %10295  ;;  %v10306_v36 = vpop.permute.xlu1 %10305  ;;  %v2905_v41 = vmax.f32 %v2849_v31, %v2884_v26  ;;  %v2909_v6 = vmax.f32 %v2853_v63, %v10303_v14  ;;  %v2908_v40 = vmax.f32 %v2852_v0, %v2886_v3  ;;  %4193 = vst.msk [vmem:[#allocation8 + $0x38] sm:$0xff] %vm3309_vm0, %v11071_v60 }
 0x40f   : > { %v2915_v47 = vpack.c.bf16 %v2906_v48, %v2903_v32  ;;  %v10298_v50 = vunpack.i.h.bf16 %v10296_v35  ;;  %v10297_v54 = vunpack.i.l.bf16 %v10296_v35  ;;  %v10308_v49 = vunpack.i.h.bf16 %v10306_v36  ;;  %6707 = vst.msk [vmem:[#allocation14] sm:$0xff] %vm3309_vm0, %v11071_v60  ;;  %6708 = vst.msk [vmem:[#allocation14 + $0x10] sm:$0xff] %vm3309_vm0, %v11071_v60 }
 0x410   : > { %v10307_v52 = vunpack.i.l.bf16 %v10306_v36  ;;  %v2914_v59 = vpack.c.bf16 %v2905_v41, %v2902_v27  ;;  %v2913_v57 = vpack.c.bf16 %v2904_v9, %v2901_v45  ;;  %6709 = vst.msk [vmem:[#allocation14 + $0x20] sm:$0xff] %vm3309_vm0, %v11071_v60  ;;  %6710 = vst.msk [vmem:[#allocation14 + $0x30] sm:$0xff] %vm3309_vm0, %v11071_v60 }
 0x411   : > { %v2829_v46 = vsel %vm913_vm3, %v10297_v54, %v10282_v1  ;;  %9546 = vmatmul.mubr.msk.bf16.vlgmr.msra.gmra.mxu1 %vm3177_vm8, %v2915_v47  ;;  %v2856_v61 = vmax.f32 %v11876_v51, %v10308_v49  ;;  %6711 = vst.msk [vmem:[#allocation14 + $0x40] sm:$0xff] %vm3309_vm0, %v11071_v60  ;;  %6712 = vst.msk [vmem:[#allocation14 + $0x50] sm:$0xff] %vm3309_vm0, %v11071_v60 }
 0x412   : > { %v2831_v43 = vsel %vm913_vm3, %v10298_v50, %v10307_v52  ;;  %v2832_v25 = vsel %vm913_vm3, %v10307_v52, %v10308_v49  ;;  %v10311_v62 = vpop.permute.xlu0 %10310  ;;  %v10316_v16 = vpop.permute.xlu1 %10315  ;;  %3226 = vmatprep.mubr.bf16.mxu0 %v2914_v59  ;;  %3289 = vmatprep.mubr.bf16.mxu1 %v11069_v34  ;;  %v2851_v51 = vmax.f32 %v2765_v5, %v2829_v46 }
 0x413   : > { %v10313_v39 = vunpack.i.h.bf16 %v10311_v62  ;;  %v10312_v15 = vunpack.i.l.bf16 %v10311_v62  ;;  %v10318_v10 = vunpack.i.h.bf16 %v10316_v16  ;;  %v10317_v22 = vunpack.i.l.bf16 %v10316_v16  ;;  %3227 = vmatmul.mubr.bf16.vlgmr.msra.gmra.mxu0 %v2913_v57  ;;  %6713 = vst.msk [vmem:[#allocation14 + $0x60] sm:$0xff] %vm3309_vm0, %v11071_v60  ;;  %6714 = vst.msk [vmem:[#allocation14 + $0x70] sm:$0xff] %vm3309_vm0, %v11071_v60 }
 0x414   : > { %v2855_v17 = vmax.f32 %v2769_v28, %v2832_v25  ;;  %v2854_v55 = vmax.f32 %v2768_v20, %v2831_v43  ;;  %3315 = vst.msk [vmem:[#allocation6 + $0x8] sm:$0xff] %vm3314_vm12, %v11071_v60  ;;  %3316 = vst.msk [vmem:[#allocation6 + $0x18] sm:$0xff] %vm3314_vm12, %v11071_v60 }
 0x415   : > { %v2912_v53 = vmax.f32 %v2856_v61, %v10313_v39  ;;  %v2888_v4 = vsel %vm924_vm4, %v10312_v15, %v10313_v39  ;;  %v2885_v37 = vsel %vm924_vm4, %v10317_v22, %v10302_v24  ;;  %v2887_v21 = vsel %vm924_vm4, %v10318_v10, %v10312_v15  ;;  %3317 = vst.msk [vmem:[#allocation6 + $0x28] sm:$0xff] %vm3314_vm12, %v11071_v60 }
 0x416   : > { %v2911_v44 = vmax.f32 %v2855_v17, %v2888_v4  ;;  %v2907_v56 = vmax.f32 %v2851_v51, %v2885_v37  ;;  %v2910_v33 = vmax.f32 %v2854_v55, %v2887_v21  ;;  %3318 = vst.msk [vmem:[#allocation6 + $0x38] sm:$0xff] %vm3314_vm12, %v11071_v60  ;;  %v10657_v17 = vld [vmem:[%s11111_s25] sm:$0xff]   ;;  %vm13624_vm12 = vcmask 1043456  }
 0x417   : > { %v2918_v1 = vpack.c.bf16 %v2912_v53, %v2909_v6  ;;  %v10659_v53 = vld [vmem:[%s11111_s25 + $0x10] sm:$0xff]   ;;  %4201 = vst.msk [vmem:[#allocation8 + $0x30] sm:$0xff] %vm4194_vm2, %v11071_v60  ;;  %4195 = vst.msk [vmem:[#allocation8] sm:$0xff] %vm4194_vm2, %v11071_v60 }
 0x418   : > { %v2917_v23 = vpack.c.bf16 %v2911_v44, %v2908_v40  ;;  %v2916_v28 = vpack.c.bf16 %v2910_v33, %v2907_v56  ;;  %v10658_v44 = vld [vmem:[%s11111_s25 + $0x8] sm:$0xff]   ;;  %v10660_v56 = vld [vmem:[%s11111_s25 + $0x18] sm:$0xff]   ;;  %v3734_v33 = vld [vmem:[%s11116_s29] sm:$0xff]  ;;  %4196 = vst.msk [vmem:[#allocation8 + $0x8] sm:$0xff] %vm4194_vm2, %v11071_v60 }
 0x419   : > { %9547 = vmatmul.mubr.msk.bf16.gmra.mxu1 %vm3177_vm8, %v2918_v1  ;;  %v3736_v1 = vld [vmem:[%s11116_s29 + $0x10] sm:$0xff]  ;;  %4197 = vst.msk [vmem:[#allocation8 + $0x10] sm:$0xff] %vm4194_vm2, %v11071_v60  ;;  %4198 = vst.msk [vmem:[#allocation8 + $0x18] sm:$0xff] %vm4194_vm2, %v11071_v60 }
 0x41a   : > { %3236 = vmatprep.mubr.bf16.mxu0 %v2917_v23  ;;  %3484 = vmatprep.mubr.bf16.mxu1 %v11069_v34  ;;  %v3738_v23 = vld [vmem:[%s11116_s29 + $0x20] sm:$0xff]  ;;  %4199 = vst.msk [vmem:[#allocation8 + $0x20] sm:$0xff] %vm4194_vm2, %v11071_v60  ;;  %4200 = vst.msk [vmem:[#allocation8 + $0x28] sm:$0xff] %vm4194_vm2, %v11071_v60 }
 0x41b   : > { %3237 = vmatmul.mubr.bf16.gmra.mxu0 %v2916_v28  ;;  %v3735_v28 = vld [vmem:[%s11116_s29 + $0x8] sm:$0xff]  ;;  %4202 = vst.msk [vmem:[#allocation8 + $0x38] sm:$0xff] %vm4194_vm2, %v11071_v60  ;;  %vm4235_vm2 = vcmask 703496  }
 0x41c   : > { %3569 = vmatprep.mubr.bf16.mxu0 %v11069_v34 }
 0x4d1   : > { %v3281_v5 = vpop.f32.mrf.mxu1 }
 0x4d3   : > { %v3228_v19 = vpop.f32.mrf.mxu0  ;;  %v3283_v20 = vpop.f32.mrf.mxu1 }
 0x4d4   : > { %v3282_v58 = vadd.f32 %v3281_v5, %v3228_v19  ;;  %v3740_v5 = vld [vmem:[%s11116_s29 + $0x30] sm:$0xff]  ;;  %v3737_v19 = vld [vmem:[%s11116_s29 + $0x18] sm:$0xff] }
 0x4d5   : > { %v3230_v2 = vpop.f32.mrf.mxu0  ;;  %v3285_v7 = vpop.f32.mrf.mxu1 }
 0x4d6   : > { %3300 = vst [vmem:[#allocation5] sm:$0xff] %v3282_v58  ;;  %v3284_v8 = vadd.f32 %v3283_v20, %v3230_v2  ;;  %3335 = vrot.lane.b32.xlu0 %v3282_v58, %s11072_s11  ;;  %v3739_v20 = vld [vmem:[%s11116_s29 + $0x28] sm:$0xff]  ;;  %v3741_v58 = vld [vmem:[%s11116_s29 + $0x38] sm:$0xff] }
 0x4d7   : > { %v3232_v32 = vpop.f32.mrf.mxu0  ;;  %v3287_v29 = vpop.f32.mrf.mxu1 }
 0x4d8   : > { %3302 = vst.msk [vmem:[#allocation5 + $0x8] sm:$0xff] %vm3301_vm13, %v3284_v8  ;;  %v3286_v11 = vadd.f32 %v3285_v7, %v3232_v32 }
 0x4d9   : > { %v3234_v12 = vpop.f32.mrf.mxu0  ;;  %v3291_v13 = vpop.f32.mrf.mxu1 }
 0x4da   : > { %3303 = vst [vmem:[#allocation5 + $0x10] sm:$0xff] %v3286_v11  ;;  %v3288_v14 = vadd.f32 %v3287_v29, %v3234_v12 }
 0x4db   : > { %v3238_v31 = vpop.f32.mrf.mxu0  ;;  %v3293_v27 = vpop.f32.mrf.mxu1 }
 0x4dc   : > { %3304 = vst.msk [vmem:[#allocation5 + $0x18] sm:$0xff] %vm3301_vm13, %v3288_v14  ;;  %v3292_v30 = vadd.f32 %v3291_v13, %v3238_v31 }
 0x4dd   : > { %v3240_v48 = vpop.f32.mrf.mxu0  ;;  %v3295_v24 = vpop.f32.mrf.mxu1 }
 0x4de   : > { %3305 = vst [vmem:[#allocation5 + $0x20] sm:$0xff] %v3292_v30  ;;  %v3294_v26 = vadd.f32 %v3293_v27, %v3240_v48  ;;  %3343 = vrot.lane.b32.xlu0 %v3292_v30, %s11072_s11 }
 0x4df   : > { %v3242_v38 = vpop.f32.mrf.mxu0  ;;  %v3320_v9 = vld [vmem:[#allocation5 + $0x8] sm:$0xff]  ;;  %v3297_v36 = vpop.f32.mrf.mxu1 }
 0x4e0   : > { %3306 = vst.msk [vmem:[#allocation5 + $0x28] sm:$0xff] %vm3301_vm13, %v3294_v26  ;;  %v3296_v35 = vadd.f32 %v3295_v24, %v3242_v38  ;;  %3337 = vrot.lane.b32.xlu1 %v3320_v9, %s11072_s11 }
 0x4e1   : > { %v3244_v41 = vpop.f32.mrf.mxu0 }
 0x4e2   : > { %3307 = vst [vmem:[#allocation5 + $0x30] sm:$0xff] %v3296_v35  ;;  %v3298_v45 = vadd.f32 %v3297_v36, %v3244_v41  ;;  %3347 = vrot.lane.b32.xlu0 %v3296_v35, %s11072_s11 }
 0x4e3   : > { %v3322_v54 = vld [vmem:[#allocation5 + $0x18] sm:$0xff] }
 0x4e4   : > { %3308 = vst.msk [vmem:[#allocation5 + $0x38] sm:$0xff] %vm3301_vm13, %v3298_v45  ;;  %v10661_v45 = vld [vmem:[%s11121_s3 + $0x38] sm:$0xff]  }
 0x4e6   : > { %3339 = vrot.lane.b32.xlu0 %v3286_v11, %s11072_s11 }
 0x4e7   : > { %v3324_v47 = vld [vmem:[#allocation5 + $0x28] sm:$0xff] }
 0x4e8   : > { %3345 = vrot.lane.b32.xlu1 %v3324_v47, %s11072_s11  ;;  %v10662_v47 = vld [vmem:[%s11121_s3 + $0x30] sm:$0xff]  }
 0x4eb   : > { %v3326_v50 = vld [vmem:[#allocation5 + $0x38] sm:$0xff] }
 0x4ec   : > { %3349 = vrot.lane.b32.xlu1 %v3326_v50, %s11072_s11  ;;  %v10663_v50 = vld [vmem:[%s11121_s3 + $0x28] sm:$0xff]  }
 0x4f0   : > { %3341 = vrot.lane.b32.xlu1 %v3322_v54, %s11072_s11  ;;  %v10664_v54 = vld [vmem:[%s11121_s3 + $0x20] sm:$0xff]  }
 0x548   : > { %v3336_v49 = vpop.permute.xlu0 %3335 }
 0x549   : > { %3364 = vst.msk [vmem:[#allocation6] sm:$0xff] %vm3363_vm14, %v3336_v49 }
 0x550   : > { %v3344_v52 = vpop.permute.xlu0 %3343  ;;  %v3381_v39 = vld [vmem:[#allocation6] sm:$0xff] }
 0x551   : > { %3369 = vst.msk [vmem:[#allocation6 + $0x20] sm:$0xff] %vm3363_vm14, %v3344_v52 }
 0x552   : > { %v3338_v59 = vpop.permute.xlu1 %3337 }
 0x553   : > { %v3351_v57 = vsel %vm3309_vm0, %v3336_v49, %v3338_v59  ;;  %v10665_v49 = vld [vmem:[%s11121_s3 + $0x18] sm:$0xff]   ;;  %v10667_v59 = vld [vmem:[%s11121_s3 + $0x8] sm:$0xff]  }
 0x554   : > { %3366 = vst.msk [vmem:[#allocation6 + $0x8] sm:$0xff] %vm3365_vm7, %v3351_v57  ;;  %v3348_v63 = vpop.permute.xlu0 %3347 }
 0x555   : > { %3371 = vst.msk [vmem:[#allocation6 + $0x30] sm:$0xff] %vm3363_vm14, %v3348_v63 }
 0x558   : > { %v3340_v46 = vpop.permute.xlu0 %3339  ;;  %v3385_v61 = vld [vmem:[#allocation6 + $0x20] sm:$0xff] }
 0x559   : > { %3367 = vst.msk [vmem:[#allocation6 + $0x10] sm:$0xff] %vm3363_vm14, %v3340_v46 }
 0x55a   : > { %v3346_v0 = vpop.permute.xlu1 %3345 }
 0x55b   : > { %v3353_v3 = vsel %vm3309_vm0, %v3344_v52, %v3346_v0  ;;  %v3382_v37 = vld [vmem:[#allocation6 + $0x8] sm:$0xff]  ;;  %v10666_v52 = vld [vmem:[%s11121_s3 + $0x10] sm:$0xff]  }
 0x55c   : > { %3370 = vst.msk [vmem:[#allocation6 + $0x28] sm:$0xff] %vm3365_vm7, %v3353_v3  ;;  %v3387_v43 = vld [vmem:[#allocation6 + $0x30] sm:$0xff] }
 0x55d   : > { %v3391_v25 = vpack.c.bf16 %v3387_v43, %v3385_v61 }
 0x55e   : > { %v3350_v62 = vpop.permute.xlu1 %3349 }
 0x55f   : > { %v3354_v16 = vsel %vm3309_vm0, %v3348_v63, %v3350_v62  ;;  %3429 = vrot.lane.b32.xlu0 %v3391_v25, %s11054_s1 }
 0x560   : > { %3372 = vst.msk [vmem:[#allocation6 + $0x38] sm:$0xff] %vm3365_vm7, %v3354_v16  ;;  %v3383_v15 = vld [vmem:[#allocation6 + $0x10] sm:$0xff] }
 0x561   : > { %v3389_v10 = vpack.c.bf16 %v3383_v15, %v3381_v39 }
 0x562   : > { %v3342_v22 = vpop.permute.xlu1 %3341 }
 0x563   : > { %v3352_v6 = vsel %vm3309_vm0, %v3340_v46, %v3342_v22  ;;  %3425 = vrot.lane.b32.xlu0 %v3389_v10, %s11054_s1  ;;  %v3386_v51 = vld [vmem:[#allocation6 + $0x28] sm:$0xff] }
 0x564   : > { %3368 = vst.msk [vmem:[#allocation6 + $0x18] sm:$0xff] %vm3365_vm7, %v3352_v6 }
 0x567   : > { %v3388_v55 = vld [vmem:[#allocation6 + $0x38] sm:$0xff]  ;;  %3413 = vrot.lane.b32.xlu0 %v10657_v17, %s11073_s16 }
 0x568   : > { %v3392_v4 = vpack.c.bf16 %v3388_v55, %v3386_v51 }
 0x56a   : > { %3431 = vrot.lane.b32.xlu1 %v3392_v4, %s11054_s1  ;;  %3549 = vmatprep.subr.bf16.mxu0 %v3392_v4 }
 0x56b   : > { %3550 = vmatpush1.bf16.msra.mxu0 %v3391_v25  ;;  %v3384_v21 = vld [vmem:[#allocation6 + $0x18] sm:$0xff]  ;;  %3417 = vrot.lane.b32.xlu0 %v10659_v53, %s11073_s16 }
 0x56c   : > { %v3390_v40 = vpack.c.bf16 %v3384_v21, %v3382_v37 }
 0x56e   : > { %3427 = vrot.lane.b32.xlu1 %v3390_v40, %s11054_s1  ;;  %3551 = vmatprep.subr.bf16.mxu0 %v3390_v40 }
 0x56f   : > { %3552 = vmatpush1.bf16.msra.mxu0 %v3389_v10  ;;  %3622 = vrot.lane.b32.xlu0 %v3391_v25, %s11055_s2 }
 0x570   : > { %4121 = vmatprep.subr.bf16.mxu0 %v11069_v34 }
 0x572   : > { %3415 = vrot.lane.b32.xlu1 %v10658_v44, %s11073_s16  ;;  %9556 = vmatmul.mubr.msk.bf16.vlgmr.msra.gmra.mxu0 %vm1304_vm9, %v10657_v17 }
 0x573   : > { %3618 = vrot.lane.b32.xlu0 %v3389_v10, %s11055_s2  ;;  %3579 = vmatprep.mubr.bf16.mxu0 %v11069_v34 }
 0x574   : > { %4122 = vmatpush1.bf16.msra.mxu0 %v10661_v45 }
 0x575   : > { %4123 = vmatprep.subr.bf16.mxu0 %v11069_v34 }
 0x576   : > { %3419 = vrot.lane.b32.xlu1 %v10660_v56, %s11073_s16 }
 0x577   : > { %3610 = vrot.lane.b32.xlu0 %v10657_v17, %s11074_s15 }
 0x578   : > { %4124 = vmatpush1.bf16.msra.mxu0 %v10662_v47 }
 0x579   : > { %4125 = vmatprep.subr.bf16.mxu0 %v11069_v34 }
 0x57a   : > { %3624 = vrot.lane.b32.xlu1 %v3392_v4, %s11055_s2  ;;  %9557 = vmatmul.mubr.msk.bf16.gmra.mxu0 %vm1304_vm9, %v10658_v44 }
 0x57b   : > { %3614 = vrot.lane.b32.xlu0 %v10659_v53, %s11074_s15  ;;  %3589 = vmatprep.mubr.bf16.mxu0 %v11069_v34 }
 0x57c   : > { %4126 = vmatpush1.bf16.msra.mxu0 %v10663_v50 }
 0x57d   : > { %4127 = vmatprep.subr.bf16.mxu0 %v11069_v34 }
 0x57e   : > { %3620 = vrot.lane.b32.xlu1 %v3390_v40, %s11055_s2 }
 0x57f   : > { %3744 = vperm.xlu0 %10198, %v3734_v33  }
 0x580   : > { %4128 = vmatpush1.bf16.msra.mxu0 %v10664_v54 }
 0x581   : > { %4129 = vmatprep.subr.bf16.mxu0 %v11069_v34 }
 0x582   : > { %3612 = vrot.lane.b32.xlu1 %v10658_v44, %s11074_s15  ;;  %9558 = vmatmul.mubr.msk.bf16.gmra.mxu0 %vm1304_vm9, %v10659_v53 }
 0x583   : > { %3754 = vperm.xlu0 %10198, %v3736_v1   ;;  %3599 = vmatprep.mubr.bf16.mxu0 %v11069_v34 }
 0x584   : > { %4130 = vmatpush1.bf16.msra.mxu0 %v10665_v49 }
 0x585   : > { %4131 = vmatprep.subr.bf16.mxu0 %v11069_v34 }
 0x586   : > { %3616 = vrot.lane.b32.xlu1 %v10660_v56, %s11074_s15 }
 0x587   : > { %3764 = vperm.xlu0 %10198, %v3738_v23  }
 0x588   : > { %4132 = vmatpush1.bf16.msra.mxu0 %v10666_v52 }
 0x589   : > { %4133 = vmatprep.subr.bf16.mxu0 %v11069_v34 }
 0x58a   : > { %3749 = vperm.xlu1 %10197, %v3735_v28   ;;  %9559 = vmatmul.mubr.msk.bf16.gmra.mxu0 %vm1304_vm9, %v10660_v56 }
 0x58b   : > { %3774 = vperm.xlu0 %10198, %v3740_v5  }
 0x58c   : > { %4134 = vmatpush1.bf16.msra.mxu0 %v10667_v59 }
 0x58d   : > { %4135 = vmatprep.subr.bf16.mxu0 %v11069_v34 }
 0x58e   : > { %3759 = vperm.xlu1 %10197, %v3737_v19  }
 0x592   : > { %3769 = vperm.xlu1 %10197, %v3739_v20  }
 0x596   : > { %3779 = vperm.xlu1 %10197, %v3741_v58  }
 0x5d1   : > { %v3430_v2 = vpop.permute.xlu0 %3429 }
 0x5d5   : > { %v3426_v7 = vpop.permute.xlu0 %3425 }
 0x5d9   : > { %v3414_v29 = vpop.permute.xlu0 %3413 }
 0x5dc   : > { %v3432_v8 = vpop.permute.xlu1 %3431 }
 0x5dd   : > { %3464 = vmatprep.subr.bf16.mxu1 %v3432_v8  ;;  %v3435_v32 = vsel %vm913_vm3, %v3430_v2, %v3432_v8  ;;  %v3418_v14 = vpop.permute.xlu0 %3417 }
 0x5de   : > { %3465 = vmatpush1.bf16.msra.mxu1 %v3435_v32 }
 0x5e0   : > { %v3428_v11 = vpop.permute.xlu1 %3427 }
 0x5e1   : > { %3466 = vmatprep.subr.bf16.mxu1 %v3428_v11  ;;  %v3434_v12 = vsel %vm913_vm3, %v3426_v7, %v3428_v11  ;;  %v3623_v27 = vpop.permute.xlu0 %3622 }
 0x5e2   : > { %3467 = vmatpush1.bf16.msra.mxu1 %v3434_v12 }
 0x5e4   : > { %v3416_v13 = vpop.permute.xlu1 %3415 }
 0x5e5   : > { %9552 = vmatmul.mubr.msk.bf16.vlgmr.msra.gmra.mxu1 %vm1304_vm9, %v3414_v29  ;;  %v3619_v24 = vpop.permute.xlu0 %3618 }
 0x5e6   : > { %3494 = vmatprep.mubr.bf16.mxu1 %v11069_v34 }
 0x5e8   : > { %v3420_v31 = vpop.permute.xlu1 %3419 }
 0x5e9   : > { %v3611_v9 = vpop.permute.xlu0 %3610 }
 0x5ec   : > { %v3625_v30 = vpop.permute.xlu1 %3624 }
 0x5ed   : > { %9553 = vmatmul.mubr.msk.bf16.gmra.mxu1 %vm1304_vm9, %v3416_v13  ;;  %3657 = vmatprep.subr.bf16.mxu1 %v3625_v30  ;;  %v3628_v48 = vsel %vm924_vm4, %v3623_v27, %v3625_v30  ;;  %v3615_v36 = vpop.permute.xlu0 %3614 }
 0x5ee   : > { %3658 = vmatpush1.bf16.msra.mxu1 %v3628_v48  ;;  %3504 = vmatprep.mubr.bf16.mxu1 %v11069_v34 }
 0x5f0   : > { %v3621_v26 = vpop.permute.xlu1 %3620 }
 0x5f1   : > { %3659 = vmatprep.subr.bf16.mxu1 %v3621_v26  ;;  %v3627_v38 = vsel %vm924_vm4, %v3619_v24, %v3621_v26 }
 0x5f2   : > { %3660 = vmatpush1.bf16.msra.mxu1 %v3627_v38 }
 0x5f4   : > { %v3613_v35 = vpop.permute.xlu1 %3612 }
 0x5f5   : > { %9554 = vmatmul.mubr.msk.bf16.gmra.mxu1 %vm1304_vm9, %v3418_v14 }
 0x5f6   : > { %3514 = vmatprep.mubr.bf16.mxu1 %v11069_v34 }
 0x5f8   : > { %v3617_v41 = vpop.permute.xlu1 %3616 }
 0x5fa   : > { %v3745_v19 = vpop.permute.xlu0 %3744 }
 0x5fd   : > { %9555 = vmatmul.mubr.msk.bf16.gmra.mxu1 %vm1304_vm9, %v3420_v31 }
 0x5fe   : > { %3677 = vmatprep.mubr.bf16.mxu1 %v11069_v34 }
 0x605   : > { %9560 = vmatmul.mubr.msk.bf16.vlgmr.msra.gmra.mxu1 %vm1304_vm9, %v3611_v9  ;;  %v3750_v13 = vpop.permute.xlu1 %3749 }
 0x606   : > { %3687 = vmatprep.mubr.bf16.mxu1 %v11069_v34 }
 0x60d   : > { %9561 = vmatmul.mubr.msk.bf16.gmra.mxu1 %vm1304_vm9, %v3613_v35  ;;  %v3755_v35 = vpop.permute.xlu0 %3754 }
 0x60e   : > { %3697 = vmatprep.mubr.bf16.mxu1 %v11069_v34 }
 0x615   : > { %9562 = vmatmul.mubr.msk.bf16.gmra.mxu1 %vm1304_vm9, %v3615_v36 }
 0x616   : > { %3707 = vmatprep.mubr.bf16.mxu1 %v11069_v34 }
 0x61d   : > { %9563 = vmatmul.mubr.msk.bf16.gmra.mxu1 %vm1304_vm9, %v3617_v41 }
 0x632   : > { %v3571_v57 = vpop.f32.mrf.mxu0 }
 0x634   : > { %v3573_v46 = vpop.f32.mrf.mxu0 }
 0x636   : > { %v3575_v61 = vpop.f32.mrf.mxu0 }
 0x638   : > { %v3577_v62 = vpop.f32.mrf.mxu0 }
 0x63a   : > { %v3581_v15 = vpop.f32.mrf.mxu0 }
 0x63c   : > { %v3583_v6 = vpop.f32.mrf.mxu0 }
 0x63e   : > { %v3585_v55 = vpop.f32.mrf.mxu0 }
 0x640   : > { %v3587_v37 = vpop.f32.mrf.mxu0 }
 0x642   : > { %v3591_v44 = vpop.f32.mrf.mxu0 }
 0x644   : > { %v3593_v28 = vpop.f32.mrf.mxu0 }
 0x646   : > { %v3595_v29 = vpop.f32.mrf.mxu0 }
 0x648   : > { %v3597_v26 = vpop.f32.mrf.mxu0 }
 0x64a   : > { %v3601_v49 = vpop.f32.mrf.mxu0 }
 0x6a5   : > { %v3486_v63 = vpop.f32.mrf.mxu1 }
 0x6a6   : > { %v3572_v33 = vadd.f32 %v3571_v57, %v3486_v63  ;;  %v3760_v57 = vpop.permute.xlu1 %3759 }
 0x6a7   : > { %v3488_v0 = vpop.f32.mrf.mxu1 }
 0x6a8   : > { %v3574_v23 = vadd.f32 %v3573_v46, %v3488_v0 }
 0x6a9   : > { %v3490_v3 = vpop.f32.mrf.mxu1 }
 0x6aa   : > { %v3576_v58 = vadd.f32 %v3575_v61, %v3490_v3 }
 0x6ab   : > { %v3492_v43 = vpop.f32.mrf.mxu1 }
 0x6ac   : > { %v3578_v32 = vadd.f32 %v3577_v62, %v3492_v43 }
 0x6ad   : > { %v3496_v25 = vpop.f32.mrf.mxu1 }
 0x6ae   : > { %v3582_v31 = vadd.f32 %v3581_v15, %v3496_v25  ;;  %v3603_v25 = vpop.f32.mrf.mxu0  ;;  %v3765_v15 = vpop.permute.xlu0 %3764 }
 0x6af   : > { %v3498_v16 = vpop.f32.mrf.mxu1 }
 0x6b0   : > { %v3584_v24 = vadd.f32 %v3583_v6, %v3498_v16 }
 0x6b1   : > { %v3500_v39 = vpop.f32.mrf.mxu1 }
 0x6b2   : > { %v3586_v41 = vadd.f32 %v3585_v55, %v3500_v39  ;;  %v10668_v55 = vld [vmem:[%s11121_s3] sm:$0xff]  }
 0x6b3   : > { %v3502_v10 = vpop.f32.mrf.mxu1  ;;  %4136 = vmatpush1.bf16.msra.mxu0 %v10668_v55 }
 0x6b4   : > { %v3588_v54 = vadd.f32 %v3587_v37, %v3502_v10  ;;  %4147 = vmatprep.subr.bf16.mxu0 %v11069_v34 }
 0x6b5   : > { %v3506_v22 = vpop.f32.mrf.mxu1 }
 0x6b6   : > { %v3592_v46 = vadd.f32 %v3591_v44, %v3506_v22 }
 0x6b7   : > { %v3508_v17 = vpop.f32.mrf.mxu1 }
 0x6b8   : > { %v3594_v43 = vadd.f32 %v3593_v28, %v3508_v17  ;;  %v3605_v28 = vpop.f32.mrf.mxu0 }
 0x6b9   : > { %v12063_v51 = vpop.f32.mrf.mxu1 }
 0x6ba   : > { %v3596_v10 = vadd.f32 %v3595_v29, %v12063_v51 }
 0x6bb   : > { %v12065_v53 = vpop.f32.mrf.mxu1 }
 0x6bd   : > { %v12067_v4 = vpop.f32.mrf.mxu1 }
 0x6bf   : > { %v12069_v21 = vpop.f32.mrf.mxu1 }
 0x6c1   : > { %v12071_v40 = vpop.f32.mrf.mxu1 }
 0x6c3   : > { %v12073_v56 = vpop.f32.mrf.mxu1 }
 0x6c5   : > { %v3679_v1 = vpop.f32.mrf.mxu1 }
 0x6c6   : > { %v3718_v5 = vadd.f32 %v3679_v1, %v3572_v33  ;;  %v3598_v33 = vadd.f32 %v3597_v26, %v12065_v53  ;;  %v10669_v1 = vld [vmem:[%s11121_s3 + $0x50] sm:$0x1f]   ;;  %v3770_v53 = vpop.permute.xlu1 %3769 }
 0x6c7   : > { %v3681_v20 = vpop.f32.mrf.mxu1 }
 0x6c8   : > { %v3782_v2 = vadd.f32 %v3745_v19, %v3718_v5  ;;  %v3719_v7 = vadd.f32 %v3681_v20, %v3574_v23  ;;  %v4116_v23 = vsel %vm13624_vm12, 4294967295, %v11070_v42  ;;  %vm4101_vm12 = vcmask 334848  }
 0x6c9   : > { %v3683_v8 = vpop.f32.mrf.mxu1 }
 0x6ca   : > { %10937 = vtanh.f32 %v3782_v2  ;;  %v3783_v11 = vadd.f32 %v3745_v19, %v3719_v7  ;;  %v3720_v12 = vadd.f32 %v3683_v8, %v3576_v58  ;;  %v4117_v19 = vsel %vm13626_vm10, %v4116_v23, 0 }
 0x6cb   : > { %v3685_v14 = vpop.f32.mrf.mxu1  ;;  %v4119_v2 = vand.u32 %v10669_v1, %v4117_v19  ;;  %v3602_v7 = vadd.f32 %v3601_v49, %v12067_v4  ;;  %v3775_v4 = vpop.permute.xlu0 %3774  ;;  %v10671_v49 = vld [vmem:[%s11121_s3 + $0x40] sm:$0xff]  }
 0x6cc   : > { %10939 = vtanh.f32 %v3783_v11  ;;  %v3784_v27 = vadd.f32 %v3750_v13, %v3720_v12  ;;  %v3721_v30 = vadd.f32 %v3685_v14, %v3578_v32  ;;  %v3604_v12 = vadd.f32 %v3603_v25, %v12069_v21 }
 0x6cd   : > { %v3689_v48 = vpop.f32.mrf.mxu1  ;;  %4148 = vmatpush2.bf16.msra.mxu0 %v4119_v2 }
 0x6ce   : > { %10941 = vtanh.f32 %v3784_v27  ;;  %v3785_v38 = vadd.f32 %v3750_v13, %v3721_v30  ;;  %v3722_v9 = vadd.f32 %v3689_v48, %v3582_v31  ;;  %v3607_v13 = vpop.f32.mrf.mxu0  ;;  %4149 = vmatprep.subr.bf16.mxu0 %v11069_v34  ;;  %v10670_v48 = vld [vmem:[%s11121_s3 + $0x48] sm:$0xff]  }
 0x6cf   : > { %v3691_v36 = vpop.f32.mrf.mxu1 }
 0x6d0   : > { %10943 = vtanh.f32 %v3785_v38  ;;  %v3786_v45 = vadd.f32 %v3755_v35, %v3722_v9  ;;  %v3723_v47 = vadd.f32 %v3691_v36, %v3584_v24  ;;  %v3606_v24 = vadd.f32 %v3605_v28, %v12071_v40 }
 0x6d1   : > { %v3693_v50 = vpop.f32.mrf.mxu1  ;;  %v3608_v9 = vadd.f32 %v3607_v13, %v12073_v56  ;;  %4150 = vmatpush2.bf16.msra.mxu0 %v10670_v48 }
 0x6d2   : > { %10945 = vtanh.f32 %v3786_v45  ;;  %v3787_v52 = vadd.f32 %v3755_v35, %v3723_v47  ;;  %v3724_v59 = vadd.f32 %v3693_v50, %v3586_v41  ;;  %4151 = vmatprep.subr.bf16.mxu0 %v11069_v34  ;;  %v3780_v50 = vpop.permute.xlu1 %3779 }
 0x6d3   : > { %v3695_v63 = vpop.f32.mrf.mxu1 }
 0x6d4   : > { %10947 = vtanh.f32 %v3787_v52  ;;  %v3788_v0 = vadd.f32 %v3760_v57, %v3724_v59  ;;  %v3725_v3 = vadd.f32 %v3695_v63, %v3588_v54 }
 0x6d5   : > { %v3699_v61 = vpop.f32.mrf.mxu1  ;;  %4152 = vmatpush2.bf16.msra.mxu0 %v10671_v49 }
 0x6d6   : > { %10949 = vtanh.f32 %v3788_v0  ;;  %v3789_v62 = vadd.f32 %v3760_v57, %v3725_v3  ;;  %v3726_v16 = vadd.f32 %v3699_v61, %v3592_v46 }
 0x6d7   : > { %v12075_v39 = vpop.eup %10937  ;;  %v3701_v6 = vpop.f32.mrf.mxu1 }
 0x6d8   : > { %10951 = vtanh.f32 %v3789_v62  ;;  %v3790_v37 = vadd.f32 %v3765_v15, %v3726_v16  ;;  %v3727_v22 = vadd.f32 %v3701_v6, %v3594_v43 }
 0x6d9   : > { %v10940_v44 = vpop.eup %10939  ;;  %v3703_v17 = vpop.f32.mrf.mxu1 }
 0x6da   : > { %3815 = vst.msk [vmem:[#allocation7 + $0x8] sm:$0xff] %vm3301_vm13, %v10940_v44  ;;  %10953 = vtanh.f32 %v3790_v37  ;;  %v3791_v51 = vadd.f32 %v3765_v15, %v3727_v22  ;;  %v3728_v5 = vadd.f32 %v3703_v17, %v3596_v10 }
 0x6db   : > { %v12086_v20 = vpop.eup %10941  ;;  %v3705_v58 = vpop.f32.mrf.mxu1 }
 0x6dc   : > { %10955 = vtanh.f32 %v3791_v51  ;;  %v3792_v8 = vadd.f32 %v3770_v53, %v3728_v5  ;;  %v3729_v32 = vadd.f32 %v3705_v58, %v3598_v33 }
 0x6dd   : > { %v10944_v29 = vpop.eup %10943  ;;  %v3709_v11 = vpop.f32.mrf.mxu1 }
 0x6de   : > { %3817 = vst.msk [vmem:[#allocation7 + $0x18] sm:$0xff] %vm3301_vm13, %v10944_v29  ;;  %10957 = vtanh.f32 %v3792_v8  ;;  %v3793_v14 = vadd.f32 %v3770_v53, %v3729_v32  ;;  %v3730_v31 = vadd.f32 %v3709_v11, %v3602_v7 }
 0x6df   : > { %v12092_v27 = vpop.eup %10945  ;;  %v3711_v30 = vpop.f32.mrf.mxu1 }
 0x6e0   : > { %10959 = vtanh.f32 %v3793_v14  ;;  %v3794_v26 = vadd.f32 %v3775_v4, %v3730_v31  ;;  %v3731_v38 = vadd.f32 %v3711_v30, %v3604_v12 }
 0x6e1   : > { %v10948_v21 = vpop.eup %10947  ;;  %v3713_v35 = vpop.f32.mrf.mxu1  ;;  %v12097_v36 = vld [vmem:[#allocation7 + $0x8] sm:$0xff] }
 0x6e2   : > { %3819 = vst.msk [vmem:[#allocation7 + $0x28] sm:$0xff] %vm3301_vm13, %v10948_v21  ;;  %10961 = vtanh.f32 %v3794_v26  ;;  %v3795_v41 = vadd.f32 %v3775_v4, %v3731_v38  ;;  %v3732_v45 = vadd.f32 %v3713_v35, %v3606_v24  ;;  %v10319_v47 = vpack.i.bf16 %v12097_v36, %v12075_v39 }
 0x6e3   : > { %v12103_v40 = vpop.eup %10949  ;;  %v3715_v54 = vpop.f32.mrf.mxu1 }
 0x6e4   : > { %10963 = vtanh.f32 %v3795_v41  ;;  %v3796_v56 = vadd.f32 %v3780_v50, %v3732_v45  ;;  %v3733_v52 = vadd.f32 %v3715_v54, %v3608_v9  ;;  %10320 = vrot.lane.b32.xlu0 %v10319_v47, %s11054_s1 }
 0x6e5   : > { %v10952_v59 = vpop.eup %10951  ;;  %v3833_v57 = vld [vmem:[#allocation7 + $0x18] sm:$0xff] }
 0x6e6   : > { %3821 = vst.msk [vmem:[#allocation7 + $0x38] sm:$0xff] %vm3301_vm13, %v10952_v59  ;;  %10965 = vtanh.f32 %v3796_v56  ;;  %v3797_v63 = vadd.f32 %v3780_v50, %v3733_v52  ;;  %v10329_v46 = vpack.i.bf16 %v3833_v57, %v12086_v20 }
 0x6e7   : > { %v12109_v0 = vpop.eup %10953 }
 0x6e8   : > { %10967 = vtanh.f32 %v3797_v63  ;;  %10325 = vrot.lane.b32.xlu0 %v10319_v47, %s11055_s2  ;;  %10330 = vrot.lane.b32.xlu1 %v10329_v46, %s11054_s1 }
 0x6e9   : > { %v10956_v3 = vpop.eup %10955  ;;  %v12113_v61 = vld [vmem:[#allocation7 + $0x28] sm:$0xff] }
 0x6ea   : > { %3823 = vst.msk [vmem:[#allocation7 + $0x48] sm:$0xff] %vm3301_vm13, %v10956_v3  ;;  %v10339_v43 = vpack.i.bf16 %v12113_v61, %v12092_v27 }
 0x6eb   : > { %v12118_v25 = vpop.eup %10957 }
 0x6ec   : > { %10340 = vrot.lane.b32.xlu0 %v10339_v43, %s11054_s1  ;;  %10335 = vrot.lane.b32.xlu1 %v10329_v46, %s11055_s2 }
 0x6ed   : > { %v10960_v62 = vpop.eup %10959  ;;  %v12122_v16 = vld [vmem:[#allocation7 + $0x38] sm:$0xff] }
 0x6ee   : > { %3825 = vst.msk [vmem:[#allocation7 + $0x58] sm:$0xff] %vm3301_vm13, %v10960_v62  ;;  %v10349_v15 = vpack.i.bf16 %v12122_v16, %v12103_v40 }
 0x6ef   : > { %v12127_v10 = vpop.eup %10961 }
 0x6f0   : > { %10345 = vrot.lane.b32.xlu0 %v10339_v43, %s11055_s2  ;;  %10350 = vrot.lane.b32.xlu1 %v10349_v15, %s11054_s1 }
 0x6f1   : > { %v10964_v6 = vpop.eup %10963  ;;  %v12131_v55 = vld [vmem:[#allocation7 + $0x48] sm:$0xff] }
 0x6f2   : > { %3827 = vst.msk [vmem:[#allocation7 + $0x68] sm:$0xff] %vm3301_vm13, %v10964_v6  ;;  %v10359_v37 = vpack.i.bf16 %v12131_v55, %v12109_v0 }
 0x6f3   : > { %v12136_v22 = vpop.eup %10965 }
 0x6f4   : > { %10360 = vrot.lane.b32.xlu0 %v10359_v37, %s11054_s1  ;;  %10355 = vrot.lane.b32.xlu1 %v10349_v15, %s11055_s2 }
 0x6f5   : > { %v10968_v44 = vpop.eup %10967  ;;  %v12140_v33 = vld [vmem:[#allocation7 + $0x58] sm:$0xff] }
 0x6f6   : > { %3829 = vst.msk [vmem:[#allocation7 + $0x78] sm:$0xff] %vm3301_vm13, %v10968_v44  ;;  %v10369_v17 = vpack.i.bf16 %v12140_v33, %v12118_v25 }
 0x6f8   : > { %10365 = vrot.lane.b32.xlu0 %v10359_v37, %s11055_s2  ;;  %10370 = vrot.lane.b32.xlu1 %v10369_v17, %s11054_s1 }
 0x6f9   : > { %v12147_v1 = vld [vmem:[#allocation7 + $0x68] sm:$0xff] }
 0x6fa   : > { %v10379_v23 = vpack.i.bf16 %v12147_v1, %v12127_v10 }
 0x6fc   : > { %10380 = vrot.lane.b32.xlu0 %v10379_v23, %s11054_s1  ;;  %10375 = vrot.lane.b32.xlu1 %v10369_v17, %s11055_s2 }
 0x6fd   : > { %v12153_v28 = vld [vmem:[#allocation7 + $0x78] sm:$0xff] }
 0x6fe   : > { %v10389_v51 = vpack.i.bf16 %v12153_v28, %v12136_v22 }
 0x700   : > { %10385 = vrot.lane.b32.xlu0 %v10379_v23, %s11055_s2  ;;  %10390 = vrot.lane.b32.xlu1 %v10389_v51, %s11054_s1 }
 0x704   : > { %10395 = vrot.lane.b32.xlu1 %v10389_v51, %s11055_s2 }
 0x756   : > { %v10321_v5 = vpop.permute.xlu0 %10320 }
 0x757   : > { %v10323_v19 = vunpack.i.h.bf16 %v10321_v5  ;;  %v10322_v53 = vunpack.i.l.bf16 %v10321_v5 }
 0x759   : > { %v3894_v11 = vsel %vm913_vm3, %v10322_v53, %v10323_v19  ;;  %v3919_v24 = vmax.f32 %v12097_v36, %v10323_v19 }
 0x75a   : > { %v10326_v58 = vpop.permute.xlu0 %10325  ;;  %v10331_v2 = vpop.permute.xlu1 %10330  ;;  %v3918_v26 = vmax.f32 %v12075_v39, %v3894_v11 }
 0x75b   : > { %v10328_v7 = vunpack.i.h.bf16 %v10326_v58  ;;  %v10327_v8 = vunpack.i.l.bf16 %v10326_v58  ;;  %v10333_v32 = vunpack.i.h.bf16 %v10331_v2  ;;  %v10332_v29 = vunpack.i.l.bf16 %v10331_v2 }
 0x75d   : > { %v3895_v12 = vsel %vm913_vm3, %v10332_v29, %v10333_v32  ;;  %v3966_v31 = vsel %vm924_vm4, %v10327_v8, %v10328_v7  ;;  %v3921_v4 = vmax.f32 %v3833_v57, %v10333_v32  ;;  %v3991_v47 = vmax.f32 %v3919_v24, %v10328_v7 }
 0x75e   : > { %v10341_v13 = vpop.permute.xlu0 %10340  ;;  %v10336_v14 = vpop.permute.xlu1 %10335  ;;  %v3920_v38 = vmax.f32 %v12086_v20, %v3895_v12  ;;  %v3990_v45 = vmax.f32 %v3918_v26, %v3966_v31 }
 0x75f   : > { %v10338_v30 = vunpack.i.h.bf16 %v10336_v14  ;;  %v10337_v48 = vunpack.i.l.bf16 %v10336_v14  ;;  %v10343_v21 = vunpack.i.h.bf16 %v10341_v13  ;;  %v10342_v9 = vunpack.i.l.bf16 %v10341_v13 }
 0x761   : > { %v3967_v35 = vsel %vm924_vm4, %v10337_v48, %v10338_v30  ;;  %v3993_v41 = vmax.f32 %v3921_v4, %v10338_v30  ;;  %v3896_v39 = vsel %vm913_vm3, %v10342_v9, %v10343_v21  ;;  %v3923_v37 = vmax.f32 %v12113_v61, %v10343_v21 }
 0x762   : > { %v3992_v50 = vmax.f32 %v3920_v38, %v3967_v35  ;;  %v10346_v54 = vpop.permute.xlu0 %10345  ;;  %v10351_v49 = vpop.permute.xlu1 %10350  ;;  %v3922_v44 = vmax.f32 %v12092_v27, %v3896_v39 }
 0x763   : > { %v10348_v56 = vunpack.i.h.bf16 %v10346_v54  ;;  %v10347_v52 = vunpack.i.l.bf16 %v10346_v54  ;;  %v10353_v59 = vunpack.i.h.bf16 %v10351_v49  ;;  %v10352_v57 = vunpack.i.l.bf16 %v10351_v49 }
 0x764   : > { %v4006_v36 = vpack.c.bf16 %v3992_v50, %v3990_v45  ;;  %v4007_v63 = vpack.c.bf16 %v3993_v41, %v3991_v47 }
 0x765   : > { %v3897_v20 = vsel %vm913_vm3, %v10352_v57, %v10353_v59  ;;  %v3925_v43 = vmax.f32 %v12122_v16, %v10353_v59  ;;  %v3968_v6 = vsel %vm924_vm4, %v10347_v52, %v10348_v56  ;;  %v3995_v53 = vmax.f32 %v3923_v37, %v10348_v56 }
 0x766   : > { %9575 = vmatprep.mubr.msk.bf16.mxu0 %vm4101_vm12, %v4007_v63  ;;  %v10361_v46 = vpop.permute.xlu0 %10360  ;;  %v10356_v3 = vpop.permute.xlu1 %10355  ;;  %v3924_v17 = vmax.f32 %v12103_v40, %v3897_v20  ;;  %v3994_v16 = vmax.f32 %v3922_v44, %v3968_v6 }
 0x767   : > { %v10358_v62 = vunpack.i.h.bf16 %v10356_v3  ;;  %v10357_v15 = vunpack.i.l.bf16 %v10356_v3  ;;  %4154 = vmatmul.mubr.bf16.vlgmr.msra.gmra.mxu0 %v4006_v36  ;;  %v10363_v23 = vunpack.i.h.bf16 %v10361_v46  ;;  %v10362_v51 = vunpack.i.l.bf16 %v10361_v46 }
 0x769   : > { %v3997_v5 = vmax.f32 %v3925_v43, %v10358_v62  ;;  %v3969_v19 = vsel %vm924_vm4, %v10357_v15, %v10358_v62  ;;  %v3898_v27 = vsel %vm913_vm3, %v10362_v51, %v10363_v23  ;;  %v3927_v24 = vmax.f32 %v12131_v55, %v10363_v23 }
 0x76a   : > { %v10366_v58 = vpop.permute.xlu0 %10365  ;;  %v10371_v2 = vpop.permute.xlu1 %10370  ;;  %v3996_v7 = vmax.f32 %v3924_v17, %v3969_v19  ;;  %v3926_v26 = vmax.f32 %v12109_v0, %v3898_v27 }
 0x76b   : > { %v10368_v8 = vunpack.i.h.bf16 %v10366_v58  ;;  %v10367_v32 = vunpack.i.l.bf16 %v10366_v58  ;;  %v10373_v29 = vunpack.i.h.bf16 %v10371_v2  ;;  %v10372_v11 = vunpack.i.l.bf16 %v10371_v2 }
 0x76c   : > { %v4009_v12 = vpack.c.bf16 %v3997_v5, %v3995_v53  ;;  %v4008_v61 = vpack.c.bf16 %v3996_v7, %v3994_v16 }
 0x76d   : > { %v3899_v40 = vsel %vm913_vm3, %v10372_v11, %v10373_v29  ;;  %v3929_v31 = vmax.f32 %v12140_v33, %v10373_v29  ;;  %v3970_v48 = vsel %vm924_vm4, %v10367_v32, %v10368_v8  ;;  %v3999_v45 = vmax.f32 %v3927_v24, %v10368_v8 }
 0x76e   : > { %9576 = vmatprep.mubr.msk.bf16.mxu0 %vm4101_vm12, %v4009_v12  ;;  %v10381_v13 = vpop.permute.xlu0 %10380  ;;  %v10376_v14 = vpop.permute.xlu1 %10375  ;;  %v3928_v38 = vmax.f32 %v12118_v25, %v3899_v40  ;;  %v3998_v33 = vmax.f32 %v3926_v26, %v3970_v48 }
 0x76f   : > { %v10378_v4 = vunpack.i.h.bf16 %v10376_v14  ;;  %v10377_v30 = vunpack.i.l.bf16 %v10376_v14  ;;  %4162 = vmatmul.mubr.bf16.gmra.mxu0 %v4008_v61  ;;  %v10383_v21 = vunpack.i.h.bf16 %v10381_v13  ;;  %v10382_v9 = vunpack.i.l.bf16 %v10381_v13 }
 0x771   : > { %v4001_v35 = vmax.f32 %v3929_v31, %v10378_v4  ;;  %v3971_v41 = vsel %vm924_vm4, %v10377_v30, %v10378_v4  ;;  %v3900_v0 = vsel %vm913_vm3, %v10382_v9, %v10383_v21  ;;  %v3931_v36 = vmax.f32 %v12147_v1, %v10383_v21 }
 0x772   : > { %v10386_v47 = vpop.permute.xlu0 %10385  ;;  %v10391_v50 = vpop.permute.xlu1 %10390  ;;  %v4000_v54 = vmax.f32 %v3928_v38, %v3971_v41  ;;  %v3930_v43 = vmax.f32 %v12127_v10, %v3900_v0 }
 0x773   : > { %v10388_v49 = vunpack.i.h.bf16 %v10386_v47  ;;  %v10387_v56 = vunpack.i.l.bf16 %v10386_v47  ;;  %v10393_v52 = vunpack.i.h.bf16 %v10391_v50  ;;  %v10392_v59 = vunpack.i.l.bf16 %v10391_v50  ;;  %v10672_v47 = vld [vmem:[%s11126_s8] ss:$8 sps:$4 sm:$0xff]  }
 0x774   : > { %v4011_v57 = vpack.c.bf16 %v4001_v35, %v3999_v45  ;;  %v4010_v55 = vpack.c.bf16 %v4000_v54, %v3998_v33 }
 0x775   : > { %v3901_v25 = vsel %vm913_vm3, %v10392_v59, %v10393_v52  ;;  %v3933_v39 = vmax.f32 %v12153_v28, %v10393_v52  ;;  %v3972_v3 = vsel %vm924_vm4, %v10387_v56, %v10388_v49  ;;  %v4003_v15 = vmax.f32 %v3931_v36, %v10388_v49  ;;  %v10673_v49 = vld [vmem:[%s11126_s8 + $0x10] ss:$8 sps:$4 sm:$0xff]   ;;  %v4486_v56 = vld [vmem:[%s11131_s14] sm:$0xff]  ;;  %v4487_v59 = vld [vmem:[%s11131_s14 + $0x8] sm:$0xff] }
 0x776   : > { %9577 = vmatprep.mubr.msk.bf16.mxu0 %vm4101_vm12, %v4011_v57  ;;  %v10396_v63 = vpop.permute.xlu1 %10395  ;;  %v3932_v62 = vmax.f32 %v12136_v22, %v3901_v25  ;;  %v4002_v44 = vmax.f32 %v3930_v43, %v3972_v3  ;;  %v4488_v52 = vld [vmem:[%s11131_s14 + $0x10] sm:$0xff]  ;;  %v4489_v57 = vld [vmem:[%s11131_s14 + $0x18] sm:$0xff] }
 0x777   : > { %v10398_v20 = vunpack.i.h.bf16 %v10396_v63  ;;  %v10397_v46 = vunpack.i.l.bf16 %v10396_v63  ;;  %4170 = vmatmul.mubr.bf16.gmra.mxu0 %v4010_v55 }
 0x779   : > { %v4005_v6 = vmax.f32 %v3933_v39, %v10398_v20  ;;  %v3973_v37 = vsel %vm924_vm4, %v10397_v46, %v10398_v20  ;;  %v10674_v46 = vld [vmem:[%s11126_s8 + $0x4] ss:$8 sps:$4 sm:$0xff]  }
 0x77a   : > { %v4004_v1 = vmax.f32 %v3932_v62, %v3973_v37 }
 0x77b   : > { %v4013_v17 = vpack.c.bf16 %v4005_v6, %v4003_v15  ;;  %v10675_v15 = vld [vmem:[%s11126_s8 + $0x14] ss:$8 sps:$4 sm:$0xff]   ;;  %v10676_v6 = vld [vmem:[%s11136_s19 + $0x28] ss:$0 sps:$4 sm:$0x33]  }
 0x77c   : > { %v4012_v23 = vpack.c.bf16 %v4004_v1, %v4002_v44 }
 0x77d   : > { %9578 = vmatprep.mubr.msk.bf16.mxu0 %vm4101_vm12, %v4013_v17  ;;  %vm4290_vm12 = vcmask 523264   ;;  %v10677_v17 = vld [vmem:[%s11136_s19 + $0x20] sm:$0xff]  }
 0x77f   : > { %4178 = vmatmul.mubr.bf16.gmra.mxu0 %v4012_v23  ;;  %v10678_v23 = vld [vmem:[%s11136_s19 + $0x18] sm:$0xff]  }
 0x827   : > { %v4155_v10 = vpop.f32.mrf.mxu0 }
 0x829   : > { %v4157_v22 = vpop.f32.mrf.mxu0 }
 0x82b   : > { %v4158_v28 = vpop.f32.mrf.mxu0 }
 0x82d   : > { %v4160_v51 = vpop.f32.mrf.mxu0 }
 0x82f   : > { %v4163_v5 = vpop.f32.mrf.mxu0 }
 0x831   : > { %v4165_v19 = vpop.f32.mrf.mxu0 }
 0x833   : > { %v4166_v53 = vpop.f32.mrf.mxu0 }
 0x835   : > { %v4168_v58 = vpop.f32.mrf.mxu0 }
 0x837   : > { %v4171_v2 = vpop.f32.mrf.mxu0 }
 0x839   : > { %v4173_v16 = vpop.f32.mrf.mxu0 }
 0x83b   : > { %v4174_v7 = vpop.f32.mrf.mxu0 }
 0x83d   : > { %v4176_v8 = vpop.f32.mrf.mxu0 }
 0x83f   : > { %v4179_v32 = vpop.f32.mrf.mxu0 }
 0x840   : > { %4223 = vrot.lane.b32.xlu0 %v4179_v32, %s11072_s11 }
 0x841   : > { %v4181_v29 = vpop.f32.mrf.mxu0 }
 0x843   : > { %v4182_v11 = vpop.f32.mrf.mxu0 }
 0x844   : > { %4219 = vrot.lane.b32.xlu0 %v4171_v2, %s11072_s11  ;;  %4225 = vrot.lane.b32.xlu1 %v4182_v11, %s11072_s11 }
 0x845   : > { %v4184_v12 = vpop.f32.mrf.mxu0 }
 0x848   : > { %4215 = vrot.lane.b32.xlu0 %v4163_v5, %s11072_s11  ;;  %4221 = vrot.lane.b32.xlu1 %v4174_v7, %s11072_s11 }
 0x84c   : > { %4211 = vrot.lane.b32.xlu0 %v4155_v10, %s11072_s11  ;;  %4217 = vrot.lane.b32.xlu1 %v4166_v53, %s11072_s11 }
 0x850   : > { %4213 = vrot.lane.b32.xlu1 %v4158_v28, %s11072_s11 }
 0x8b2   : > { %v4224_v61 = vpop.permute.xlu0 %4223 }
 0x8b3   : > { %4242 = vst.msk [vmem:[#allocation8 + $0x30] sm:$0xff] %vm4235_vm2, %v4224_v61 }
 0x8b6   : > { %v4220_v27 = vpop.permute.xlu0 %4219  ;;  %v4226_v40 = vpop.permute.xlu1 %4225 }
 0x8b7   : > { %4240 = vst.msk [vmem:[#allocation8 + $0x20] sm:$0xff] %vm4235_vm2, %v4220_v27  ;;  %4243 = vst.msk [vmem:[#allocation8 + $0x38] sm:$0xff] %vm4235_vm2, %v4226_v40 }
 0x8ba   : > { %v4216_v13 = vpop.permute.xlu0 %4215  ;;  %v4222_v14 = vpop.permute.xlu1 %4221  ;;  %v4254_v30 = vld [vmem:[#allocation8 + $0x30] sm:$0xff] }
 0x8bb   : > { %4238 = vst.msk [vmem:[#allocation8 + $0x10] sm:$0xff] %vm4235_vm2, %v4216_v13  ;;  %4241 = vst.msk [vmem:[#allocation8 + $0x28] sm:$0xff] %vm4235_vm2, %v4222_v14 }
 0x8be   : > { %v4212_v31 = vpop.permute.xlu0 %4211  ;;  %v4218_v4 = vpop.permute.xlu1 %4217  ;;  %v4255_v48 = vld [vmem:[#allocation8 + $0x38] sm:$0xff]  ;;  %v4252_v38 = vld [vmem:[#allocation8 + $0x20] sm:$0xff] }
 0x8bf   : > { %4236 = vst.msk [vmem:[#allocation8] sm:$0xff] %vm4235_vm2, %v4212_v31  ;;  %4239 = vst.msk [vmem:[#allocation8 + $0x18] sm:$0xff] %vm4235_vm2, %v4218_v4  ;;  %v4259_v24 = vpack.c.bf16 %v4255_v48, %v4254_v30 }
 0x8c1   : > { %4284 = vrot.lane.b32.xlu0 %v4259_v24, %s11054_s1 }
 0x8c2   : > { %v4214_v26 = vpop.permute.xlu1 %4213  ;;  %v4253_v21 = vld [vmem:[#allocation8 + $0x28] sm:$0xff]  ;;  %v4250_v35 = vld [vmem:[#allocation8 + $0x10] sm:$0xff] }
 0x8c3   : > { %4237 = vst.msk [vmem:[#allocation8 + $0x8] sm:$0xff] %vm4235_vm2, %v4214_v26  ;;  %v4258_v9 = vpack.c.bf16 %v4253_v21, %v4252_v38  ;;  %vm4615_vm2 = vcmask 1040384   ;;  %v10679_v21 = vld [vmem:[%s11136_s19 + $0x10] sm:$0xff]  }
 0x8c4   : > { %v4616_v37 = vsel %vm4615_vm2, 4294967295, %v11070_v42  ;;  %vm4754_vm2 = vcmask 15360  }
 0x8c5   : > { %4282 = vrot.lane.b32.xlu1 %v4258_v9, %s11054_s1  ;;  %v4617_v44 = vsel %vm3184_vm15, %v4616_v37, 0  ;;  %vm4608_vm15 = vcmask 678912   ;;  %4757 = vst.msk [vmem:[#allocation10 + $0x10] sm:$0xff] %vm4754_vm2, %v11071_v60  ;;  %4755 = vst.msk [vmem:[#allocation10] sm:$0xff] %vm4754_vm2, %v11071_v60 }
 0x8c6   : > { %v4251_v41 = vld [vmem:[#allocation8 + $0x18] sm:$0xff]  ;;  %v4248_v50 = vld [vmem:[#allocation8] sm:$0xff]  ;;  %v4619_v1 = vand.u32 %v10676_v6, %v4617_v44  ;;  %4756 = vst.msk [vmem:[#allocation10 + $0x8] sm:$0xff] %vm4754_vm2, %v11071_v60  ;;  %4758 = vst.msk [vmem:[#allocation10 + $0x18] sm:$0xff] %vm4754_vm2, %v11071_v60 }
 0x8c7   : > { %v4257_v45 = vpack.c.bf16 %v4251_v41, %v4250_v35  ;;  %5314 = vst.msk [vmem:[#allocation11] sm:$0xff] %vm4754_vm2, %v11071_v60  ;;  %5315 = vst.msk [vmem:[#allocation11 + $0x10] sm:$0xff] %vm4754_vm2, %v11071_v60 }
 0x8c8   : > { %10056 = vmatprep.subr.bf16.mxu0 %v4619_v1  ;;  %5316 = vst.msk [vmem:[#allocation11 + $0x20] sm:$0xff] %vm4754_vm2, %v11071_v60  ;;  %5317 = vst.msk [vmem:[#allocation11 + $0x30] sm:$0xff] %vm4754_vm2, %v11071_v60 }
 0x8c9   : > { %4280 = vrot.lane.b32.xlu0 %v4257_v45, %s11054_s1  ;;  %10057 = vmatpush3.bf16.msra.mxu0 %v4619_v1  ;;  %5318 = vst.msk [vmem:[#allocation11 + $0x40] sm:$0xff] %vm4754_vm2, %v11071_v60  ;;  %5319 = vst.msk [vmem:[#allocation11 + $0x50] sm:$0xff] %vm4754_vm2, %v11071_v60 }
 0x8ca   : > { %v4249_v33 = vld [vmem:[#allocation8 + $0x8] sm:$0xff]  ;;  %10058 = vmatprep.subr.bf16.mxu0 %v10677_v17  ;;  %5320 = vst.msk [vmem:[#allocation11 + $0x60] sm:$0xff] %vm4754_vm2, %v11071_v60  ;;  %5321 = vst.msk [vmem:[#allocation11 + $0x70] sm:$0xff] %vm4754_vm2, %v11071_v60 }
 0x8cb   : > { %v4256_v54 = vpack.c.bf16 %v4249_v33, %v4248_v50 }
 0x8cd   : > { %4270 = vrot.lane.b32.xlu0 %v10672_v47, %s11074_s15  ;;  %4278 = vrot.lane.b32.xlu1 %v4256_v54, %s11054_s1 }
 0x8ce   : > { %10059 = vmatpush3.bf16.msra.mxu0 %v10677_v17 }
 0x8cf   : > { %10060 = vmatprep.subr.bf16.mxu0 %v10678_v23 }
 0x8d1   : > { %4421 = vrot.lane.b32.xlu0 %v4259_v24, %s11055_s2  ;;  %4272 = vrot.lane.b32.xlu1 %v10673_v49, %s11074_s15 }
 0x8d2   : > { %10061 = vmatpush3.bf16.msra.mxu0 %v10678_v23 }
 0x8d3   : > { %10062 = vmatprep.subr.bf16.mxu0 %v10679_v21 }
 0x8d5   : > { %4417 = vrot.lane.b32.xlu0 %v4257_v45, %s11055_s2  ;;  %4419 = vrot.lane.b32.xlu1 %v4258_v9, %s11055_s2 }
 0x8d6   : > { %10063 = vmatpush3.bf16.msra.mxu0 %v10679_v21  ;;  %v10688_v21 = vld [vmem:[%s11146_s30 + $0x18] sm:$0xff]  }
 0x8d9   : > { %4492 = vperm.xlu0 %10198, %v4486_v56   ;;  %4415 = vrot.lane.b32.xlu1 %v4256_v54, %s11055_s2 }
 0x8dd   : > { %4502 = vperm.xlu0 %10198, %v4488_v52   ;;  %4497 = vperm.xlu1 %10197, %v4487_v59   ;;  %v10682_v59 = vld [vmem:[%s11141_s24 + $0x10] sm:$0x1f]  }
 0x8e1   : > { %4507 = vperm.xlu1 %10197, %v4489_v57   ;;  %v4703_v57 = vsel %vm13626_vm10, %v10682_v59, 0 }
 0x933   : > { %v4285_v55 = vpop.permute.xlu0 %4284 }
 0x934   : > { %10020 = vmatprep.subr.bf16.mxu1 %v4285_v55 }
 0x935   : > { %10021 = vmatpush3.bf16.msra.mxu1 %v4285_v55 }
 0x937   : > { %v4283_v0 = vpop.permute.xlu1 %4282 }
 0x938   : > { %10022 = vmatprep.subr.bf16.mxu1 %v4283_v0 }
 0x939   : > { %10023 = vmatpush3.bf16.msra.mxu1 %v4283_v0 }
 0x93b   : > { %v4281_v25 = vpop.permute.xlu0 %4280 }
 0x93c   : > { %10024 = vmatprep.subr.bf16.mxu1 %v4281_v25 }
 0x93d   : > { %10025 = vmatpush3.bf16.msra.mxu1 %v4281_v25 }
 0x93f   : > { %v4271_v36 = vpop.permute.xlu0 %4270  ;;  %v4279_v63 = vpop.permute.xlu1 %4278 }
 0x940   : > { %10026 = vmatprep.subr.bf16.mxu1 %v4279_v63  ;;  %10028 = vmatprep.mubr.msk.bf16.mxu1 %vm4290_vm12, %v4271_v36 }
 0x941   : > { %10027 = vmatpush3.bf16.msra.mxu1 %v4279_v63 }
 0x942   : > { %10032 = vmatprep.subr.bf16.mxu1 %v4259_v24 }
 0x943   : > { %v4273_v39 = vpop.permute.xlu1 %4272  ;;  %v4422_v20 = vpop.permute.xlu0 %4421 }
 0x944   : > { %10029 = vmatmul.mubr.msk.bf16.vlgmr.msra.gmra.mxu1 %vm4290_vm12, %v4273_v39 }
 0x945   : > { %10033 = vmatpush3.bf16.msra.mxu1 %v4259_v24  ;;  %10040 = vmatprep.mubr.msk.bf16.mxu1 %vm4290_vm12, %v10672_v47  ;;  %v10681_v47 = vld [vmem:[%s11136_s19] sm:$0xff]  }
 0x946   : > { %10034 = vmatprep.subr.bf16.mxu1 %v4258_v9 }
 0x947   : > { %v4420_v3 = vpop.permute.xlu1 %4419  ;;  %v4418_v43 = vpop.permute.xlu0 %4417 }
 0x949   : > { %10035 = vmatpush3.bf16.msra.mxu1 %v4258_v9 }
 0x94a   : > { %10036 = vmatprep.subr.bf16.mxu1 %v4257_v45 }
 0x94b   : > { %v4416_v62 = vpop.permute.xlu1 %4415 }
 0x94d   : > { %10037 = vmatpush3.bf16.msra.mxu1 %v4257_v45  ;;  %v10680_v45 = vld [vmem:[%s11136_s19 + $0x8] sm:$0xff]  }
 0x94e   : > { %10038 = vmatprep.subr.bf16.mxu1 %v4256_v54  ;;  %10064 = vmatprep.subr.bf16.mxu0 %v10680_v45 }
 0x94f   : > { %10065 = vmatpush3.bf16.msra.mxu0 %v10680_v45  ;;  %v5092_v45 = vld [vmem:[%s11151_s6 + $0x20] sm:$0xff] }
 0x950   : > { %10066 = vmatprep.subr.bf16.mxu0 %v10681_v47 }
 0x951   : > { %10039 = vmatpush3.bf16.msra.mxu1 %v4256_v54 }
 0x952   : > { %10044 = vmatprep.subr.bf16.mxu1 %v4422_v20 }
 0x953   : > { %10067 = vmatpush3.bf16.msra.mxu0 %v10681_v47  ;;  %v5091_v47 = vld [vmem:[%s11151_s6 + $0x18] sm:$0xff] }
 0x954   : > { %10041 = vmatmul.mubr.msk.bf16.vlgmr.msra.gmra.mxu1 %vm4290_vm12, %v10673_v49  ;;  %v4493_v58 = vpop.permute.xlu0 %4492 }
 0x955   : > { %10045 = vmatpush3.bf16.msra.mxu1 %v4422_v20  ;;  %10052 = vmatprep.mubr.msk.bf16.mxu1 %vm4290_vm12, %v10674_v46 }
 0x956   : > { %10046 = vmatprep.subr.bf16.mxu1 %v4420_v3 }
 0x958   : > { %v4498_v16 = vpop.permute.xlu1 %4497  ;;  %v4503_v29 = vpop.permute.xlu0 %4502 }
 0x959   : > { %10047 = vmatpush3.bf16.msra.mxu1 %v4420_v3 }
 0x95a   : > { %10048 = vmatprep.subr.bf16.mxu1 %v4418_v43 }
 0x95c   : > { %v4508_v30 = vpop.permute.xlu1 %4507 }
 0x95d   : > { %10049 = vmatpush3.bf16.msra.mxu1 %v4418_v43 }
 0x95e   : > { %10050 = vmatprep.subr.bf16.mxu1 %v4416_v62 }
 0x961   : > { %10051 = vmatpush3.bf16.msra.mxu1 %v4416_v62 }
 0x962   : > { %10118 = vmatprep.subr.msk.bf16.mxu1 %vm13626_vm10, %v10682_v59  ;;  %vm4759_vm10 = vcmask 720560  }
 0x963   : > { %4762 = vst.msk [vmem:[#allocation10 + $0x10] sm:$0xff] %vm4759_vm10, %v11071_v60  ;;  %4760 = vst.msk [vmem:[#allocation10] sm:$0xff] %vm4759_vm10, %v11071_v60 }
 0x964   : > { %10053 = vmatmul.mubr.msk.bf16.vlgmr.msra.gmra.mxu1 %vm4290_vm12, %v10675_v15  ;;  %4761 = vst.msk [vmem:[#allocation10 + $0x8] sm:$0xff] %vm4759_vm10, %v11071_v60  ;;  %4763 = vst.msk [vmem:[#allocation10 + $0x18] sm:$0xff] %vm4759_vm10, %v11071_v60  ;;  %vm5222_vm10 = vcmask 703488  }
 0x965   : > { %10073 = vmatpush3.bf16.msra.mxu1 %v4703_v57 }
 0xa04   : > { %v10030_v10 = vpop.f32.mrf.mxu1 }
 0xa06   : > { %v4331_v22 = vpop.f32.mrf.mxu1 }
 0xa08   : > { %v10031_v28 = vpop.f32.mrf.mxu1 }
 0xa0a   : > { %v4334_v51 = vpop.f32.mrf.mxu1 }
 0xa14   : > { %v10042_v5 = vpop.f32.mrf.mxu1 }
 0xa15   : > { %v4395_v2 = vadd.f32 %v10042_v5, %v10030_v10  ;;  %v10683_v5 = vld [vmem:[%s11141_s24 + $0x8] sm:$0xff]  }
 0xa16   : > { %v4386_v19 = vpop.f32.mrf.mxu1  ;;  %10074 = vmatprep.subr.bf16.mxu1 %v10683_v5 }
 0xa17   : > { %v4387_v8 = vadd.f32 %v4386_v19, %v4331_v22  ;;  %10075 = vmatpush3.bf16.msra.mxu1 %v10683_v5  ;;  %v10684_v19 = vld [vmem:[%s11141_s24] sm:$0xff]  }
 0xa18   : > { %v10043_v53 = vpop.f32.mrf.mxu1  ;;  %10076 = vmatprep.subr.bf16.mxu1 %v10684_v19 }
 0xa19   : > { %v4398_v12 = vadd.f32 %v10043_v53, %v10031_v28 }
 0xa1a   : > { %v4389_v42 = vpop.f32.mrf.mxu1 }
 0xa1b   : > { %v4390_v13 = vadd.f32 %v4389_v42, %v4334_v51  ;;  %10077 = vmatpush3.bf16.msra.mxu1 %v10684_v19 }
 0xa24   : > { %v10054_v7 = vpop.f32.mrf.mxu1 }
 0xa25   : > { %v4484_v32 = vadd.f32 %v10054_v7, %v4395_v2 }
 0xa26   : > { %v4467_v11 = vpop.f32.mrf.mxu1 }
 0xa27   : > { %v4512_v61 = vadd.f32 %v4503_v29, %v4484_v32  ;;  %v4482_v27 = vadd.f32 %v4467_v11, %v4387_v8  ;;  %v10685_v11 = vld [vmem:[%s11146_s30] sm:$0xff]  }
 0xa28   : > { %v10055_v40 = vpop.f32.mrf.mxu1 }
 0xa29   : > { %v4516_v14 = vmax.f32 %v4512_v61, 0.0  ;;  %v4510_v31 = vadd.f32 %v4493_v58, %v4482_v27  ;;  %v4485_v4 = vadd.f32 %v10055_v40, %v4398_v12 }
 0xa2a   : > { %v4470_v48 = vpop.f32.mrf.mxu1 }
 0xa2b   : > { %4520 = vst.msk [vmem:[#allocation9 + $0x10] sm:$0xff] %vm3177_vm8, %v4516_v14  ;;  %v4514_v24 = vmax.f32 %v4510_v31, 0.0  ;;  %v4513_v26 = vadd.f32 %v4508_v30, %v4485_v4  ;;  %v4483_v38 = vadd.f32 %v4470_v48, %v4390_v13 }
 0xa2d   : > { %4518 = vst.msk [vmem:[#allocation9] sm:$0xff] %vm3177_vm8, %v4514_v24  ;;  %v4517_v9 = vmax.f32 %v4513_v26, 0.0  ;;  %v4511_v35 = vadd.f32 %v4498_v16, %v4483_v38  ;;  %v10686_v26 = vld [vmem:[%s11146_s30 + $0x10] sm:$0xff]   ;;  %v10687_v38 = vld [vmem:[%s11146_s30 + $0x8] sm:$0xff]  }
 0xa2f   : > { %4521 = vst.msk [vmem:[#allocation9 + $0x18] sm:$0xff] %vm3177_vm8, %v4517_v9  ;;  %v4515_v41 = vmax.f32 %v4511_v35, 0.0  ;;  %v5088_v9 = vld [vmem:[%s11151_s6] sm:$0xff]  ;;  %v5090_v35 = vld [vmem:[%s11151_s6 + $0x10] sm:$0xff] }
 0xa31   : > { %4519 = vst.msk [vmem:[#allocation9 + $0x8] sm:$0xff] %vm3177_vm8, %v4515_v41  ;;  %vm4695_vm8 = vcmask 343040   ;;  %v5089_v41 = vld [vmem:[%s11151_s6 + $0x8] sm:$0xff] }
 0xa32   : > { %v4524_v50 = vld [vmem:[#allocation9 + $0x10] sm:$0xff] }
 0xa34   : > { %v4522_v49 = vld [vmem:[#allocation9] sm:$0xff] }
 0xa36   : > { %v4525_v33 = vld [vmem:[#allocation9 + $0x18] sm:$0xff] }
 0xa37   : > { %v10399_v54 = vpack.i.bf16 %v4525_v33, %v4524_v50 }
 0xa38   : > { %v4523_v56 = vld [vmem:[#allocation9 + $0x8] sm:$0xff] }
 0xa39   : > { %10400 = vrot.lane.b32.xlu1 %v10399_v54, %s11054_s1  ;;  %v10404_v52 = vpack.i.bf16 %v4523_v56, %v4522_v49 }
 0xa3b   : > { %10405 = vrot.lane.b32.xlu0 %v10404_v52, %s11054_s1 }
 0xa3d   : > { %10415 = vrot.lane.b32.xlu1 %v10399_v54, %s11055_s2  ;;  %v5095_v54 = vld [vmem:[%s11151_s6 + $0x38] sm:$0xff] }
 0xa3f   : > { %10410 = vrot.lane.b32.xlu0 %v10404_v52, %s11055_s2 }
 0xaab   : > { %v10401_v55 = vpop.permute.xlu1 %10400 }
 0xaac   : > { %v10403_v0 = vunpack.i.h.bf16 %v10401_v55  ;;  %v10402_v25 = vunpack.i.l.bf16 %v10401_v55 }
 0xaad   : > { %v10406_v36 = vpop.permute.xlu0 %10405 }
 0xaae   : > { %v10408_v63 = vunpack.i.h.bf16 %v10406_v36  ;;  %v10407_v39 = vunpack.i.l.bf16 %v10406_v36  ;;  %v4545_v43 = vmax.f32 %v4525_v33, %v10403_v0  ;;  %v4544_v62 = vmax.f32 %v4524_v50, %v10402_v25  ;;  %v5094_v50 = vld [vmem:[%s11151_s6 + $0x30] sm:$0xff]  ;;  %v5093_v33 = vld [vmem:[%s11151_s6 + $0x28] sm:$0xff] }
 0xaaf   : > { %v10416_v20 = vpop.permute.xlu1 %10415 }
 0xab0   : > { %v10418_v46 = vunpack.i.h.bf16 %v10416_v20  ;;  %v10417_v3 = vunpack.i.l.bf16 %v10416_v20  ;;  %v4543_v6 = vmax.f32 %v4523_v56, %v10408_v63  ;;  %v4542_v37 = vmax.f32 %v4522_v49, %v10407_v39 }
 0xab1   : > { %v10411_v15 = vpop.permute.xlu0 %10410 }
 0xab2   : > { %v10413_v44 = vunpack.i.h.bf16 %v10411_v15  ;;  %v10412_v1 = vunpack.i.l.bf16 %v10411_v15  ;;  %v4560_v17 = vmax.f32 %v4544_v62, %v10417_v3  ;;  %v4561_v23 = vmax.f32 %v4545_v43, %v10418_v46  ;;  %v5166_v46 = vld [vmem:[%s13641_s28 + $0x50] sm:$0x77]  ;;  %v10693_v15 = vld [vmem:[%s13641_s28 + $0x44] ss:$8 sps:$4 sm:$0xff]  }
 0xab3   : > { %v9629_v3 = vcombine.high %v5166_v46, %v5166_v46  ;;  %v9628_v43 = vcombine.low %v5166_v46, %v5166_v46 }
 0xab4   : > { %v4558_v10 = vmax.f32 %v4542_v37, %v10412_v1  ;;  %v4559_v22 = vmax.f32 %v4543_v6, %v10413_v44  ;;  %v4563_v51 = vpack.c.bf16 %v4561_v23, %v4560_v17  ;;  %v10691_v6 = vld [vmem:[%s13641_s28 + $0x40] ss:$8 sps:$4 sm:$0xff]   ;;  %v10696_v37 = vld [vmem:[%s13641_s28 + $0x34] ss:$8 sps:$4 sm:$0xff]   ;;  %v10694_v44 = vld [vmem:[%s13641_s28 + $0x30] ss:$8 sps:$4 sm:$0xff]  }
 0xab5   : > { %v5236_v62 = vsel %vm3185_vm1, %v9628_v43, 0  ;;  %v10699_v1 = vld [vmem:[%s13641_s28 + $0x24] ss:$8 sps:$4 sm:$0xff]   ;;  %v10697_v17 = vld [vmem:[%s13641_s28 + $0x20] ss:$8 sps:$4 sm:$0xff]  }
 0xab6   : > { %v4562_v28 = vpack.c.bf16 %v4559_v22, %v4558_v10  ;;  %v10702_v23 = vld [vmem:[%s13641_s28 + $0x14] ss:$8 sps:$4 sm:$0xff]   ;;  %v10700_v10 = vld [vmem:[%s13641_s28 + $0x10] ss:$8 sps:$4 sm:$0xff]   ;;  %v10705_v22 = vld [vmem:[%s13641_s28 + $0x4] ss:$8 sps:$4 sm:$0xff]  }
 0xab8   : > { %10068 = vmatprep.mubr.msk.bf16.mxu0 %vm4608_vm15, %v4562_v28  ;;  %v10703_v28 = vld [vmem:[%s13641_s28] ss:$8 sps:$4 sm:$0xff]  }
 0xab9   : > { %10069 = vmatmul.mubr.msk.bf16.vlgmr.msra.gmra.mxu0 %vm4608_vm15, %v4563_v51  ;;  %vm4780_vm15 = vcmask 703504  }
 0xb79   : > { %v10070_v53 = vpop.f32.mrf.mxu0 }
 0xb7b   : > { %v4655_v58 = vpop.f32.mrf.mxu0 }
 0xb7d   : > { %v10071_v42 = vpop.f32.mrf.mxu0 }
 0xb7e   : > { %v4671_v7 = vpack.c.bf16 %v10071_v42, %v10070_v53 }
 0xb7f   : > { %v4658_v2 = vpop.f32.mrf.mxu0 }
 0xb80   : > { %v4670_v16 = vpack.c.bf16 %v4658_v2, %v4655_v58 }
 0xb82   : > { %10078 = vmatprep.mubr.msk.bf16.mxu1 %vm4695_vm8, %v4670_v16 }
 0xb83   : > { %10079 = vmatmul.mubr.msk.bf16.vlgmr.msra.gmra.mxu1 %vm4695_vm8, %v4671_v7 }
 0xb84   : > { %10098 = vmatprep.mubr.msk.bf16.mxu1 %vm1304_vm9, %v10685_v11 }
 0xc43   : > { %v10080_v8 = vpop.f32.mrf.mxu1 }
 0xc44   : > { %4772 = vrot.lane.b32.xlu0 %v10080_v8, %s11075_s26 }
 0xc45   : > { %v4739_v32 = vpop.f32.mrf.mxu1 }
 0xc47   : > { %v10081_v29 = vpop.f32.mrf.mxu1 }
 0xc48   : > { %4768 = vrot.lane.b32.xlu0 %v4739_v32, %s11075_s26  ;;  %4774 = vrot.lane.b32.xlu1 %v10081_v29, %s11075_s26 }
 0xc49   : > { %v4742_v12 = vpop.f32.mrf.mxu1 }
 0xc4c   : > { %4770 = vrot.lane.b32.xlu1 %v4742_v12, %s11075_s26 }
 0xcb6   : > { %v4773_v61 = vpop.permute.xlu0 %4772 }
 0xcb7   : > { %4783 = vst.msk [vmem:[#allocation10 + $0x10] sm:$0xff] %vm4780_vm15, %v4773_v61 }
 0xcba   : > { %v4769_v27 = vpop.permute.xlu0 %4768  ;;  %v4775_v40 = vpop.permute.xlu1 %4774 }
 0xcbb   : > { %4781 = vst.msk [vmem:[#allocation10] sm:$0xff] %vm4780_vm15, %v4769_v27  ;;  %4784 = vst.msk [vmem:[#allocation10 + $0x18] sm:$0xff] %vm4780_vm15, %v4775_v40 }
 0xcbe   : > { %v4771_v13 = vpop.permute.xlu1 %4770  ;;  %v4795_v14 = vld [vmem:[#allocation10 + $0x10] sm:$0xff] }
 0xcbf   : > { %4782 = vst.msk [vmem:[#allocation10 + $0x8] sm:$0xff] %vm4780_vm15, %v4771_v13  ;;  %vm5405_vm15 = vcmask 375808  }
 0xcc2   : > { %v4796_v31 = vld [vmem:[#allocation10 + $0x18] sm:$0xff]  ;;  %v4793_v30 = vld [vmem:[#allocation10] sm:$0xff] }
 0xcc3   : > { %v4798_v4 = vpack.c.bf16 %v4796_v31, %v4795_v14 }
 0xcc5   : > { %4831 = vrot.lane.b32.xlu0 %v4798_v4, %s11054_s1  ;;  %10094 = vmatprep.subr.bf16.mxu1 %v4798_v4 }
 0xcc6   : > { %10095 = vmatpush3.bf16.msra.mxu1 %v4798_v4  ;;  %v4794_v48 = vld [vmem:[#allocation10 + $0x8] sm:$0xff] }
 0xcc7   : > { %v4797_v24 = vpack.c.bf16 %v4794_v48, %v4793_v30 }
 0xcc9   : > { %4819 = vrot.lane.b32.xlu0 %v10685_v11, %s11073_s16  ;;  %4829 = vrot.lane.b32.xlu1 %v4797_v24, %s11054_s1 }
 0xcca   : > { %10096 = vmatprep.subr.bf16.mxu1 %v4797_v24 }
 0xccb   : > { %10097 = vmatpush3.bf16.msra.mxu1 %v4797_v24 }
 0xccc   : > { %9630 = vmatprep.subr.msk.bf16.mxu1 %vm3185_vm1, %v9629_v3  ;;  %vm5403_vm1 = vcmask 1047568  }
 0xccd   : > { %4823 = vrot.lane.b32.xlu0 %v10686_v26, %s11073_s16  ;;  %4821 = vrot.lane.b32.xlu1 %v10687_v38, %s11073_s16 }
 0xcce   : > { %10099 = vmatmul.mubr.msk.bf16.vlgmr.msra.gmra.mxu1 %vm1304_vm9, %v10687_v38 }
 0xccf   : > { %10102 = vmatprep.mubr.msk.bf16.mxu1 %vm1304_vm9, %v10686_v26  ;;  %5246 = vmatpush1.bf16.msra.mxu1 %v5236_v62 }
 0xcd0   : > { %5247 = vmatprep.subr.bf16.mxu1 %v10693_v15 }
 0xcd1   : > { %4999 = vrot.lane.b32.xlu0 %v4798_v4, %s11055_s2  ;;  %4825 = vrot.lane.b32.xlu1 %v10688_v21, %s11073_s16  ;;  %s13645_s16 = sld [smem:[#allocation20_spill]] }
 0xcd3   : > { %5248 = vmatpush1.bf16.msra.mxu1 %v10691_v6 }
 0xcd4   : > { %5249 = vmatprep.subr.bf16.mxu1 %v10696_v37 }
 0xcd5   : > { %4989 = vrot.lane.b32.xlu0 %v10685_v11, %s11074_s15  ;;  %4997 = vrot.lane.b32.xlu1 %v4797_v24, %s11055_s2 }
 0xcd6   : > { %10103 = vmatmul.mubr.msk.bf16.gmra.mxu1 %vm1304_vm9, %v10688_v21 }
 0xcd7   : > { %5273 = vmatprep.mubr.bf16.mxu1 %v11069_v34  ;;  %5250 = vmatpush1.bf16.msra.mxu1 %v10694_v44 }
 0xcd8   : > { %5251 = vmatprep.subr.bf16.mxu1 %v10699_v1 }
 0xcd9   : > { %4993 = vrot.lane.b32.xlu0 %v10686_v26, %s11074_s15  ;;  %4991 = vrot.lane.b32.xlu1 %v10687_v38, %s11074_s15 }
 0xcdb   : > { %5252 = vmatpush1.bf16.msra.mxu1 %v10697_v17 }
 0xcdc   : > { %5253 = vmatprep.subr.bf16.mxu1 %v10702_v23 }
 0xcdd   : > { %5098 = vperm.xlu0 %10198, %v5088_v9   ;;  %4995 = vrot.lane.b32.xlu1 %v10688_v21, %s11074_s15 }
 0xcdf   : > { %5254 = vmatpush1.bf16.msra.mxu1 %v10700_v10 }
 0xce0   : > { %5255 = vmatprep.subr.bf16.mxu1 %v10705_v22 }
 0xce1   : > { %5108 = vperm.xlu0 %10198, %v5090_v35   ;;  %5103 = vperm.xlu1 %10197, %v5089_v41  }
 0xce3   : > { %5256 = vmatpush1.bf16.msra.mxu1 %v10703_v28 }
 0xce5   : > { %5118 = vperm.xlu0 %10198, %v5092_v45   ;;  %5113 = vperm.xlu1 %10197, %v5091_v47  }
 0xce9   : > { %5128 = vperm.xlu0 %10198, %v5094_v50   ;;  %5123 = vperm.xlu1 %10197, %v5093_v33  }
 0xced   : > { %5133 = vperm.xlu1 %10197, %v5095_v54  }
 0xd37   : > { %v4832_v49 = vpop.permute.xlu0 %4831 }
 0xd38   : > { %10082 = vmatprep.subr.bf16.mxu0 %v4832_v49 }
 0xd39   : > { %10083 = vmatpush3.bf16.msra.mxu0 %v4832_v49 }
 0xd3b   : > { %v4820_v56 = vpop.permute.xlu0 %4819  ;;  %v4830_v52 = vpop.permute.xlu1 %4829 }
 0xd3c   : > { %10084 = vmatprep.subr.bf16.mxu0 %v4830_v52  ;;  %10086 = vmatprep.mubr.msk.bf16.mxu0 %vm1304_vm9, %v4820_v56 }
 0xd3d   : > { %10085 = vmatpush3.bf16.msra.mxu0 %v4830_v52 }
 0xd3f   : > { %v4824_v59 = vpop.permute.xlu0 %4823  ;;  %v4822_v57 = vpop.permute.xlu1 %4821 }
 0xd40   : > { %10087 = vmatmul.mubr.msk.bf16.vlgmr.msra.gmra.mxu0 %vm1304_vm9, %v4822_v57 }
 0xd41   : > { %10090 = vmatprep.mubr.msk.bf16.mxu0 %vm1304_vm9, %v4824_v59 }
 0xd43   : > { %v5000_v55 = vpop.permute.xlu0 %4999  ;;  %v4826_v0 = vpop.permute.xlu1 %4825 }
 0xd44   : > { %10106 = vmatprep.subr.bf16.mxu0 %v5000_v55 }
 0xd45   : > { %10107 = vmatpush3.bf16.msra.mxu0 %v5000_v55 }
 0xd47   : > { %v4998_v25 = vpop.permute.xlu1 %4997  ;;  %v4990_v36 = vpop.permute.xlu0 %4989 }
 0xd48   : > { %10091 = vmatmul.mubr.msk.bf16.gmra.mxu0 %vm1304_vm9, %v4826_v0  ;;  %10108 = vmatprep.subr.bf16.mxu0 %v4998_v25 }
 0xd49   : > { %10109 = vmatpush3.bf16.msra.mxu0 %v4998_v25  ;;  %10110 = vmatprep.mubr.msk.bf16.mxu0 %vm1304_vm9, %v4990_v36 }
 0xd4b   : > { %v4992_v63 = vpop.permute.xlu1 %4991  ;;  %v4994_v39 = vpop.permute.xlu0 %4993 }
 0xd4f   : > { %v4996_v20 = vpop.permute.xlu1 %4995 }
 0xd50   : > { %10111 = vmatmul.mubr.msk.bf16.vlgmr.msra.gmra.mxu0 %vm1304_vm9, %v4992_v63 }
 0xd51   : > { %10114 = vmatprep.mubr.msk.bf16.mxu0 %vm1304_vm9, %v4994_v39 }
 0xd58   : > { %10115 = vmatmul.mubr.msk.bf16.gmra.mxu0 %vm1304_vm9, %v4996_v20  ;;  %v5099_v31 = vpop.permute.xlu0 %5098  ;;  %vm5322_vm9 = vcmask 392560  }
 0xd59   : > { %5537 = vmatprep.mubr.bf16.mxu0 %v11069_v34  ;;  %5325 = vst.msk [vmem:[#allocation11 + $0x28] sm:$0xff] %vm5322_vm9, %v11071_v60  ;;  %5323 = vst.msk [vmem:[#allocation11 + $0x8] sm:$0xff] %vm5322_vm9, %v11071_v60 }
 0xd5a   : > { %5324 = vst.msk [vmem:[#allocation11 + $0x18] sm:$0xff] %vm5322_vm9, %v11071_v60  ;;  %5326 = vst.msk [vmem:[#allocation11 + $0x38] sm:$0xff] %vm5322_vm9, %v11071_v60 }
 0xd5b   : > { %5327 = vst.msk [vmem:[#allocation11 + $0x48] sm:$0xff] %vm5322_vm9, %v11071_v60  ;;  %5328 = vst.msk [vmem:[#allocation11 + $0x58] sm:$0xff] %vm5322_vm9, %v11071_v60 }
 0xd5c   : > { %v5104_v4 = vpop.permute.xlu1 %5103  ;;  %v5109_v52 = vpop.permute.xlu0 %5108  ;;  %5329 = vst.msk [vmem:[#allocation11 + $0x68] sm:$0xff] %vm5322_vm9, %v11071_v60  ;;  %5330 = vst.msk [vmem:[#allocation11 + $0x78] sm:$0xff] %vm5322_vm9, %v11071_v60  ;;  %vm13659_vm9 = vcmask 1043456  }
 0xd60   : > { %v5114_v50 = vpop.permute.xlu1 %5113  ;;  %v5119_v20 = vpop.permute.xlu0 %5118 }
 0xd64   : > { %v5124_v63 = vpop.permute.xlu1 %5123  ;;  %v5129_v10 = vpop.permute.xlu0 %5128 }
 0xd68   : > { %v5134_v1 = vpop.permute.xlu1 %5133 }
 0xd8e   : > { %v10100_v5 = vpop.f32.mrf.mxu1 }
 0xd90   : > { %v4958_v58 = vpop.f32.mrf.mxu1 }
 0xd92   : > { %v10101_v16 = vpop.f32.mrf.mxu1 }
 0xd94   : > { %v4961_v8 = vpop.f32.mrf.mxu1 }
 0xd96   : > { %v10104_v11 = vpop.f32.mrf.mxu1 }
 0xd98   : > { %v4974_v13 = vpop.f32.mrf.mxu1 }
 0xd9a   : > { %v10105_v21 = vpop.f32.mrf.mxu1 }
 0xd9c   : > { %v4977_v54 = vpop.f32.mrf.mxu1 }
 0xe00   : > { %v10088_v51 = vpop.f32.mrf.mxu0 }
 0xe01   : > { %v4967_v35 = vadd.f32 %v10100_v5, %v10088_v51 }
 0xe02   : > { %v4881_v19 = vpop.f32.mrf.mxu0 }
 0xe03   : > { %v4959_v61 = vadd.f32 %v4958_v58, %v4881_v19 }
 0xe04   : > { %v10089_v53 = vpop.f32.mrf.mxu0 }
 0xe05   : > { %v4970_v26 = vadd.f32 %v10101_v16, %v10089_v53 }
 0xe06   : > { %v4884_v42 = vpop.f32.mrf.mxu0 }
 0xe07   : > { %v4962_v30 = vadd.f32 %v4961_v8, %v4884_v42 }
 0xe08   : > { %v10092_v2 = vpop.f32.mrf.mxu0 }
 0xe09   : > { %v4983_v15 = vadd.f32 %v10104_v11, %v10092_v2 }
 0xe0a   : > { %v4897_v7 = vpop.f32.mrf.mxu0 }
 0xe0b   : > { %v4975_v0 = vadd.f32 %v4974_v13, %v4897_v7 }
 0xe0c   : > { %v10093_v32 = vpop.f32.mrf.mxu0 }
 0xe0d   : > { %v4986_v3 = vadd.f32 %v10105_v21, %v10093_v32 }
 0xe0e   : > { %v4900_v29 = vpop.f32.mrf.mxu0 }
 0xe0f   : > { %v4978_v55 = vadd.f32 %v4977_v54, %v4900_v29 }
 0xe10   : > { %v10112_v12 = vpop.f32.mrf.mxu0 }
 0xe11   : > { %v5082_v33 = vadd.f32 %v10112_v12, %v4967_v35 }
 0xe12   : > { %v5049_v27 = vpop.f32.mrf.mxu0 }
 0xe13   : > { %v5080_v40 = vadd.f32 %v5049_v27, %v4959_v61  ;;  %v5138_v57 = vadd.f32 %v5109_v52, %v5082_v33 }
 0xe14   : > { %v10113_v14 = vpop.f32.mrf.mxu0 }
 0xe15   : > { %v5136_v48 = vadd.f32 %v5099_v31, %v5080_v40  ;;  %v5083_v41 = vadd.f32 %v10113_v14, %v4970_v26 }
 0xe16   : > { %v5052_v24 = vpop.f32.mrf.mxu0 }
 0xe17   : > { %v5081_v38 = vadd.f32 %v5052_v24, %v4962_v30  ;;  %10969 = vtanh.f32 %v5136_v48  ;;  %v5139_v56 = vadd.f32 %v5114_v50, %v5083_v41 }
 0xe18   : > { %v10116_v9 = vpop.f32.mrf.mxu0 }
 0xe19   : > { %v5137_v45 = vadd.f32 %v5104_v4, %v5081_v38  ;;  %v5086_v44 = vadd.f32 %v10116_v9, %v4983_v15 }
 0xe1a   : > { %v5065_v47 = vpop.f32.mrf.mxu0 }
 0xe1b   : > { %10971 = vtanh.f32 %v5137_v45  ;;  %v5084_v36 = vadd.f32 %v5065_v47, %v4975_v0  ;;  %v5142_v22 = vadd.f32 %v5129_v10, %v5086_v44 }
 0xe1c   : > { %v10117_v49 = vpop.f32.mrf.mxu0  ;;  %10973 = vtanh.f32 %v5139_v56 }
 0xe1d   : > { %10975 = vtanh.f32 %v5138_v57  ;;  %v5140_v43 = vadd.f32 %v5119_v20, %v5084_v36  ;;  %v5087_v37 = vadd.f32 %v10117_v49, %v4986_v3 }
 0xe1e   : > { %v5068_v59 = vpop.f32.mrf.mxu0 }
 0xe1f   : > { %v5085_v25 = vadd.f32 %v5068_v59, %v4978_v55  ;;  %v5143_v17 = vadd.f32 %v5134_v1, %v5087_v37 }
 0xe21   : > { %v5141_v39 = vadd.f32 %v5124_v63, %v5085_v25 }
 0xe23   : > { %10977 = vtanh.f32 %v5141_v39 }
 0xe24   : > { %v10970_v46 = vpop.eup %10969  ;;  %10979 = vtanh.f32 %v5140_v43 }
 0xe25   : > { %10981 = vtanh.f32 %v5143_v17 }
 0xe26   : > { %10983 = vtanh.f32 %v5142_v22 }
 0xe28   : > { %v10972_v62 = vpop.eup %10971 }
 0xe29   : > { %v5152_v6 = vpack.c.bf16 %v10972_v62, %v10970_v46  ;;  %v10974_v23 = vpop.eup %10973 }
 0xe2a   : > { %v10976_v28 = vpop.eup %10975 }
 0xe2b   : > { %9631 = vmatmul.mubr.msk.bf16.vlgmr.msra.gmra.mxu1 %vm5222_vm10, %v5152_v6  ;;  %v5153_v51 = vpack.c.bf16 %v10974_v23, %v10976_v28 }
 0xe2c   : > { %5283 = vmatprep.mubr.bf16.mxu1 %v11069_v34 }
 0xe30   : > { %v10978_v5 = vpop.eup %10977 }
 0xe31   : > { %v10980_v19 = vpop.eup %10979 }
 0xe32   : > { %v5154_v53 = vpack.c.bf16 %v10978_v5, %v10980_v19  ;;  %v10982_v58 = vpop.eup %10981 }
 0xe33   : > { %9632 = vmatmul.mubr.msk.bf16.gmra.mxu1 %vm5222_vm10, %v5153_v51  ;;  %v10984_v42 = vpop.eup %10983 }
 0xe34   : > { %5293 = vmatprep.mubr.bf16.mxu1 %v11069_v34  ;;  %v5155_v2 = vpack.c.bf16 %v10982_v58, %v10984_v42 }
 0xe3b   : > { %9633 = vmatmul.mubr.msk.bf16.gmra.mxu1 %vm5222_vm10, %v5154_v53 }
 0xe3c   : > { %5303 = vmatprep.mubr.bf16.mxu1 %v11069_v34 }
 0xe43   : > { %9634 = vmatmul.mubr.msk.bf16.gmra.mxu1 %vm5222_vm10, %v5155_v2 }
 0xe44   : > { %6928 = vmatprep.mubr.bf16.mxu1 %v11069_v34 }
 0xeeb   : > { %v5275_v16 = vpop.f32.mrf.mxu1 }
 0xeed   : > { %v5277_v7 = vpop.f32.mrf.mxu1 }
 0xeef   : > { %v5279_v8 = vpop.f32.mrf.mxu1 }
 0xef1   : > { %v5281_v32 = vpop.f32.mrf.mxu1 }
 0xef3   : > { %v5285_v29 = vpop.f32.mrf.mxu1 }
 0xef4   : > { %5355 = vrot.lane.b32.xlu0 %v5285_v29, %s11075_s26  ;;  %v5729_v29 = vld [vmem:[%s13643_s22 + $0x18] sm:$0xff] }
 0xef5   : > { %v5287_v11 = vpop.f32.mrf.mxu1 }
 0xef6   : > { %5357 = vrot.lane.b32.xlu1 %v5287_v11, %s11075_s26  ;;  %v5727_v11 = vld [vmem:[%s13643_s22 + $0x8] sm:$0xff] }
 0xef7   : > { %v5289_v12 = vpop.f32.mrf.mxu1 }
 0xef9   : > { %v5291_v61 = vpop.f32.mrf.mxu1 }
 0xefb   : > { %v5295_v27 = vpop.f32.mrf.mxu1 }
 0xefc   : > { %5363 = vrot.lane.b32.xlu0 %v5295_v27, %s11075_s26 }
 0xefd   : > { %v5297_v40 = vpop.f32.mrf.mxu1 }
 0xefe   : > { %5365 = vrot.lane.b32.xlu1 %v5297_v40, %s11075_s26 }
 0xeff   : > { %v5299_v13 = vpop.f32.mrf.mxu1 }
 0xf00   : > { %5367 = vrot.lane.b32.xlu0 %v5299_v13, %s11075_s26 }
 0xf01   : > { %v5301_v60 = vpop.f32.mrf.mxu1 }
 0xf02   : > { %5369 = vrot.lane.b32.xlu1 %v5301_v60, %s11075_s26 }
 0xf03   : > { %v5305_v14 = vpop.f32.mrf.mxu1 }
 0xf04   : > { %5371 = vrot.lane.b32.xlu0 %v5305_v14, %s11075_s26 }
 0xf05   : > { %v5307_v31 = vpop.f32.mrf.mxu1 }
 0xf06   : > { %5373 = vrot.lane.b32.xlu1 %v5307_v31, %s11075_s26 }
 0xf07   : > { %v5309_v4 = vpop.f32.mrf.mxu1 }
 0xf08   : > { %5375 = vrot.lane.b32.xlu0 %v5309_v4, %s11075_s26 }
 0xf09   : > { %v5311_v30 = vpop.f32.mrf.mxu1 }
 0xf0a   : > { %5377 = vrot.lane.b32.xlu1 %v5311_v30, %s11075_s26 }
 0xf0c   : > { %5359 = vrot.lane.b32.xlu0 %v5289_v12, %s11075_s26  ;;  %v5728_v12 = vld [vmem:[%s13643_s22 + $0x10] sm:$0xff] }
 0xf0e   : > { %5361 = vrot.lane.b32.xlu1 %v5291_v61, %s11075_s26  ;;  %v5726_v61 = vld [vmem:[%s13643_s22] sm:$0xff] }
 0xf10   : > { %5347 = vrot.lane.b32.xlu0 %v5275_v16, %s11075_s26 }
 0xf12   : > { %5349 = vrot.lane.b32.xlu1 %v5277_v7, %s11075_s26  ;;  %v10706_v7 = vld [vmem:[%s13642_s18] ss:$8 sps:$4 sm:$0xff]  }
 0xf14   : > { %5351 = vrot.lane.b32.xlu0 %v5279_v8, %s11075_s26 }
 0xf16   : > { %5353 = vrot.lane.b32.xlu1 %v5281_v32, %s11075_s26  ;;  %v12431_v32 = vld [vmem:[%s13642_s18 + $0x10] ss:$8 sps:$4 sm:$0xff]   ;;  %s13649_s26 = smov 112  }
 0xf66   : > { %v5356_v48 = vpop.permute.xlu0 %5355 }
 0xf67   : > { %5409 = vst.msk [vmem:[#allocation11 + $0x20] sm:$0xff] %vm5403_vm1, %v5356_v48 }
 0xf68   : > { %v5358_v24 = vpop.permute.xlu1 %5357 }
 0xf69   : > { %v5381_v26 = vsel %vm4754_vm2, %v5356_v48, %v5358_v24 }
 0xf6a   : > { %5410 = vst.msk [vmem:[#allocation11 + $0x28] sm:$0xff] %vm5405_vm15, %v5381_v26 }
 0xf6e   : > { %v5364_v38 = vpop.permute.xlu0 %5363  ;;  %v5429_v22 = vld [vmem:[#allocation11 + $0x20] sm:$0xff] }
 0xf6f   : > { %5413 = vst.msk [vmem:[#allocation11 + $0x40] sm:$0xff] %vm5403_vm1, %v5364_v38 }
 0xf70   : > { %v5366_v21 = vpop.permute.xlu1 %5365 }
 0xf71   : > { %v5383_v9 = vsel %vm4754_vm2, %v5364_v38, %v5366_v21  ;;  %v5430_v5 = vld [vmem:[#allocation11 + $0x28] sm:$0xff] }
 0xf72   : > { %5414 = vst.msk [vmem:[#allocation11 + $0x48] sm:$0xff] %vm5405_vm15, %v5383_v9  ;;  %v5368_v35 = vpop.permute.xlu0 %5367 }
 0xf73   : > { %5415 = vst.msk [vmem:[#allocation11 + $0x50] sm:$0xff] %vm5403_vm1, %v5368_v35 }
 0xf74   : > { %v5370_v41 = vpop.permute.xlu1 %5369 }
 0xf75   : > { %v5384_v45 = vsel %vm4754_vm2, %v5368_v35, %v5370_v41 }
 0xf76   : > { %5416 = vst.msk [vmem:[#allocation11 + $0x58] sm:$0xff] %vm5405_vm15, %v5384_v45  ;;  %v5372_v47 = vpop.permute.xlu0 %5371  ;;  %v5433_v15 = vld [vmem:[#allocation11 + $0x40] sm:$0xff] }
 0xf77   : > { %5417 = vst.msk [vmem:[#allocation11 + $0x60] sm:$0xff] %vm5403_vm1, %v5372_v47 }
 0xf78   : > { %v5374_v50 = vpop.permute.xlu1 %5373 }
 0xf79   : > { %v5385_v33 = vsel %vm4754_vm2, %v5372_v47, %v5374_v50  ;;  %v5434_v23 = vld [vmem:[#allocation11 + $0x48] sm:$0xff] }
 0xf7a   : > { %5418 = vst.msk [vmem:[#allocation11 + $0x68] sm:$0xff] %vm5405_vm15, %v5385_v33  ;;  %v5376_v54 = vpop.permute.xlu0 %5375  ;;  %v5435_v39 = vld [vmem:[#allocation11 + $0x50] sm:$0xff] }
 0xf7b   : > { %5419 = vst.msk [vmem:[#allocation11 + $0x70] sm:$0xff] %vm5403_vm1, %v5376_v54  ;;  %v12413_v6 = vpack.c.bf16 %v5435_v39, %v5433_v15 }
 0xf7c   : > { %v5378_v49 = vpop.permute.xlu1 %5377 }
 0xf7d   : > { %v5386_v56 = vsel %vm4754_vm2, %v5376_v54, %v5378_v49  ;;  %v5436_v37 = vld [vmem:[#allocation11 + $0x58] sm:$0xff] }
 0xf7e   : > { %5420 = vst.msk [vmem:[#allocation11 + $0x78] sm:$0xff] %vm5405_vm15, %v5386_v56  ;;  %v5360_v52 = vpop.permute.xlu0 %5359  ;;  %v5437_v0 = vld [vmem:[#allocation11 + $0x60] sm:$0xff]  ;;  %v5446_v10 = vpack.c.bf16 %v5436_v37, %v5434_v23 }
 0xf7f   : > { %5411 = vst.msk [vmem:[#allocation11 + $0x30] sm:$0xff] %vm5403_vm1, %v5360_v52 }
 0xf80   : > { %v5362_v59 = vpop.permute.xlu1 %5361 }
 0xf81   : > { %v5382_v57 = vsel %vm4754_vm2, %v5360_v52, %v5362_v59  ;;  %v5438_v46 = vld [vmem:[#allocation11 + $0x68] sm:$0xff] }
 0xf82   : > { %5412 = vst.msk [vmem:[#allocation11 + $0x38] sm:$0xff] %vm5405_vm15, %v5382_v57  ;;  %v5348_v55 = vpop.permute.xlu0 %5347  ;;  %v5439_v25 = vld [vmem:[#allocation11 + $0x70] sm:$0xff] }
 0xf83   : > { %5404 = vst.msk [vmem:[#allocation11] sm:$0xff] %vm5403_vm1, %v5348_v55  ;;  %v12404_v36 = vpack.c.bf16 %v5439_v25, %v5437_v0  ;;  %v10709_v0 = vld [vmem:[%s13642_s18 + $0x14] ss:$8 sps:$4 sm:$0xff]  }
 0xf84   : > { %v5350_v63 = vpop.permute.xlu1 %5349 }
 0xf85   : > { %v5379_v20 = vsel %vm4754_vm2, %v5348_v55, %v5350_v63  ;;  %5483 = vrot.lane.b32.xlu0 %v12404_v36, %s11054_s1  ;;  %v5440_v3 = vld [vmem:[#allocation11 + $0x78] sm:$0xff]  ;;  %v10708_v55 = vld [vmem:[%s13642_s18 + $0x4] ss:$8 sps:$4 sm:$0xff]  }
 0xf86   : > { %5406 = vst.msk [vmem:[#allocation11 + $0x8] sm:$0xff] %vm5405_vm15, %v5379_v20  ;;  %v5352_v43 = vpop.permute.xlu0 %5351  ;;  %v12410_v62 = vpack.c.bf16 %v5440_v3, %v5438_v46  ;;  %v5431_v1 = vld [vmem:[#allocation11 + $0x30] sm:$0xff] }
 0xf87   : > { %5407 = vst.msk [vmem:[#allocation11 + $0x10] sm:$0xff] %vm5403_vm1, %v5352_v43  ;;  %v12421_v28 = vpack.c.bf16 %v5431_v1, %v5429_v22  ;;  %vm13660_vm1 = vmmov %vm13659_vm9 }
 0xf88   : > { %5485 = vrot.lane.b32.xlu1 %v12410_v62, %s11054_s1  ;;  %v5354_v44 = vpop.permute.xlu1 %5353 }
 0xf89   : > { %v5380_v17 = vsel %vm4754_vm2, %v5352_v43, %v5354_v44  ;;  %5479 = vrot.lane.b32.xlu0 %v12413_v6, %s11054_s1  ;;  %v5432_v51 = vld [vmem:[#allocation11 + $0x38] sm:$0xff]  ;;  %vm5978_vm2 = vcmask 630104  }
 0xf8a   : > { %5408 = vst.msk [vmem:[#allocation11 + $0x18] sm:$0xff] %vm5405_vm15, %v5380_v17  ;;  %v5444_v19 = vpack.c.bf16 %v5432_v51, %v5430_v5  ;;  %v5425_v53 = vld [vmem:[#allocation11] sm:$0xff] }
 0xf8c   : > { %5481 = vrot.lane.b32.xlu1 %v5446_v10, %s11054_s1 }
 0xf8d   : > { %5475 = vrot.lane.b32.xlu0 %v12421_v28, %s11054_s1  ;;  %v5426_v2 = vld [vmem:[#allocation11 + $0x8] sm:$0xff] }
 0xf8e   : > { %v5427_v58 = vld [vmem:[#allocation11 + $0x10] sm:$0xff] }
 0xf8f   : > { %v5441_v42 = vpack.c.bf16 %v5427_v58, %v5425_v53 }
 0xf90   : > { %5477 = vrot.lane.b32.xlu1 %v5444_v19, %s11054_s1 }
 0xf91   : > { %5471 = vrot.lane.b32.xlu0 %v5441_v42, %s11054_s1  ;;  %v5428_v16 = vld [vmem:[#allocation11 + $0x18] sm:$0xff] }
 0xf92   : > { %v5442_v8 = vpack.c.bf16 %v5428_v16, %v5426_v2 }
 0xf94   : > { %5473 = vrot.lane.b32.xlu1 %v5442_v8, %s11054_s1 }
 0xf95   : > { %5459 = vrot.lane.b32.xlu0 %v10706_v7, %s11074_s15 }
 0xf98   : > { %5461 = vrot.lane.b32.xlu1 %v12431_v32, %s11074_s15 }
 0xf99   : > { %5643 = vrot.lane.b32.xlu0 %v12404_v36, %s11055_s2 }
 0xf9c   : > { %5645 = vrot.lane.b32.xlu1 %v12410_v62, %s11055_s2 }
 0xf9d   : > { %5639 = vrot.lane.b32.xlu0 %v12413_v6, %s11055_s2 }
 0xfa0   : > { %5641 = vrot.lane.b32.xlu1 %v5446_v10, %s11055_s2 }
 0xfa1   : > { %5635 = vrot.lane.b32.xlu0 %v12421_v28, %s11055_s2 }
 0xfa4   : > { %5637 = vrot.lane.b32.xlu1 %v5444_v19, %s11055_s2 }
 0xfa5   : > { %5631 = vrot.lane.b32.xlu0 %v5441_v42, %s11055_s2 }
 0xfa8   : > { %5633 = vrot.lane.b32.xlu1 %v5442_v8, %s11055_s2 }
 0xfa9   : > { %5747 = vperm.xlu0 %10198, %v5729_v29  }
 0xfac   : > { %5737 = vperm.xlu1 %10197, %v5727_v11  }
 0xfad   : > { %5742 = vperm.xlu0 %10198, %v5728_v12  }
 0xfb0   : > { %5732 = vperm.xlu1 %10197, %v5726_v61  }
 0xff7   : > { %v5484_v27 = vpop.permute.xlu0 %5483 }
 0xffa   : > { %v5486_v40 = vpop.permute.xlu1 %5485 }
 0xffb   : > { %v5480_v13 = vpop.permute.xlu0 %5479  ;;  %5513 = vmatprep.subr.bf16.mxu0 %v5486_v40  ;;  %v5490_v60 = vsel %vm913_vm3, %v5484_v27, %v5486_v40 }
 0xffc   : > { %5514 = vmatpush1.bf16.msra.mxu0 %v5490_v60 }
 0xffe   : > { %v5482_v14 = vpop.permute.xlu1 %5481 }
 0xfff   : > { %v5476_v31 = vpop.permute.xlu0 %5475  ;;  %5515 = vmatprep.subr.bf16.mxu0 %v5482_v14  ;;  %v5489_v4 = vsel %vm913_vm3, %v5480_v13, %v5482_v14 }
0x1000   : > { %5516 = vmatpush1.bf16.msra.mxu0 %v5489_v4 }
0x1002   : > { %v5478_v30 = vpop.permute.xlu1 %5477 }
0x1003   : > { %5517 = vmatprep.subr.bf16.mxu0 %v5478_v30  ;;  %v5488_v48 = vsel %vm913_vm3, %v5476_v31, %v5478_v30  ;;  %v5472_v24 = vpop.permute.xlu0 %5471 }
0x1004   : > { %5518 = vmatpush1.bf16.msra.mxu0 %v5488_v48 }
0x1006   : > { %v5474_v26 = vpop.permute.xlu1 %5473 }
0x1007   : > { %5519 = vmatprep.subr.bf16.mxu0 %v5474_v26  ;;  %v5487_v38 = vsel %vm913_vm3, %v5472_v24, %v5474_v26  ;;  %v5460_v21 = vpop.permute.xlu0 %5459 }
0x1008   : > { %5520 = vmatpush1.bf16.msra.mxu0 %v5487_v38 }
0x1009   : > { %5572 = vmatprep.subr.bf16.mxu0 %v12410_v62 }
0x100a   : > { %v5462_v9 = vpop.permute.xlu1 %5461 }
0x100b   : > { %9637 = vmatmul.mubr.msk.bf16.vlgmr.msra.gmra.mxu0 %vm4290_vm12, %v5460_v21  ;;  %v5644_v41 = vpop.permute.xlu0 %5643 }
0x100c   : > { %5573 = vmatpush1.bf16.msra.mxu0 %v12404_v36  ;;  %5547 = vmatprep.mubr.bf16.mxu0 %v11069_v34 }
0x100d   : > { %5574 = vmatprep.subr.bf16.mxu0 %v5446_v10 }
0x100e   : > { %v5646_v35 = vpop.permute.xlu1 %5645 }
0x100f   : > { %v5640_v47 = vpop.permute.xlu0 %5639  ;;  %v5650_v50 = vsel %vm924_vm4, %v5644_v41, %v5646_v35 }
0x1010   : > { %5575 = vmatpush1.bf16.msra.mxu0 %v12413_v6 }
0x1011   : > { %5576 = vmatprep.subr.bf16.mxu0 %v5444_v19 }
0x1012   : > { %v5642_v45 = vpop.permute.xlu1 %5641 }
0x1013   : > { %9638 = vmatmul.mubr.msk.bf16.gmra.mxu0 %vm4290_vm12, %v5462_v9  ;;  %v5649_v54 = vsel %vm924_vm4, %v5640_v47, %v5642_v45  ;;  %v5636_v49 = vpop.permute.xlu0 %5635 }
0x1014   : > { %5577 = vmatpush1.bf16.msra.mxu0 %v12421_v28  ;;  %5596 = vmatprep.mubr.bf16.mxu0 %v11069_v34 }
0x1015   : > { %5578 = vmatprep.subr.bf16.mxu0 %v5442_v8 }
0x1016   : > { %v5638_v33 = vpop.permute.xlu1 %5637 }
0x1017   : > { %v5648_v56 = vsel %vm924_vm4, %v5636_v49, %v5638_v33  ;;  %v5632_v59 = vpop.permute.xlu0 %5631 }
0x1018   : > { %5579 = vmatpush1.bf16.msra.mxu0 %v5441_v42 }
0x1019   : > { %5673 = vmatprep.subr.bf16.mxu0 %v5646_v35 }
0x101a   : > { %v5634_v52 = vpop.permute.xlu1 %5633 }
0x101b   : > { %9639 = vmatmul.mubr.msk.bf16.vlgmr.msra.gmra.mxu0 %vm4290_vm12, %v10706_v7  ;;  %v5647_v57 = vsel %vm924_vm4, %v5632_v59, %v5634_v52 }
0x101c   : > { %5674 = vmatpush1.bf16.msra.mxu0 %v5650_v50  ;;  %5606 = vmatprep.mubr.bf16.mxu0 %v11069_v34 }
0x101d   : > { %5675 = vmatprep.subr.bf16.mxu0 %v5642_v45 }
0x1020   : > { %5676 = vmatpush1.bf16.msra.mxu0 %v5649_v54 }
0x1021   : > { %5677 = vmatprep.subr.bf16.mxu0 %v5638_v33 }
0x1023   : > { %9640 = vmatmul.mubr.msk.bf16.gmra.mxu0 %vm4290_vm12, %v12431_v32 }
0x1024   : > { %5678 = vmatpush1.bf16.msra.mxu0 %v5648_v56  ;;  %5697 = vmatprep.mubr.bf16.mxu0 %v11069_v34  ;;  %v5748_v16 = vpop.permute.xlu0 %5747 }
0x1025   : > { %5679 = vmatprep.subr.bf16.mxu0 %v5634_v52 }
0x1027   : > { %v5738_v17 = vpop.permute.xlu1 %5737 }
0x1028   : > { %5680 = vmatpush1.bf16.msra.mxu0 %v5647_v57  ;;  %v5743_v48 = vpop.permute.xlu0 %5742 }
0x102b   : > { %9643 = vmatmul.mubr.msk.bf16.vlgmr.msra.gmra.mxu0 %vm4290_vm12, %v10708_v55  ;;  %v5733_v19 = vpop.permute.xlu1 %5732 }
0x102c   : > { %5707 = vmatprep.mubr.bf16.mxu0 %v11069_v34 }
0x1033   : > { %9644 = vmatmul.mubr.msk.bf16.gmra.mxu0 %vm4290_vm12, %v10709_v0 }
0x1034   : > { %6998 = vmatprep.mubr.bf16.mxu0 %v11069_v34 }
0x10cb   : > { %v5539_v25 = vpop.f32.mrf.mxu0 }
0x10cd   : > { %v5541_v36 = vpop.f32.mrf.mxu0 }
0x10cf   : > { %v5543_v63 = vpop.f32.mrf.mxu0 }
0x10d1   : > { %v5545_v39 = vpop.f32.mrf.mxu0 }
0x10d3   : > { %v5549_v20 = vpop.f32.mrf.mxu0 }
0x10d5   : > { %v5551_v46 = vpop.f32.mrf.mxu0 }
0x10d7   : > { %v5553_v3 = vpop.f32.mrf.mxu0 }
0x10d9   : > { %v5555_v43 = vpop.f32.mrf.mxu0 }
0x10db   : > { %v5598_v62 = vpop.f32.mrf.mxu0 }
0x10dc   : > { %v5599_v22 = vadd.f32 %v5598_v62, %v5539_v25 }
0x10dd   : > { %v5600_v15 = vpop.f32.mrf.mxu0 }
0x10de   : > { %v5601_v51 = vadd.f32 %v5600_v15, %v5541_v36 }
0x10df   : > { %v5602_v6 = vpop.f32.mrf.mxu0 }
0x10e0   : > { %v5603_v58 = vadd.f32 %v5602_v6, %v5543_v63 }
0x10e1   : > { %v5604_v37 = vpop.f32.mrf.mxu0 }
0x10e2   : > { %v5605_v8 = vadd.f32 %v5604_v37, %v5545_v39 }
0x10e3   : > { %v5608_v44 = vpop.f32.mrf.mxu0 }
0x10e4   : > { %v5609_v12 = vadd.f32 %v5608_v44, %v5549_v20 }
0x10e5   : > { %v5610_v1 = vpop.f32.mrf.mxu0 }
0x10e6   : > { %v5611_v60 = vadd.f32 %v5610_v1, %v5551_v46 }
0x10e7   : > { %v5612_v23 = vpop.f32.mrf.mxu0 }
0x10e8   : > { %v5613_v24 = vadd.f32 %v5612_v23, %v5553_v3 }
0x10e9   : > { %v5614_v10 = vpop.f32.mrf.mxu0 }
0x10ea   : > { %v5615_v35 = vadd.f32 %v5614_v10, %v5555_v43 }
0x10eb   : > { %v5699_v28 = vpop.f32.mrf.mxu0 }
0x10ec   : > { %v5718_v5 = vadd.f32 %v5699_v28, %v5599_v22  ;;  %v11076_v28 = vmov -1e+30  }
0x10ed   : > { %v5701_v53 = vpop.f32.mrf.mxu0  ;;  %5980 = vst.msk [vmem:[#allocation13 + $0x18] sm:$0xff] %vm5978_vm2, %v11076_v28  ;;  %5984 = vst.msk [vmem:[#allocation13 + $0x58] sm:$0xff] %vm5978_vm2, %v11076_v28 }
0x10ee   : > { %v5750_v42 = vadd.f32 %v5733_v19, %v5718_v5  ;;  %v5719_v2 = vadd.f32 %v5701_v53, %v5601_v51  ;;  %5979 = vst.msk [vmem:[#allocation13 + $0x8] sm:$0xff] %vm5978_vm2, %v11076_v28  ;;  %5981 = vst.msk [vmem:[#allocation13 + $0x28] sm:$0xff] %vm5978_vm2, %v11076_v28 }
0x10ef   : > { %v5703_v7 = vpop.f32.mrf.mxu0  ;;  %5982 = vst.msk [vmem:[#allocation13 + $0x38] sm:$0xff] %vm5978_vm2, %v11076_v28  ;;  %5983 = vst.msk [vmem:[#allocation13 + $0x48] sm:$0xff] %vm5978_vm2, %v11076_v28 }
0x10f0   : > { %v5758_v32 = vmul.f32 0.5, %v5750_v42  ;;  %v5751_v29 = vadd.f32 %v5733_v19, %v5719_v2  ;;  %v5720_v11 = vadd.f32 %v5703_v7, %v5603_v58  ;;  %5985 = vst.msk [vmem:[#allocation13 + $0x68] sm:$0xff] %vm5978_vm2, %v11076_v28  ;;  %5986 = vst.msk [vmem:[#allocation13 + $0x78] sm:$0xff] %vm5978_vm2, %v11076_v28  ;;  %vm7159_vm2 = vcmask 195584  }
0x10f1   : > { %v5705_v61 = vpop.f32.mrf.mxu0 }
0x10f2   : > { %10985 = vtanh.f32 %v5758_v32  ;;  %v5759_v27 = vmul.f32 0.5, %v5751_v29  ;;  %v5752_v40 = vadd.f32 %v5738_v17, %v5720_v11  ;;  %v5721_v13 = vadd.f32 %v5705_v61, %v5605_v8 }
0x10f3   : > { %v5709_v14 = vpop.f32.mrf.mxu0  ;;  %v12542_v61 = vshrl.u32 %v902_v18, 7 }
0x10f4   : > { %10987 = vtanh.f32 %v5759_v27  ;;  %v5760_v31 = vmul.f32 0.5, %v5752_v40  ;;  %v5753_v4 = vadd.f32 %v5738_v17, %v5721_v13  ;;  %v5722_v30 = vadd.f32 %v5709_v14, %v5609_v12 }
0x10f5   : > { %v5711_v26 = vpop.f32.mrf.mxu0 }
0x10f6   : > { %10989 = vtanh.f32 %v5760_v31  ;;  %v5761_v38 = vmul.f32 0.5, %v5753_v4  ;;  %v5754_v21 = vadd.f32 %v5743_v48, %v5722_v30  ;;  %v5723_v9 = vadd.f32 %v5711_v26, %v5611_v60  ;;  %v12551_v30 = vld [vmem:[%s13644_s23] sm:$0x3]  ;;  %s13650_s23 = sld [smem:[#allocation22_spill]] }
0x10f7   : > { %v5713_v41 = vpop.f32.mrf.mxu0  ;;  %v12547_v31 = vsub.s32 1, %v12542_v61 }
0x10f8   : > { %10991 = vtanh.f32 %v5761_v38  ;;  %v5762_v45 = vmul.f32 0.5, %v5754_v21  ;;  %v5755_v47 = vadd.f32 %v5743_v48, %v5723_v9  ;;  %v5724_v50 = vadd.f32 %v5713_v41, %v5613_v24  ;;  %v5958_v24 = vld [vmem:[%s13645_s16] sm:$0x3]  ;;  %s13662_s16 = sld [smem:[#allocation24_spill]] }
0x10f9   : > { %v5715_v33 = vpop.f32.mrf.mxu0  ;;  %v12554_v48 = vsub.s32 0, %v12542_v61  ;;  %v12559_v9 = vrot.slane %v12551_v30, %v12547_v31 }
0x10fa   : > { %10993 = vtanh.f32 %v5762_v45  ;;  %v5763_v54 = vmul.f32 0.5, %v5755_v47  ;;  %v5756_v49 = vadd.f32 %v5748_v16, %v5724_v50  ;;  %v5725_v56 = vadd.f32 %v5715_v33, %v5615_v35  ;;  %v5925_v47 = vld [vmem:[#allocation5 + $0x18] sm:$0xff] }
0x10fb   : > { %v12562_v35 = vrot.slane %v5958_v24, %v12547_v31  ;;  %v12566_v50 = vrot.slane %v5958_v24, %v12554_v48 }
0x10fc   : > { %10995 = vtanh.f32 %v5763_v54  ;;  %v5764_v52 = vmul.f32 0.5, %v5756_v49  ;;  %v5757_v59 = vadd.f32 %v5748_v16, %v5725_v56  ;;  %v5924_v49 = vld [vmem:[#allocation5 + $0x10] sm:$0xff] }
0x10fe   : > { %10997 = vtanh.f32 %v5764_v52  ;;  %v5765_v57 = vmul.f32 0.5, %v5757_v59 }
0x10ff   : > { %v10986_v55 = vpop.eup %10985 }
0x1100   : > { %v5774_v0 = vadd.f32 1.0, %v10986_v55  ;;  %10999 = vtanh.f32 %v5765_v57 }
0x1101   : > { %v10988_v25 = vpop.eup %10987 }
0x1102   : > { %v12479_v36 = vmul.f32 0.5, %v5774_v0  ;;  %v5775_v63 = vadd.f32 1.0, %v10988_v25 }
0x1103   : > { %v10990_v39 = vpop.eup %10989 }
0x1104   : > { %v5783_v20 = vmul.f32 0.5, %v5775_v63  ;;  %v5776_v46 = vadd.f32 1.0, %v10990_v39  ;;  %5814 = vrot.lane.b32.xlu0 %v12479_v36, %s11054_s1 }
0x1105   : > { %v10992_v3 = vpop.eup %10991 }
0x1106   : > { %5791 = vst.msk [vmem:[#allocation12 + $0x8] sm:$0xff] %vm5405_vm15, %v5783_v20  ;;  %v12484_v43 = vmul.f32 0.5, %v5776_v46  ;;  %v5777_v62 = vadd.f32 1.0, %v10992_v3 }
0x1107   : > { %v10994_v15 = vpop.eup %10993 }
0x1108   : > { %v5785_v6 = vmul.f32 0.5, %v5777_v62  ;;  %v5778_v37 = vadd.f32 1.0, %v10994_v15  ;;  %5818 = vrot.lane.b32.xlu0 %v12484_v43, %s11054_s1 }
0x1109   : > { %v10996_v44 = vpop.eup %10995 }
0x110a   : > { %5793 = vst.msk [vmem:[#allocation12 + $0x18] sm:$0xff] %vm5405_vm15, %v5785_v6  ;;  %v12489_v1 = vmul.f32 0.5, %v5778_v37  ;;  %v5779_v17 = vadd.f32 1.0, %v10996_v44 }
0x110b   : > { %v10998_v23 = vpop.eup %10997 }
0x110c   : > { %v5787_v10 = vmul.f32 0.5, %v5779_v17  ;;  %v5780_v22 = vadd.f32 1.0, %v10998_v23  ;;  %5854 = vrot.lane.b32.xlu0 %v12484_v43, %s11055_s2 }
0x110d   : > { %v11000_v51 = vpop.eup %10999  ;;  %v12493_v5 = vld [vmem:[#allocation12 + $0x8] sm:$0xff] }
0x110e   : > { %5795 = vst.msk [vmem:[#allocation12 + $0x28] sm:$0xff] %vm5405_vm15, %v5787_v10  ;;  %v12496_v19 = vmul.f32 0.5, %v5780_v22  ;;  %v5781_v53 = vadd.f32 1.0, %v11000_v51  ;;  %5816 = vrot.lane.b32.xlu1 %v12493_v5, %s11054_s1 }
0x1110   : > { %v5789_v58 = vmul.f32 0.5, %v5781_v53  ;;  %5890 = vrot.lane.b32.xlu0 %v12484_v43, %s11056_s0  ;;  %v5929_v53 = vld [vmem:[#allocation5 + $0x38] sm:$0xff] }
0x1111   : > { %v5801_v42 = vld [vmem:[#allocation12 + $0x18] sm:$0xff] }
0x1112   : > { %5797 = vst.msk [vmem:[#allocation12 + $0x38] sm:$0xff] %vm5405_vm15, %v5789_v58  ;;  %5820 = vrot.lane.b32.xlu1 %v5801_v42, %s11054_s1  ;;  %vm13666_vm15 = vmmov %vm13660_vm1 }
0x1114   : > { %5822 = vrot.lane.b32.xlu0 %v12489_v1, %s11054_s1 }
0x1115   : > { %v12512_v2 = vld [vmem:[#allocation12 + $0x28] sm:$0xff] }
0x1116   : > { %5856 = vrot.lane.b32.xlu1 %v5801_v42, %s11055_s2 }
0x1118   : > { %5858 = vrot.lane.b32.xlu0 %v12489_v1, %s11055_s2 }
0x1119   : > { %v5805_v16 = vld [vmem:[#allocation12 + $0x38] sm:$0xff] }
0x111a   : > { %5892 = vrot.lane.b32.xlu1 %v5801_v42, %s11056_s0 }
0x111c   : > { %5826 = vrot.lane.b32.xlu0 %v12496_v19, %s11054_s1 }
0x111e   : > { %5824 = vrot.lane.b32.xlu1 %v12512_v2, %s11054_s1 }
0x1120   : > { %5862 = vrot.lane.b32.xlu0 %v12496_v19, %s11055_s2 }
0x1122   : > { %5860 = vrot.lane.b32.xlu1 %v12512_v2, %s11055_s2 }
0x1124   : > { %5898 = vrot.lane.b32.xlu0 %v12496_v19, %s11056_s0 }
0x1126   : > { %5828 = vrot.lane.b32.xlu1 %v5805_v16, %s11054_s1 }
0x1128   : > { %5894 = vrot.lane.b32.xlu0 %v12489_v1, %s11056_s0 }
0x112a   : > { %5864 = vrot.lane.b32.xlu1 %v5805_v16, %s11055_s2 }
0x112c   : > { %5850 = vrot.lane.b32.xlu0 %v12479_v36, %s11055_s2 }
0x112e   : > { %5900 = vrot.lane.b32.xlu1 %v5805_v16, %s11056_s0 }
0x1130   : > { %5886 = vrot.lane.b32.xlu0 %v12479_v36, %s11056_s0 }
0x1132   : > { %5896 = vrot.lane.b32.xlu1 %v12512_v2, %s11056_s0 }
0x1136   : > { %5852 = vrot.lane.b32.xlu1 %v12493_v5, %s11055_s2 }
0x113a   : > { %5888 = vrot.lane.b32.xlu1 %v12493_v5, %s11056_s0 }
0x1176   : > { %v12537_v7 = vpop.permute.xlu0 %5814 }
0x117a   : > { %v5819_v8 = vpop.permute.xlu0 %5818 }
0x117e   : > { %v5855_v32 = vpop.permute.xlu0 %5854 }
0x1180   : > { %v12539_v29 = vpop.permute.xlu1 %5816 }
0x1182   : > { %v5891_v11 = vpop.permute.xlu0 %5890 }
0x1184   : > { %v5821_v12 = vpop.permute.xlu1 %5820 }
0x1185   : > { %v5831_v40 = vsel %vm913_vm3, %v5819_v8, %v5821_v12  ;;  %v5845_v60 = vmax.f32 %v5801_v42, %v5821_v12 }
0x1186   : > { %v5823_v27 = vpop.permute.xlu0 %5822  ;;  %v5844_v4 = vmax.f32 %v12484_v43, %v5831_v40 }
0x1188   : > { %v5857_v13 = vpop.permute.xlu1 %5856 }
0x1189   : > { %v5867_v14 = vsel %vm924_vm4, %v5855_v32, %v5857_v13  ;;  %v5881_v26 = vmax.f32 %v5845_v60, %v5857_v13  ;;  %v5927_v13 = vld [vmem:[#allocation5 + $0x28] sm:$0xff] }
0x118a   : > { %v5859_v18 = vpop.permute.xlu0 %5858  ;;  %v5880_v38 = vmax.f32 %v5844_v4, %v5867_v14  ;;  %v5830_v14 = vsel %vm913_vm3, %v12537_v7, %v12539_v29  ;;  %v5926_v4 = vld [vmem:[#allocation5 + $0x20] sm:$0xff] }
0x118c   : > { %v5893_v21 = vpop.permute.xlu1 %5892 }
0x118d   : > { %v5903_v41 = vsel %vm935_vm5, %v5891_v11, %v5893_v21  ;;  %v5917_v45 = vmax.f32 %v5881_v26, %v5893_v21  ;;  %v5928_v21 = vld [vmem:[#allocation5 + $0x30] sm:$0xff] }
0x118e   : > { %v5916_v33 = vmax.f32 %v5880_v38, %v5903_v41  ;;  %v5827_v54 = vpop.permute.xlu0 %5826  ;;  %v5843_v38 = vmax.f32 %v12493_v5, %v12539_v29 }
0x118f   : > { %v5933_v56 = vmul.f32 %v5925_v47, %v5917_v45  ;;  %v5842_v47 = vmax.f32 %v12479_v36, %v5830_v14 }
0x1190   : > { %v12568_v52 = vmul.f32 %v5924_v49, %v5916_v33  ;;  %v5825_v59 = vpop.permute.xlu1 %5824 }
0x1191   : > { %v12571_v57 = vmul.f32 %v12559_v9, %v5933_v56  ;;  %v12574_v55 = vmul.f32 %v12562_v35, %v5933_v56  ;;  %v5832_v62 = vsel %vm913_vm3, %v5823_v27, %v5825_v59  ;;  %v5847_v17 = vmax.f32 %v12512_v2, %v5825_v59 }
0x1192   : > { %v12578_v0 = vmul.f32 %v12566_v50, %v12568_v52  ;;  %v5863_v63 = vpop.permute.xlu0 %5862  ;;  %v5846_v28 = vmax.f32 %v12489_v1, %v5832_v62 }
0x1193   : > { %5990 = vst.msk [vmem:[#allocation13 + $0x18] sm:$0xff] %vm3301_vm13, %v12571_v57  ;;  %5998 = vst.msk [vmem:[#allocation13 + $0x58] sm:$0xff] %vm3301_vm13, %v12574_v55 }
0x1194   : > { %v5861_v25 = vpop.permute.xlu1 %5860  ;;  %6055 = vrot.lane.b32.xlu0 %v12578_v0, %s11054_s1 }
0x1195   : > { %v5868_v23 = vsel %vm924_vm4, %v5859_v18, %v5861_v25  ;;  %v5883_v58 = vmax.f32 %v5847_v17, %v5861_v25 }
0x1196   : > { %v5899_v46 = vpop.permute.xlu0 %5898  ;;  %v5882_v8 = vmax.f32 %v5846_v28, %v5868_v23 }
0x1198   : > { %v5829_v39 = vpop.permute.xlu1 %5828 }
0x1199   : > { %v5849_v43 = vmax.f32 %v5805_v16, %v5829_v39  ;;  %v5833_v15 = vsel %vm913_vm3, %v5827_v54, %v5829_v39 }
0x119a   : > { %v12586_v20 = vld [vmem:[#allocation13 + $0x58] sm:$0xff]  ;;  %v5895_v44 = vpop.permute.xlu0 %5894  ;;  %v5848_v51 = vmax.f32 %v12496_v19, %v5833_v15 }
0x119b   : > { %6057 = vrot.lane.b32.xlu1 %v12586_v20, %s11054_s1 }
0x119c   : > { %v5865_v3 = vpop.permute.xlu1 %5864 }
0x119d   : > { %v5885_v6 = vmax.f32 %v5849_v43, %v5865_v3  ;;  %v5869_v10 = vsel %vm924_vm4, %v5863_v63, %v5865_v3  ;;  %v5923_v63 = vld [vmem:[#allocation5 + $0x8] sm:$0xff] }
0x119e   : > { %v5884_v32 = vmax.f32 %v5848_v51, %v5869_v10  ;;  %v5851_v60 = vpop.permute.xlu0 %5850  ;;  %v12664_v10 = vld [vmem:[#allocation13 + $0x18] sm:$0xff] }
0x11a0   : > { %v5901_v37 = vpop.permute.xlu1 %5900 }
0x11a1   : > { %v5921_v22 = vmax.f32 %v5885_v6, %v5901_v37  ;;  %v5905_v42 = vsel %vm935_vm5, %v5899_v46, %v5901_v37  ;;  %v5922_v46 = vld [vmem:[#allocation5] sm:$0xff]  ;;  %v5943_v6 = vrot.slane %v12551_v30, %v12554_v48 }
0x11a2   : > { %v5920_v1 = vmax.f32 %v5884_v32, %v5905_v42  ;;  %v5887_v5 = vpop.permute.xlu0 %5886 }
0x11a3   : > { %v5937_v16 = vmul.f32 %v5929_v53, %v5921_v22 }
0x11a4   : > { %v5897_v11 = vpop.permute.xlu1 %5896  ;;  %v5936_v33 = vmul.f32 %v5928_v21, %v5920_v1 }
0x11a5   : > { %v12599_v12 = vmul.f32 %v12559_v9, %v5937_v16  ;;  %v12602_v2 = vmul.f32 %v12562_v35, %v5937_v16  ;;  %v5904_v27 = vsel %vm935_vm5, %v5895_v44, %v5897_v11  ;;  %v5919_v40 = vmax.f32 %v5883_v58, %v5897_v11 }
0x11a6   : > { %v5918_v19 = vmax.f32 %v5882_v8, %v5904_v27  ;;  %v12627_v36 = vmul.f32 %v12566_v50, %v5936_v33  ;;  %v12649_v30 = vmul.f32 %v5943_v6, %v5936_v33 }
0x11a7   : > { %5994 = vst.msk [vmem:[#allocation13 + $0x38] sm:$0xff] %vm3301_vm13, %v12599_v12  ;;  %6002 = vst.msk [vmem:[#allocation13 + $0x78] sm:$0xff] %vm3301_vm13, %v12602_v2  ;;  %v5935_v24 = vmul.f32 %v5927_v13, %v5919_v40 }
0x11a8   : > { %v5934_v18 = vmul.f32 %v5926_v4, %v5918_v19  ;;  %v5853_v26 = vpop.permute.xlu1 %5852 }
0x11a9   : > { %v5955_v41 = vmul.f32 %v12559_v9, %v5935_v24  ;;  %v5975_v45 = vmul.f32 %v12562_v35, %v5935_v24  ;;  %v5866_v7 = vsel %vm924_vm4, %v5851_v60, %v5853_v26  ;;  %v5879_v49 = vmax.f32 %v5843_v38, %v5853_v26 }
0x11aa   : > { %v12619_v54 = vmul.f32 %v12566_v50, %v5934_v18  ;;  %v5878_v56 = vmax.f32 %v5842_v47, %v5866_v7  ;;  %v12654_v17 = vmul.f32 %v5943_v6, %v5934_v18 }
0x11ab   : > { %5992 = vst.msk [vmem:[#allocation13 + $0x28] sm:$0xff] %vm3301_vm13, %v5955_v41  ;;  %6000 = vst.msk [vmem:[#allocation13 + $0x68] sm:$0xff] %vm3301_vm13, %v5975_v45 }
0x11ac   : > { %v5889_v29 = vpop.permute.xlu1 %5888  ;;  %6059 = vrot.lane.b32.xlu0 %v12619_v54, %s11054_s1 }
0x11ad   : > { %v5902_v59 = vsel %vm935_vm5, %v5887_v5, %v5889_v29  ;;  %v5915_v25 = vmax.f32 %v5879_v49, %v5889_v29 }
0x11ae   : > { %v5914_v39 = vmax.f32 %v5878_v56, %v5902_v59 }
0x11af   : > { %v5931_v3 = vmul.f32 %v5923_v63, %v5915_v25 }
0x11b0   : > { %v5930_v43 = vmul.f32 %v5922_v46, %v5914_v39  ;;  %6063 = vrot.lane.b32.xlu0 %v12627_v36, %s11054_s1 }
0x11b1   : > { %v5951_v62 = vmul.f32 %v12559_v9, %v5931_v3  ;;  %v5971_v15 = vmul.f32 %v12562_v35, %v5931_v3  ;;  %v12644_v9 = vmul.f32 %v5943_v6, %v12568_v52  ;;  %v6018_v35 = vld [vmem:[#allocation13 + $0x78] sm:$0xff] }
0x11b2   : > { %v12636_v37 = vmul.f32 %v12566_v50, %v5930_v43  ;;  %v6016_v44 = vld [vmem:[#allocation13 + $0x68] sm:$0xff]  ;;  %v6010_v50 = vld [vmem:[#allocation13 + $0x38] sm:$0xff]  ;;  %v12662_v52 = vmul.f32 %v5943_v6, %v5930_v43 }
0x11b3   : > { %5988 = vst.msk [vmem:[#allocation13 + $0x8] sm:$0xff] %vm3301_vm13, %v5951_v62  ;;  %5996 = vst.msk [vmem:[#allocation13 + $0x48] sm:$0xff] %vm3301_vm13, %v5971_v15  ;;  %6061 = vrot.lane.b32.xlu1 %v6016_v44, %s11054_s1  ;;  %v12670_v22 = vld [vmem:[#allocation13 + $0x28] sm:$0xff] }
0x11b4   : > { %6051 = vrot.lane.b32.xlu0 %v12636_v37, %s11054_s1 }
0x11b7   : > { %6065 = vrot.lane.b32.xlu1 %v6018_v35, %s11054_s1 }
0x11b8   : > { %6039 = vrot.lane.b32.xlu0 %v12644_v9, %s11054_s1 }
0x11ba   : > { %v12656_v23 = vld [vmem:[#allocation13 + $0x48] sm:$0xff] }
0x11bb   : > { %6049 = vrot.lane.b32.xlu1 %v6010_v50, %s11054_s1  ;;  %v12676_v28 = vld [vmem:[#allocation13 + $0x8] sm:$0xff] }
0x11bc   : > { %6047 = vrot.lane.b32.xlu0 %v12649_v30, %s11054_s1 }
0x11bf   : > { %6053 = vrot.lane.b32.xlu1 %v12656_v23, %s11054_s1 }
0x11c0   : > { %6043 = vrot.lane.b32.xlu0 %v12654_v17, %s11054_s1 }
0x11c3   : > { %6041 = vrot.lane.b32.xlu1 %v12664_v10, %s11054_s1 }
0x11c4   : > { %6035 = vrot.lane.b32.xlu0 %v12662_v52, %s11054_s1 }
0x11c7   : > { %6045 = vrot.lane.b32.xlu1 %v12670_v22, %s11054_s1 }
0x11c8   : > { %6775 = vrot.lane.b32.xlu0 %v12619_v54, %s11072_s11 }
0x11cb   : > { %6037 = vrot.lane.b32.xlu1 %v12676_v28, %s11054_s1 }
0x11cc   : > { %6779 = vrot.lane.b32.xlu0 %v12627_v36, %s11072_s11 }
0x11cf   : > { %6777 = vrot.lane.b32.xlu1 %v5975_v45, %s11072_s11 }
0x11d0   : > { %6767 = vrot.lane.b32.xlu0 %v12636_v37, %s11072_s11 }
0x11d3   : > { %6781 = vrot.lane.b32.xlu1 %v12602_v2, %s11072_s11 }
0x11d4   : > { %6771 = vrot.lane.b32.xlu0 %v12578_v0, %s11072_s11 }
0x11d7   : > { %6769 = vrot.lane.b32.xlu1 %v5971_v15, %s11072_s11 }
0x11d8   : > { %6731 = vrot.lane.b32.xlu0 %v12654_v17, %s11072_s11 }
0x11db   : > { %6773 = vrot.lane.b32.xlu1 %v12574_v55, %s11072_s11 }
0x11dc   : > { %6735 = vrot.lane.b32.xlu0 %v12649_v30, %s11072_s11 }
0x11df   : > { %6733 = vrot.lane.b32.xlu1 %v5955_v41, %s11072_s11 }
0x11e0   : > { %6723 = vrot.lane.b32.xlu0 %v12662_v52, %s11072_s11 }
0x11e3   : > { %6737 = vrot.lane.b32.xlu1 %v12599_v12, %s11072_s11 }
0x11e4   : > { %6727 = vrot.lane.b32.xlu0 %v12644_v9, %s11072_s11 }
0x11e7   : > { %6725 = vrot.lane.b32.xlu1 %v5951_v62, %s11072_s11 }
0x11eb   : > { %6729 = vrot.lane.b32.xlu1 %v12571_v57, %s11072_s11  ;;  %s13647_s11 = smov 124  }
0x1206   : > { %v6056_v51 = vpop.permute.xlu0 %6055 }
0x120d   : > { %v6058_v55 = vpop.permute.xlu1 %6057 }
0x120e   : > { %v6102_v53 = vmax.f32 %v12586_v20, %v6058_v55  ;;  %v6072_v58 = vsel %vm913_vm3, %v6056_v51, %v6058_v55 }
0x120f   : > { %v12709_v42 = vmax.f32 %v12578_v0, %v6072_v58 }
0x1210   : > { %6118 = vst.msk [vmem:[#allocation13 + $0x58] sm:$0xff] %vm3301_vm13, %v6102_v53 }
0x1211   : > { %6175 = vrot.lane.b32.xlu0 %v12709_v42, %s11055_s2 }
0x1217   : > { %v12714_v16 = vld [vmem:[#allocation13 + $0x58] sm:$0xff] }
0x1218   : > { %6177 = vrot.lane.b32.xlu1 %v12714_v16, %s11055_s2 }
0x121e   : > { %v6060_v57 = vpop.permute.xlu0 %6059 }
0x1222   : > { %v6064_v8 = vpop.permute.xlu0 %6063 }
0x1225   : > { %v6062_v32 = vpop.permute.xlu1 %6061 }
0x1226   : > { %v6104_v11 = vmax.f32 %v6016_v44, %v6062_v32  ;;  %v6073_v20 = vsel %vm913_vm3, %v6060_v57, %v6062_v32  ;;  %v6052_v12 = vpop.permute.xlu0 %6051 }
0x1227   : > { %v12720_v0 = vmax.f32 %v12619_v54, %v6073_v20 }
0x1228   : > { %6120 = vst.msk [vmem:[#allocation13 + $0x68] sm:$0xff] %vm3301_vm13, %v6104_v11 }
0x1229   : > { %v6066_v2 = vpop.permute.xlu1 %6065  ;;  %6179 = vrot.lane.b32.xlu0 %v12720_v0, %s11055_s2 }
0x122a   : > { %v6106_v27 = vmax.f32 %v6018_v35, %v6066_v2  ;;  %v6074_v40 = vsel %vm913_vm3, %v6064_v8, %v6066_v2  ;;  %v6040_v1 = vpop.permute.xlu0 %6039 }
0x122b   : > { %v12727_v13 = vmax.f32 %v12627_v36, %v6074_v40 }
0x122c   : > { %6122 = vst.msk [vmem:[#allocation13 + $0x78] sm:$0xff] %vm3301_vm13, %v6106_v27 }
0x122d   : > { %v6050_v19 = vpop.permute.xlu1 %6049  ;;  %6183 = vrot.lane.b32.xlu0 %v12727_v13, %s11055_s2 }
0x122e   : > { %v6098_v60 = vmax.f32 %v6010_v50, %v6050_v19  ;;  %v6048_v14 = vpop.permute.xlu0 %6047 }
0x122f   : > { %v12732_v4 = vld [vmem:[#allocation13 + $0x68] sm:$0xff]  ;;  %v6070_v56 = vsel %vm913_vm3, %v6048_v14, %v6050_v19 }
0x1230   : > { %6114 = vst.msk [vmem:[#allocation13 + $0x38] sm:$0xff] %vm3301_vm13, %v6098_v60  ;;  %6181 = vrot.lane.b32.xlu1 %v12732_v4, %s11055_s2  ;;  %v12764_v25 = vmax.f32 %v12649_v30, %v6070_v56 }
0x1231   : > { %v6054_v24 = vpop.permute.xlu1 %6053 }
0x1232   : > { %v6071_v18 = vsel %vm913_vm3, %v6052_v12, %v6054_v24  ;;  %v6100_v26 = vmax.f32 %v12656_v23, %v6054_v24  ;;  %v6044_v38 = vpop.permute.xlu0 %6043 }
0x1233   : > { %v12740_v21 = vmax.f32 %v12636_v37, %v6071_v18  ;;  %v12742_v41 = vld [vmem:[#allocation13 + $0x78] sm:$0xff] }
0x1234   : > { %6116 = vst.msk [vmem:[#allocation13 + $0x48] sm:$0xff] %vm3301_vm13, %v6100_v26  ;;  %6185 = vrot.lane.b32.xlu1 %v12742_v41, %s11055_s2 }
0x1235   : > { %v6042_v45 = vpop.permute.xlu1 %6041  ;;  %6171 = vrot.lane.b32.xlu0 %v12740_v21, %s11055_s2 }
0x1236   : > { %v6068_v7 = vsel %vm913_vm3, %v6040_v1, %v6042_v45  ;;  %v6094_v47 = vmax.f32 %v12664_v10, %v6042_v45  ;;  %v6036_v33 = vpop.permute.xlu0 %6035 }
0x1237   : > { %v12752_v54 = vmax.f32 %v12644_v9, %v6068_v7  ;;  %v12754_v49 = vld [vmem:[#allocation13 + $0x38] sm:$0xff] }
0x1238   : > { %6110 = vst.msk [vmem:[#allocation13 + $0x18] sm:$0xff] %vm3301_vm13, %v6094_v47  ;;  %6169 = vrot.lane.b32.xlu1 %v12754_v49, %s11055_s2 }
0x1239   : > { %v6046_v5 = vpop.permute.xlu1 %6045  ;;  %6159 = vrot.lane.b32.xlu0 %v12752_v54, %s11055_s2 }
0x123a   : > { %v6096_v29 = vmax.f32 %v12670_v22, %v6046_v5  ;;  %v6776_v59 = vpop.permute.xlu0 %6775  ;;  %v6069_v63 = vsel %vm913_vm3, %v6044_v38, %v6046_v5 }
0x123b   : > { %v12766_v36 = vld [vmem:[#allocation13 + $0x48] sm:$0xff]  ;;  %6799 = vst.msk [vmem:[#allocation14 + $0x60] sm:$0xff] %vm3363_vm14, %v6776_v59  ;;  %v12777_v43 = vmax.f32 %v12654_v17, %v6069_v63 }
0x123c   : > { %6112 = vst.msk [vmem:[#allocation13 + $0x28] sm:$0xff] %vm3301_vm13, %v6096_v29  ;;  %6173 = vrot.lane.b32.xlu1 %v12766_v36, %s11055_s2 }
0x123d   : > { %v6038_v39 = vpop.permute.xlu1 %6037  ;;  %6167 = vrot.lane.b32.xlu0 %v12764_v25, %s11055_s2 }
0x123e   : > { %v6092_v46 = vmax.f32 %v12676_v28, %v6038_v39  ;;  %v6780_v3 = vpop.permute.xlu0 %6779  ;;  %v6067_v15 = vsel %vm913_vm3, %v6036_v33, %v6038_v39 }
0x123f   : > { %v12779_v62 = vld [vmem:[#allocation13 + $0x18] sm:$0xff]  ;;  %6801 = vst.msk [vmem:[#allocation14 + $0x70] sm:$0xff] %vm3363_vm14, %v6780_v3  ;;  %v12790_v9 = vmax.f32 %v12662_v52, %v6067_v15 }
0x1240   : > { %6108 = vst.msk [vmem:[#allocation13 + $0x8] sm:$0xff] %vm3301_vm13, %v6092_v46  ;;  %6161 = vrot.lane.b32.xlu1 %v12779_v62, %s11055_s2 }
0x1241   : > { %v6778_v6 = vpop.permute.xlu1 %6777  ;;  %6163 = vrot.lane.b32.xlu0 %v12777_v43, %s11055_s2 }
0x1242   : > { %v6785_v37 = vsel %vm3309_vm0, %v6776_v59, %v6778_v6  ;;  %v6768_v44 = vpop.permute.xlu0 %6767  ;;  %v6820_v23 = vld [vmem:[#allocation14 + $0x60] sm:$0xff] }
0x1243   : > { %6800 = vst.msk [vmem:[#allocation14 + $0x68] sm:$0xff] %vm3365_vm7, %v6785_v37  ;;  %v12793_v35 = vld [vmem:[#allocation13 + $0x28] sm:$0xff] }
0x1244   : > { %6795 = vst.msk [vmem:[#allocation14 + $0x40] sm:$0xff] %vm3363_vm14, %v6768_v44  ;;  %6165 = vrot.lane.b32.xlu1 %v12793_v35, %s11055_s2 }
0x1245   : > { %v6782_v30 = vpop.permute.xlu1 %6781  ;;  %6155 = vrot.lane.b32.xlu0 %v12790_v9, %s11055_s2 }
0x1246   : > { %v6786_v50 = vsel %vm3309_vm0, %v6780_v3, %v6782_v30  ;;  %v6772_v17 = vpop.permute.xlu0 %6771  ;;  %v6822_v10 = vld [vmem:[#allocation14 + $0x70] sm:$0xff] }
0x1247   : > { %6802 = vst.msk [vmem:[#allocation14 + $0x78] sm:$0xff] %vm3365_vm7, %v6786_v50  ;;  %v12802_v52 = vld [vmem:[#allocation13 + $0x8] sm:$0xff]  ;;  %v6830_v22 = vpack.c.bf16 %v6822_v10, %v6820_v23 }
0x1248   : > { %6797 = vst.msk [vmem:[#allocation14 + $0x50] sm:$0xff] %vm3363_vm14, %v6772_v17  ;;  %6157 = vrot.lane.b32.xlu1 %v12802_v52, %s11055_s2  ;;  %s13646_s2 = sld [smem:[#allocation21_spill]] }
0x1249   : > { %v6770_v28 = vpop.permute.xlu1 %6769  ;;  %6871 = vrot.lane.b32.xlu0 %v6830_v22, %s11054_s1 }
0x124a   : > { %v6783_v55 = vsel %vm3309_vm0, %v6768_v44, %v6770_v28  ;;  %v6732_v51 = vpop.permute.xlu0 %6731  ;;  %v6821_v58 = vld [vmem:[#allocation14 + $0x68] sm:$0xff] }
0x124b   : > { %6796 = vst.msk [vmem:[#allocation14 + $0x48] sm:$0xff] %vm3365_vm7, %v6783_v55  ;;  %v6816_v11 = vld [vmem:[#allocation14 + $0x40] sm:$0xff] }
0x124c   : > { %6755 = vst.msk [vmem:[#allocation14 + $0x20] sm:$0xff] %vm3363_vm14, %v6732_v51 }
0x124d   : > { %v6774_v53 = vpop.permute.xlu1 %6773 }
0x124e   : > { %v6784_v57 = vsel %vm3309_vm0, %v6772_v17, %v6774_v53  ;;  %v6823_v8 = vld [vmem:[#allocation14 + $0x78] sm:$0xff]  ;;  %v6736_v32 = vpop.permute.xlu0 %6735  ;;  %v10710_v44 = vld [vmem:[%s13646_s2] sm:$0xff]   ;;  %v12835_v30 = vld [vmem:[%s13646_s2 + $0x8] sm:$0xff]  }
0x124f   : > { %v6818_v20 = vld [vmem:[#allocation14 + $0x50] sm:$0xff]  ;;  %6798 = vst.msk [vmem:[#allocation14 + $0x58] sm:$0xff] %vm3365_vm7, %v6784_v57  ;;  %v6831_v12 = vpack.c.bf16 %v6823_v8, %v6821_v58 }
0x1250   : > { %6757 = vst.msk [vmem:[#allocation14 + $0x30] sm:$0xff] %vm3363_vm14, %v6736_v32  ;;  %v6828_v2 = vpack.c.bf16 %v6818_v20, %v6816_v11  ;;  %v12841_v50 = vld [vmem:[%s13646_s2 + $0x10] ss:$0 sps:$4 sm:$0xff]  }
0x1251   : > { %v6734_v27 = vpop.permute.xlu1 %6733  ;;  %6873 = vrot.lane.b32.xlu1 %v6831_v12, %s11054_s1  ;;  %6974 = vmatprep.subr.bf16.mxu0 %v6831_v12 }
0x1252   : > { %v6741_v40 = vsel %vm3309_vm0, %v6732_v51, %v6734_v27  ;;  %6975 = vmatpush1.bf16.msra.mxu0 %v6830_v22  ;;  %6867 = vrot.lane.b32.xlu0 %v6828_v2, %s11054_s1  ;;  %v6724_v1 = vpop.permute.xlu0 %6723  ;;  %v6817_v60 = vld [vmem:[#allocation14 + $0x48] sm:$0xff] }
0x1253   : > { %6756 = vst.msk [vmem:[#allocation14 + $0x28] sm:$0xff] %vm3365_vm7, %v6741_v40  ;;  %v6812_v26 = vld [vmem:[#allocation14 + $0x20] sm:$0xff] }
0x1254   : > { %6751 = vst.msk [vmem:[#allocation14] sm:$0xff] %vm3363_vm14, %v6724_v1 }
0x1255   : > { %v6738_v19 = vpop.permute.xlu1 %6737 }
0x1256   : > { %v6742_v14 = vsel %vm3309_vm0, %v6736_v32, %v6738_v19  ;;  %v6819_v24 = vld [vmem:[#allocation14 + $0x58] sm:$0xff]  ;;  %v6728_v18 = vpop.permute.xlu0 %6727 }
0x1257   : > { %v6814_v38 = vld [vmem:[#allocation14 + $0x30] sm:$0xff]  ;;  %6758 = vst.msk [vmem:[#allocation14 + $0x38] sm:$0xff] %vm3365_vm7, %v6742_v14  ;;  %v6829_v45 = vpack.c.bf16 %v6819_v24, %v6817_v60 }
0x1258   : > { %6753 = vst.msk [vmem:[#allocation14 + $0x10] sm:$0xff] %vm3363_vm14, %v6728_v18  ;;  %v6826_v7 = vpack.c.bf16 %v6814_v38, %v6812_v26 }
0x1259   : > { %v6726_v47 = vpop.permute.xlu1 %6725  ;;  %6869 = vrot.lane.b32.xlu1 %v6829_v45, %s11054_s1  ;;  %6976 = vmatprep.subr.bf16.mxu0 %v6829_v45 }
0x125a   : > { %v6739_v33 = vsel %vm3309_vm0, %v6724_v1, %v6726_v47  ;;  %6977 = vmatpush1.bf16.msra.mxu0 %v6828_v2  ;;  %6863 = vrot.lane.b32.xlu0 %v6826_v7, %s11054_s1  ;;  %v6813_v5 = vld [vmem:[#allocation14 + $0x28] sm:$0xff] }
0x125b   : > { %6752 = vst.msk [vmem:[#allocation14 + $0x8] sm:$0xff] %vm3365_vm7, %v6739_v33  ;;  %v6808_v63 = vld [vmem:[#allocation14] sm:$0xff] }
0x125d   : > { %v6730_v56 = vpop.permute.xlu1 %6729 }
0x125e   : > { %v6740_v29 = vsel %vm3309_vm0, %v6728_v18, %v6730_v56  ;;  %v6815_v59 = vld [vmem:[#allocation14 + $0x38] sm:$0xff] }
0x125f   : > { %v6810_v39 = vld [vmem:[#allocation14 + $0x10] sm:$0xff]  ;;  %6754 = vst.msk [vmem:[#allocation14 + $0x18] sm:$0xff] %vm3365_vm7, %v6740_v29  ;;  %v6827_v46 = vpack.c.bf16 %v6815_v59, %v6813_v5 }
0x1260   : > { %v6824_v3 = vpack.c.bf16 %v6810_v39, %v6808_v63 }
0x1261   : > { %6865 = vrot.lane.b32.xlu1 %v6827_v46, %s11054_s1  ;;  %6978 = vmatprep.subr.bf16.mxu0 %v6827_v46 }
0x1262   : > { %6979 = vmatpush1.bf16.msra.mxu0 %v6826_v7  ;;  %6859 = vrot.lane.b32.xlu0 %v6824_v3, %s11054_s1  ;;  %v6809_v15 = vld [vmem:[#allocation14 + $0x8] sm:$0xff] }
0x1266   : > { %v6811_v6 = vld [vmem:[#allocation14 + $0x18] sm:$0xff] }
0x1267   : > { %v6825_v37 = vpack.c.bf16 %v6811_v6, %v6809_v15 }
0x1269   : > { %6861 = vrot.lane.b32.xlu1 %v6825_v37, %s11054_s1  ;;  %6980 = vmatprep.subr.bf16.mxu0 %v6825_v37 }
0x126a   : > { %6981 = vmatpush1.bf16.msra.mxu0 %v6824_v3 }
0x126d   : > { %9651 = vmatmul.mubr.msk.bf16.vlgmr.msra.gmra.mxu0 %vm4290_vm12, %v10710_v44 }
0x126e   : > { %7008 = vmatprep.mubr.bf16.mxu0 %v11069_v34 }
0x1275   : > { %9652 = vmatmul.mubr.msk.bf16.gmra.mxu0 %vm4290_vm12, %v12835_v30 }
0x1276   : > { %7018 = vmatprep.mubr.bf16.mxu0 %v11069_v34 }
0x127d   : > { %9653 = vmatmul.mubr.msk.bf16.gmra.mxu0 %vm4290_vm12, %v12841_v50 }
0x127e   : > { %7320 = vmatprep.mubr.bf16.mxu0 %v11069_v34 }
0x1283   : > { %v6176_v10 = vpop.permute.xlu0 %6175 }
0x128a   : > { %v6178_v17 = vpop.permute.xlu1 %6177 }
0x128b   : > { %v6222_v23 = vmax.f32 %v12714_v16, %v6178_v17  ;;  %v6192_v2 = vsel %vm924_vm4, %v6176_v10, %v6178_v17 }
0x128c   : > { %v12865_v40 = vmax.f32 %v12709_v42, %v6192_v2 }
0x128d   : > { %6238 = vst.msk [vmem:[#allocation13 + $0x58] sm:$0xff] %vm3301_vm13, %v6222_v23 }
0x129b   : > { %v6180_v22 = vpop.permute.xlu0 %6179 }
0x129f   : > { %v6184_v51 = vpop.permute.xlu0 %6183 }
0x12a2   : > { %v6182_v28 = vpop.permute.xlu1 %6181 }
0x12a3   : > { %v6224_v55 = vmax.f32 %v12732_v4, %v6182_v28 }
0x12a5   : > { %6240 = vst.msk [vmem:[#allocation13 + $0x68] sm:$0xff] %vm3301_vm13, %v6224_v55 }
0x12a6   : > { %v6186_v53 = vpop.permute.xlu1 %6185 }
0x12a7   : > { %v6226_v58 = vmax.f32 %v12742_v41, %v6186_v53  ;;  %v6172_v57 = vpop.permute.xlu0 %6171 }
0x12a9   : > { %6242 = vst.msk [vmem:[#allocation13 + $0x78] sm:$0xff] %vm3301_vm13, %v6226_v58 }
0x12aa   : > { %v6170_v8 = vpop.permute.xlu1 %6169 }
0x12ab   : > { %v6218_v32 = vmax.f32 %v12754_v49, %v6170_v8  ;;  %v6160_v16 = vpop.permute.xlu0 %6159 }
0x12ac   : > { %v12894_v26 = vld [vmem:[#allocation13 + $0x68] sm:$0xff] }
0x12ad   : > { %6234 = vst.msk [vmem:[#allocation13 + $0x38] sm:$0xff] %vm3301_vm13, %v6218_v32 }
0x12ae   : > { %v6174_v11 = vpop.permute.xlu1 %6173 }
0x12af   : > { %v6220_v20 = vmax.f32 %v12766_v36, %v6174_v11  ;;  %v6191_v4 = vsel %vm924_vm4, %v6172_v57, %v6174_v11  ;;  %v6168_v41 = vpop.permute.xlu0 %6167  ;;  %v6193_v36 = vsel %vm924_vm4, %v6180_v22, %v6182_v28 }
0x12b0   : > { %v12857_v12 = vmax.f32 %v12740_v21, %v6191_v4  ;;  %v12873_v60 = vmax.f32 %v12720_v0, %v6193_v36  ;;  %v12887_v0 = vld [vmem:[#allocation13 + $0x58] sm:$0xff]  ;;  %v6190_v7 = vsel %vm924_vm4, %v6168_v41, %v6170_v8 }
0x12b1   : > { %6236 = vst.msk [vmem:[#allocation13 + $0x48] sm:$0xff] %vm3301_vm13, %v6220_v20  ;;  %v12900_v45 = vld [vmem:[#allocation13 + $0x78] sm:$0xff]  ;;  %v12911_v56 = vmax.f32 %v12764_v25, %v6190_v7 }
0x12b2   : > { %v6162_v27 = vpop.permute.xlu1 %6161  ;;  %6291 = vrot.lane.b32.xlu0 %v12857_v12, %s13647_s11 }
0x12b3   : > { %v6214_v49 = vmax.f32 %v12779_v62, %v6162_v27  ;;  %v6164_v19 = vpop.permute.xlu0 %6163  ;;  %v6194_v62 = vsel %vm924_vm4, %v6184_v51, %v6186_v53  ;;  %v6188_v33 = vsel %vm924_vm4, %v6160_v16, %v6162_v27 }
0x12b4   : > { %v12913_v5 = vld [vmem:[#allocation13 + $0x38] sm:$0xff]  ;;  %v12920_v29 = vmax.f32 %v12752_v54, %v6188_v33 }
0x12b5   : > { %6230 = vst.msk [vmem:[#allocation13 + $0x18] sm:$0xff] %vm3301_vm13, %v6214_v49 }
0x12b6   : > { %v6166_v21 = vpop.permute.xlu1 %6165  ;;  %6295 = vrot.lane.b32.xlu0 %v12865_v40, %s13647_s11 }
0x12b7   : > { %v6216_v1 = vmax.f32 %v12793_v35, %v6166_v21  ;;  %v12885_v35 = vmax.f32 %v12727_v13, %v6194_v62  ;;  %v6156_v18 = vpop.permute.xlu0 %6155  ;;  %v6189_v39 = vsel %vm924_vm4, %v6164_v19, %v6166_v21 }
0x12b8   : > { %v12875_v14 = vld [vmem:[#allocation13 + $0x48] sm:$0xff]  ;;  %v12931_v3 = vmax.f32 %v12777_v43, %v6189_v39 }
0x12b9   : > { %6232 = vst.msk [vmem:[#allocation13 + $0x28] sm:$0xff] %vm3301_vm13, %v6216_v1  ;;  %6293 = vrot.lane.b32.xlu1 %v12875_v14, %s13647_s11 }
0x12ba   : > { %v6158_v42 = vpop.permute.xlu1 %6157  ;;  %6299 = vrot.lane.b32.xlu0 %v12873_v60, %s13647_s11 }
0x12bb   : > { %v6212_v24 = vmax.f32 %v12802_v52, %v6158_v42  ;;  %v6872_v13 = vpop.permute.xlu0 %6871  ;;  %v6187_v54 = vsel %vm924_vm4, %v6156_v18, %v6158_v42  ;;  %vm13651_vm4 = vcmask 916480  }
0x12bc   : > { %v12905_v47 = vld [vmem:[#allocation13 + $0x18] sm:$0xff]  ;;  %v12941_v6 = vmax.f32 %v12790_v9, %v6187_v54  ;;  %vm13654_vm0 = vmmov %vm13651_vm4 }
0x12bd   : > { %6228 = vst.msk [vmem:[#allocation13 + $0x8] sm:$0xff] %vm3301_vm13, %v6212_v24  ;;  %6297 = vrot.lane.b32.xlu1 %v12887_v0, %s13647_s11  ;;  %vm13655_vm14 = vmmov %vm13654_vm0 }
0x12be   : > { %6303 = vrot.lane.b32.xlu0 %v12885_v35, %s13647_s11  ;;  %vm13656_vm7 = vmmov %vm13654_vm0 }
0x12bf   : > { %vm13658_vm10 = vmmov %vm13654_vm0 }
0x12c0   : > { %v12926_v25 = vld [vmem:[#allocation13 + $0x28] sm:$0xff] }
0x12c1   : > { %6301 = vrot.lane.b32.xlu1 %v12894_v26, %s13647_s11 }
0x12c2   : > { %6845 = vrot.lane.b32.xlu0 %v10710_v44, %s11074_s15 }
0x12c3   : > { %v6874_v52 = vpop.permute.xlu1 %6873 }
0x12c4   : > { %v6878_v38 = vsel %vm913_vm3, %v6872_v13, %v6874_v52  ;;  %6904 = vmatprep.subr.bf16.mxu1 %v6874_v52  ;;  %v6868_v59 = vpop.permute.xlu0 %6867  ;;  %v12936_v15 = vld [vmem:[#allocation13 + $0x8] sm:$0xff] }
0x12c5   : > { %6305 = vrot.lane.b32.xlu1 %v12900_v45, %s13647_s11  ;;  %6905 = vmatpush1.bf16.msra.mxu1 %v6878_v38 }
0x12c6   : > { %6281 = vrot.lane.b32.xlu0 %v12905_v47, %s13647_s11 }
0x12c9   : > { %6289 = vrot.lane.b32.xlu1 %v12913_v5, %s13647_s11 }
0x12ca   : > { %6287 = vrot.lane.b32.xlu0 %v12911_v56, %s13647_s11 }
0x12cb   : > { %v6870_v63 = vpop.permute.xlu1 %6869 }
0x12cc   : > { %v6877_v46 = vsel %vm913_vm3, %v6868_v59, %v6870_v63  ;;  %6906 = vmatprep.subr.bf16.mxu1 %v6870_v63  ;;  %v6864_v37 = vpop.permute.xlu0 %6863 }
0x12cd   : > { %6279 = vrot.lane.b32.xlu1 %v12920_v29, %s13647_s11  ;;  %6907 = vmatpush1.bf16.msra.mxu1 %v6877_v46 }
0x12ce   : > { %6285 = vrot.lane.b32.xlu0 %v12926_v25, %s13647_s11 }
0x12d1   : > { %6283 = vrot.lane.b32.xlu1 %v12931_v3, %s13647_s11 }
0x12d2   : > { %6277 = vrot.lane.b32.xlu0 %v12936_v15, %s13647_s11 }
0x12d3   : > { %v6866_v44 = vpop.permute.xlu1 %6865 }
0x12d4   : > { %v6876_v17 = vsel %vm913_vm3, %v6864_v37, %v6866_v44  ;;  %6908 = vmatprep.subr.bf16.mxu1 %v6866_v44  ;;  %v6860_v43 = vpop.permute.xlu0 %6859 }
0x12d5   : > { %6275 = vrot.lane.b32.xlu1 %v12941_v6, %s13647_s11  ;;  %6909 = vmatpush1.bf16.msra.mxu1 %v6876_v17  ;;  %s13663_s11 = sld [smem:[#allocation25_spill]] }
0x12d6   : > { %6849 = vrot.lane.b32.xlu0 %v12841_v50, %s11074_s15 }
0x12d9   : > { %6847 = vrot.lane.b32.xlu1 %v12835_v30, %s11074_s15  ;;  %s13648_s15 = smov 120  }
0x12db   : > { %v6862_v23 = vpop.permute.xlu1 %6861 }
0x12dc   : > { %v6875_v9 = vsel %vm913_vm3, %v6860_v43, %v6862_v23  ;;  %6910 = vmatprep.subr.bf16.mxu1 %v6862_v23 }
0x12dd   : > { %6911 = vmatpush1.bf16.msra.mxu1 %v6875_v9 }
0x1324   : > { %v6292_v10 = vpop.permute.xlu0 %6291 }
0x1328   : > { %v6296_v22 = vpop.permute.xlu0 %6295 }
0x132b   : > { %v6294_v28 = vpop.permute.xlu1 %6293 }
0x132c   : > { %v6340_v55 = vmax.f32 %v12875_v14, %v6294_v28  ;;  %v6300_v51 = vpop.permute.xlu0 %6299  ;;  %v6311_v21 = vsel %vm946_vm6, %v6292_v10, %v6294_v28 }
0x132d   : > { %v12985_v14 = vmax.f32 %v12857_v12, %v6311_v21 }
0x132e   : > { %6356 = vst.msk [vmem:[#allocation13 + $0x48] sm:$0xff] %vm3301_vm13, %v6340_v55 }
0x132f   : > { %v6298_v53 = vpop.permute.xlu1 %6297 }
0x1330   : > { %v6342_v50 = vmax.f32 %v12887_v0, %v6298_v53  ;;  %v6312_v58 = vsel %vm946_vm6, %v6296_v22, %v6298_v53  ;;  %v6304_v30 = vpop.permute.xlu0 %6303 }
0x1331   : > { %v12956_v57 = vmax.f32 %v12865_v40, %v6312_v58  ;;  %v13055_v58 = vpop.f32.mrf.mxu0 }
0x1332   : > { %6358 = vst.msk [vmem:[#allocation13 + $0x58] sm:$0xff] %vm3301_vm13, %v6342_v50 }
0x1333   : > { %v6302_v8 = vpop.permute.xlu1 %6301  ;;  %6415 = vrot.lane.b32.xlu1 %v12956_v57, %s13648_s15 }
0x1334   : > { %v6344_v32 = vmax.f32 %v12894_v26, %v6302_v8  ;;  %v6313_v16 = vsel %vm946_vm6, %v6300_v51, %v6302_v8  ;;  %v6846_v11 = vpop.permute.xlu0 %6845 }
0x1335   : > { %v12964_v20 = vmax.f32 %v12873_v60, %v6313_v16  ;;  %9648 = vmatmul.mubr.msk.bf16.vlgmr.msra.gmra.mxu1 %vm4290_vm12, %v6846_v11  ;;  %v13064_v16 = vpop.f32.mrf.mxu0 }
0x1336   : > { %6360 = vst.msk [vmem:[#allocation13 + $0x68] sm:$0xff] %vm3301_vm13, %v6344_v32  ;;  %6938 = vmatprep.mubr.bf16.mxu1 %v11069_v34 }
0x1337   : > { %v6306_v4 = vpop.permute.xlu1 %6305  ;;  %6419 = vrot.lane.b32.xlu1 %v12964_v20, %s13648_s15 }
0x1338   : > { %v6346_v2 = vmax.f32 %v12900_v45, %v6306_v4  ;;  %v6314_v41 = vsel %vm946_vm6, %v6304_v30, %v6306_v4  ;;  %v6282_v27 = vpop.permute.xlu0 %6281 }
0x1339   : > { %v12974_v49 = vmax.f32 %v12885_v35, %v6314_v41  ;;  %v6374_v40 = vld [vmem:[#allocation13 + $0x58] sm:$0xff]  ;;  %v6334_v36 = vmax.f32 %v12905_v47, %v6282_v27 }
0x133a   : > { %6362 = vst.msk [vmem:[#allocation13 + $0x78] sm:$0xff] %vm3301_vm13, %v6346_v2  ;;  %6417 = vrot.lane.b32.xlu0 %v6374_v40, %s13648_s15 }
0x133b   : > { %v6290_v1 = vpop.permute.xlu1 %6289  ;;  %6350 = vst.msk [vmem:[#allocation13 + $0x18] sm:$0xff] %vm3301_vm13, %v6334_v36  ;;  %6423 = vrot.lane.b32.xlu1 %v12974_v49, %s13648_s15 }
0x133c   : > { %v6338_v19 = vmax.f32 %v12913_v5, %v6290_v1  ;;  %v6288_v60 = vpop.permute.xlu0 %6287 }
0x133d   : > { %v6376_v62 = vld [vmem:[#allocation13 + $0x68] sm:$0xff]  ;;  %v6310_v12 = vsel %vm946_vm6, %v6288_v60, %v6290_v1 }
0x133e   : > { %6354 = vst.msk [vmem:[#allocation13 + $0x38] sm:$0xff] %vm3301_vm13, %v6338_v19  ;;  %6421 = vrot.lane.b32.xlu0 %v6376_v62, %s13648_s15  ;;  %v13002_v38 = vmax.f32 %v12911_v56, %v6310_v12 }
0x133f   : > { %v6280_v42 = vpop.permute.xlu1 %6279  ;;  %6411 = vrot.lane.b32.xlu1 %v12985_v14, %s13648_s15 }
0x1340   : > { %v6308_v24 = vsel %vm946_vm6, %v6280_v42, %v6282_v27  ;;  %v6286_v35 = vpop.permute.xlu0 %6285 }
0x1341   : > { %v12993_v0 = vmax.f32 %v12920_v29, %v6308_v24  ;;  %v6378_v18 = vld [vmem:[#allocation13 + $0x78] sm:$0xff]  ;;  %v6336_v26 = vmax.f32 %v12926_v25, %v6286_v35  ;;  %v6372_v29 = vld [vmem:[#allocation13 + $0x48] sm:$0xff] }
0x1342   : > { %6425 = vrot.lane.b32.xlu0 %v6378_v18, %s13648_s15  ;;  %v6366_v39 = vld [vmem:[#allocation13 + $0x18] sm:$0xff] }
0x1343   : > { %v6284_v13 = vpop.permute.xlu1 %6283  ;;  %6352 = vst.msk [vmem:[#allocation13 + $0x28] sm:$0xff] %vm3301_vm13, %v6336_v26  ;;  %6399 = vrot.lane.b32.xlu1 %v12993_v0, %s13648_s15 }
0x1344   : > { %v6278_v52 = vpop.permute.xlu0 %6277  ;;  %v6309_v47 = vsel %vm946_vm6, %v6284_v13, %v6286_v35 }
0x1345   : > { %v6370_v45 = vld [vmem:[#allocation13 + $0x38] sm:$0xff]  ;;  %v6332_v7 = vmax.f32 %v12936_v15, %v6278_v52  ;;  %v13011_v5 = vmax.f32 %v12931_v3, %v6309_v47 }
0x1346   : > { %6409 = vrot.lane.b32.xlu0 %v6370_v45, %s13648_s15 }
0x1347   : > { %v6276_v33 = vpop.permute.xlu1 %6275  ;;  %6348 = vst.msk [vmem:[#allocation13 + $0x8] sm:$0xff] %vm3301_vm13, %v6332_v7  ;;  %6407 = vrot.lane.b32.xlu1 %v13002_v38, %s13648_s15 }
0x1348   : > { %v6307_v56 = vsel %vm946_vm6, %v6276_v33, %v6278_v52  ;;  %v6850_v25 = vpop.permute.xlu0 %6849  ;;  %vm13652_vm6 = vmmov %vm13651_vm4 }
0x1349   : > { %v13019_v63 = vmax.f32 %v12941_v6, %v6307_v56 }
0x134a   : > { %6413 = vrot.lane.b32.xlu0 %v6372_v29, %s13648_s15  ;;  %v13025_v46 = vld [vmem:[#allocation13 + $0x28] sm:$0xff] }
0x134b   : > { %6403 = vrot.lane.b32.xlu1 %v13011_v5, %s13648_s15  ;;  %v6848_v59 = vpop.permute.xlu1 %6847 }
0x134c   : > { %9649 = vmatmul.mubr.msk.bf16.gmra.mxu1 %vm4290_vm12, %v6848_v59 }
0x134d   : > { %6948 = vmatprep.mubr.bf16.mxu1 %v11069_v34 }
0x134e   : > { %6401 = vrot.lane.b32.xlu0 %v6366_v39, %s13648_s15  ;;  %v13030_v3 = vld [vmem:[#allocation13 + $0x8] sm:$0xff] }
0x134f   : > { %6395 = vrot.lane.b32.xlu1 %v13019_v63, %s13648_s15 }
0x1352   : > { %6405 = vrot.lane.b32.xlu0 %v13025_v46, %s13648_s15 }
0x1354   : > { %9650 = vmatmul.mubr.msk.bf16.gmra.mxu1 %vm4290_vm12, %v6850_v25  ;;  %v7031_v25 = vld [vmem:[%s13650_s23 + $0x20] sm:$0xff]  ;;  %vm13657_vm12 = vmmov %vm13654_vm0 }
0x1355   : > { %7263 = vmatprep.mubr.bf16.mxu1 %v11069_v34 }
0x1356   : > { %6397 = vrot.lane.b32.xlu0 %v13030_v3, %s13648_s15  ;;  %s11077_s15 = smov 24  }
0x13a5   : > { %v6416_v54 = vpop.permute.xlu1 %6415 }
0x13a9   : > { %v6420_v15 = vpop.permute.xlu1 %6419 }
0x13ac   : > { %v6418_v6 = vpop.permute.xlu0 %6417 }
0x13ad   : > { %v6462_v37 = vmax.f32 %v6374_v40, %v6418_v6  ;;  %v6432_v44 = vsel %vm990_vm11, %v6416_v54, %v6418_v6  ;;  %v6424_v17 = vpop.permute.xlu1 %6423 }
0x13ae   : > { %v13037_v43 = vmax.f32 %v12956_v57, %v6432_v44 }
0x13af   : > { %6478 = vst.msk [vmem:[#allocation13 + $0x58] sm:$0xff] %vm3301_vm13, %v6462_v37 }
0x13b0   : > { %v6422_v23 = vpop.permute.xlu0 %6421  ;;  %6535 = vrot.lane.b32.xlu1 %v13037_v43, %s13649_s26 }
0x13b1   : > { %v6464_v34 = vmax.f32 %v6376_v62, %v6422_v23  ;;  %v6433_v9 = vsel %vm990_vm11, %v6420_v15, %v6422_v23  ;;  %v6412_v10 = vpop.permute.xlu1 %6411 }
0x13b2   : > { %v13044_v22 = vmax.f32 %v12964_v20, %v6433_v9 }
0x13b3   : > { %6480 = vst.msk [vmem:[#allocation13 + $0x68] sm:$0xff] %vm3301_vm13, %v6464_v34 }
0x13b4   : > { %v6426_v28 = vpop.permute.xlu0 %6425  ;;  %6539 = vrot.lane.b32.xlu1 %v13044_v22, %s13649_s26 }
0x13b5   : > { %v6466_v55 = vmax.f32 %v6378_v18, %v6426_v28  ;;  %v6434_v51 = vsel %vm990_vm11, %v6424_v17, %v6426_v28  ;;  %v6400_v30 = vpop.permute.xlu1 %6399 }
0x13b6   : > { %v13051_v53 = vmax.f32 %v12974_v49, %v6434_v51  ;;  %v13053_v50 = vld [vmem:[#allocation13 + $0x58] sm:$0xff]  ;;  %v13075_v49 = vpop.f32.mrf.mxu0 }
0x13b7   : > { %6482 = vst.msk [vmem:[#allocation13 + $0x78] sm:$0xff] %vm3301_vm13, %v6466_v55  ;;  %6537 = vrot.lane.b32.xlu0 %v13053_v50, %s13649_s26 }
0x13b8   : > { %v6410_v57 = vpop.permute.xlu0 %6409  ;;  %6543 = vrot.lane.b32.xlu1 %v13051_v53, %s13649_s26  ;;  %v7006_v60 = vpop.f32.mrf.mxu0 }
0x13b9   : > { %v6458_v8 = vmax.f32 %v6370_v45, %v6410_v57  ;;  %v6408_v2 = vpop.permute.xlu1 %6407 }
0x13ba   : > { %v13062_v32 = vld [vmem:[#allocation13 + $0x68] sm:$0xff]  ;;  %v13094_v24 = vpop.f32.mrf.mxu0 }
0x13bb   : > { %6474 = vst.msk [vmem:[#allocation13 + $0x38] sm:$0xff] %vm3301_vm13, %v6458_v8  ;;  %6541 = vrot.lane.b32.xlu0 %v13062_v32, %s13649_s26 }
0x13bc   : > { %v6414_v11 = vpop.permute.xlu0 %6413  ;;  %v13102_v26 = vpop.f32.mrf.mxu0 }
0x13bd   : > { %v6431_v20 = vsel %vm990_vm11, %v6412_v10, %v6414_v11  ;;  %v6460_v4 = vmax.f32 %v6372_v29, %v6414_v11  ;;  %v6404_v62 = vpop.permute.xlu1 %6403 }
0x13be   : > { %v13071_v41 = vmax.f32 %v12985_v14, %v6431_v20  ;;  %v13073_v27 = vld [vmem:[#allocation13 + $0x78] sm:$0xff]  ;;  %v6430_v14 = vsel %vm990_vm11, %v6408_v2, %v6410_v57  ;;  %v13110_v52 = vpop.f32.mrf.mxu0 }
0x13bf   : > { %6476 = vst.msk [vmem:[#allocation13 + $0x48] sm:$0xff] %vm3301_vm13, %v6460_v4  ;;  %6545 = vrot.lane.b32.xlu0 %v13073_v27, %s13649_s26 }
0x13c0   : > { %v6402_v40 = vpop.permute.xlu0 %6401  ;;  %6531 = vrot.lane.b32.xlu1 %v13071_v41, %s13649_s26  ;;  %v13118_v33 = vpop.f32.mrf.mxu0 }
0x13c1   : > { %v6428_v36 = vsel %vm990_vm11, %v6400_v30, %v6402_v40  ;;  %v6454_v21 = vmax.f32 %v6366_v39, %v6402_v40  ;;  %v6396_v7 = vpop.permute.xlu1 %6395 }
0x13c2   : > { %v13084_v1 = vmax.f32 %v12993_v0, %v6428_v36  ;;  %v13086_v19 = vld [vmem:[#allocation13 + $0x38] sm:$0xff]  ;;  %v13098_v0 = vmax.f32 %v13002_v38, %v6430_v14  ;;  %v13126_v56 = vpop.f32.mrf.mxu0 }
0x13c3   : > { %6470 = vst.msk [vmem:[#allocation13 + $0x18] sm:$0xff] %vm3301_vm13, %v6454_v21  ;;  %6529 = vrot.lane.b32.xlu0 %v13086_v19, %s13649_s26 }
0x13c4   : > { %v6406_v42 = vpop.permute.xlu0 %6405  ;;  %6519 = vrot.lane.b32.xlu1 %v13084_v1, %s13649_s26  ;;  %v13133_v39 = vpop.f32.mrf.mxu0 }
0x13c5   : > { %v6456_v35 = vmax.f32 %v13025_v46, %v6406_v42  ;;  %v6429_v12 = vsel %vm990_vm11, %v6404_v62, %v6406_v42 }
0x13c6   : > { %v13100_v18 = vld [vmem:[#allocation13 + $0x48] sm:$0xff]  ;;  %v13114_v45 = vmax.f32 %v13011_v5, %v6429_v12  ;;  %v7024_v46 = vpop.f32.mrf.mxu0 }
0x13c7   : > { %6472 = vst.msk [vmem:[#allocation13 + $0x28] sm:$0xff] %vm3301_vm13, %v6456_v35  ;;  %6533 = vrot.lane.b32.xlu0 %v13100_v18, %s13649_s26 }
0x13c8   : > { %v6398_v13 = vpop.permute.xlu0 %6397  ;;  %6527 = vrot.lane.b32.xlu1 %v13098_v0, %s13649_s26  ;;  %v7025_v54 = vpop.f32.mrf.mxu0 }
0x13c9   : > { %v6452_v38 = vmax.f32 %v13030_v3, %v6398_v13  ;;  %v6427_v29 = vsel %vm990_vm11, %v6396_v7, %v6398_v13  ;;  %vm13653_vm11 = vmmov %vm13651_vm4 }
0x13ca   : > { %v13116_v47 = vld [vmem:[#allocation13 + $0x18] sm:$0xff]  ;;  %v13129_v5 = vmax.f32 %v13019_v63, %v6427_v29 }
0x13cb   : > { %6468 = vst.msk [vmem:[#allocation13 + $0x8] sm:$0xff] %vm3301_vm13, %v6452_v38  ;;  %6521 = vrot.lane.b32.xlu0 %v13116_v47, %s13649_s26 }
0x13cc   : > { %6523 = vrot.lane.b32.xlu1 %v13114_v45, %s13649_s26 }
0x13ce   : > { %v13131_v59 = vld [vmem:[#allocation13 + $0x28] sm:$0xff] }
0x13cf   : > { %6525 = vrot.lane.b32.xlu0 %v13131_v59, %s13649_s26 }
0x13d0   : > { %6515 = vrot.lane.b32.xlu1 %v13129_v5, %s13649_s26 }
0x13d2   : > { %v13140_v3 = vld [vmem:[#allocation13 + $0x8] sm:$0xff] }
0x13d3   : > { %6517 = vrot.lane.b32.xlu0 %v13140_v3, %s13649_s26  ;;  %s13677_s26 = sld [smem:[#allocation26_spill]] }
0x13d4   : > { %7054 = vperm.xlu1 %10197, %v7031_v25  }
0x13f5   : > { %v13144_v63 = vpop.f32.mrf.mxu1 }
0x13f7   : > { %v13146_v15 = vpop.f32.mrf.mxu1 }
0x13f9   : > { %v13148_v6 = vpop.f32.mrf.mxu1 }
0x13fb   : > { %v6936_v37 = vpop.f32.mrf.mxu1 }
0x13fc   : > { %v13150_v44 = vadd.f32 %v7006_v60, %v6936_v37 }
0x140c   : > { %v13152_v17 = vpop.f32.mrf.mxu1 }
0x140e   : > { %v13154_v23 = vpop.f32.mrf.mxu1 }
0x1410   : > { %v13156_v34 = vpop.f32.mrf.mxu1 }
0x1412   : > { %v13158_v9 = vpop.f32.mrf.mxu1 }
0x1414   : > { %v6950_v10 = vpop.f32.mrf.mxu1 }
0x1416   : > { %v6952_v28 = vpop.f32.mrf.mxu1 }
0x1418   : > { %v6954_v55 = vpop.f32.mrf.mxu1 }
0x141a   : > { %v6955_v51 = vpop.f32.mrf.mxu1 }
0x1422   : > { %v6536_v30 = vpop.permute.xlu1 %6535 }
0x1426   : > { %v6540_v57 = vpop.permute.xlu1 %6539 }
0x1429   : > { %v6538_v8 = vpop.permute.xlu0 %6537 }
0x142a   : > { %v6582_v11 = vmax.f32 %v13053_v50, %v6538_v8  ;;  %v6552_v20 = vsel %vm13651_vm4, %v6536_v30, %v6538_v8  ;;  %v6544_v21 = vpop.permute.xlu1 %6543 }
0x142b   : > { %v13163_v4 = vmax.f32 %v13037_v43, %v6552_v20  ;;  %v7023_v20 = vadd.f32 %v13133_v39, %v6952_v28  ;;  %v7030_v28 = vld [vmem:[%s13650_s23 + $0x18] sm:$0xff] }
0x142c   : > { %6598 = vst.msk [vmem:[#allocation13 + $0x58] sm:$0xff] %vm3301_vm13, %v6582_v11 }
0x142d   : > { %v6542_v2 = vpop.permute.xlu0 %6541 }
0x142e   : > { %v6584_v40 = vmax.f32 %v13062_v32, %v6542_v2  ;;  %v6553_v36 = vsel %vm13652_vm6, %v6540_v57, %v6542_v2 }
0x142f   : > { %v13169_v60 = vmax.f32 %v13044_v22, %v6553_v36 }
0x1430   : > { %6600 = vst.msk [vmem:[#allocation13 + $0x68] sm:$0xff] %vm3301_vm13, %v6584_v40 }
0x1431   : > { %v6546_v14 = vpop.permute.xlu0 %6545 }
0x1432   : > { %v6586_v50 = vmax.f32 %v13073_v27, %v6546_v14  ;;  %v6554_v62 = vsel %vm13653_vm11, %v6544_v21, %v6546_v14  ;;  %v6532_v43 = vpop.permute.xlu1 %6531 }
0x1433   : > { %v13175_v42 = vmax.f32 %v13051_v53, %v6554_v62  ;;  %v6614_v8 = vld [vmem:[#allocation13 + $0x58] sm:$0xff] }
0x1434   : > { %6602 = vst.msk [vmem:[#allocation13 + $0x78] sm:$0xff] %vm3301_vm13, %v6586_v50  ;;  %v7027_v50 = vld [vmem:[%s13650_s23] sm:$0xff] }
0x1435   : > { %v6530_v32 = vpop.permute.xlu0 %6529 }
0x1436   : > { %v6578_v35 = vmax.f32 %v13086_v19, %v6530_v32  ;;  %v6520_v12 = vpop.permute.xlu1 %6519 }
0x1438   : > { %6594 = vst.msk [vmem:[#allocation13 + $0x38] sm:$0xff] %vm3301_vm13, %v6578_v35 }
0x1439   : > { %v6534_v22 = vpop.permute.xlu0 %6533 }
0x143a   : > { %v6580_v13 = vmax.f32 %v13100_v18, %v6534_v22  ;;  %v6551_v38 = vsel %vm13654_vm0, %v6532_v43, %v6534_v22  ;;  %v6528_v27 = vpop.permute.xlu1 %6527  ;;  %v7028_v43 = vld [vmem:[%s13650_s23 + $0x8] sm:$0xff] }
0x143b   : > { %v13183_v7 = vmax.f32 %v13071_v41, %v6551_v38  ;;  %v6550_v53 = vsel %vm13655_vm14, %v6528_v27, %v6530_v32  ;;  %v6618_v14 = vld [vmem:[#allocation13 + $0x78] sm:$0xff] }
0x143c   : > { %6596 = vst.msk [vmem:[#allocation13 + $0x48] sm:$0xff] %vm3301_vm13, %v6580_v13  ;;  %v13188_v29 = vmax.f32 %v13098_v0, %v6550_v53 }
0x143d   : > { %v6522_v19 = vpop.permute.xlu0 %6521 }
0x143e   : > { %v6574_v46 = vmax.f32 %v13116_v47, %v6522_v19  ;;  %v6548_v25 = vsel %vm13656_vm7, %v6520_v12, %v6522_v19  ;;  %v6524_v54 = vpop.permute.xlu1 %6523 }
0x143f   : > { %v13193_v18 = vmax.f32 %v13084_v1, %v6548_v25 }
0x1440   : > { %6590 = vst.msk [vmem:[#allocation13 + $0x18] sm:$0xff] %vm3301_vm13, %v6574_v46 }
0x1441   : > { %v6526_v41 = vpop.permute.xlu0 %6525 }
0x1442   : > { %v6576_v37 = vmax.f32 %v13131_v59, %v6526_v41  ;;  %v6549_v55 = vsel %vm13657_vm12, %v6524_v54, %v6526_v41  ;;  %v6516_v30 = vpop.permute.xlu1 %6515 }
0x1443   : > { %v6612_v51 = vld [vmem:[#allocation13 + $0x48] sm:$0xff]  ;;  %v13199_v0 = vmax.f32 %v13114_v45, %v6549_v55 }
0x1444   : > { %6592 = vst.msk [vmem:[#allocation13 + $0x28] sm:$0xff] %vm3301_vm13, %v6576_v37  ;;  %6653 = vrot.lane.b32.xlu0 %v6612_v51, %s11056_s0  ;;  %v6616_v45 = vld [vmem:[#allocation13 + $0x68] sm:$0xff] }
0x1445   : > { %v6518_v47 = vpop.permute.xlu0 %6517 }
0x1446   : > { %v6572_v1 = vmax.f32 %v13140_v3, %v6518_v47  ;;  %v6547_v57 = vsel %vm13658_vm10, %v6516_v30, %v6518_v47  ;;  %v7021_v3 = vadd.f32 %v13126_v56, %v6950_v10  ;;  %v6610_v56 = vld [vmem:[#allocation13 + $0x38] sm:$0xff]  ;;  %v7029_v10 = vld [vmem:[%s13650_s23 + $0x10] sm:$0xff]  ;;  %vm9272_vm10 = vcmask 80896  }
0x1447   : > { %v6606_v11 = vld [vmem:[#allocation13 + $0x18] sm:$0xff]  ;;  %v13206_v59 = vmax.f32 %v13129_v5, %v6547_v57 }
0x1448   : > { %6588 = vst.msk [vmem:[#allocation13 + $0x8] sm:$0xff] %vm3301_vm13, %v6572_v1  ;;  %6657 = vrot.lane.b32.xlu0 %v6614_v8, %s11056_s0  ;;  %6641 = vrot.lane.b32.xlu1 %v6606_v11, %s11056_s0 }
0x144b   : > { %v6608_v39 = vld [vmem:[#allocation13 + $0x28] sm:$0xff] }
0x144c   : > { %6661 = vrot.lane.b32.xlu0 %v6616_v45, %s11056_s0  ;;  %6651 = vrot.lane.b32.xlu1 %v13183_v7, %s11056_s0 }
0x144f   : > { %v7055_v2 = vpop.permute.xlu1 %7054  ;;  %v13240_v62 = vld [vmem:[#allocation13 + $0x8] sm:$0xff] }
0x1450   : > { %6655 = vrot.lane.b32.xlu1 %v13163_v4, %s11056_s0  ;;  %6639 = vrot.lane.b32.xlu0 %v13193_v18, %s11056_s0  ;;  %v13220_v5 = vadd.f32 %v7055_v2, %v7021_v3  ;;  %v7066_v40 = vadd.f32 %v7055_v2, %v7023_v20 }
0x1452   : > { %v7075_v36 = vmax.f32 %v13220_v5, 0.0  ;;  %v7076_v21 = vmax.f32 %v7066_v40, 0.0 }
0x1454   : > { %6659 = vrot.lane.b32.xlu1 %v13169_v60, %s11056_s0  ;;  %6665 = vrot.lane.b32.xlu0 %v6618_v14, %s11056_s0  ;;  %7086 = vst.msk [vmem:[#allocation15 + $0x48] sm:$0xff] %vm3301_vm13, %v7076_v21 }
0x1458   : > { %6663 = vrot.lane.b32.xlu1 %v13175_v42, %s11056_s0  ;;  %6649 = vrot.lane.b32.xlu0 %v6610_v56, %s11056_s0 }
0x145c   : > { %6645 = vrot.lane.b32.xlu1 %v6608_v39, %s11056_s0  ;;  %6643 = vrot.lane.b32.xlu0 %v13199_v0, %s11056_s0 }
0x1460   : > { %6647 = vrot.lane.b32.xlu1 %v13188_v29, %s11056_s0  ;;  %7044 = vperm.xlu0 %10198, %v7029_v10  }
0x1464   : > { %7049 = vperm.xlu1 %10197, %v7030_v28   ;;  %6635 = vrot.lane.b32.xlu0 %v13206_v59, %s11056_s0 }
0x1468   : > { %6637 = vrot.lane.b32.xlu1 %v13240_v62, %s11056_s0  ;;  %7034 = vperm.xlu0 %10198, %v7027_v50   ;;  %s13661_s0 = sld [smem:[#allocation23_spill]] }
0x146c   : > { %7039 = vperm.xlu1 %10197, %v7028_v43  }
0x14b6   : > { %v6654_v32 = vpop.permute.xlu0 %6653 }
0x14b7   : > { %v6700_v35 = vmax.f32 %v6612_v51, %v6654_v32 }
0x14b9   : > { %7096 = vst.msk [vmem:[#allocation15 + $0x98] sm:$0xff] %vm3301_vm13, %v6700_v35 }
0x14ba   : > { %v6642_v12 = vpop.permute.xlu1 %6641  ;;  %v6658_v22 = vpop.permute.xlu0 %6657 }
0x14bb   : > { %v6694_v13 = vmax.f32 %v6606_v11, %v6642_v12  ;;  %v6702_v38 = vmax.f32 %v6614_v8, %v6658_v22 }
0x14bd   : > { %7090 = vst.msk [vmem:[#allocation15 + $0x68] sm:$0xff] %vm3301_vm13, %v6694_v13  ;;  %7098 = vst.msk [vmem:[#allocation15 + $0xa8] sm:$0xff] %vm3301_vm13, %v6702_v38 }
0x14be   : > { %v6652_v27 = vpop.permute.xlu1 %6651  ;;  %v6662_v53 = vpop.permute.xlu0 %6661 }
0x14bf   : > { %v6671_v19 = vsel %vm935_vm5, %v6652_v27, %v6654_v32  ;;  %v6704_v46 = vmax.f32 %v6616_v45, %v6662_v53 }
0x14c0   : > { %v6699_v25 = vmax.f32 %v13183_v7, %v6671_v19 }
0x14c1   : > { %7100 = vst.msk [vmem:[#allocation15 + $0xb8] sm:$0xff] %vm3301_vm13, %v6704_v46 }
0x14c2   : > { %v6656_v54 = vpop.permute.xlu1 %6655  ;;  %v6640_v41 = vpop.permute.xlu0 %6639 }
0x14c3   : > { %v6672_v37 = vsel %vm935_vm5, %v6656_v54, %v6658_v22  ;;  %v6668_v55 = vsel %vm935_vm5, %v6640_v41, %v6642_v12  ;;  %v7124_v22 = vld [vmem:[#allocation15 + $0x98] sm:$0xff] }
0x14c4   : > { %v6701_v51 = vmax.f32 %v13163_v4, %v6672_v37  ;;  %v6693_v47 = vmax.f32 %v13193_v18, %v6668_v55  ;;  %v7126_v43 = vld [vmem:[#allocation15 + $0xa8] sm:$0xff]  ;;  %v7015_v55 = vadd.f32 %v13110_v52, %v13156_v34  ;;  %v7003_v52 = vadd.f32 %v13064_v16, %v13146_v15 }
0x14c5   : > { %v7118_v19 = vld [vmem:[#allocation15 + $0x68] sm:$0xff] }
0x14c6   : > { %v6660_v30 = vpop.permute.xlu1 %6659  ;;  %v6666_v1 = vpop.permute.xlu0 %6665 }
0x14c7   : > { %v6673_v57 = vsel %vm935_vm5, %v6660_v30, %v6662_v53  ;;  %v6706_v8 = vmax.f32 %v6618_v14, %v6666_v1  ;;  %v7011_v53 = vadd.f32 %v13094_v24, %v13152_v17  ;;  %v7017_v24 = vadd.f32 %v13118_v33, %v13158_v9 }
0x14c8   : > { %v6703_v11 = vmax.f32 %v13169_v60, %v6673_v57  ;;  %v7128_v28 = vld [vmem:[#allocation15 + $0xb8] sm:$0xff] }
0x14c9   : > { %7102 = vst.msk [vmem:[#allocation15 + $0xc8] sm:$0xff] %vm3301_vm13, %v6706_v8 }
0x14ca   : > { %v6664_v7 = vpop.permute.xlu1 %6663  ;;  %v6650_v45 = vpop.permute.xlu0 %6649 }
0x14cb   : > { %v6674_v3 = vsel %vm935_vm5, %v6664_v7, %v6666_v1  ;;  %v6698_v20 = vmax.f32 %v6610_v56, %v6650_v45  ;;  %v7001_v1 = vadd.f32 %v13055_v58, %v13144_v63  ;;  %v7005_v58 = vadd.f32 %v13075_v49, %v13148_v6  ;;  %v7114_v6 = vld [vmem:[#allocation15 + $0x48] sm:$0xff] }
0x14cc   : > { %v6705_v2 = vmax.f32 %v13175_v42, %v6674_v3  ;;  %v7141_v42 = vpack.c.bf16 %v6703_v11, %v6701_v51 }
0x14cd   : > { %7094 = vst.msk [vmem:[#allocation15 + $0x88] sm:$0xff] %vm3301_vm13, %v6698_v20 }
0x14ce   : > { %v6646_v4 = vpop.permute.xlu1 %6645  ;;  %v6644_v18 = vpop.permute.xlu0 %6643  ;;  %v7143_v40 = vpack.c.bf16 %v6705_v2, %v6705_v2 }
0x14cf   : > { %v6696_v21 = vmax.f32 %v6608_v39, %v6646_v4  ;;  %v6669_v10 = vsel %vm935_vm5, %v6644_v18, %v6646_v4  ;;  %v7142_v39 = vpack.c.bf16 %v7128_v28, %v7126_v43  ;;  %v10716_v43 = vld [vmem:[%s13661_s0] ss:$8 sps:$4 sm:$0x3f]  }
0x14d0   : > { %v6695_v14 = vmax.f32 %v13199_v0, %v6669_v10  ;;  %v7130_v60 = vld [vmem:[#allocation15 + $0xc8] sm:$0xff]  ;;  %7199 = vrot.lane.b32.xlu0 %v7143_v40, %s11054_s1  ;;  %v7283_v35 = vsel %vm13660_vm1, %v7143_v40, 0 }
0x14d1   : > { %7092 = vst.msk [vmem:[#allocation15 + $0x78] sm:$0xff] %vm3301_vm13, %v6696_v21  ;;  %v7144_v50 = vpack.c.bf16 %v7130_v60, %v7130_v60  ;;  %v10715_v10 = vld [vmem:[%s13661_s0] ss:$8 sps:$4 sm:$0x3f]  }
0x14d2   : > { %v6648_v56 = vpop.permute.xlu1 %6647  ;;  %v7137_v46 = vpack.c.bf16 %v6695_v14, %v6693_v47 }
0x14d3   : > { %v6670_v32 = vsel %vm935_vm5, %v6648_v56, %v6650_v45  ;;  %7201 = vrot.lane.b32.xlu1 %v7144_v50, %s11054_s1  ;;  %9659 = vmatprep.subr.msk.bf16.mxu0 %vm13659_vm9, %v7144_v50  ;;  %v7331_v50 = vld [vmem:[%s13662_s16] sm:$0xff]  ;;  %vm9274_vm9 = vcmask 76800  }
0x14d4   : > { %v6697_v0 = vmax.f32 %v13188_v29, %v6670_v32  ;;  %7291 = vmatpush1.bf16.msra.mxu0 %v7283_v35  ;;  %v7122_v12 = vld [vmem:[#allocation15 + $0x88] sm:$0xff]  ;;  %7195 = vrot.lane.b32.xlu0 %v7141_v42, %s11054_s1  ;;  %v7013_v29 = vadd.f32 %v13102_v26, %v13154_v23 }
0x14d5   : > { %7292 = vmatprep.subr.bf16.mxu0 %v7142_v39  ;;  %v7140_v38 = vpack.c.bf16 %v7124_v22, %v7122_v12  ;;  %v10713_v56 = vld [vmem:[%s13661_s0 + $0x4] ss:$8 sps:$4 sm:$0x3f]  }
0x14d6   : > { %v7139_v13 = vpack.c.bf16 %v6699_v25, %v6697_v0  ;;  %v7414_v32 = vld [vmem:[%s13663_s11 + $0x1e8] sm:$0xff] }
0x14d7   : > { %7197 = vrot.lane.b32.xlu1 %v7142_v39, %s11054_s1  ;;  %v7332_v39 = vld [vmem:[%s13662_s16 + $0x8] sm:$0xf] }
0x14d8   : > { %7293 = vmatpush1.bf16.msra.mxu0 %v7141_v42  ;;  %v7120_v27 = vld [vmem:[#allocation15 + $0x78] sm:$0xff]  ;;  %7191 = vrot.lane.b32.xlu0 %v7139_v13, %s11054_s1  ;;  %v7410_v42 = vld [vmem:[%s13663_s11 + $0x1c8] sm:$0xff] }
0x14d9   : > { %7294 = vmatprep.subr.bf16.mxu0 %v7140_v38  ;;  %v7138_v25 = vpack.c.bf16 %v7120_v27, %v7118_v19  ;;  %v9719_v35 = vcombine.low %v7410_v42, %v7414_v32  ;;  %v9720_v0 = vcombine.high %v7410_v42, %v7414_v32  ;;  %v7402_v12 = vld [vmem:[%s13663_s11 + $0x188] sm:$0xff] }
0x14da   : > { %v7406_v22 = vld [vmem:[%s13663_s11 + $0x1a8] sm:$0xff] }
0x14db   : > { %7193 = vrot.lane.b32.xlu1 %v7140_v38, %s11054_s1  ;;  %v7045_v54 = vpop.permute.xlu0 %7044  ;;  %v7394_v38 = vld [vmem:[%s13663_s11 + $0x148] sm:$0xff] }
0x14dc   : > { %v7061_v41 = vadd.f32 %v7045_v54, %v7011_v53  ;;  %v7062_v37 = vadd.f32 %v7045_v54, %v7013_v29  ;;  %7295 = vmatpush1.bf16.msra.mxu0 %v7139_v13  ;;  %7187 = vrot.lane.b32.xlu0 %v7137_v46, %s11054_s1  ;;  %v9712_v13 = vcombine.high %v7402_v12, %v7406_v22  ;;  %v7398_v27 = vld [vmem:[%s13663_s11 + $0x168] sm:$0xff] }
0x14dd   : > { %7296 = vmatprep.subr.bf16.mxu0 %v7138_v25  ;;  %v9711_v53 = vcombine.low %v7402_v12, %v7406_v22  ;;  %v9704_v29 = vcombine.high %v7394_v38, %v7398_v27  ;;  %v7386_v19 = vld [vmem:[%s13663_s11 + $0x108] sm:$0xff]  ;;  %v9703_v54 = vcombine.low %v7394_v38, %v7398_v27  ;;  %v7397_v12 = vld [vmem:[%s13663_s11 + $0x160] sm:$0xff] }
0x14de   : > { %v7071_v17 = vmax.f32 %v7061_v41, 0.0  ;;  %v7072_v26 = vmax.f32 %v7062_v37, 0.0  ;;  %v7378_v41 = vld [vmem:[%s13663_s11 + $0xc8] sm:$0xff]  ;;  %v7385_v38 = vld [vmem:[%s13663_s11 + $0x100] sm:$0xff] }
0x14df   : > { %v7050_v23 = vpop.permute.xlu1 %7049  ;;  %7189 = vrot.lane.b32.xlu1 %v7138_v25, %s11054_s1  ;;  %v6636_v51 = vpop.permute.xlu0 %6635  ;;  %v7382_v37 = vld [vmem:[%s13663_s11 + $0xe8] sm:$0xff]  ;;  %v7389_v27 = vld [vmem:[%s13663_s11 + $0x120] sm:$0xff] }
0x14e0   : > { %7082 = vst.msk [vmem:[#allocation15 + $0x28] sm:$0xff] %vm3301_vm13, %v7072_v26  ;;  %v7063_v47 = vadd.f32 %v7050_v23, %v7015_v55  ;;  %v7064_v30 = vadd.f32 %v7050_v23, %v7017_v24  ;;  %7297 = vmatpush1.bf16.msra.mxu0 %v7137_v46  ;;  %v7390_v46 = vld [vmem:[%s13663_s11 + $0x128] sm:$0xff]  ;;  %v9688_v24 = vcombine.high %v7378_v41, %v7382_v37 }
0x14e1   : > { %v9696_v25 = vcombine.high %v7386_v19, %v7390_v46  ;;  %v9695_v55 = vcombine.low %v7386_v19, %v7390_v46  ;;  %v7374_v26 = vld [vmem:[%s13663_s11 + $0xa8] sm:$0xff]  ;;  %v9687_v23 = vcombine.low %v7378_v41, %v7382_v37  ;;  %v7377_v19 = vld [vmem:[%s13663_s11 + $0xc0] sm:$0xff] }
0x14e2   : > { %v7073_v34 = vmax.f32 %v7063_v47, 0.0  ;;  %v7074_v57 = vmax.f32 %v7064_v30, 0.0  ;;  %v7362_v47 = vld [vmem:[%s13663_s11 + $0x48] sm:$0xff]  ;;  %v7381_v46 = vld [vmem:[%s13663_s11 + $0xe0] sm:$0xff] }
0x14e3   : > { %v6638_v33 = vpop.permute.xlu1 %6637  ;;  %v7035_v9 = vpop.permute.xlu0 %7034  ;;  %v7366_v30 = vld [vmem:[%s13663_s11 + $0x68] sm:$0xff]  ;;  %v7369_v41 = vld [vmem:[%s13663_s11 + $0x80] sm:$0xff] }
0x14e4   : > { %7084 = vst.msk [vmem:[#allocation15 + $0x38] sm:$0xff] %vm3301_vm13, %v7074_v57  ;;  %v6667_v8 = vsel %vm935_vm5, %v6636_v51, %v6638_v33  ;;  %v6692_v11 = vmax.f32 %v13240_v62, %v6638_v33  ;;  %v7057_v7 = vadd.f32 %v7035_v9, %v7001_v1  ;;  %v7058_v45 = vadd.f32 %v7035_v9, %v7003_v52  ;;  %v7358_v57 = vld [vmem:[%s13663_s11 + $0x28] sm:$0xff]  ;;  %v7373_v37 = vld [vmem:[%s13663_s11 + $0xa0] sm:$0xff] }
0x14e5   : > { %v6691_v3 = vmax.f32 %v13206_v59, %v6667_v8  ;;  %v7133_v20 = vpack.c.bf16 %v7073_v34, %v7071_v17  ;;  %vm13664_vm5 = vcmask 850944   ;;  %v7370_v17 = vld [vmem:[%s13663_s11 + $0x88] sm:$0xff]  ;;  %v9672_v52 = vcombine.high %v7362_v47, %v7366_v30 }
0x14e6   : > { %7088 = vst.msk [vmem:[#allocation15 + $0x58] sm:$0xff] %vm3301_vm13, %v6692_v11  ;;  %v7067_v16 = vmax.f32 %v7057_v7, 0.0  ;;  %v7068_v63 = vmax.f32 %v7058_v45, 0.0  ;;  %v9680_v51 = vcombine.high %v7370_v17, %v7374_v26  ;;  %v9679_v1 = vcombine.low %v7370_v17, %v7374_v26  ;;  %v7354_v34 = vld [vmem:[%s13663_s11 + $0x8] sm:$0xff]  ;;  %vm13667_vm4 = vmmov %vm13664_vm5  ;;  %v7361_v17 = vld [vmem:[%s13663_s11 + $0x40] sm:$0xff] }
0x14e7   : > { %v7040_v15 = vpop.permute.xlu1 %7039  ;;  %v7135_v2 = vpack.c.bf16 %v6691_v3, %v7075_v36  ;;  %v7110_v36 = vld [vmem:[#allocation15 + $0x28] sm:$0xff]  ;;  %v9671_v33 = vcombine.low %v7362_v47, %v7366_v30  ;;  %v9664_v9 = vcombine.high %v7354_v34, %v7358_v57  ;;  %v9663_v8 = vcombine.low %v7354_v34, %v7358_v57  ;;  %v7365_v26 = vld [vmem:[%s13663_s11 + $0x60] sm:$0xff] }
0x14e8   : > { %7078 = vst.msk [vmem:[#allocation15 + $0x8] sm:$0xff] %vm3301_vm13, %v7068_v63  ;;  %v7059_v4 = vadd.f32 %v7040_v15, %v7005_v58  ;;  %v7060_v62 = vadd.f32 %v7040_v15, %v13150_v44  ;;  %v7353_v47 = vld [vmem:[%s13663_s11] sm:$0xff] }
0x14e9   : > { %7183 = vrot.lane.b32.xlu0 %v7135_v2, %s11054_s1  ;;  %v7357_v30 = vld [vmem:[%s13663_s11 + $0x20] sm:$0xff] }
0x14ea   : > { %v7069_v59 = vmax.f32 %v7059_v4, 0.0  ;;  %v7070_v18 = vmax.f32 %v7060_v62, 0.0  ;;  %v9661_v34 = vcombine.low %v7353_v47, %v7357_v30  ;;  %v7433_v57 = vld [vmem:[%s13663_s11 + $0x280] sm:$0xff] }
0x14eb   : > { %v7112_v21 = vld [vmem:[#allocation15 + $0x38] sm:$0xff] }
0x14ec   : > { %7080 = vst.msk [vmem:[#allocation15 + $0x18] sm:$0xff] %vm3301_vm13, %v7070_v18  ;;  %v7131_v49 = vpack.c.bf16 %v7069_v59, %v7067_v16  ;;  %v7134_v44 = vpack.c.bf16 %v7112_v21, %v7110_v36  ;;  %vm13665_vm13 = vmmov %vm13660_vm1  ;;  %v7413_v36 = vld [vmem:[%s13663_s11 + $0x1e0] sm:$0xff] }
0x14ed   : > { %v7116_v40 = vld [vmem:[#allocation15 + $0x58] sm:$0xff]  ;;  %7179 = vrot.lane.b32.xlu0 %v7133_v20, %s11054_s1 }
0x14ee   : > { %v7136_v5 = vpack.c.bf16 %v7116_v40, %v7114_v6 }
0x14ef   : > { %v7106_v14 = vld [vmem:[#allocation15 + $0x8] sm:$0xff] }
0x14f0   : > { %7185 = vrot.lane.b32.xlu1 %v7136_v5, %s11054_s1  ;;  %7298 = vmatprep.subr.bf16.mxu0 %v7136_v5  ;;  %v7409_v5 = vld [vmem:[%s13663_s11 + $0x1c0] sm:$0xff] }
0x14f1   : > { %7299 = vmatpush1.bf16.msra.mxu0 %v7135_v2  ;;  %7175 = vrot.lane.b32.xlu0 %v7131_v49, %s11054_s1  ;;  %v9717_v42 = vcombine.low %v7409_v5, %v7413_v36 }
0x14f2   : > { %7300 = vmatprep.subr.bf16.mxu0 %v7134_v44 }
0x14f3   : > { %v7108_v60 = vld [vmem:[#allocation15 + $0x18] sm:$0xff] }
0x14f4   : > { %7181 = vrot.lane.b32.xlu1 %v7134_v44, %s11054_s1  ;;  %v7132_v28 = vpack.c.bf16 %v7108_v60, %v7106_v14  ;;  %v9718_v14 = vcombine.high %v7409_v5, %v7413_v36  ;;  %v7422_v5 = vld [vmem:[%s13663_s11 + $0x228] sm:$0xff] }
0x14f5   : > { %7301 = vmatpush1.bf16.msra.mxu0 %v7133_v20  ;;  %7155 = vrot.lane.b32.xlu0 %v10715_v10, %s11077_s15 }
0x14f6   : > { %7302 = vmatprep.subr.bf16.mxu0 %v7132_v28 }
0x14f8   : > { %7177 = vrot.lane.b32.xlu1 %v7132_v28, %s11054_s1  ;;  %s13676_s1 = sld [smem:[#allocation27_spill]] }
0x14f9   : > { %7303 = vmatpush1.bf16.msra.mxu0 %v7131_v49  ;;  %7335 = vperm.xlu0 %10198, %v7331_v50   ;;  %v7401_v50 = vld [vmem:[%s13663_s11 + $0x180] sm:$0xff] }
0x14fa   : > { %7985 = vmatprep.subr.bf16.mxu0 %v9720_v0  ;;  %v7393_v0 = vld [vmem:[%s13663_s11 + $0x140] sm:$0xff] }
0x14fc   : > { %7157 = vrot.lane.b32.xlu1 %v10713_v56, %s11077_s15  ;;  %9660 = vmatmul.mubr.msk.bf16.vlgmr.msra.gmra.mxu0 %vm13664_vm5, %v10716_v43  ;;  %v7405_v56 = vld [vmem:[%s13663_s11 + $0x1a0] sm:$0xff]  ;;  %s9904_s15 = sshll.u32 %s13679_s10, 4 }
0x14fd   : > { %7986 = vmatpush1.bf16.msra.mxu0 %v9719_v35  ;;  %v9709_v22 = vcombine.low %v7401_v50, %v7405_v56 }
0x14fe   : > { %7987 = vmatprep.subr.bf16.mxu0 %v9712_v13  ;;  %v9702_v13 = vcombine.high %v7393_v0, %v7397_v12 }
0x1500   : > { %7340 = vperm.xlu1 %10197, %v7332_v39   ;;  %v9710_v39 = vcombine.high %v7401_v50, %v7405_v56  ;;  %v7416_v56 = vld [vmem:[%s13663_s11 + $0x1f8] sm:$0xff] }
0x1501   : > { %7988 = vmatpush1.bf16.msra.mxu0 %v9711_v53  ;;  %v9701_v53 = vcombine.low %v7393_v0, %v7397_v12 }
0x1502   : > { %7989 = vmatprep.subr.bf16.mxu0 %v9704_v29  ;;  %v9694_v29 = vcombine.high %v7385_v38, %v7389_v27 }
0x1505   : > { %7990 = vmatpush1.bf16.msra.mxu0 %v9703_v54  ;;  %v9693_v54 = vcombine.low %v7385_v38, %v7389_v27 }
0x1506   : > { %7991 = vmatprep.subr.bf16.mxu0 %v9696_v25  ;;  %v9686_v25 = vcombine.high %v7377_v19, %v7381_v46 }
0x1509   : > { %7992 = vmatpush1.bf16.msra.mxu0 %v9695_v55  ;;  %v9685_v55 = vcombine.low %v7377_v19, %v7381_v46 }
0x150a   : > { %7993 = vmatprep.subr.bf16.mxu0 %v9688_v24  ;;  %v9678_v24 = vcombine.high %v7369_v41, %v7373_v37 }
0x150d   : > { %7994 = vmatpush1.bf16.msra.mxu0 %v9687_v23  ;;  %v9677_v23 = vcombine.low %v7369_v41, %v7373_v37 }
0x150e   : > { %7995 = vmatprep.subr.bf16.mxu0 %v9680_v51  ;;  %v9670_v51 = vcombine.high %v7361_v17, %v7365_v26 }
0x1511   : > { %7996 = vmatpush1.bf16.msra.mxu0 %v9679_v1  ;;  %v9669_v1 = vcombine.low %v7361_v17, %v7365_v26 }
0x1512   : > { %7997 = vmatprep.subr.bf16.mxu0 %v9672_v52  ;;  %v9662_v52 = vcombine.high %v7353_v47, %v7357_v30  ;;  %v7407_v30 = vld [vmem:[%s13663_s11 + $0x1b0] sm:$0xff] }
0x1515   : > { %7998 = vmatpush1.bf16.msra.mxu0 %v9671_v33  ;;  %v7437_v33 = vld [vmem:[%s13663_s11 + $0x2a0] sm:$0x11] }
0x1516   : > { %7999 = vmatprep.subr.bf16.mxu0 %v9664_v9  ;;  %v7434_v9 = vld [vmem:[%s13663_s11 + $0x288] sm:$0xff] }
0x1519   : > { %8000 = vmatpush1.bf16.msra.mxu0 %v9663_v8  ;;  %v9742_v8 = vcombine.high %v7433_v57, %v7437_v33 }
0x1542   : > { %v7200_v11 = vpop.permute.xlu0 %7199 }
0x1545   : > { %v7202_v7 = vpop.permute.xlu1 %7201 }
0x1546   : > { %9656 = vmatprep.subr.msk.bf16.mxu1 %vm13665_vm13, %v7202_v7  ;;  %v7209_v45 = vsel %vm913_vm3, %v7200_v11, %v7202_v7  ;;  %v7196_v3 = vpop.permute.xlu0 %7195  ;;  %v7438_v11 = vld [vmem:[%s13663_s11 + $0x2a8] sm:$0x11]  ;;  %v9741_v7 = vcombine.low %v7433_v57, %v7437_v33  ;;  %v7395_v33 = vld [vmem:[%s13663_s11 + $0x150] sm:$0xff] }
0x1547   : > { %v7226_v20 = vsel %vm13666_vm15, %v7209_v45, 0  ;;  %v9744_v45 = vcombine.high %v7434_v9, %v7438_v11 }
0x1548   : > { %7234 = vmatpush1.bf16.msra.mxu1 %v7226_v20 }
0x1549   : > { %v7198_v58 = vpop.permute.xlu1 %7197 }
0x154a   : > { %7235 = vmatprep.subr.bf16.mxu1 %v7198_v58  ;;  %v7208_v16 = vsel %vm913_vm3, %v7196_v3, %v7198_v58  ;;  %v7192_v63 = vpop.permute.xlu0 %7191  ;;  %v9743_v3 = vcombine.low %v7434_v9, %v7438_v11  ;;  %v7399_v11 = vld [vmem:[%s13663_s11 + $0x170] sm:$0xff] }
0x154c   : > { %7236 = vmatpush1.bf16.msra.mxu1 %v7208_v16  ;;  %v7425_v16 = vld [vmem:[%s13663_s11 + $0x240] sm:$0xff] }
0x154d   : > { %v7194_v15 = vpop.permute.xlu1 %7193 }
0x154e   : > { %7237 = vmatprep.subr.bf16.mxu1 %v7194_v15  ;;  %v7207_v2 = vsel %vm913_vm3, %v7192_v63, %v7194_v15  ;;  %v7188_v62 = vpop.permute.xlu0 %7187  ;;  %v7429_v63 = vld [vmem:[%s13663_s11 + $0x260] sm:$0xff]  ;;  %v7426_v15 = vld [vmem:[%s13663_s11 + $0x248] sm:$0xff] }
0x1550   : > { %7238 = vmatpush1.bf16.msra.mxu1 %v7207_v2  ;;  %v9734_v2 = vcombine.high %v7425_v16, %v7429_v63 }
0x1551   : > { %v7190_v4 = vpop.permute.xlu1 %7189 }
0x1552   : > { %7239 = vmatprep.subr.bf16.mxu1 %v7190_v4  ;;  %v7206_v59 = vsel %vm913_vm3, %v7188_v62, %v7190_v4  ;;  %v7430_v4 = vld [vmem:[%s13663_s11 + $0x268] sm:$0xff]  ;;  %v9733_v62 = vcombine.low %v7425_v16, %v7429_v63  ;;  %v7387_v63 = vld [vmem:[%s13663_s11 + $0x110] sm:$0xff] }
0x1554   : > { %7240 = vmatpush1.bf16.msra.mxu1 %v7206_v59  ;;  %v9735_v59 = vcombine.low %v7426_v15, %v7430_v4 }
0x155b   : > { %v7184_v18 = vpop.permute.xlu0 %7183 }
0x155f   : > { %v7180_v6 = vpop.permute.xlu0 %7179 }
0x1562   : > { %v7186_v49 = vpop.permute.xlu1 %7185 }
0x1563   : > { %7241 = vmatprep.subr.bf16.mxu1 %v7186_v49  ;;  %v7205_v40 = vsel %vm913_vm3, %v7184_v18, %v7186_v49  ;;  %v7176_v10 = vpop.permute.xlu0 %7175  ;;  %v9736_v18 = vcombine.high %v7426_v15, %v7430_v4  ;;  %v7417_v49 = vld [vmem:[%s13663_s11 + $0x200] sm:$0xff]  ;;  %v7391_v15 = vld [vmem:[%s13663_s11 + $0x130] sm:$0xff]  ;;  %v7392_v4 = vld [vmem:[%s13663_s11 + $0x138] sm:$0xff] }
0x1564   : > { %7242 = vmatpush1.bf16.msra.mxu1 %v7205_v40  ;;  %v7418_v40 = vld [vmem:[%s13663_s11 + $0x208] sm:$0xff] }
0x1566   : > { %v7182_v21 = vpop.permute.xlu1 %7181 }
0x1567   : > { %7243 = vmatprep.subr.bf16.mxu1 %v7182_v21  ;;  %v7204_v44 = vsel %vm913_vm3, %v7180_v6, %v7182_v21  ;;  %v7156_v43 = vpop.permute.xlu0 %7155  ;;  %v7421_v6 = vld [vmem:[%s13663_s11 + $0x220] sm:$0xff] }
0x1568   : > { %7244 = vmatpush1.bf16.msra.mxu1 %v7204_v44  ;;  %v9726_v21 = vcombine.high %v7417_v49, %v7421_v6  ;;  %v9725_v36 = vcombine.low %v7417_v49, %v7421_v6  ;;  %v9727_v44 = vcombine.low %v7418_v40, %v7422_v5  ;;  %v7379_v6 = vld [vmem:[%s13663_s11 + $0xd0] sm:$0xff] }
0x156a   : > { %v7178_v60 = vpop.permute.xlu1 %7177 }
0x156b   : > { %7245 = vmatprep.subr.bf16.mxu1 %v7178_v60  ;;  %v7203_v28 = vsel %vm913_vm3, %v7176_v10, %v7178_v60  ;;  %vm13668_vm3 = vcmask 1044480   ;;  %v9728_v10 = vcombine.high %v7418_v40, %v7422_v5  ;;  %v7415_v60 = vld [vmem:[%s13663_s11 + $0x1f0] sm:$0xff]  ;;  %v7384_v5 = vld [vmem:[%s13663_s11 + $0xf8] sm:$0xff] }
0x156c   : > { %7246 = vmatpush1.bf16.msra.mxu1 %v7203_v28  ;;  %vm13669_vm6 = vmmov %vm13668_vm3  ;;  %v7412_v28 = vld [vmem:[%s13663_s11 + $0x1d8] sm:$0xff]  ;;  %v7383_v40 = vld [vmem:[%s13663_s11 + $0xf0] sm:$0xff] }
0x156d   : > { %7942 = vmatprep.subr.bf16.mxu1 %v9718_v14  ;;  %v7919_v20 = vsel %vm13669_vm6, %v9741_v7, 0  ;;  %vm13670_vm11 = vmmov %vm13668_vm3  ;;  %v7411_v14 = vld [vmem:[%s13663_s11 + $0x1d0] sm:$0xff]  ;;  %v7396_v7 = vld [vmem:[%s13663_s11 + $0x158] sm:$0xff] }
0x156e   : > { %v7158_v32 = vpop.permute.xlu1 %7157  ;;  %9751 = vmatprep.subr.msk.bf16.mxu0 %vm13670_vm11, %v9744_v45  ;;  %vm13671_vm0 = vmmov %vm13668_vm3  ;;  %v9722_v50 = vcombine.high %v7411_v14, %v7415_v60  ;;  %v7400_v45 = vld [vmem:[%s13663_s11 + $0x178] sm:$0xff] }
0x156f   : > { %v7160_v35 = vsel %vm7159_vm2, %v7156_v43, %v7158_v32  ;;  %v7925_v58 = vsel %vm13671_vm0, %v9743_v3, 0  ;;  %v9721_v43 = vcombine.low %v7411_v14, %v7415_v60  ;;  %v9724_v32 = vcombine.high %v7412_v28, %v7416_v56  ;;  %v7371_v60 = vld [vmem:[%s13663_s11 + $0x90] sm:$0xff]  ;;  %vm13673_vm14 = vmmov %vm13671_vm0 }
0x1570   : > { %9657 = vmatmul.mubr.msk.bf16.vlgmr.msra.gmra.mxu1 %vm13667_vm4, %v7160_v35  ;;  %8012 = vmatpush2.bf16.msra.mxu0 %v7925_v58  ;;  %v9706_v58 = vcombine.high %v7395_v33, %v7399_v11  ;;  %v9708_v16 = vcombine.high %v7396_v7, %v7400_v45  ;;  %vm13674_vm7 = vmmov %vm13671_vm0 }
0x1571   : > { %7943 = vmatpush1.bf16.msra.mxu1 %v9717_v42  ;;  %8013 = vmatprep.subr.bf16.mxu0 %v9736_v18  ;;  %v9723_v42 = vcombine.low %v7412_v28, %v7416_v56  ;;  %v9698_v18 = vcombine.high %v7387_v63, %v7391_v15  ;;  %v7375_v28 = vld [vmem:[%s13663_s11 + $0xb0] sm:$0xff]  ;;  %v7376_v56 = vld [vmem:[%s13663_s11 + $0xb8] sm:$0xff]  ;;  %vm13675_vm12 = vmmov %vm13671_vm0 }
0x1572   : > { %7944 = vmatprep.subr.bf16.mxu1 %v9710_v39 }
0x1574   : > { %8014 = vmatpush2.bf16.msra.mxu0 %v9735_v59  ;;  %v9707_v59 = vcombine.low %v7396_v7, %v7400_v45 }
0x1575   : > { %7945 = vmatpush1.bf16.msra.mxu1 %v9709_v22  ;;  %8015 = vmatprep.subr.bf16.mxu0 %v9728_v10  ;;  %v9690_v10 = vcombine.high %v7379_v6, %v7383_v40 }
0x1576   : > { %7946 = vmatprep.subr.bf16.mxu1 %v9702_v13 }
0x1578   : > { %8016 = vmatpush2.bf16.msra.mxu0 %v9727_v44 }
0x1579   : > { %7947 = vmatpush1.bf16.msra.mxu1 %v9701_v53  ;;  %8071 = vmatprep.subr.bf16.mxu0 %v9724_v32  ;;  %v9682_v32 = vcombine.high %v7371_v60, %v7375_v28 }
0x157a   : > { %7948 = vmatprep.subr.bf16.mxu1 %v9694_v29  ;;  %v7336_v29 = vpop.permute.xlu0 %7335 }
0x157b   : > { %v7341_v53 = vpop.permute.xlu1 %7340 }
0x157d   : > { %7949 = vmatpush1.bf16.msra.mxu1 %v9693_v54 }
0x157e   : > { %7950 = vmatprep.subr.bf16.mxu1 %v9686_v25 }
0x1581   : > { %7951 = vmatpush1.bf16.msra.mxu1 %v9685_v55 }
0x1582   : > { %7952 = vmatprep.subr.bf16.mxu1 %v9678_v24 }
0x1585   : > { %7953 = vmatpush1.bf16.msra.mxu1 %v9677_v23 }
0x1586   : > { %7954 = vmatprep.subr.bf16.mxu1 %v9670_v51  ;;  %v7403_v51 = vld [vmem:[%s13663_s11 + $0x190] sm:$0xff] }
0x1587   : > { %v9714_v9 = vcombine.high %v7403_v51, %v7407_v30  ;;  %v9713_v3 = vcombine.low %v7403_v51, %v7407_v30 }
0x1589   : > { %7955 = vmatpush1.bf16.msra.mxu1 %v9669_v1  ;;  %v7404_v1 = vld [vmem:[%s13663_s11 + $0x198] sm:$0xff] }
0x158a   : > { %7956 = vmatprep.subr.bf16.mxu1 %v9662_v52  ;;  %v7408_v52 = vld [vmem:[%s13663_s11 + $0x1b8] sm:$0xff] }
0x158d   : > { %7957 = vmatpush1.bf16.msra.mxu1 %v9661_v34 }
0x158e   : > { %9749 = vmatprep.subr.msk.bf16.mxu1 %vm13668_vm3, %v9742_v8  ;;  %v9716_v8 = vcombine.high %v7404_v1, %v7408_v52 }
0x1591   : > { %7969 = vmatpush2.bf16.msra.mxu1 %v7919_v20  ;;  %v9715_v20 = vcombine.low %v7404_v1, %v7408_v52 }
0x1592   : > { %7970 = vmatprep.subr.bf16.mxu1 %v9734_v2  ;;  %v7388_v2 = vld [vmem:[%s13663_s11 + $0x118] sm:$0xff] }
0x1593   : > { %v9700_v49 = vcombine.high %v7388_v2, %v7392_v4  ;;  %v9699_v44 = vcombine.low %v7388_v2, %v7392_v4 }
0x1595   : > { %7971 = vmatpush2.bf16.msra.mxu1 %v9733_v62  ;;  %v9705_v62 = vcombine.low %v7395_v33, %v7399_v11  ;;  %v7427_v33 = vld [vmem:[%s13663_s11 + $0x250] sm:$0xff]  ;;  %v7432_v11 = vld [vmem:[%s13663_s11 + $0x278] sm:$0xff] }
0x1596   : > { %7972 = vmatprep.subr.bf16.mxu1 %v9726_v21  ;;  %v7380_v21 = vld [vmem:[%s13663_s11 + $0xd8] sm:$0xff] }
0x1597   : > { %v9692_v14 = vcombine.high %v7380_v21, %v7384_v5 }
0x1599   : > { %7973 = vmatpush2.bf16.msra.mxu1 %v9725_v36  ;;  %v9697_v36 = vcombine.low %v7387_v63, %v7391_v15  ;;  %v7420_v63 = vld [vmem:[%s13663_s11 + $0x218] sm:$0xff] }
0x159a   : > { %8028 = vmatprep.subr.bf16.mxu1 %v9722_v50  ;;  %v7372_v50 = vld [vmem:[%s13663_s11 + $0x98] sm:$0xff] }
0x159b   : > { %v7424_v15 = vld [vmem:[%s13663_s11 + $0x238] sm:$0xff] }
0x15bc   : > { %v7322_v39 = vpop.f32.mrf.mxu0 }
0x15be   : > { %v7324_v35 = vpop.f32.mrf.mxu0 }
0x15c0   : > { %v7326_v22 = vpop.f32.mrf.mxu0 }
0x15c2   : > { %v7328_v54 = vpop.f32.mrf.mxu0 }
0x1630   : > { %v7265_v0 = vpop.f32.mrf.mxu1 }
0x1631   : > { %v7323_v38 = vadd.f32 %v7322_v39, %v7265_v0  ;;  %v9684_v39 = vcombine.high %v7372_v50, %v7376_v56  ;;  %v7367_v0 = vld [vmem:[%s13663_s11 + $0x70] sm:$0xff] }
0x1632   : > { %v7267_v12 = vpop.f32.mrf.mxu1 }
0x1633   : > { %v7325_v13 = vadd.f32 %v7324_v35, %v7267_v12  ;;  %v7343_v55 = vadd.f32 %v7336_v29, %v7323_v38  ;;  %v7363_v35 = vld [vmem:[%s13663_s11 + $0x50] sm:$0xff]  ;;  %v7364_v12 = vld [vmem:[%s13663_s11 + $0x58] sm:$0xff]  ;;  %v9683_v38 = vcombine.low %v7372_v50, %v7376_v56 }
0x1634   : > { %v7269_v27 = vpop.f32.mrf.mxu1  ;;  %v10729_v50 = vld [vmem:[%s13676_s1 + $0x50] ss:$8 sps:$4 sm:$0xff]  }
0x1635   : > { %v7327_v19 = vadd.f32 %v7326_v22, %v7269_v27  ;;  %v7344_v25 = vadd.f32 %v7336_v29, %v7325_v13  ;;  %v7347_v47 = vmax.f32 %v7343_v55, 0.0  ;;  %v7368_v22 = vld [vmem:[%s13663_s11 + $0x78] sm:$0xff]  ;;  %v9681_v13 = vcombine.low %v7371_v60, %v7375_v28  ;;  %v7355_v29 = vld [vmem:[%s13663_s11 + $0x10] sm:$0xff] }
0x1636   : > { %v7271_v46 = vpop.f32.mrf.mxu1  ;;  %v9674_v27 = vcombine.high %v7363_v35, %v7367_v0  ;;  %v10731_v60 = vld [vmem:[%s13676_s1 + $0x54] ss:$8 sps:$4 sm:$0xff]   ;;  %v10732_v56 = vld [vmem:[%s13676_s1 + $0x150] ss:$8 sps:$4 sm:$0xff]  }
0x1637   : > { %v7345_v41 = vadd.f32 %v7341_v53, %v7327_v19  ;;  %v7329_v37 = vadd.f32 %v7328_v54, %v7271_v46  ;;  %v7348_v26 = vmax.f32 %v7344_v25, 0.0  ;;  %v7359_v19 = vld [vmem:[%s13663_s11 + $0x30] sm:$0xff]  ;;  %v7356_v46 = vld [vmem:[%s13663_s11 + $0x18] sm:$0xff]  ;;  %v9673_v25 = vcombine.low %v7363_v35, %v7367_v0 }
0x1638   : > { %v7360_v54 = vld [vmem:[%s13663_s11 + $0x38] sm:$0xff]  ;;  %v9665_v51 = vcombine.low %v7355_v29, %v7359_v19 }
0x1639   : > { %v7346_v24 = vadd.f32 %v7341_v53, %v7329_v37  ;;  %v7349_v17 = vmax.f32 %v7345_v41, 0.0  ;;  %v9676_v53 = vcombine.high %v7364_v12, %v7368_v22  ;;  %v9675_v41 = vcombine.low %v7364_v12, %v7368_v22  ;;  %v10734_v28 = vld [vmem:[%s13676_s1 + $0x154] ss:$8 sps:$4 sm:$0xff]   ;;  %v10741_v0 = vld [vmem:[%s13676_s1 + $0x30] ss:$8 sps:$4 sm:$0xff]  }
0x163a   : > { %v9666_v37 = vcombine.high %v7355_v29, %v7359_v19  ;;  %v9668_v55 = vcombine.high %v7356_v46, %v7360_v54  ;;  %v10746_v35 = vld [vmem:[%s13676_s1 + $0x134] ss:$8 sps:$4 sm:$0xff]   ;;  %v10744_v12 = vld [vmem:[%s13676_s1 + $0x130] ss:$8 sps:$4 sm:$0xff]   ;;  %v10749_v22 = vld [vmem:[%s13676_s1 + $0x24] ss:$8 sps:$4 sm:$0xff]  }
0x163b   : > { %v7350_v23 = vmax.f32 %v7346_v24, 0.0  ;;  %v13379_v57 = vpack.c.bf16 %v7349_v17, %v7347_v47  ;;  %v7435_v24 = vld [vmem:[%s13663_s11 + $0x290] sm:$0xff]  ;;  %v9667_v47 = vcombine.low %v7356_v46, %v7360_v54  ;;  %v10761_v54 = vld [vmem:[%s13676_s1 + $0x4] ss:$8 sps:$4 sm:$0xff]  }
0x163c   : > { %v7439_v17 = vld [vmem:[%s13663_s11 + $0x2b0] sm:$0x11] }
0x163d   : > { %v7352_v34 = vpack.c.bf16 %v7350_v23, %v7348_v26  ;;  %v7436_v26 = vld [vmem:[%s13663_s11 + $0x298] sm:$0xff]  ;;  %v9746_v30 = vcombine.high %v7435_v24, %v7439_v17  ;;  %v9745_v52 = vcombine.low %v7435_v24, %v7439_v17 }
0x163e   : > { %v7440_v23 = vld [vmem:[%s13663_s11 + $0x2b8] sm:$0x11] }
0x163f   : > { %9750 = vmatprep.mubr.msk.bf16.mxu1 %vm4695_vm8, %v7352_v34  ;;  %9752 = vmatprep.mubr.msk.bf16.mxu0 %vm4695_vm8, %v7352_v34  ;;  %v9748_v1 = vcombine.high %v7436_v26, %v7440_v23  ;;  %v7931_v7 = vsel %vm13674_vm7, %v9745_v52, 0  ;;  %v10758_v29 = vld [vmem:[%s13676_s1 + $0x114] ss:$8 sps:$4 sm:$0xff]   ;;  %v10753_v19 = vld [vmem:[%s13676_s1 + $0x10] ss:$8 sps:$4 sm:$0xff]  }
0x1640   : > { %7975 = vmatmul.mubr.bf16.vlgmr.msra.gmra.mxu1 %v13379_v57  ;;  %8018 = vmatmul.mubr.bf16.vlgmr.msra.gmra.mxu0 %v13379_v57  ;;  %v10756_v46 = vld [vmem:[%s13676_s1 + $0x110] ss:$8 sps:$4 sm:$0xff]   ;;  %v10770_v24 = vld [vmem:[%s13676_s1 + $0x1f4] ss:$8 sps:$4 sm:$0xff]  }
0x1641   : > { %8029 = vmatpush1.bf16.msra.mxu1 %v9721_v43  ;;  %8072 = vmatpush1.bf16.msra.mxu0 %v9723_v42  ;;  %v9689_v43 = vcombine.low %v7379_v6, %v7383_v40  ;;  %v9691_v42 = vcombine.low %v7380_v21, %v7384_v5  ;;  %v10719_v6 = vld [vmem:[%s13676_s1 + $0x74] ss:$8 sps:$4 sm:$0xff]   ;;  %v10717_v21 = vld [vmem:[%s13676_s1 + $0x70] ss:$8 sps:$4 sm:$0xff]  }
0x1642   : > { %9754 = vmatprep.mubr.msk.bf16.mxu1 %vm4695_vm8, %v7352_v34  ;;  %9756 = vmatprep.mubr.msk.bf16.mxu0 %vm4695_vm8, %v7352_v34  ;;  %v9747_v34 = vcombine.low %v7436_v26, %v7440_v23  ;;  %vm13672_vm8 = vmmov %vm13671_vm0  ;;  %v10722_v40 = vld [vmem:[%s13676_s1 + $0x174] ss:$8 sps:$4 sm:$0xff]   ;;  %v10720_v5 = vld [vmem:[%s13676_s1 + $0x170] ss:$8 sps:$4 sm:$0xff]  }
0x1643   : > { %8030 = vmatprep.subr.bf16.mxu1 %v9714_v9  ;;  %8073 = vmatprep.subr.bf16.mxu0 %v9716_v8  ;;  %v7431_v9 = vld [vmem:[%s13663_s11 + $0x270] sm:$0xff]  ;;  %v7428_v8 = vld [vmem:[%s13663_s11 + $0x258] sm:$0xff]  ;;  %v10773_v23 = vld [vmem:[%s13676_s1 + $0xe4] ss:$8 sps:$4 sm:$0xff]  }
0x1644   : > { %v7937_v45 = vsel %vm13675_vm12, %v9747_v34, 0  ;;  %v9737_v2 = vcombine.low %v7427_v33, %v7431_v9  ;;  %v9739_v4 = vcombine.low %v7428_v8, %v7432_v11  ;;  %v10765_v17 = vld [vmem:[%s13676_s1 + $0xf0] ss:$8 sps:$4 sm:$0xff]   ;;  %v10782_v52 = vld [vmem:[%s13676_s1 + $0x1d4] ss:$8 sps:$4 sm:$0xff]  }
0x1645   : > { %8031 = vmatpush1.bf16.msra.mxu1 %v9713_v3  ;;  %8074 = vmatpush1.bf16.msra.mxu0 %v9715_v20  ;;  %v9738_v3 = vcombine.high %v7427_v33, %v7431_v9  ;;  %v9740_v20 = vcombine.high %v7428_v8, %v7432_v11  ;;  %v10768_v26 = vld [vmem:[%s13676_s1 + $0x1f0] ss:$8 sps:$4 sm:$0xff]   ;;  %v10785_v9 = vld [vmem:[%s13676_s1 + $0xc4] ss:$8 sps:$4 sm:$0xff]   ;;  %v10783_v11 = vld [vmem:[%s13676_s1 + $0xc0] ss:$8 sps:$4 sm:$0xff]  }
0x1646   : > { %8032 = vmatprep.subr.bf16.mxu1 %v9706_v58  ;;  %8075 = vmatprep.subr.bf16.mxu0 %v9708_v16  ;;  %v7419_v58 = vld [vmem:[%s13663_s11 + $0x210] sm:$0xff]  ;;  %v10788_v8 = vld [vmem:[%s13676_s1 + $0x1c4] ss:$8 sps:$4 sm:$0xff]  }
0x1647   : > { %v7423_v16 = vld [vmem:[%s13663_s11 + $0x230] sm:$0xff] }
0x1648   : > { %v10777_v34 = vld [vmem:[%s13676_s1 + $0xd0] ss:$8 sps:$4 sm:$0xff]  }
0x1649   : > { %8033 = vmatpush1.bf16.msra.mxu1 %v9705_v62  ;;  %8076 = vmatpush1.bf16.msra.mxu0 %v9707_v59  ;;  %v9730_v62 = vcombine.high %v7419_v58, %v7423_v16  ;;  %v9732_v59 = vcombine.high %v7420_v63, %v7424_v15  ;;  %v10780_v33 = vld [vmem:[%s13676_s1 + $0x1d0] ss:$8 sps:$4 sm:$0xff]  }
0x164a   : > { %8034 = vmatprep.subr.bf16.mxu1 %v9698_v18  ;;  %8077 = vmatprep.subr.bf16.mxu0 %v9700_v49  ;;  %v9729_v18 = vcombine.low %v7419_v58, %v7423_v16  ;;  %v9731_v49 = vcombine.low %v7420_v63, %v7424_v15  ;;  %v10792_v58 = vld [vmem:[%s13676_s1 + $0x1b0] ss:$8 sps:$4 sm:$0xff]   ;;  %v10797_v16 = vld [vmem:[%s13676_s1 + $0xa4] ss:$8 sps:$4 sm:$0xff]   ;;  %v10795_v15 = vld [vmem:[%s13676_s1 + $0xa0] ss:$8 sps:$4 sm:$0xff]  }
0x164b   : > { %v10800_v63 = vld [vmem:[%s13676_s1 + $0x1a4] ss:$8 sps:$4 sm:$0xff]  }
0x164d   : > { %8035 = vmatpush1.bf16.msra.mxu1 %v9697_v36  ;;  %8078 = vmatpush1.bf16.msra.mxu0 %v9699_v44  ;;  %v10725_v36 = vld [vmem:[%s13676_s1 + $0x64] ss:$8 sps:$4 sm:$0xff]  }
0x164e   : > { %8036 = vmatprep.subr.bf16.mxu1 %v9690_v10  ;;  %8079 = vmatprep.subr.bf16.mxu0 %v9692_v14  ;;  %v10728_v44 = vld [vmem:[%s13676_s1 + $0x164] ss:$8 sps:$4 sm:$0xff]   ;;  %v10723_v10 = vld [vmem:[%s13676_s1 + $0x60] ss:$8 sps:$4 sm:$0xff]  }
0x164f   : > { %v10726_v14 = vld [vmem:[%s13676_s1 + $0x160] ss:$8 sps:$4 sm:$0xff]  }
0x1651   : > { %8037 = vmatpush1.bf16.msra.mxu1 %v9689_v43  ;;  %8080 = vmatpush1.bf16.msra.mxu0 %v9691_v42  ;;  %v10740_v43 = vld [vmem:[%s13676_s1 + $0x144] ss:$8 sps:$4 sm:$0xff]   ;;  %v10735_v42 = vld [vmem:[%s13676_s1 + $0x40] ss:$8 sps:$4 sm:$0xff]  }
0x1652   : > { %8038 = vmatprep.subr.bf16.mxu1 %v9682_v32  ;;  %8081 = vmatprep.subr.bf16.mxu0 %v9684_v39  ;;  %v10738_v32 = vld [vmem:[%s13676_s1 + $0x140] ss:$8 sps:$4 sm:$0xff]   ;;  %v10743_v39 = vld [vmem:[%s13676_s1 + $0x34] ss:$8 sps:$4 sm:$0xff]  }
0x1655   : > { %8039 = vmatpush1.bf16.msra.mxu1 %v9681_v13  ;;  %8082 = vmatpush1.bf16.msra.mxu0 %v9683_v38  ;;  %v10752_v13 = vld [vmem:[%s13676_s1 + $0x124] ss:$8 sps:$4 sm:$0xff]   ;;  %v10747_v38 = vld [vmem:[%s13676_s1 + $0x20] ss:$8 sps:$4 sm:$0xff]  }
0x1656   : > { %8040 = vmatprep.subr.bf16.mxu1 %v9674_v27  ;;  %8083 = vmatprep.subr.bf16.mxu0 %v9676_v53  ;;  %v10750_v27 = vld [vmem:[%s13676_s1 + $0x120] ss:$8 sps:$4 sm:$0xff]   ;;  %v10755_v53 = vld [vmem:[%s13676_s1 + $0x14] ss:$8 sps:$4 sm:$0xff]  }
0x1659   : > { %8041 = vmatpush1.bf16.msra.mxu1 %v9673_v25  ;;  %8084 = vmatpush1.bf16.msra.mxu0 %v9675_v41  ;;  %v10764_v25 = vld [vmem:[%s13676_s1 + $0x104] ss:$8 sps:$4 sm:$0xff]   ;;  %v10759_v41 = vld [vmem:[%s13676_s1] ss:$8 sps:$4 sm:$0xff]  }
0x165a   : > { %8042 = vmatprep.subr.bf16.mxu1 %v9666_v37  ;;  %8085 = vmatprep.subr.bf16.mxu0 %v9668_v55  ;;  %v10762_v37 = vld [vmem:[%s13676_s1 + $0x100] ss:$8 sps:$4 sm:$0xff]   ;;  %v10767_v55 = vld [vmem:[%s13676_s1 + $0xf4] ss:$8 sps:$4 sm:$0xff]  }
0x165d   : > { %8043 = vmatpush1.bf16.msra.mxu1 %v9665_v51  ;;  %8086 = vmatpush1.bf16.msra.mxu0 %v9667_v47  ;;  %v10776_v51 = vld [vmem:[%s13676_s1 + $0x1e4] ss:$8 sps:$4 sm:$0xff]   ;;  %v10771_v47 = vld [vmem:[%s13676_s1 + $0xe0] ss:$8 sps:$4 sm:$0xff]  }
0x165e   : > { %9753 = vmatprep.subr.msk.bf16.mxu1 %vm13672_vm8, %v9746_v30  ;;  %9755 = vmatprep.subr.msk.bf16.mxu0 %vm13673_vm14, %v9748_v1  ;;  %v10774_v30 = vld [vmem:[%s13676_s1 + $0x1e0] ss:$8 sps:$4 sm:$0xff]   ;;  %v10779_v1 = vld [vmem:[%s13676_s1 + $0xd4] ss:$8 sps:$4 sm:$0xff]  }
0x1661   : > { %8055 = vmatpush2.bf16.msra.mxu1 %v7931_v7  ;;  %8098 = vmatpush2.bf16.msra.mxu0 %v7937_v45  ;;  %v10786_v7 = vld [vmem:[%s13676_s1 + $0x1c0] ss:$8 sps:$4 sm:$0xff]   ;;  %v10791_v45 = vld [vmem:[%s13676_s1 + $0xb4] ss:$8 sps:$4 sm:$0xff]  }
0x1662   : > { %8056 = vmatprep.subr.bf16.mxu1 %v9738_v3  ;;  %8099 = vmatprep.subr.bf16.mxu0 %v9740_v20  ;;  %v10794_v3 = vld [vmem:[%s13676_s1 + $0x1b4] ss:$8 sps:$4 sm:$0xff]   ;;  %v10789_v20 = vld [vmem:[%s13676_s1 + $0xb0] ss:$8 sps:$4 sm:$0xff]  }
0x1665   : > { %8057 = vmatpush2.bf16.msra.mxu1 %v9737_v2  ;;  %8100 = vmatpush2.bf16.msra.mxu0 %v9739_v4  ;;  %v10798_v2 = vld [vmem:[%s13676_s1 + $0x1a0] ss:$8 sps:$4 sm:$0xff]   ;;  %v10803_v4 = vld [vmem:[%s13676_s1 + $0x94] ss:$8 sps:$4 sm:$0xff]  }
0x1666   : > { %8058 = vmatprep.subr.bf16.mxu1 %v9730_v62  ;;  %8101 = vmatprep.subr.bf16.mxu0 %v9732_v59  ;;  %v10806_v62 = vld [vmem:[%s13676_s1 + $0x194] ss:$8 sps:$4 sm:$0xff]   ;;  %v10801_v59 = vld [vmem:[%s13676_s1 + $0x90] ss:$8 sps:$4 sm:$0xff]  }
0x1669   : > { %8059 = vmatpush2.bf16.msra.mxu1 %v9729_v18  ;;  %8102 = vmatpush2.bf16.msra.mxu0 %v9731_v49  ;;  %v10804_v18 = vld [vmem:[%s13676_s1 + $0x190] ss:$8 sps:$4 sm:$0xff]   ;;  %v10809_v49 = vld [vmem:[%s13676_s1 + $0x84] ss:$8 sps:$4 sm:$0xff]  }
0x166a   : > { %8918 = vmatprep.subr.bf16.mxu1 %v10719_v6  ;;  %8961 = vmatprep.subr.bf16.mxu0 %v10722_v40  ;;  %v10812_v6 = vld [vmem:[%s13676_s1 + $0x184] ss:$8 sps:$4 sm:$0xff]   ;;  %v10807_v40 = vld [vmem:[%s13676_s1 + $0x80] ss:$8 sps:$4 sm:$0xff]  }
0x166c   : > { %8061 = vmatmul.mubr.bf16.vlgmr.msra.gmra.mxu1 %v13379_v57  ;;  %8104 = vmatmul.mubr.bf16.vlgmr.msra.gmra.mxu0 %v13379_v57  ;;  %v10737_v57 = vld [vmem:[%s13676_s1 + $0x44] ss:$8 sps:$4 sm:$0xff]  }
0x166d   : > { %8919 = vmatpush1.bf16.msra.mxu1 %v10717_v21  ;;  %8962 = vmatpush1.bf16.msra.mxu0 %v10720_v5  ;;  %v10810_v21 = vld [vmem:[%s13676_s1 + $0x180] ss:$8 sps:$4 sm:$0xff]   ;;  %v10815_v5 = vld [vmem:[%s13676_s1 + $0x274] ss:$8 sps:$4 sm:$0xff]  }
0x166e   : > { %8920 = vmatprep.subr.bf16.mxu1 %v10725_v36  ;;  %8963 = vmatprep.subr.bf16.mxu0 %v10728_v44  ;;  %v10818_v36 = vld [vmem:[%s13676_s1 + $0x374] ss:$8 sps:$4 sm:$0xff]   ;;  %v7457_v44 = vsub.s32 3, %v12542_v61 }
0x1671   : > { %8921 = vmatpush1.bf16.msra.mxu1 %v10723_v10  ;;  %8964 = vmatpush1.bf16.msra.mxu0 %v10726_v14  ;;  %v7453_v10 = vsub.s32 2, %v12542_v61  ;;  %v13498_v14 = vld [vmem:[%s13677_s26] sm:$0xff]  ;;  %s899_s26 = scalar_lea.vmem %s11231_s4, %s9904_s15 }
0x1672   : > { %8922 = vmatprep.subr.bf16.mxu1 %v10731_v60  ;;  %8965 = vmatprep.subr.bf16.mxu0 %v10734_v28 }
0x1675   : > { %8923 = vmatpush1.bf16.msra.mxu1 %v10729_v50  ;;  %8966 = vmatpush1.bf16.msra.mxu0 %v10732_v56  ;;  %v7450_v50 = vrot.slane %v13498_v14, %v12547_v31  ;;  %v7458_v56 = vrot.slane %v13498_v14, %v7457_v44  ;;  %v10857_v44 = vld [vmem:[%s13676_s1 + $0x204] ss:$8 sps:$4 sm:$0xff]  }
0x1676   : > { %8924 = vmatprep.subr.bf16.mxu1 %v10737_v57  ;;  %8967 = vmatprep.subr.bf16.mxu0 %v10740_v43  ;;  %v7446_v57 = vrot.slane %v13498_v14, %v12554_v48  ;;  %v7454_v43 = vrot.slane %v13498_v14, %v7453_v10  ;;  %v10860_v10 = vld [vmem:[%s13676_s1 + $0x304] ss:$8 sps:$4 sm:$0xff]  }
0x1679   : > { %8925 = vmatpush1.bf16.msra.mxu1 %v10735_v42  ;;  %8968 = vmatpush1.bf16.msra.mxu0 %v10738_v32 }
0x167a   : > { %8926 = vmatprep.subr.bf16.mxu1 %v10743_v39  ;;  %8969 = vmatprep.subr.bf16.mxu0 %v10746_v35 }
0x167d   : > { %8927 = vmatpush1.bf16.msra.mxu1 %v10741_v0  ;;  %8970 = vmatpush1.bf16.msra.mxu0 %v10744_v12 }
0x167e   : > { %8928 = vmatprep.subr.bf16.mxu1 %v10749_v22  ;;  %8971 = vmatprep.subr.bf16.mxu0 %v10752_v13 }
0x1681   : > { %8929 = vmatpush1.bf16.msra.mxu1 %v10747_v38  ;;  %8972 = vmatpush1.bf16.msra.mxu0 %v10750_v27 }
0x1682   : > { %8930 = vmatprep.subr.bf16.mxu1 %v10755_v53  ;;  %8973 = vmatprep.subr.bf16.mxu0 %v10758_v29 }
0x1685   : > { %8931 = vmatpush1.bf16.msra.mxu1 %v10753_v19  ;;  %8974 = vmatpush1.bf16.msra.mxu0 %v10756_v46 }
0x1686   : > { %8932 = vmatprep.subr.bf16.mxu1 %v10761_v54  ;;  %8975 = vmatprep.subr.bf16.mxu0 %v10764_v25 }
0x1689   : > { %8933 = vmatpush1.bf16.msra.mxu1 %v10759_v41  ;;  %8976 = vmatpush1.bf16.msra.mxu0 %v10762_v37 }
0x168a   : > { %8934 = vmatprep.subr.bf16.mxu1 %v10767_v55  ;;  %8977 = vmatprep.subr.bf16.mxu0 %v10770_v24 }
0x168d   : > { %8935 = vmatpush2.bf16.msra.mxu1 %v10765_v17  ;;  %8978 = vmatpush2.bf16.msra.mxu0 %v10768_v26 }
0x168e   : > { %8936 = vmatprep.subr.bf16.mxu1 %v10773_v23  ;;  %8979 = vmatprep.subr.bf16.mxu0 %v10776_v51 }
0x1691   : > { %8937 = vmatpush2.bf16.msra.mxu1 %v10771_v47  ;;  %8980 = vmatpush2.bf16.msra.mxu0 %v10774_v30  ;;  %v10813_v47 = vld [vmem:[%s13676_s1 + $0x270] ss:$8 sps:$4 sm:$0xff]  }
0x1692   : > { %8938 = vmatprep.subr.bf16.mxu1 %v10779_v1  ;;  %8981 = vmatprep.subr.bf16.mxu0 %v10782_v52  ;;  %v10816_v30 = vld [vmem:[%s13676_s1 + $0x370] ss:$8 sps:$4 sm:$0xff]  }
0x1695   : > { %8939 = vmatpush2.bf16.msra.mxu1 %v10777_v34  ;;  %8982 = vmatpush2.bf16.msra.mxu0 %v10780_v33  ;;  %v10821_v34 = vld [vmem:[%s13676_s1 + $0x264] ss:$8 sps:$4 sm:$0xff]  }
0x1696   : > { %8940 = vmatprep.subr.bf16.mxu1 %v10785_v9  ;;  %8983 = vmatprep.subr.bf16.mxu0 %v10788_v8  ;;  %v10824_v33 = vld [vmem:[%s13676_s1 + $0x364] ss:$8 sps:$4 sm:$0xff]   ;;  %v10819_v9 = vld [vmem:[%s13676_s1 + $0x260] ss:$8 sps:$4 sm:$0xff]  }
0x1697   : > { %v10822_v8 = vld [vmem:[%s13676_s1 + $0x360] ss:$8 sps:$4 sm:$0xff]  }
0x1699   : > { %8941 = vmatpush2.bf16.msra.mxu1 %v10783_v11  ;;  %8984 = vmatpush2.bf16.msra.mxu0 %v10786_v7  ;;  %v10827_v11 = vld [vmem:[%s13676_s1 + $0x254] ss:$8 sps:$4 sm:$0xff]  }
0x169a   : > { %8942 = vmatprep.subr.bf16.mxu1 %v10791_v45  ;;  %8985 = vmatprep.subr.bf16.mxu0 %v10794_v3  ;;  %v10830_v7 = vld [vmem:[%s13676_s1 + $0x354] ss:$8 sps:$4 sm:$0xff]   ;;  %v10825_v45 = vld [vmem:[%s13676_s1 + $0x250] ss:$8 sps:$4 sm:$0xff]  }
0x169b   : > { %v10828_v3 = vld [vmem:[%s13676_s1 + $0x350] ss:$8 sps:$4 sm:$0xff]  }
0x169d   : > { %8943 = vmatpush2.bf16.msra.mxu1 %v10789_v20  ;;  %8986 = vmatpush2.bf16.msra.mxu0 %v10792_v58  ;;  %v10833_v20 = vld [vmem:[%s13676_s1 + $0x244] ss:$8 sps:$4 sm:$0xff]  }
0x169e   : > { %8944 = vmatprep.subr.bf16.mxu1 %v10797_v16  ;;  %8987 = vmatprep.subr.bf16.mxu0 %v10800_v63  ;;  %v10836_v58 = vld [vmem:[%s13676_s1 + $0x344] ss:$8 sps:$4 sm:$0xff]   ;;  %v10831_v16 = vld [vmem:[%s13676_s1 + $0x240] ss:$8 sps:$4 sm:$0xff]  }
0x169f   : > { %v10834_v63 = vld [vmem:[%s13676_s1 + $0x340] ss:$8 sps:$4 sm:$0xff]  }
0x16a1   : > { %8945 = vmatpush2.bf16.msra.mxu1 %v10795_v15  ;;  %8988 = vmatpush2.bf16.msra.mxu0 %v10798_v2  ;;  %v10839_v15 = vld [vmem:[%s13676_s1 + $0x234] ss:$8 sps:$4 sm:$0xff]  }
0x16a2   : > { %8946 = vmatprep.subr.bf16.mxu1 %v10803_v4  ;;  %8989 = vmatprep.subr.bf16.mxu0 %v10806_v62  ;;  %v10842_v2 = vld [vmem:[%s13676_s1 + $0x334] ss:$8 sps:$4 sm:$0xff]   ;;  %v10837_v4 = vld [vmem:[%s13676_s1 + $0x230] ss:$8 sps:$4 sm:$0xff]  }
0x16a3   : > { %v10840_v62 = vld [vmem:[%s13676_s1 + $0x330] ss:$8 sps:$4 sm:$0xff]  }
0x16a5   : > { %8947 = vmatpush2.bf16.msra.mxu1 %v10801_v59  ;;  %8990 = vmatpush2.bf16.msra.mxu0 %v10804_v18  ;;  %v10845_v59 = vld [vmem:[%s13676_s1 + $0x224] ss:$8 sps:$4 sm:$0xff]  }
0x16a6   : > { %8948 = vmatprep.subr.bf16.mxu1 %v10809_v49  ;;  %8991 = vmatprep.subr.bf16.mxu0 %v10812_v6  ;;  %v10848_v18 = vld [vmem:[%s13676_s1 + $0x324] ss:$8 sps:$4 sm:$0xff]   ;;  %v10843_v49 = vld [vmem:[%s13676_s1 + $0x220] ss:$8 sps:$4 sm:$0xff]  }
0x16a7   : > { %v10846_v6 = vld [vmem:[%s13676_s1 + $0x320] ss:$8 sps:$4 sm:$0xff]  }
0x16a9   : > { %8949 = vmatpush2.bf16.msra.mxu1 %v10807_v40  ;;  %8992 = vmatpush2.bf16.msra.mxu0 %v10810_v21  ;;  %v10851_v40 = vld [vmem:[%s13676_s1 + $0x214] ss:$8 sps:$4 sm:$0xff]  }
0x16aa   : > { %9004 = vmatprep.subr.bf16.mxu1 %v10815_v5  ;;  %9047 = vmatprep.subr.bf16.mxu0 %v10818_v36  ;;  %v10854_v21 = vld [vmem:[%s13676_s1 + $0x314] ss:$8 sps:$4 sm:$0xff]   ;;  %v10849_v5 = vld [vmem:[%s13676_s1 + $0x210] ss:$8 sps:$4 sm:$0xff]  }
0x16ab   : > { %v10852_v36 = vld [vmem:[%s13676_s1 + $0x310] ss:$8 sps:$4 sm:$0xff]  }
0x1700   : > { %v7976_v60 = vpop.f32.mrf.mxu1  ;;  %v8019_v28 = vpop.f32.mrf.mxu0 }
0x1701   : > { %v7977_v38 = vadd.f32 %v7976_v60, %v7446_v57  ;;  %v8020_v27 = vadd.f32 %v8019_v28, %v7454_v43  ;;  %v10855_v60 = vld [vmem:[%s13676_s1 + $0x200] ss:$8 sps:$4 sm:$0xff]  }
0x1702   : > { %v7978_v42 = vpop.f32.mrf.mxu1  ;;  %v8021_v32 = vpop.f32.mrf.mxu0  ;;  %v10858_v28 = vld [vmem:[%s13676_s1 + $0x300] ss:$8 sps:$4 sm:$0xff]  }
0x1703   : > { %v7979_v0 = vadd.f32 %v7978_v42, %v7450_v50  ;;  %v8022_v12 = vadd.f32 %v8021_v32, %v7458_v56  ;;  %v8114_v17 = vmax.f32 %v7977_v38, 0.0  ;;  %v8116_v26 = vmax.f32 %v8020_v27, 0.0  ;;  %v10861_v42 = vld [vmem:[%s13676_s1 + $0x2f0] ss:$8 sps:$4 sm:$0xff]  }
0x1704   : > { %v7980_v39 = vpop.f32.mrf.mxu1  ;;  %v8023_v35 = vpop.f32.mrf.mxu0  ;;  %v10864_v32 = vld [vmem:[%s13676_s1 + $0x3f0] ss:$8 sps:$4 sm:$0xff]  }
0x1705   : > { %v7981_v22 = vadd.f32 %v7980_v39, %v7446_v57  ;;  %v8024_v13 = vadd.f32 %v8023_v35, %v7454_v43  ;;  %v8115_v41 = vmax.f32 %v7979_v0, 0.0  ;;  %v8117_v37 = vmax.f32 %v8022_v12, 0.0  ;;  %v10869_v0 = vld [vmem:[%s13676_s1 + $0x2e4] ss:$8 sps:$4 sm:$0xff]  }
0x1706   : > { %v7982_v53 = vpop.f32.mrf.mxu1  ;;  %v8025_v29 = vpop.f32.mrf.mxu0  ;;  %v7465_v57 = vsub.s32 5, %v12542_v61  ;;  %v7473_v43 = vsub.s32 7, %v12542_v61  ;;  %v10872_v12 = vld [vmem:[%s13676_s1 + $0x3e4] ss:$8 sps:$4 sm:$0xff]  }
0x1707   : > { %v7983_v19 = vadd.f32 %v7982_v53, %v7450_v50  ;;  %v8026_v46 = vadd.f32 %v8025_v29, %v7458_v56  ;;  %v8122_v54 = vmax.f32 %v7981_v22, 0.0  ;;  %v8124_v25 = vmax.f32 %v8024_v13, 0.0  ;;  %v10863_v50 = vld [vmem:[%s13676_s1 + $0x2f4] ss:$8 sps:$4 sm:$0xff]   ;;  %v10867_v53 = vld [vmem:[%s13676_s1 + $0x2e0] ss:$8 sps:$4 sm:$0xff]  }
0x1708   : > { %v10866_v56 = vld [vmem:[%s13676_s1 + $0x3f4] ss:$8 sps:$4 sm:$0xff]   ;;  %v7466_v22 = vrot.slane %v13498_v14, %v7465_v57  ;;  %v7474_v13 = vrot.slane %v13498_v14, %v7473_v43  ;;  %v10870_v29 = vld [vmem:[%s13676_s1 + $0x3e0] ss:$8 sps:$4 sm:$0xff]  }
0x1709   : > { %v8123_v55 = vmax.f32 %v7983_v19, 0.0  ;;  %v8125_v24 = vmax.f32 %v8026_v46, 0.0  ;;  %v8130_v1 = vpack.c.bf16 %v8122_v54, %v8114_v17  ;;  %v8132_v52 = vpack.c.bf16 %v8124_v25, %v8116_v26  ;;  %v10875_v54 = vld [vmem:[%s13676_s1 + $0x2d4] ss:$8 sps:$4 sm:$0xff]  }
0x170a   : > { %v10878_v25 = vld [vmem:[%s13676_s1 + $0x3d4] ss:$8 sps:$4 sm:$0xff]  }
0x170b   : > { %v8131_v23 = vpack.c.bf16 %v8123_v55, %v8115_v41  ;;  %v8133_v51 = vpack.c.bf16 %v8125_v24, %v8117_v37 }
0x170d   : > { %8950 = vmatprep.mubr.bf16.mxu1 %v8131_v23  ;;  %8993 = vmatprep.mubr.bf16.mxu0 %v8133_v51  ;;  %v10873_v23 = vld [vmem:[%s13676_s1 + $0x2d0] ss:$8 sps:$4 sm:$0xff]  }
0x170e   : > { %8951 = vmatmul.mubr.bf16.vlgmr.msra.gmra.mxu1 %v8130_v1  ;;  %8994 = vmatmul.mubr.bf16.vlgmr.msra.gmra.mxu0 %v8132_v52  ;;  %v10876_v51 = vld [vmem:[%s13676_s1 + $0x3d0] ss:$8 sps:$4 sm:$0xff]  }
0x170f   : > { %9005 = vmatpush1.bf16.msra.mxu1 %v10813_v47  ;;  %9048 = vmatpush1.bf16.msra.mxu0 %v10816_v30  ;;  %v10881_v47 = vld [vmem:[%s13676_s1 + $0x2c4] ss:$8 sps:$4 sm:$0xff]  }
0x1710   : > { %9006 = vmatprep.subr.bf16.mxu1 %v10821_v34  ;;  %9049 = vmatprep.subr.bf16.mxu0 %v10824_v33  ;;  %v10884_v30 = vld [vmem:[%s13676_s1 + $0x3c4] ss:$8 sps:$4 sm:$0xff]  }
0x1713   : > { %9007 = vmatpush1.bf16.msra.mxu1 %v10819_v9  ;;  %9050 = vmatpush1.bf16.msra.mxu0 %v10822_v8 }
0x1714   : > { %9008 = vmatprep.subr.bf16.mxu1 %v10827_v11  ;;  %9051 = vmatprep.subr.bf16.mxu0 %v10830_v7  ;;  %v10879_v11 = vld [vmem:[%s13676_s1 + $0x2c0] ss:$8 sps:$4 sm:$0xff]  }
0x1715   : > { %v10882_v7 = vld [vmem:[%s13676_s1 + $0x3c0] ss:$8 sps:$4 sm:$0xff]  }
0x1717   : > { %9009 = vmatpush1.bf16.msra.mxu1 %v10825_v45  ;;  %9052 = vmatpush1.bf16.msra.mxu0 %v10828_v3  ;;  %v10887_v45 = vld [vmem:[%s13676_s1 + $0x2b4] ss:$8 sps:$4 sm:$0xff]  }
0x1718   : > { %9010 = vmatprep.subr.bf16.mxu1 %v10833_v20  ;;  %9053 = vmatprep.subr.bf16.mxu0 %v10836_v58  ;;  %v10890_v3 = vld [vmem:[%s13676_s1 + $0x3b4] ss:$8 sps:$4 sm:$0xff]   ;;  %v10885_v20 = vld [vmem:[%s13676_s1 + $0x2b0] ss:$8 sps:$4 sm:$0xff]  }
0x1719   : > { %v10888_v58 = vld [vmem:[%s13676_s1 + $0x3b0] ss:$8 sps:$4 sm:$0xff]  }
0x171b   : > { %9011 = vmatpush1.bf16.msra.mxu1 %v10831_v16  ;;  %9054 = vmatpush1.bf16.msra.mxu0 %v10834_v63  ;;  %v10893_v16 = vld [vmem:[%s13676_s1 + $0x2a4] ss:$8 sps:$4 sm:$0xff]  }
0x171c   : > { %9012 = vmatprep.subr.bf16.mxu1 %v10839_v15  ;;  %9055 = vmatprep.subr.bf16.mxu0 %v10842_v2  ;;  %v10896_v63 = vld [vmem:[%s13676_s1 + $0x3a4] ss:$8 sps:$4 sm:$0xff]   ;;  %v7461_v15 = vsub.s32 4, %v12542_v61  ;;  %v7469_v2 = vsub.s32 6, %v12542_v61  ;;  %v10900_v61 = vld [vmem:[%s13676_s1 + $0x390] ss:$8 sps:$4 sm:$0xff]  }
0x171f   : > { %9013 = vmatpush1.bf16.msra.mxu1 %v10837_v4  ;;  %9056 = vmatpush1.bf16.msra.mxu0 %v10840_v62  ;;  %v10891_v4 = vld [vmem:[%s13676_s1 + $0x2a0] ss:$8 sps:$4 sm:$0xff]  }
0x1720   : > { %9014 = vmatprep.subr.bf16.mxu1 %v10845_v59  ;;  %9057 = vmatprep.subr.bf16.mxu0 %v10848_v18  ;;  %v10894_v62 = vld [vmem:[%s13676_s1 + $0x3a0] ss:$8 sps:$4 sm:$0xff]   ;;  %v10899_v59 = vld [vmem:[%s13676_s1 + $0x294] ss:$8 sps:$4 sm:$0xff]  }
0x1721   : > { %v10902_v18 = vld [vmem:[%s13676_s1 + $0x394] ss:$8 sps:$4 sm:$0xff]  }
0x1723   : > { %9015 = vmatpush1.bf16.msra.mxu1 %v10843_v49  ;;  %9058 = vmatpush1.bf16.msra.mxu0 %v10846_v6  ;;  %v7462_v49 = vrot.slane %v13498_v14, %v7461_v15  ;;  %v7470_v6 = vrot.slane %v13498_v14, %v7469_v2  ;;  %v10903_v14 = vld [vmem:[%s13676_s1 + $0x280] ss:$8 sps:$4 sm:$0xff]  }
0x1724   : > { %9016 = vmatprep.subr.bf16.mxu1 %v10851_v40  ;;  %9059 = vmatprep.subr.bf16.mxu0 %v10854_v21  ;;  %v10897_v40 = vld [vmem:[%s13676_s1 + $0x290] ss:$8 sps:$4 sm:$0xff]  }
0x1727   : > { %9017 = vmatpush1.bf16.msra.mxu1 %v10849_v5  ;;  %9060 = vmatpush1.bf16.msra.mxu0 %v10852_v36  ;;  %v10905_v36 = vld [vmem:[%s13676_s1 + $0x284] ss:$8 sps:$4 sm:$0xff]  }
0x1728   : > { %9018 = vmatprep.subr.bf16.mxu1 %v10857_v44  ;;  %9061 = vmatprep.subr.bf16.mxu0 %v10860_v10  ;;  %v10908_v44 = vld [vmem:[%s13676_s1 + $0x384] ss:$8 sps:$4 sm:$0xff]  }
0x172b   : > { %9019 = vmatpush1.bf16.msra.mxu1 %v10855_v60  ;;  %9062 = vmatpush1.bf16.msra.mxu0 %v10858_v28  ;;  %v10906_v28 = vld [vmem:[%s13676_s1 + $0x380] ss:$8 sps:$4 sm:$0xff]  }
0x172c   : > { %v13542_v39 = vpop.f32.mrf.mxu1  ;;  %v13544_v35 = vpop.f32.mrf.mxu0  ;;  %9020 = vmatprep.subr.bf16.mxu1 %v10863_v50  ;;  %9063 = vmatprep.subr.bf16.mxu0 %v10866_v56 }
0x172d   : > { %v8063_v10 = vadd.f32 %v13542_v39, %v7462_v49  ;;  %v8106_v60 = vadd.f32 %v13544_v35, %v7470_v6  ;;  %v10909_v39 = vld [vmem:[%s11221_s20 + $0x78] sm:$0xff]  }
0x172e   : > { %v8064_v38 = vpop.f32.mrf.mxu1  ;;  %v8107_v27 = vpop.f32.mrf.mxu0  ;;  %v10910_v35 = vld [vmem:[%s11221_s20 + $0x38] sm:$0xff]  }
0x172f   : > { %9021 = vmatpush2.bf16.msra.mxu1 %v10861_v42  ;;  %9064 = vmatpush2.bf16.msra.mxu0 %v10864_v32  ;;  %v8065_v41 = vadd.f32 %v8064_v38, %v7466_v22  ;;  %v8108_v37 = vadd.f32 %v8107_v27, %v7474_v13  ;;  %v8118_v57 = vmax.f32 %v8063_v10, 0.0  ;;  %v8120_v43 = vmax.f32 %v8106_v60, 0.0  ;;  %v10915_v38 = vld [vmem:[%s11221_s20 + $0x60] sm:$0xff]  }
0x1730   : > { %v8066_v19 = vpop.f32.mrf.mxu1  ;;  %v8109_v46 = vpop.f32.mrf.mxu0  ;;  %9022 = vmatprep.subr.bf16.mxu1 %v10869_v0  ;;  %9065 = vmatprep.subr.bf16.mxu0 %v10872_v12  ;;  %v10911_v0 = vld [vmem:[%s11221_s20 + $0x70] sm:$0xff]   ;;  %v10916_v27 = vld [vmem:[%s11221_s20 + $0x20] sm:$0xff]  }
0x1731   : > { %v8119_v1 = vmax.f32 %v8065_v41, 0.0  ;;  %v8121_v52 = vmax.f32 %v8108_v37, 0.0  ;;  %v8067_v21 = vadd.f32 %v8066_v19, %v7462_v49  ;;  %v8110_v5 = vadd.f32 %v8109_v46, %v7470_v6  ;;  %v10912_v12 = vld [vmem:[%s11221_s20 + $0x30] sm:$0xff]   ;;  %v10923_v41 = vld [vmem:[%s11221_s20 + $0x40] sm:$0xff]  }
0x1732   : > { %v8068_v55 = vpop.f32.mrf.mxu1  ;;  %v8111_v24 = vpop.f32.mrf.mxu0  ;;  %v10919_v19 = vld [vmem:[%s11221_s20 + $0x50] sm:$0xff]   ;;  %v10924_v37 = vld [vmem:[%s11221_s20] sm:$0xff]  }
0x1733   : > { %v8069_v17 = vadd.f32 %v8068_v55, %v7466_v22  ;;  %v8112_v26 = vadd.f32 %v8111_v24, %v7474_v13  ;;  %9023 = vmatpush2.bf16.msra.mxu1 %v10867_v53  ;;  %9066 = vmatpush2.bf16.msra.mxu0 %v10870_v29  ;;  %v8126_v50 = vmax.f32 %v8067_v21, 0.0  ;;  %v8128_v56 = vmax.f32 %v8110_v5, 0.0  ;;  %v10913_v22 = vld [vmem:[%s11221_s20 + $0x68] sm:$0xff]   ;;  %v10917_v53 = vld [vmem:[%s11221_s20 + $0x58] sm:$0xff]   ;;  %v10920_v46 = vld [vmem:[%s11221_s20 + $0x10] sm:$0xff]  }
0x1734   : > { %9024 = vmatprep.subr.bf16.mxu1 %v10875_v54  ;;  %9067 = vmatprep.subr.bf16.mxu0 %v10878_v25  ;;  %v10914_v13 = vld [vmem:[%s11221_s20 + $0x28] sm:$0xff]   ;;  %v10918_v29 = vld [vmem:[%s11221_s20 + $0x18] sm:$0xff]  }
0x1735   : > { %v8127_v34 = vmax.f32 %v8069_v17, 0.0  ;;  %v8129_v33 = vmax.f32 %v8112_v26, 0.0  ;;  %v8134_v42 = vpack.c.bf16 %v8126_v50, %v8118_v57  ;;  %v8136_v32 = vpack.c.bf16 %v8128_v56, %v8120_v43  ;;  %v10921_v54 = vld [vmem:[%s11221_s20 + $0x48] sm:$0xff]   ;;  %v9885_v50 = vld [vmem:[%s11226_s27] ss:$0 sm:$0xff] }
0x1736   : > { %v10922_v25 = vld [vmem:[%s11221_s20 + $0x8] sm:$0xff]  }
0x1737   : > { %v8135_v9 = vpack.c.bf16 %v8127_v34, %v8119_v1  ;;  %v8137_v8 = vpack.c.bf16 %v8129_v33, %v8121_v52  ;;  %9025 = vmatpush2.bf16.msra.mxu1 %v10873_v23  ;;  %9068 = vmatpush2.bf16.msra.mxu0 %v10876_v51  ;;  %v8266_v23 = vld [vmem:[%s11216_s12] sm:$0x3] }
0x1738   : > { %9026 = vmatprep.subr.bf16.mxu1 %v10881_v47  ;;  %9069 = vmatprep.subr.bf16.mxu0 %v10884_v30  ;;  %v8275_v51 = vrot.slane %v8266_v23, %v12547_v31  ;;  %v8271_v47 = vrot.slane %v8266_v23, %v12554_v48 }
0x1739   : > { %9036 = vmatprep.mubr.bf16.mxu1 %v8135_v9  ;;  %9079 = vmatprep.mubr.bf16.mxu0 %v8137_v8 }
0x173b   : > { %9027 = vmatpush2.bf16.msra.mxu1 %v10879_v11  ;;  %9070 = vmatpush2.bf16.msra.mxu0 %v10882_v7 }
0x173c   : > { %9028 = vmatprep.subr.bf16.mxu1 %v10887_v45  ;;  %9071 = vmatprep.subr.bf16.mxu0 %v10890_v3 }
0x173f   : > { %9029 = vmatpush2.bf16.msra.mxu1 %v10885_v20  ;;  %9072 = vmatpush2.bf16.msra.mxu0 %v10888_v58 }
0x1740   : > { %9030 = vmatprep.subr.bf16.mxu1 %v10893_v16  ;;  %9073 = vmatprep.subr.bf16.mxu0 %v10896_v63 }
0x1743   : > { %9031 = vmatpush2.bf16.msra.mxu1 %v10891_v4  ;;  %9074 = vmatpush2.bf16.msra.mxu0 %v10894_v62 }
0x1744   : > { %9032 = vmatprep.subr.bf16.mxu1 %v10899_v59  ;;  %9075 = vmatprep.subr.bf16.mxu0 %v10902_v18 }
0x1747   : > { %9033 = vmatpush2.bf16.msra.mxu1 %v10897_v40  ;;  %9076 = vmatpush2.bf16.msra.mxu0 %v10900_v61 }
0x1748   : > { %9034 = vmatprep.subr.bf16.mxu1 %v10905_v36  ;;  %9077 = vmatprep.subr.bf16.mxu0 %v10908_v44 }
0x174b   : > { %9035 = vmatpush2.bf16.msra.mxu1 %v10903_v14  ;;  %9078 = vmatpush2.bf16.msra.mxu0 %v10906_v28 }
0x174c   : > { %9998 = vmatprep.subr.bf16.mxu1 %v10909_v39 }
0x174e   : > { %9037 = vmatmul.mubr.bf16.vlgmr.msra.gmra.mxu1 %v8134_v42  ;;  %9080 = vmatmul.mubr.bf16.vlgmr.msra.gmra.mxu0 %v8136_v32 }
0x174f   : > { %9999 = vmatpush3.bf16.msra.mxu1 %v10910_v35 }
0x1750   : > { %10000 = vmatprep.subr.bf16.mxu1 %v10911_v0 }
0x1753   : > { %10001 = vmatpush3.bf16.msra.mxu1 %v10912_v12 }
0x1754   : > { %10002 = vmatprep.subr.bf16.mxu1 %v10913_v22 }
0x1757   : > { %10003 = vmatpush3.bf16.msra.mxu1 %v10914_v13 }
0x1758   : > { %10004 = vmatprep.subr.bf16.mxu1 %v10915_v38 }
0x175b   : > { %10005 = vmatpush3.bf16.msra.mxu1 %v10916_v27 }
0x175c   : > { %10006 = vmatprep.subr.bf16.mxu1 %v10917_v53 }
0x175f   : > { %10007 = vmatpush3.bf16.msra.mxu1 %v10918_v29 }
0x1760   : > { %10008 = vmatprep.subr.bf16.mxu1 %v10919_v19 }
0x1763   : > { %10009 = vmatpush3.bf16.msra.mxu1 %v10920_v46 }
0x1764   : > { %10010 = vmatprep.subr.bf16.mxu1 %v10921_v54 }
0x1767   : > { %10011 = vmatpush3.bf16.msra.mxu1 %v10922_v25 }
0x1768   : > { %10012 = vmatprep.subr.bf16.mxu1 %v10923_v41 }
0x176b   : > { %10013 = vmatpush3.bf16.msra.mxu1 %v10924_v37 }
0x17ce   : > { %v8952_v55 = vpop.f32.mrf.mxu1  ;;  %v8995_v24 = vpop.f32.mrf.mxu0 }
0x17cf   : > { %v8953_v34 = vadd.f32 %v8952_v55, %v8271_v47 }
0x17d0   : > { %v8954_v17 = vpop.f32.mrf.mxu1  ;;  %v8997_v26 = vpop.f32.mrf.mxu0 }
0x17d1   : > { %v8955_v52 = vadd.f32 %v8954_v17, %v8275_v51  ;;  %v8996_v20 = vadd.f32 %v8995_v24, %v8953_v34 }
0x17d2   : > { %v8956_v30 = vpop.f32.mrf.mxu1  ;;  %v8999_v1 = vpop.f32.mrf.mxu0 }
0x17d3   : > { %v8957_v8 = vadd.f32 %v8956_v30, %v8271_v47  ;;  %v8998_v45 = vadd.f32 %v8997_v26, %v8955_v52 }
0x17d4   : > { %v8958_v33 = vpop.f32.mrf.mxu1  ;;  %v9001_v9 = vpop.f32.mrf.mxu0 }
0x17d5   : > { %v8959_v3 = vadd.f32 %v8958_v33, %v8275_v51  ;;  %v9000_v63 = vadd.f32 %v8999_v1, %v8957_v8 }
0x17d7   : > { %v9002_v48 = vadd.f32 %v9001_v9, %v8959_v3 }
0x180e   : > { %v9038_v11 = vpop.f32.mrf.mxu1  ;;  %v9081_v7 = vpop.f32.mrf.mxu0 }
0x180f   : > { %v9039_v2 = vadd.f32 %v9038_v11, %v8996_v20 }
0x1810   : > { %v9040_v58 = vpop.f32.mrf.mxu1  ;;  %v9083_v16 = vpop.f32.mrf.mxu0 }
0x1811   : > { %v9041_v15 = vadd.f32 %v9040_v58, %v8998_v45  ;;  %v9082_v40 = vadd.f32 %v9081_v7, %v9039_v2 }
0x1812   : > { %v9042_v31 = vpop.f32.mrf.mxu1  ;;  %v9085_v4 = vpop.f32.mrf.mxu0 }
0x1813   : > { %v9043_v62 = vadd.f32 %v9042_v31, %v9000_v63  ;;  %v9084_v18 = vadd.f32 %v9083_v16, %v9041_v15  ;;  %v9090_v10 = vmax.f32 %v9082_v40, 0.0 }
0x1814   : > { %v9044_v59 = vpop.f32.mrf.mxu1  ;;  %v9087_v61 = vpop.f32.mrf.mxu0 }
0x1815   : > { %v9086_v49 = vadd.f32 %v9085_v4, %v9043_v62  ;;  %v9045_v6 = vadd.f32 %v9044_v59, %v9002_v48  ;;  %v9091_v36 = vmax.f32 %v9084_v18, 0.0 }
0x1817   : > { %v9088_v21 = vadd.f32 %v9087_v61, %v9045_v6  ;;  %v9092_v5 = vmax.f32 %v9086_v49, 0.0 }
0x1819   : > { %v9093_v44 = vmax.f32 %v9088_v21, 0.0  ;;  %v9094_v14 = vpack.c.bf16 %v9092_v5, %v9090_v10 }
0x181b   : > { %v9095_v60 = vpack.c.bf16 %v9093_v44, %v9091_v36 }
0x181d   : > { %9263 = vmatprep.mubr.bf16.mxu1 %v9095_v60 }
0x181e   : > { %9264 = vmatmul.mubr.bf16.vlgmr.msra.gmra.mxu1 %v9094_v14 }
0x18de   : > { %v10014_v28 = vpop.f32.mrf.mxu1 }
0x18e0   : > { %v10015_v56 = vpop.f32.mrf.mxu1 }
0x18e1   : > { %v10016_v57 = vadd.f32 %v10015_v56, %v10014_v28 }
0x18e2   : > { %v10017_v43 = vpop.f32.mrf.mxu1 }
0x18e3   : > { %v9266_v42 = vadd.f32 %v10016_v57, %v9885_v50 }
0x18e4   : > { %v10018_v32 = vpop.f32.mrf.mxu1 }
0x18e5   : > { %9273 = vst.msk [vmem:[%s899_s26] sm:$0xff] %vm9272_vm10, %v9266_v42  ;;  %v10019_v39 = vadd.f32 %v10018_v32, %v10017_v43 }
0x18e7   : > { %v9269_v35 = vadd.f32 %v10019_v39, %v9885_v50 }
0x18e9   : > { %9275 = vst.msk [vmem:[%s899_s26 + $0x8] sm:$0xf] %vm9274_vm9, %v9269_v35 }
0x18ea PF: > { %s69_s7 = sadd.s32 1, %s11007_s7  }
0x18eb   : > { %p66_p4 = scmp.ge.s32.totalorder %s69_s7, 4  }
0x18ed   :  { %68 = sbr.rel (!%p66_p4) target bundleno = 49 (0x31), region = 226 }

</bundles_post_ra>
